<compile_context>
chip_gen: v7x
topology: tpu7x:2x2x1
jax: 0.10.0
libtpu: 0.0.40
codegen_flags: <defaults>
</compile_context>

<pallas_src>
import jax
import jax.numpy as jnp
from jax.experimental import pallas as pl
from jax.experimental.pallas import tpu as pltpu

_LANE = 128


def _round_up(a, b):
    return (a + b - 1) // b * b


def _vmem_limit_bytes():
    """Generation-aware scoped-VMEM limit, queried at call time."""
    try:
        cap = pltpu.get_tpu_info().vmem_capacity_bytes
        return int(min(96 * 1024 * 1024, cap * 3 // 4))
    except Exception:
        return 48 * 1024 * 1024


# -----------------------------------------------------------------------------
# Fused (conv3x3 "same", no bias -> InstanceNorm2d(affine) -> ReLU) x 2 kernel
# -----------------------------------------------------------------------------
def _double_conv_kernel(H, W, R_out_p, Cmid_p, Cout_p, eps, chunk, base):
    """Kernel body factory.

    In-kernel layout ("flat padded slab", channels on lanes):
      x_ref    : (1, Rp, Cin_p)      spatially padded input; row r = flat index
                                     h*(W+2)+w of the (H+2)x(W+2) padded image.
      mid_scr  : (mid_rows, Cmid_p)  same layout for the layer-1 output, shifted
                                     by `base` rows so interior stores are
                                     sublane aligned; halo rows are zero.
      conv_scr : (R_out_p, Cmax)     raw conv output in "wide" coords
                                     p = y*(W+2) + x', x' in [0, W+2).
      o_ref    : (1, R_out_p, Cout_p) final ReLU(IN(conv2)) in wide coords.

    A 3x3 tap (dy, dx) of output position p is slab row p + dy*(W+2) + dx, so
    the conv is 9 sublane-offset MXU contractions accumulated in f32.  Columns
    x' in {W, W+1} are wrap garbage: masked out of the InstanceNorm statistics
    and zeroed in the intermediate slab (they become its left/right halo).
    """
    Wp = W + 2
    inv_n = 1.0 / float(H * W)
    taps = [dy * Wp + dx for dy in range(3) for dx in range(3)]
    mid_off = base + Wp + 1          # wide p=0 lands at padded position (1, 1)

    def kernel(x_ref, mask_ref, w1_ref, g1_ref, b1_ref, w2_ref, g2_ref, b2_ref,
               o_ref, conv_scr, mid_scr):
        # Halo (and anything never overwritten) must be zero before conv #2.
        mid_scr[...] = jnp.zeros_like(mid_scr)

        def conv_pass(read_tap, w_ref, cdim):
            """3x3 conv into conv_scr[:, :cdim]; returns masked (mean, var)."""
            s1 = jnp.zeros((1, cdim), jnp.float32)
            s2 = jnp.zeros((1, cdim), jnp.float32)
            for r0 in range(0, R_out_p, chunk):
                rows = min(chunk, R_out_p - r0)
                acc = None
                for t, off in enumerate(taps):
                    part = jnp.dot(read_tap(r0 + off, rows), w_ref[t],
                                   preferred_element_type=jnp.float32)
                    acc = part if acc is None else acc + part
                m = mask_ref[r0:r0 + rows, :]
                s1 = s1 + jnp.sum(acc * m, axis=0, keepdims=True)
                s2 = s2 + jnp.sum(acc * acc * m, axis=0, keepdims=True)
                conv_scr[r0:r0 + rows, :cdim] = acc
            mean = s1 * inv_n
            var = jnp.maximum(s2 * inv_n - mean * mean, 0.0)
            return mean, var

        def finalize(mean, var, g, b, cdim, write_chunk, apply_mask):
            """InstanceNorm affine + ReLU, applied chunk-wise from conv_scr."""
            scale = g * jax.lax.rsqrt(var + eps)
            shift = b - mean * scale
            for r0 in range(0, R_out_p, chunk):
                rows = min(chunk, R_out_p - r0)
                y = conv_scr[r0:r0 + rows, :cdim] * scale + shift
                y = jnp.maximum(y, 0.0)
                if apply_mask:
                    y = y * mask_ref[r0:r0 + rows, :]
                write_chunk(r0, rows, y)

        # ---------- layer 1: x -> conv -> IN -> ReLU -> padded slab ----------
        mean1, var1 = conv_pass(
            lambda a, rows: x_ref[0, a:a + rows, :], w1_ref, Cmid_p)

        def write_mid(r0, rows, y):
            mid_scr[mid_off + r0:mid_off + r0 + rows, :] = y

        finalize(mean1, var1, g1_ref[...], b1_ref[...], Cmid_p, write_mid, True)

        # ---------- layer 2: padded slab -> conv -> IN -> ReLU -> output -----
        mean2, var2 = conv_pass(
            lambda a, rows: mid_scr[base + a:base + a + rows, :].astype(jnp.bfloat16),
            w2_ref, Cout_p)

        def write_out(r0, rows, y):
            o_ref[0, r0:r0 + rows, :] = y

        finalize(mean2, var2, g2_ref[...], b2_ref[...], Cout_p, write_out, False)

    return kernel


# -----------------------------------------------------------------------------
# DoubleConv forward (PyTorch NCHW at the boundary)
# -----------------------------------------------------------------------------
def double_conv(x_nchw, p, eps=1e-5):
    """x: (N, Cin, H, W) f32.  p: dict of HWIO weights + IN affine.  -> (N, Cout, H, W)."""
    N, Cin, H, W = x_nchw.shape
    Cmid = p["w1"].shape[-1]
    Cout = p["w2"].shape[-1]
    Wp = W + 2

    Cin_p = _round_up(Cin, _LANE)
    Cmid_p = _round_up(Cmid, _LANE)
    Cout_p = _round_up(Cout, _LANE)
    Cmax = max(Cmid_p, Cout_p)

    R_out = H * Wp                        # wide conv-output rows (incl. wrap cols)
    R_out_p = _round_up(R_out, 8)
    Rp = _round_up((H + 2) * Wp + 16, 8)  # padded-slab rows (+ slack for tap reads)
    base = (-(W + 3)) % 8                 # aligns interior stores of the mid slab
    mid_rows = _round_up(base + Rp, 8)
    chunk = 128                           # flat rows processed per inner step

    # ---- layout plumbing (wrapper side): NCHW -> flat padded channels-in-lanes slab
    x = jnp.transpose(x_nchw, (0, 2, 3, 1))                     # NCHW -> NHWC
    x = jnp.pad(x, ((0, 0), (1, 1), (1, 1), (0, Cin_p - Cin)))  # spatial halo + lane pad
    x = x.reshape(N, (H + 2) * Wp, Cin_p)
    x = jnp.pad(x, ((0, 0), (0, Rp - (H + 2) * Wp), (0, 0))).astype(jnp.bfloat16)

    def prep_w(w, cin, cin_p, cout, cout_p):
        w = w.reshape(9, cin, cout)
        w = jnp.pad(w, ((0, 0), (0, cin_p - cin), (0, cout_p - cout)))
        return w.astype(jnp.bfloat16)

    def prep_affine(v, c, c_p):
        return jnp.pad(v, (0, c_p - c)).reshape(1, c_p).astype(jnp.float32)

    w1 = prep_w(p["w1"], Cin, Cin_p, Cmid, Cmid_p)
    w2 = prep_w(p["w2"], Cmid, Cmid_p, Cout, Cout_p)
    g1 = prep_affine(p["g1"], Cmid, Cmid_p)
    b1 = prep_affine(p["b1"], Cmid, Cmid_p)
    g2 = prep_affine(p["g2"], Cout, Cout_p)
    b2 = prep_affine(p["b2"], Cout, Cout_p)

    # Valid-position mask in wide coordinates: x' < W and p < H*(W+2).
    idx = jnp.arange(R_out_p)
    mask = ((idx % Wp < W) & (idx < R_out)).astype(jnp.float32).reshape(R_out_p, 1)

    kernel = _double_conv_kernel(H, W, R_out_p, Cmid_p, Cout_p, eps, chunk, base)

    out = pl.pallas_call(
        kernel,
        out_shape=jax.ShapeDtypeStruct((N, R_out_p, Cout_p), jnp.float32),
        grid=(N,),
        in_specs=[
            pl.BlockSpec((1, Rp, Cin_p), lambda n: (n, 0, 0)),
            pl.BlockSpec((R_out_p, 1), lambda n: (0, 0)),
            pl.BlockSpec((9, Cin_p, Cmid_p), lambda n: (0, 0, 0)),
            pl.BlockSpec((1, Cmid_p), lambda n: (0, 0)),
            pl.BlockSpec((1, Cmid_p), lambda n: (0, 0)),
            pl.BlockSpec((9, Cmid_p, Cout_p), lambda n: (0, 0, 0)),
            pl.BlockSpec((1, Cout_p), lambda n: (0, 0)),
            pl.BlockSpec((1, Cout_p), lambda n: (0, 0)),
        ],
        out_specs=pl.BlockSpec((1, R_out_p, Cout_p), lambda n: (n, 0, 0)),
        scratch_shapes=[
            pltpu.VMEM((R_out_p, Cmax), jnp.float32),     # raw conv output
            pltpu.VMEM((mid_rows, Cmid_p), jnp.float32),  # layer-1 padded slab
        ],
        compiler_params=pltpu.CompilerParams(
            dimension_semantics=("parallel",),
            vmem_limit_bytes=_vmem_limit_bytes()),
    )(x, mask, w1, g1, b1, w2, g2, b2)

    # Wide coords -> NCHW: drop wrap columns / row padding, transpose at boundary.
    out = out[:, :R_out, :Cout].reshape(N, H, Wp, Cout)[:, :, :W, :]
    return jnp.transpose(out, (0, 3, 1, 2))


# -----------------------------------------------------------------------------
# Pure-JAX reference (f32) for a correctness sanity check
# -----------------------------------------------------------------------------
def double_conv_ref(x_nchw, p, eps=1e-5):
    def conv_in_relu(x, w, g, b):
        y = jax.lax.conv_general_dilated(
            x, w, window_strides=(1, 1), padding=((1, 1), (1, 1)),
            dimension_numbers=("NCHW", "HWIO", "NCHW"))
        mean = jnp.mean(y, axis=(2, 3), keepdims=True)
        var = jnp.mean(jnp.square(y - mean), axis=(2, 3), keepdims=True)
        y = (y - mean) * jax.lax.rsqrt(var + eps)
        y = y * g.reshape(1, -1, 1, 1) + b.reshape(1, -1, 1, 1)
        return jnp.maximum(y, 0.0)

    x = conv_in_relu(x_nchw, p["w1"], p["g1"], p["b1"])
    x = conv_in_relu(x, p["w2"], p["g2"], p["b2"])
    return x


# -----------------------------------------------------------------------------
if __name__ == "__main__":
    key = jax.random.PRNGKey(0)
    k1, k2, k3, k4, k5, k6, k7 = jax.random.split(key, 7)

    # DoubleConv(in_channels=4, out_channels=8)  (mid_channels defaults to out)
    N, Cin, Cmid, Cout, H, W = 2, 4, 8, 8, 16, 16
    x = jax.random.normal(k1, (N, Cin, H, W), jnp.float32)
    params = {
        "w1": jax.random.normal(k2, (3, 3, Cin, Cmid), jnp.float32) * (9 * Cin) ** -0.5,
        "g1": 1.0 + 0.1 * jax.random.normal(k3, (Cmid,), jnp.float32),
        "b1": 0.1 * jax.random.normal(k4, (Cmid,), jnp.float32),
        "w2": jax.random.normal(k5, (3, 3, Cmid, Cout), jnp.float32) * (9 * Cmid) ** -0.5,
        "g2": 1.0 + 0.1 * jax.random.normal(k6, (Cout,), jnp.float32),
        "b2": 0.1 * jax.random.normal(k7, (Cout,), jnp.float32),
    }

    fwd = jax.jit(double_conv)
    out = fwd(x, params)
    jax.block_until_ready(out)

    assert out.shape == (N, Cout, H, W)
    assert bool(jnp.all(jnp.isfinite(out)))

    # bf16 MXU operands -> small numeric error vs the f32 reference; check both
    # the worst case and the mean so a structural bug cannot hide in the slack.
    ref = double_conv_ref(x, params)
    max_err = float(jnp.max(jnp.abs(out - ref)))
    mean_err = float(jnp.mean(jnp.abs(out - ref)))
    assert max_err < 0.15, f"max abs err {max_err}"
    assert mean_err < 0.03, f"mean abs err {mean_err}"

    print("KERNEL_OK")
</pallas_src>

<mosaic_0001>
module attributes {stable_mosaic.version = 11 : i64} {
  func.func @kernel(%arg0: i32, %arg1: memref<1x344x128xbf16, #tpu.memory_space<vmem>>, %arg2: memref<288x1xf32, #tpu.memory_space<vmem>>, %arg3: memref<9x128x128xbf16, #tpu.memory_space<vmem>>, %arg4: memref<1x128xf32, #tpu.memory_space<vmem>>, %arg5: memref<1x128xf32, #tpu.memory_space<vmem>>, %arg6: memref<9x128x128xbf16, #tpu.memory_space<vmem>>, %arg7: memref<1x128xf32, #tpu.memory_space<vmem>>, %arg8: memref<1x128xf32, #tpu.memory_space<vmem>>, %arg9: memref<1x288x128xf32, #tpu.memory_space<vmem>>, %arg10: memref<288x128xf32, #tpu.memory_space<vmem>>, %arg11: memref<352x128xf32, #tpu.memory_space<vmem>>) attributes {dimension_semantics = [#tpu.dimension_semantics<parallel>], iteration_bounds = array<i64: 2>, scalar_prefetch = 0 : i64, scratch_operands = 2 : i64, tpu.core_type = #tpu.core_type<tc>, window_params = [{transform_indices = @transform_0, window_bounds = array<i64: 1, 344, 128>}, {pipeline_mode = #tpu.pipeline_mode<synchronous>, transform_indices = @transform_1, window_bounds = array<i64: 288, 1>}, {pipeline_mode = #tpu.pipeline_mode<synchronous>, transform_indices = @transform_2, window_bounds = array<i64: 9, 128, 128>}, {pipeline_mode = #tpu.pipeline_mode<synchronous>, transform_indices = @transform_3, window_bounds = array<i64: 1, 128>}, {pipeline_mode = #tpu.pipeline_mode<synchronous>, transform_indices = @transform_4, window_bounds = array<i64: 1, 128>}, {pipeline_mode = #tpu.pipeline_mode<synchronous>, transform_indices = @transform_5, window_bounds = array<i64: 9, 128, 128>}, {pipeline_mode = #tpu.pipeline_mode<synchronous>, transform_indices = @transform_6, window_bounds = array<i64: 1, 128>}, {pipeline_mode = #tpu.pipeline_mode<synchronous>, transform_indices = @transform_7, window_bounds = array<i64: 1, 128>}, {transform_indices = @transform_8, window_bounds = array<i64: 1, 288, 128>}]} {
    %cst = arith.constant 0.000000e+00 : f32
    %0 = vector.broadcast %cst : f32 to vector<352x128xf32>
    %c0 = arith.constant 0 : index
    %c0_0 = arith.constant 0 : index
    %1 = vector.load %arg11[%c0, %c0_0] : memref<352x128xf32, #tpu.memory_space<vmem>>, vector<352x128xf32>
    tpu.vector_store %arg11[%c0, %c0_0], %0 {strides = array<i32>} : memref<352x128xf32, #tpu.memory_space<vmem>>, vector<352x128xf32>,
    %cst_1 = arith.constant 0.000000e+00 : f32
    %2 = vector.broadcast %cst_1 : f32 to vector<1x128xf32>
    %cst_2 = arith.constant 0.000000e+00 : f32
    %3 = vector.broadcast %cst_2 : f32 to vector<1x128xf32>
    %c0_3 = arith.constant 0 : index
    %c0_4 = arith.constant 0 : index
    %c0_5 = arith.constant 0 : index
    %4 = vector.load %arg1[%c0_3, %c0_4, %c0_5] : memref<1x344x128xbf16, #tpu.memory_space<vmem>>, vector<1x128x128xbf16>
    %5 = vector.shape_cast %4 : vector<1x128x128xbf16> to vector<128x128xbf16>
    %c0_6 = arith.constant 0 : index
    %c0_7 = arith.constant 0 : index
    %c0_8 = arith.constant 0 : index
    %6 = vector.load %arg3[%c0_6, %c0_7, %c0_8] : memref<9x128x128xbf16, #tpu.memory_space<vmem>>, vector<1x128x128xbf16>
    %7 = vector.shape_cast %6 : vector<1x128x128xbf16> to vector<128x128xbf16>
    %cst_9 = arith.constant dense<0.000000e+00> : vector<128x128xf32>
    %8 = tpu.matmul %5, %7, %cst_9 {dimension_numbers = #tpu.dot_dimension_numbers<[1], [0], [0], [1], [0, 0, 1, 1], [], []>} : vector<128x128xbf16>, vector<128x128xbf16>, vector<128x128xf32> -> vector<128x128xf32>
    %c0_10 = arith.constant 0 : index
    %c1 = arith.constant 1 : index
    %c0_11 = arith.constant 0 : index
    %9 = vector.load %arg1[%c0_10, %c1, %c0_11] : memref<1x344x128xbf16, #tpu.memory_space<vmem>>, vector<1x128x128xbf16>
    %10 = vector.shape_cast %9 : vector<1x128x128xbf16> to vector<128x128xbf16>
    %c1_12 = arith.constant 1 : index
    %c0_13 = arith.constant 0 : index
    %c0_14 = arith.constant 0 : index
    %11 = vector.load %arg3[%c1_12, %c0_13, %c0_14] : memref<9x128x128xbf16, #tpu.memory_space<vmem>>, vector<1x128x128xbf16>
    %12 = vector.shape_cast %11 : vector<1x128x128xbf16> to vector<128x128xbf16>
    %cst_15 = arith.constant dense<0.000000e+00> : vector<128x128xf32>
    %13 = tpu.matmul %10, %12, %cst_15 {dimension_numbers = #tpu.dot_dimension_numbers<[1], [0], [0], [1], [0, 0, 1, 1], [], []>} : vector<128x128xbf16>, vector<128x128xbf16>, vector<128x128xf32> -> vector<128x128xf32>
    %14 = arith.addf %8, %13 : vector<128x128xf32>
    %c0_16 = arith.constant 0 : index
    %c2 = arith.constant 2 : index
    %c0_17 = arith.constant 0 : index
    %15 = vector.load %arg1[%c0_16, %c2, %c0_17] : memref<1x344x128xbf16, #tpu.memory_space<vmem>>, vector<1x128x128xbf16>
    %16 = vector.shape_cast %15 : vector<1x128x128xbf16> to vector<128x128xbf16>
    %c2_18 = arith.constant 2 : index
    %c0_19 = arith.constant 0 : index
    %c0_20 = arith.constant 0 : index
    %17 = vector.load %arg3[%c2_18, %c0_19, %c0_20] : memref<9x128x128xbf16, #tpu.memory_space<vmem>>, vector<1x128x128xbf16>
    %18 = vector.shape_cast %17 : vector<1x128x128xbf16> to vector<128x128xbf16>
    %cst_21 = arith.constant dense<0.000000e+00> : vector<128x128xf32>
    %19 = tpu.matmul %16, %18, %cst_21 {dimension_numbers = #tpu.dot_dimension_numbers<[1], [0], [0], [1], [0, 0, 1, 1], [], []>} : vector<128x128xbf16>, vector<128x128xbf16>, vector<128x128xf32> -> vector<128x128xf32>
    %20 = arith.addf %14, %19 : vector<128x128xf32>
    %c0_22 = arith.constant 0 : index
    %c18 = arith.constant 18 : index
    %c0_23 = arith.constant 0 : index
    %21 = vector.load %arg1[%c0_22, %c18, %c0_23] : memref<1x344x128xbf16, #tpu.memory_space<vmem>>, vector<1x128x128xbf16>
    %22 = vector.shape_cast %21 : vector<1x128x128xbf16> to vector<128x128xbf16>
    %c3 = arith.constant 3 : index
    %c0_24 = arith.constant 0 : index
    %c0_25 = arith.constant 0 : index
    %23 = vector.load %arg3[%c3, %c0_24, %c0_25] : memref<9x128x128xbf16, #tpu.memory_space<vmem>>, vector<1x128x128xbf16>
    %24 = vector.shape_cast %23 : vector<1x128x128xbf16> to vector<128x128xbf16>
    %cst_26 = arith.constant dense<0.000000e+00> : vector<128x128xf32>
    %25 = tpu.matmul %22, %24, %cst_26 {dimension_numbers = #tpu.dot_dimension_numbers<[1], [0], [0], [1], [0, 0, 1, 1], [], []>} : vector<128x128xbf16>, vector<128x128xbf16>, vector<128x128xf32> -> vector<128x128xf32>
    %26 = arith.addf %20, %25 : vector<128x128xf32>
    %c0_27 = arith.constant 0 : index
    %c19 = arith.constant 19 : index
    %c0_28 = arith.constant 0 : index
    %27 = vector.load %arg1[%c0_27, %c19, %c0_28] : memref<1x344x128xbf16, #tpu.memory_space<vmem>>, vector<1x128x128xbf16>
    %28 = vector.shape_cast %27 : vector<1x128x128xbf16> to vector<128x128xbf16>
    %c4 = arith.constant 4 : index
    %c0_29 = arith.constant 0 : index
    %c0_30 = arith.constant 0 : index
    %29 = vector.load %arg3[%c4, %c0_29, %c0_30] : memref<9x128x128xbf16, #tpu.memory_space<vmem>>, vector<1x128x128xbf16>
    %30 = vector.shape_cast %29 : vector<1x128x128xbf16> to vector<128x128xbf16>
    %cst_31 = arith.constant dense<0.000000e+00> : vector<128x128xf32>
    %31 = tpu.matmul %28, %30, %cst_31 {dimension_numbers = #tpu.dot_dimension_numbers<[1], [0], [0], [1], [0, 0, 1, 1], [], []>} : vector<128x128xbf16>, vector<128x128xbf16>, vector<128x128xf32> -> vector<128x128xf32>
    %32 = arith.addf %26, %31 : vector<128x128xf32>
    %c0_32 = arith.constant 0 : index
    %c20 = arith.constant 20 : index
    %c0_33 = arith.constant 0 : index
    %33 = vector.load %arg1[%c0_32, %c20, %c0_33] : memref<1x344x128xbf16, #tpu.memory_space<vmem>>, vector<1x128x128xbf16>
    %34 = vector.shape_cast %33 : vector<1x128x128xbf16> to vector<128x128xbf16>
    %c5 = arith.constant 5 : index
    %c0_34 = arith.constant 0 : index
    %c0_35 = arith.constant 0 : index
    %35 = vector.load %arg3[%c5, %c0_34, %c0_35] : memref<9x128x128xbf16, #tpu.memory_space<vmem>>, vector<1x128x128xbf16>
    %36 = vector.shape_cast %35 : vector<1x128x128xbf16> to vector<128x128xbf16>
    %cst_36 = arith.constant dense<0.000000e+00> : vector<128x128xf32>
    %37 = tpu.matmul %34, %36, %cst_36 {dimension_numbers = #tpu.dot_dimension_numbers<[1], [0], [0], [1], [0, 0, 1, 1], [], []>} : vector<128x128xbf16>, vector<128x128xbf16>, vector<128x128xf32> -> vector<128x128xf32>
    %38 = arith.addf %32, %37 : vector<128x128xf32>
    %c0_37 = arith.constant 0 : index
    %c36 = arith.constant 36 : index
    %c0_38 = arith.constant 0 : index
    %39 = vector.load %arg1[%c0_37, %c36, %c0_38] : memref<1x344x128xbf16, #tpu.memory_space<vmem>>, vector<1x128x128xbf16>
    %40 = vector.shape_cast %39 : vector<1x128x128xbf16> to vector<128x128xbf16>
    %c6 = arith.constant 6 : index
    %c0_39 = arith.constant 0 : index
    %c0_40 = arith.constant 0 : index
    %41 = vector.load %arg3[%c6, %c0_39, %c0_40] : memref<9x128x128xbf16, #tpu.memory_space<vmem>>, vector<1x128x128xbf16>
    %42 = vector.shape_cast %41 : vector<1x128x128xbf16> to vector<128x128xbf16>
    %cst_41 = arith.constant dense<0.000000e+00> : vector<128x128xf32>
    %43 = tpu.matmul %40, %42, %cst_41 {dimension_numbers = #tpu.dot_dimension_numbers<[1], [0], [0], [1], [0, 0, 1, 1], [], []>} : vector<128x128xbf16>, vector<128x128xbf16>, vector<128x128xf32> -> vector<128x128xf32>
    %44 = arith.addf %38, %43 : vector<128x128xf32>
    %c0_42 = arith.constant 0 : index
    %c37 = arith.constant 37 : index
    %c0_43 = arith.constant 0 : index
    %45 = vector.load %arg1[%c0_42, %c37, %c0_43] : memref<1x344x128xbf16, #tpu.memory_space<vmem>>, vector<1x128x128xbf16>
    %46 = vector.shape_cast %45 : vector<1x128x128xbf16> to vector<128x128xbf16>
    %c7 = arith.constant 7 : index
    %c0_44 = arith.constant 0 : index
    %c0_45 = arith.constant 0 : index
    %47 = vector.load %arg3[%c7, %c0_44, %c0_45] : memref<9x128x128xbf16, #tpu.memory_space<vmem>>, vector<1x128x128xbf16>
    %48 = vector.shape_cast %47 : vector<1x128x128xbf16> to vector<128x128xbf16>
    %cst_46 = arith.constant dense<0.000000e+00> : vector<128x128xf32>
    %49 = tpu.matmul %46, %48, %cst_46 {dimension_numbers = #tpu.dot_dimension_numbers<[1], [0], [0], [1], [0, 0, 1, 1], [], []>} : vector<128x128xbf16>, vector<128x128xbf16>, vector<128x128xf32> -> vector<128x128xf32>
    %50 = arith.addf %44, %49 : vector<128x128xf32>
    %c0_47 = arith.constant 0 : index
    %c38 = arith.constant 38 : index
    %c0_48 = arith.constant 0 : index
    %51 = vector.load %arg1[%c0_47, %c38, %c0_48] : memref<1x344x128xbf16, #tpu.memory_space<vmem>>, vector<1x128x128xbf16>
    %52 = vector.shape_cast %51 : vector<1x128x128xbf16> to vector<128x128xbf16>
    %c8 = arith.constant 8 : index
    %c0_49 = arith.constant 0 : index
    %c0_50 = arith.constant 0 : index
    %53 = vector.load %arg3[%c8, %c0_49, %c0_50] : memref<9x128x128xbf16, #tpu.memory_space<vmem>>, vector<1x128x128xbf16>
    %54 = vector.shape_cast %53 : vector<1x128x128xbf16> to vector<128x128xbf16>
    %cst_51 = arith.constant dense<0.000000e+00> : vector<128x128xf32>
    %55 = tpu.matmul %52, %54, %cst_51 {dimension_numbers = #tpu.dot_dimension_numbers<[1], [0], [0], [1], [0, 0, 1, 1], [], []>} : vector<128x128xbf16>, vector<128x128xbf16>, vector<128x128xf32> -> vector<128x128xf32>
    %56 = arith.addf %50, %55 : vector<128x128xf32>
    %c0_52 = arith.constant 0 : index
    %c0_53 = arith.constant 0 : index
    %57 = vector.load %arg2[%c0_52, %c0_53] : memref<288x1xf32, #tpu.memory_space<vmem>>, vector<128x1xf32>
    %58 = vector.broadcast %57 : vector<128x1xf32> to vector<128x128xf32>
    %59 = arith.mulf %56, %58 : vector<128x128xf32>
    %cst_54 = arith.constant dense<0.000000e+00> : vector<128xf32>
    %60 = vector.multi_reduction <add>, %59, %cst_54 [0] : vector<128x128xf32> to vector<128xf32>
    %61 = vector.shape_cast %60 : vector<128xf32> to vector<1x128xf32>
    %62 = arith.addf %2, %61 : vector<1x128xf32>
    %63 = arith.mulf %56, %56 : vector<128x128xf32>
    %64 = vector.broadcast %57 : vector<128x1xf32> to vector<128x128xf32>
    %65 = arith.mulf %63, %64 : vector<128x128xf32>
    %cst_55 = arith.constant dense<0.000000e+00> : vector<128xf32>
    %66 = vector.multi_reduction <add>, %65, %cst_55 [0] : vector<128x128xf32> to vector<128xf32>
    %67 = vector.shape_cast %66 : vector<128xf32> to vector<1x128xf32>
    %68 = arith.addf %3, %67 : vector<1x128xf32>
    %c0_56 = arith.constant 0 : index
    %c0_57 = arith.constant 0 : index
    %69 = vector.load %arg10[%c0_56, %c0_57] : memref<288x128xf32, #tpu.memory_space<vmem>>, vector<128x128xf32>
    tpu.vector_store %arg10[%c0_56, %c0_57], %56 {strides = array<i32>} : memref<288x128xf32, #tpu.memory_space<vmem>>, vector<128x128xf32>,
    %c0_58 = arith.constant 0 : index
    %c128 = arith.constant 128 : index
    %c0_59 = arith.constant 0 : index
    %70 = vector.load %arg1[%c0_58, %c128, %c0_59] : memref<1x344x128xbf16, #tpu.memory_space<vmem>>, vector<1x128x128xbf16>
    %71 = vector.shape_cast %70 : vector<1x128x128xbf16> to vector<128x128xbf16>
    %c0_60 = arith.constant 0 : index
    %c0_61 = arith.constant 0 : index
    %c0_62 = arith.constant 0 : index
    %72 = vector.load %arg3[%c0_60, %c0_61, %c0_62] : memref<9x128x128xbf16, #tpu.memory_space<vmem>>, vector<1x128x128xbf16>
    %73 = vector.shape_cast %72 : vector<1x128x128xbf16> to vector<128x128xbf16>
    %cst_63 = arith.constant dense<0.000000e+00> : vector<128x128xf32>
    %74 = tpu.matmul %71, %73, %cst_63 {dimension_numbers = #tpu.dot_dimension_numbers<[1], [0], [0], [1], [0, 0, 1, 1], [], []>} : vector<128x128xbf16>, vector<128x128xbf16>, vector<128x128xf32> -> vector<128x128xf32>
    %c0_64 = arith.constant 0 : index
    %c129 = arith.constant 129 : index
    %c0_65 = arith.constant 0 : index
    %75 = vector.load %arg1[%c0_64, %c129, %c0_65] : memref<1x344x128xbf16, #tpu.memory_space<vmem>>, vector<1x128x128xbf16>
    %76 = vector.shape_cast %75 : vector<1x128x128xbf16> to vector<128x128xbf16>
    %c1_66 = arith.constant 1 : index
    %c0_67 = arith.constant 0 : index
    %c0_68 = arith.constant 0 : index
    %77 = vector.load %arg3[%c1_66, %c0_67, %c0_68] : memref<9x128x128xbf16, #tpu.memory_space<vmem>>, vector<1x128x128xbf16>
    %78 = vector.shape_cast %77 : vector<1x128x128xbf16> to vector<128x128xbf16>
    %cst_69 = arith.constant dense<0.000000e+00> : vector<128x128xf32>
    %79 = tpu.matmul %76, %78, %cst_69 {dimension_numbers = #tpu.dot_dimension_numbers<[1], [0], [0], [1], [0, 0, 1, 1], [], []>} : vector<128x128xbf16>, vector<128x128xbf16>, vector<128x128xf32> -> vector<128x128xf32>
    %80 = arith.addf %74, %79 : vector<128x128xf32>
    %c0_70 = arith.constant 0 : index
    %c130 = arith.constant 130 : index
    %c0_71 = arith.constant 0 : index
    %81 = vector.load %arg1[%c0_70, %c130, %c0_71] : memref<1x344x128xbf16, #tpu.memory_space<vmem>>, vector<1x128x128xbf16>
    %82 = vector.shape_cast %81 : vector<1x128x128xbf16> to vector<128x128xbf16>
    %c2_72 = arith.constant 2 : index
    %c0_73 = arith.constant 0 : index
    %c0_74 = arith.constant 0 : index
    %83 = vector.load %arg3[%c2_72, %c0_73, %c0_74] : memref<9x128x128xbf16, #tpu.memory_space<vmem>>, vector<1x128x128xbf16>
    %84 = vector.shape_cast %83 : vector<1x128x128xbf16> to vector<128x128xbf16>
    %cst_75 = arith.constant dense<0.000000e+00> : vector<128x128xf32>
    %85 = tpu.matmul %82, %84, %cst_75 {dimension_numbers = #tpu.dot_dimension_numbers<[1], [0], [0], [1], [0, 0, 1, 1], [], []>} : vector<128x128xbf16>, vector<128x128xbf16>, vector<128x128xf32> -> vector<128x128xf32>
    %86 = arith.addf %80, %85 : vector<128x128xf32>
    %c0_76 = arith.constant 0 : index
    %c146 = arith.constant 146 : index
    %c0_77 = arith.constant 0 : index
    %87 = vector.load %arg1[%c0_76, %c146, %c0_77] : memref<1x344x128xbf16, #tpu.memory_space<vmem>>, vector<1x128x128xbf16>
    %88 = vector.shape_cast %87 : vector<1x128x128xbf16> to vector<128x128xbf16>
    %c3_78 = arith.constant 3 : index
    %c0_79 = arith.constant 0 : index
    %c0_80 = arith.constant 0 : index
    %89 = vector.load %arg3[%c3_78, %c0_79, %c0_80] : memref<9x128x128xbf16, #tpu.memory_space<vmem>>, vector<1x128x128xbf16>
    %90 = vector.shape_cast %89 : vector<1x128x128xbf16> to vector<128x128xbf16>
    %cst_81 = arith.constant dense<0.000000e+00> : vector<128x128xf32>
    %91 = tpu.matmul %88, %90, %cst_81 {dimension_numbers = #tpu.dot_dimension_numbers<[1], [0], [0], [1], [0, 0, 1, 1], [], []>} : vector<128x128xbf16>, vector<128x128xbf16>, vector<128x128xf32> -> vector<128x128xf32>
    %92 = arith.addf %86, %91 : vector<128x128xf32>
    %c0_82 = arith.constant 0 : index
    %c147 = arith.constant 147 : index
    %c0_83 = arith.constant 0 : index
    %93 = vector.load %arg1[%c0_82, %c147, %c0_83] : memref<1x344x128xbf16, #tpu.memory_space<vmem>>, vector<1x128x128xbf16>
    %94 = vector.shape_cast %93 : vector<1x128x128xbf16> to vector<128x128xbf16>
    %c4_84 = arith.constant 4 : index
    %c0_85 = arith.constant 0 : index
    %c0_86 = arith.constant 0 : index
    %95 = vector.load %arg3[%c4_84, %c0_85, %c0_86] : memref<9x128x128xbf16, #tpu.memory_space<vmem>>, vector<1x128x128xbf16>
    %96 = vector.shape_cast %95 : vector<1x128x128xbf16> to vector<128x128xbf16>
    %cst_87 = arith.constant dense<0.000000e+00> : vector<128x128xf32>
    %97 = tpu.matmul %94, %96, %cst_87 {dimension_numbers = #tpu.dot_dimension_numbers<[1], [0], [0], [1], [0, 0, 1, 1], [], []>} : vector<128x128xbf16>, vector<128x128xbf16>, vector<128x128xf32> -> vector<128x128xf32>
    %98 = arith.addf %92, %97 : vector<128x128xf32>
    %c0_88 = arith.constant 0 : index
    %c148 = arith.constant 148 : index
    %c0_89 = arith.constant 0 : index
    %99 = vector.load %arg1[%c0_88, %c148, %c0_89] : memref<1x344x128xbf16, #tpu.memory_space<vmem>>, vector<1x128x128xbf16>
    %100 = vector.shape_cast %99 : vector<1x128x128xbf16> to vector<128x128xbf16>
    %c5_90 = arith.constant 5 : index
    %c0_91 = arith.constant 0 : index
    %c0_92 = arith.constant 0 : index
    %101 = vector.load %arg3[%c5_90, %c0_91, %c0_92] : memref<9x128x128xbf16, #tpu.memory_space<vmem>>, vector<1x128x128xbf16>
    %102 = vector.shape_cast %101 : vector<1x128x128xbf16> to vector<128x128xbf16>
    %cst_93 = arith.constant dense<0.000000e+00> : vector<128x128xf32>
    %103 = tpu.matmul %100, %102, %cst_93 {dimension_numbers = #tpu.dot_dimension_numbers<[1], [0], [0], [1], [0, 0, 1, 1], [], []>} : vector<128x128xbf16>, vector<128x128xbf16>, vector<128x128xf32> -> vector<128x128xf32>
    %104 = arith.addf %98, %103 : vector<128x128xf32>
    %c0_94 = arith.constant 0 : index
    %c164 = arith.constant 164 : index
    %c0_95 = arith.constant 0 : index
    %105 = vector.load %arg1[%c0_94, %c164, %c0_95] : memref<1x344x128xbf16, #tpu.memory_space<vmem>>, vector<1x128x128xbf16>
    %106 = vector.shape_cast %105 : vector<1x128x128xbf16> to vector<128x128xbf16>
    %c6_96 = arith.constant 6 : index
    %c0_97 = arith.constant 0 : index
    %c0_98 = arith.constant 0 : index
    %107 = vector.load %arg3[%c6_96, %c0_97, %c0_98] : memref<9x128x128xbf16, #tpu.memory_space<vmem>>, vector<1x128x128xbf16>
    %108 = vector.shape_cast %107 : vector<1x128x128xbf16> to vector<128x128xbf16>
    %cst_99 = arith.constant dense<0.000000e+00> : vector<128x128xf32>
    %109 = tpu.matmul %106, %108, %cst_99 {dimension_numbers = #tpu.dot_dimension_numbers<[1], [0], [0], [1], [0, 0, 1, 1], [], []>} : vector<128x128xbf16>, vector<128x128xbf16>, vector<128x128xf32> -> vector<128x128xf32>
    %110 = arith.addf %104, %109 : vector<128x128xf32>
    %c0_100 = arith.constant 0 : index
    %c165 = arith.constant 165 : index
    %c0_101 = arith.constant 0 : index
    %111 = vector.load %arg1[%c0_100, %c165, %c0_101] : memref<1x344x128xbf16, #tpu.memory_space<vmem>>, vector<1x128x128xbf16>
    %112 = vector.shape_cast %111 : vector<1x128x128xbf16> to vector<128x128xbf16>
    %c7_102 = arith.constant 7 : index
    %c0_103 = arith.constant 0 : index
    %c0_104 = arith.constant 0 : index
    %113 = vector.load %arg3[%c7_102, %c0_103, %c0_104] : memref<9x128x128xbf16, #tpu.memory_space<vmem>>, vector<1x128x128xbf16>
    %114 = vector.shape_cast %113 : vector<1x128x128xbf16> to vector<128x128xbf16>
    %cst_105 = arith.constant dense<0.000000e+00> : vector<128x128xf32>
    %115 = tpu.matmul %112, %114, %cst_105 {dimension_numbers = #tpu.dot_dimension_numbers<[1], [0], [0], [1], [0, 0, 1, 1], [], []>} : vector<128x128xbf16>, vector<128x128xbf16>, vector<128x128xf32> -> vector<128x128xf32>
    %116 = arith.addf %110, %115 : vector<128x128xf32>
    %c0_106 = arith.constant 0 : index
    %c166 = arith.constant 166 : index
    %c0_107 = arith.constant 0 : index
    %117 = vector.load %arg1[%c0_106, %c166, %c0_107] : memref<1x344x128xbf16, #tpu.memory_space<vmem>>, vector<1x128x128xbf16>
    %118 = vector.shape_cast %117 : vector<1x128x128xbf16> to vector<128x128xbf16>
    %c8_108 = arith.constant 8 : index
    %c0_109 = arith.constant 0 : index
    %c0_110 = arith.constant 0 : index
    %119 = vector.load %arg3[%c8_108, %c0_109, %c0_110] : memref<9x128x128xbf16, #tpu.memory_space<vmem>>, vector<1x128x128xbf16>
    %120 = vector.shape_cast %119 : vector<1x128x128xbf16> to vector<128x128xbf16>
    %cst_111 = arith.constant dense<0.000000e+00> : vector<128x128xf32>
    %121 = tpu.matmul %118, %120, %cst_111 {dimension_numbers = #tpu.dot_dimension_numbers<[1], [0], [0], [1], [0, 0, 1, 1], [], []>} : vector<128x128xbf16>, vector<128x128xbf16>, vector<128x128xf32> -> vector<128x128xf32>
    %122 = arith.addf %116, %121 : vector<128x128xf32>
    %c128_112 = arith.constant 128 : index
    %c0_113 = arith.constant 0 : index
    %123 = vector.load %arg2[%c128_112, %c0_113] : memref<288x1xf32, #tpu.memory_space<vmem>>, vector<128x1xf32>
    %124 = vector.broadcast %123 : vector<128x1xf32> to vector<128x128xf32>
    %125 = arith.mulf %122, %124 : vector<128x128xf32>
    %cst_114 = arith.constant dense<0.000000e+00> : vector<128xf32>
    %126 = vector.multi_reduction <add>, %125, %cst_114 [0] : vector<128x128xf32> to vector<128xf32>
    %127 = vector.shape_cast %126 : vector<128xf32> to vector<1x128xf32>
    %128 = arith.addf %62, %127 : vector<1x128xf32>
    %129 = arith.mulf %122, %122 : vector<128x128xf32>
    %130 = vector.broadcast %123 : vector<128x1xf32> to vector<128x128xf32>
    %131 = arith.mulf %129, %130 : vector<128x128xf32>
    %cst_115 = arith.constant dense<0.000000e+00> : vector<128xf32>
    %132 = vector.multi_reduction <add>, %131, %cst_115 [0] : vector<128x128xf32> to vector<128xf32>
    %133 = vector.shape_cast %132 : vector<128xf32> to vector<1x128xf32>
    %134 = arith.addf %68, %133 : vector<1x128xf32>
    %c128_116 = arith.constant 128 : index
    %c0_117 = arith.constant 0 : index
    %135 = vector.load %arg10[%c128_116, %c0_117] : memref<288x128xf32, #tpu.memory_space<vmem>>, vector<128x128xf32>
    tpu.vector_store %arg10[%c128_116, %c0_117], %122 {strides = array<i32>} : memref<288x128xf32, #tpu.memory_space<vmem>>, vector<128x128xf32>,
    %c0_118 = arith.constant 0 : index
    %c256 = arith.constant 256 : index
    %c0_119 = arith.constant 0 : index
    %136 = vector.load %arg1[%c0_118, %c256, %c0_119] : memref<1x344x128xbf16, #tpu.memory_space<vmem>>, vector<1x32x128xbf16>
    %137 = vector.shape_cast %136 : vector<1x32x128xbf16> to vector<32x128xbf16>
    %c0_120 = arith.constant 0 : index
    %c0_121 = arith.constant 0 : index
    %c0_122 = arith.constant 0 : index
    %138 = vector.load %arg3[%c0_120, %c0_121, %c0_122] : memref<9x128x128xbf16, #tpu.memory_space<vmem>>, vector<1x128x128xbf16>
    %139 = vector.shape_cast %138 : vector<1x128x128xbf16> to vector<128x128xbf16>
    %cst_123 = arith.constant dense<0.000000e+00> : vector<32x128xf32>
    %140 = tpu.matmul %137, %139, %cst_123 {dimension_numbers = #tpu.dot_dimension_numbers<[1], [0], [0], [1], [0, 0, 1, 1], [], []>} : vector<32x128xbf16>, vector<128x128xbf16>, vector<32x128xf32> -> vector<32x128xf32>
    %c0_124 = arith.constant 0 : index
    %c257 = arith.constant 257 : index
    %c0_125 = arith.constant 0 : index
    %141 = vector.load %arg1[%c0_124, %c257, %c0_125] : memref<1x344x128xbf16, #tpu.memory_space<vmem>>, vector<1x32x128xbf16>
    %142 = vector.shape_cast %141 : vector<1x32x128xbf16> to vector<32x128xbf16>
    %c1_126 = arith.constant 1 : index
    %c0_127 = arith.constant 0 : index
    %c0_128 = arith.constant 0 : index
    %143 = vector.load %arg3[%c1_126, %c0_127, %c0_128] : memref<9x128x128xbf16, #tpu.memory_space<vmem>>, vector<1x128x128xbf16>
    %144 = vector.shape_cast %143 : vector<1x128x128xbf16> to vector<128x128xbf16>
    %cst_129 = arith.constant dense<0.000000e+00> : vector<32x128xf32>
    %145 = tpu.matmul %142, %144, %cst_129 {dimension_numbers = #tpu.dot_dimension_numbers<[1], [0], [0], [1], [0, 0, 1, 1], [], []>} : vector<32x128xbf16>, vector<128x128xbf16>, vector<32x128xf32> -> vector<32x128xf32>
    %146 = arith.addf %140, %145 : vector<32x128xf32>
    %c0_130 = arith.constant 0 : index
    %c258 = arith.constant 258 : index
    %c0_131 = arith.constant 0 : index
    %147 = vector.load %arg1[%c0_130, %c258, %c0_131] : memref<1x344x128xbf16, #tpu.memory_space<vmem>>, vector<1x32x128xbf16>
    %148 = vector.shape_cast %147 : vector<1x32x128xbf16> to vector<32x128xbf16>
    %c2_132 = arith.constant 2 : index
    %c0_133 = arith.constant 0 : index
    %c0_134 = arith.constant 0 : index
    %149 = vector.load %arg3[%c2_132, %c0_133, %c0_134] : memref<9x128x128xbf16, #tpu.memory_space<vmem>>, vector<1x128x128xbf16>
    %150 = vector.shape_cast %149 : vector<1x128x128xbf16> to vector<128x128xbf16>
    %cst_135 = arith.constant dense<0.000000e+00> : vector<32x128xf32>
    %151 = tpu.matmul %148, %150, %cst_135 {dimension_numbers = #tpu.dot_dimension_numbers<[1], [0], [0], [1], [0, 0, 1, 1], [], []>} : vector<32x128xbf16>, vector<128x128xbf16>, vector<32x128xf32> -> vector<32x128xf32>
    %152 = arith.addf %146, %151 : vector<32x128xf32>
    %c0_136 = arith.constant 0 : index
    %c274 = arith.constant 274 : index
    %c0_137 = arith.constant 0 : index
    %153 = vector.load %arg1[%c0_136, %c274, %c0_137] : memref<1x344x128xbf16, #tpu.memory_space<vmem>>, vector<1x32x128xbf16>
    %154 = vector.shape_cast %153 : vector<1x32x128xbf16> to vector<32x128xbf16>
    %c3_138 = arith.constant 3 : index
    %c0_139 = arith.constant 0 : index
    %c0_140 = arith.constant 0 : index
    %155 = vector.load %arg3[%c3_138, %c0_139, %c0_140] : memref<9x128x128xbf16, #tpu.memory_space<vmem>>, vector<1x128x128xbf16>
    %156 = vector.shape_cast %155 : vector<1x128x128xbf16> to vector<128x128xbf16>
    %cst_141 = arith.constant dense<0.000000e+00> : vector<32x128xf32>
    %157 = tpu.matmul %154, %156, %cst_141 {dimension_numbers = #tpu.dot_dimension_numbers<[1], [0], [0], [1], [0, 0, 1, 1], [], []>} : vector<32x128xbf16>, vector<128x128xbf16>, vector<32x128xf32> -> vector<32x128xf32>
    %158 = arith.addf %152, %157 : vector<32x128xf32>
    %c0_142 = arith.constant 0 : index
    %c275 = arith.constant 275 : index
    %c0_143 = arith.constant 0 : index
    %159 = vector.load %arg1[%c0_142, %c275, %c0_143] : memref<1x344x128xbf16, #tpu.memory_space<vmem>>, vector<1x32x128xbf16>
    %160 = vector.shape_cast %159 : vector<1x32x128xbf16> to vector<32x128xbf16>
    %c4_144 = arith.constant 4 : index
    %c0_145 = arith.constant 0 : index
    %c0_146 = arith.constant 0 : index
    %161 = vector.load %arg3[%c4_144, %c0_145, %c0_146] : memref<9x128x128xbf16, #tpu.memory_space<vmem>>, vector<1x128x128xbf16>
    %162 = vector.shape_cast %161 : vector<1x128x128xbf16> to vector<128x128xbf16>
    %cst_147 = arith.constant dense<0.000000e+00> : vector<32x128xf32>
    %163 = tpu.matmul %160, %162, %cst_147 {dimension_numbers = #tpu.dot_dimension_numbers<[1], [0], [0], [1], [0, 0, 1, 1], [], []>} : vector<32x128xbf16>, vector<128x128xbf16>, vector<32x128xf32> -> vector<32x128xf32>
    %164 = arith.addf %158, %163 : vector<32x128xf32>
    %c0_148 = arith.constant 0 : index
    %c276 = arith.constant 276 : index
    %c0_149 = arith.constant 0 : index
    %165 = vector.load %arg1[%c0_148, %c276, %c0_149] : memref<1x344x128xbf16, #tpu.memory_space<vmem>>, vector<1x32x128xbf16>
    %166 = vector.shape_cast %165 : vector<1x32x128xbf16> to vector<32x128xbf16>
    %c5_150 = arith.constant 5 : index
    %c0_151 = arith.constant 0 : index
    %c0_152 = arith.constant 0 : index
    %167 = vector.load %arg3[%c5_150, %c0_151, %c0_152] : memref<9x128x128xbf16, #tpu.memory_space<vmem>>, vector<1x128x128xbf16>
    %168 = vector.shape_cast %167 : vector<1x128x128xbf16> to vector<128x128xbf16>
    %cst_153 = arith.constant dense<0.000000e+00> : vector<32x128xf32>
    %169 = tpu.matmul %166, %168, %cst_153 {dimension_numbers = #tpu.dot_dimension_numbers<[1], [0], [0], [1], [0, 0, 1, 1], [], []>} : vector<32x128xbf16>, vector<128x128xbf16>, vector<32x128xf32> -> vector<32x128xf32>
    %170 = arith.addf %164, %169 : vector<32x128xf32>
    %c0_154 = arith.constant 0 : index
    %c292 = arith.constant 292 : index
    %c0_155 = arith.constant 0 : index
    %171 = vector.load %arg1[%c0_154, %c292, %c0_155] : memref<1x344x128xbf16, #tpu.memory_space<vmem>>, vector<1x32x128xbf16>
    %172 = vector.shape_cast %171 : vector<1x32x128xbf16> to vector<32x128xbf16>
    %c6_156 = arith.constant 6 : index
    %c0_157 = arith.constant 0 : index
    %c0_158 = arith.constant 0 : index
    %173 = vector.load %arg3[%c6_156, %c0_157, %c0_158] : memref<9x128x128xbf16, #tpu.memory_space<vmem>>, vector<1x128x128xbf16>
    %174 = vector.shape_cast %173 : vector<1x128x128xbf16> to vector<128x128xbf16>
    %cst_159 = arith.constant dense<0.000000e+00> : vector<32x128xf32>
    %175 = tpu.matmul %172, %174, %cst_159 {dimension_numbers = #tpu.dot_dimension_numbers<[1], [0], [0], [1], [0, 0, 1, 1], [], []>} : vector<32x128xbf16>, vector<128x128xbf16>, vector<32x128xf32> -> vector<32x128xf32>
    %176 = arith.addf %170, %175 : vector<32x128xf32>
    %c0_160 = arith.constant 0 : index
    %c293 = arith.constant 293 : index
    %c0_161 = arith.constant 0 : index
    %177 = vector.load %arg1[%c0_160, %c293, %c0_161] : memref<1x344x128xbf16, #tpu.memory_space<vmem>>, vector<1x32x128xbf16>
    %178 = vector.shape_cast %177 : vector<1x32x128xbf16> to vector<32x128xbf16>
    %c7_162 = arith.constant 7 : index
    %c0_163 = arith.constant 0 : index
    %c0_164 = arith.constant 0 : index
    %179 = vector.load %arg3[%c7_162, %c0_163, %c0_164] : memref<9x128x128xbf16, #tpu.memory_space<vmem>>, vector<1x128x128xbf16>
    %180 = vector.shape_cast %179 : vector<1x128x128xbf16> to vector<128x128xbf16>
    %cst_165 = arith.constant dense<0.000000e+00> : vector<32x128xf32>
    %181 = tpu.matmul %178, %180, %cst_165 {dimension_numbers = #tpu.dot_dimension_numbers<[1], [0], [0], [1], [0, 0, 1, 1], [], []>} : vector<32x128xbf16>, vector<128x128xbf16>, vector<32x128xf32> -> vector<32x128xf32>
    %182 = arith.addf %176, %181 : vector<32x128xf32>
    %c0_166 = arith.constant 0 : index
    %c294 = arith.constant 294 : index
    %c0_167 = arith.constant 0 : index
    %183 = vector.load %arg1[%c0_166, %c294, %c0_167] : memref<1x344x128xbf16, #tpu.memory_space<vmem>>, vector<1x32x128xbf16>
    %184 = vector.shape_cast %183 : vector<1x32x128xbf16> to vector<32x128xbf16>
    %c8_168 = arith.constant 8 : index
    %c0_169 = arith.constant 0 : index
    %c0_170 = arith.constant 0 : index
    %185 = vector.load %arg3[%c8_168, %c0_169, %c0_170] : memref<9x128x128xbf16, #tpu.memory_space<vmem>>, vector<1x128x128xbf16>
    %186 = vector.shape_cast %185 : vector<1x128x128xbf16> to vector<128x128xbf16>
    %cst_171 = arith.constant dense<0.000000e+00> : vector<32x128xf32>
    %187 = tpu.matmul %184, %186, %cst_171 {dimension_numbers = #tpu.dot_dimension_numbers<[1], [0], [0], [1], [0, 0, 1, 1], [], []>} : vector<32x128xbf16>, vector<128x128xbf16>, vector<32x128xf32> -> vector<32x128xf32>
    %188 = arith.addf %182, %187 : vector<32x128xf32>
    %c256_172 = arith.constant 256 : index
    %c0_173 = arith.constant 0 : index
    %189 = vector.load %arg2[%c256_172, %c0_173] : memref<288x1xf32, #tpu.memory_space<vmem>>, vector<32x1xf32>
    %190 = vector.broadcast %189 : vector<32x1xf32> to vector<32x128xf32>
    %191 = arith.mulf %188, %190 : vector<32x128xf32>
    %cst_174 = arith.constant dense<0.000000e+00> : vector<128xf32>
    %192 = vector.multi_reduction <add>, %191, %cst_174 [0] : vector<32x128xf32> to vector<128xf32>
    %193 = vector.shape_cast %192 : vector<128xf32> to vector<1x128xf32>
    %194 = arith.addf %128, %193 : vector<1x128xf32>
    %195 = arith.mulf %188, %188 : vector<32x128xf32>
    %196 = vector.broadcast %189 : vector<32x1xf32> to vector<32x128xf32>
    %197 = arith.mulf %195, %196 : vector<32x128xf32>
    %cst_175 = arith.constant dense<0.000000e+00> : vector<128xf32>
    %198 = vector.multi_reduction <add>, %197, %cst_175 [0] : vector<32x128xf32> to vector<128xf32>
    %199 = vector.shape_cast %198 : vector<128xf32> to vector<1x128xf32>
    %200 = arith.addf %134, %199 : vector<1x128xf32>
    %c256_176 = arith.constant 256 : index
    %c0_177 = arith.constant 0 : index
    %201 = vector.load %arg10[%c256_176, %c0_177] : memref<288x128xf32, #tpu.memory_space<vmem>>, vector<32x128xf32>
    tpu.vector_store %arg10[%c256_176, %c0_177], %188 {strides = array<i32>} : memref<288x128xf32, #tpu.memory_space<vmem>>, vector<32x128xf32>,
    %cst_178 = arith.constant 3.906250e-03 : f32
    %202 = vector.broadcast %cst_178 : f32 to vector<1x128xf32>
    %203 = arith.mulf %194, %202 : vector<1x128xf32>
    %cst_179 = arith.constant 3.906250e-03 : f32
    %204 = vector.broadcast %cst_179 : f32 to vector<1x128xf32>
    %205 = arith.mulf %200, %204 : vector<1x128xf32>
    %206 = arith.mulf %203, %203 : vector<1x128xf32>
    %207 = arith.subf %205, %206 : vector<1x128xf32>
    %cst_180 = arith.constant 0.000000e+00 : f32
    %208 = vector.broadcast %cst_180 : f32 to vector<1x128xf32>
    %209 = arith.maximumf %207, %208 : vector<1x128xf32>
    %c0_181 = arith.constant 0 : index
    %c0_182 = arith.constant 0 : index
    %210 = vector.load %arg4[%c0_181, %c0_182] : memref<1x128xf32, #tpu.memory_space<vmem>>, vector<1x128xf32>
    %c0_183 = arith.constant 0 : index
    %c0_184 = arith.constant 0 : index
    %211 = vector.load %arg5[%c0_183, %c0_184] : memref<1x128xf32, #tpu.memory_space<vmem>>, vector<1x128xf32>
    %cst_185 = arith.constant 9.99999974E-6 : f32
    %212 = vector.broadcast %cst_185 : f32 to vector<1x128xf32>
    %213 = arith.addf %209, %212 : vector<1x128xf32>
    %214 = math.rsqrt %213 : vector<1x128xf32>
    %215 = arith.mulf %210, %214 : vector<1x128xf32>
    %216 = arith.mulf %203, %215 : vector<1x128xf32>
    %217 = arith.subf %211, %216 : vector<1x128xf32>
    %c0_186 = arith.constant 0 : index
    %c0_187 = arith.constant 0 : index
    %218 = vector.load %arg10[%c0_186, %c0_187] : memref<288x128xf32, #tpu.memory_space<vmem>>, vector<128x128xf32>
    %219 = vector.broadcast %215 : vector<1x128xf32> to vector<128x128xf32>
    %220 = arith.mulf %218, %219 : vector<128x128xf32>
    %221 = vector.broadcast %217 : vector<1x128xf32> to vector<128x128xf32>
    %222 = arith.addf %220, %221 : vector<128x128xf32>
    %cst_188 = arith.constant 0.000000e+00 : f32
    %223 = vector.broadcast %cst_188 : f32 to vector<128x128xf32>
    %224 = arith.maximumf %222, %223 : vector<128x128xf32>
    %c0_189 = arith.constant 0 : index
    %c0_190 = arith.constant 0 : index
    %225 = vector.load %arg2[%c0_189, %c0_190] : memref<288x1xf32, #tpu.memory_space<vmem>>, vector<128x1xf32>
    %226 = vector.broadcast %225 : vector<128x1xf32> to vector<128x128xf32>
    %227 = arith.mulf %224, %226 : vector<128x128xf32>
    %c24 = arith.constant 24 : index
    %c0_191 = arith.constant 0 : index
    %228 = vector.load %arg11[%c24, %c0_191] : memref<352x128xf32, #tpu.memory_space<vmem>>, vector<128x128xf32>
    tpu.vector_store %arg11[%c24, %c0_191], %227 {strides = array<i32>} : memref<352x128xf32, #tpu.memory_space<vmem>>, vector<128x128xf32>,
    %c128_192 = arith.constant 128 : index
    %c0_193 = arith.constant 0 : index
    %229 = vector.load %arg10[%c128_192, %c0_193] : memref<288x128xf32, #tpu.memory_space<vmem>>, vector<128x128xf32>
    %230 = vector.broadcast %215 : vector<1x128xf32> to vector<128x128xf32>
    %231 = arith.mulf %229, %230 : vector<128x128xf32>
    %232 = vector.broadcast %217 : vector<1x128xf32> to vector<128x128xf32>
    %233 = arith.addf %231, %232 : vector<128x128xf32>
    %cst_194 = arith.constant 0.000000e+00 : f32
    %234 = vector.broadcast %cst_194 : f32 to vector<128x128xf32>
    %235 = arith.maximumf %233, %234 : vector<128x128xf32>
    %c128_195 = arith.constant 128 : index
    %c0_196 = arith.constant 0 : index
    %236 = vector.load %arg2[%c128_195, %c0_196] : memref<288x1xf32, #tpu.memory_space<vmem>>, vector<128x1xf32>
    %237 = vector.broadcast %236 : vector<128x1xf32> to vector<128x128xf32>
    %238 = arith.mulf %235, %237 : vector<128x128xf32>
    %c152 = arith.constant 152 : index
    %c0_197 = arith.constant 0 : index
    %239 = vector.load %arg11[%c152, %c0_197] : memref<352x128xf32, #tpu.memory_space<vmem>>, vector<128x128xf32>
    tpu.vector_store %arg11[%c152, %c0_197], %238 {strides = array<i32>} : memref<352x128xf32, #tpu.memory_space<vmem>>, vector<128x128xf32>,
    %c256_198 = arith.constant 256 : index
    %c0_199 = arith.constant 0 : index
    %240 = vector.load %arg10[%c256_198, %c0_199] : memref<288x128xf32, #tpu.memory_space<vmem>>, vector<32x128xf32>
    %241 = vector.broadcast %215 : vector<1x128xf32> to vector<32x128xf32>
    %242 = arith.mulf %240, %241 : vector<32x128xf32>
    %243 = vector.broadcast %217 : vector<1x128xf32> to vector<32x128xf32>
    %244 = arith.addf %242, %243 : vector<32x128xf32>
    %cst_200 = arith.constant 0.000000e+00 : f32
    %245 = vector.broadcast %cst_200 : f32 to vector<32x128xf32>
    %246 = arith.maximumf %244, %245 : vector<32x128xf32>
    %c256_201 = arith.constant 256 : index
    %c0_202 = arith.constant 0 : index
    %247 = vector.load %arg2[%c256_201, %c0_202] : memref<288x1xf32, #tpu.memory_space<vmem>>, vector<32x1xf32>
    %248 = vector.broadcast %247 : vector<32x1xf32> to vector<32x128xf32>
    %249 = arith.mulf %246, %248 : vector<32x128xf32>
    %c280 = arith.constant 280 : index
    %c0_203 = arith.constant 0 : index
    %250 = vector.load %arg11[%c280, %c0_203] : memref<352x128xf32, #tpu.memory_space<vmem>>, vector<32x128xf32>
    tpu.vector_store %arg11[%c280, %c0_203], %249 {strides = array<i32>} : memref<352x128xf32, #tpu.memory_space<vmem>>, vector<32x128xf32>,
    %cst_204 = arith.constant 0.000000e+00 : f32
    %251 = vector.broadcast %cst_204 : f32 to vector<1x128xf32>
    %cst_205 = arith.constant 0.000000e+00 : f32
    %252 = vector.broadcast %cst_205 : f32 to vector<1x128xf32>
    %c5_206 = arith.constant 5 : index
    %c0_207 = arith.constant 0 : index
    %253 = vector.load %arg11[%c5_206, %c0_207] : memref<352x128xf32, #tpu.memory_space<vmem>>, vector<128x128xf32>
    %254 = arith.truncf %253 : vector<128x128xf32> to vector<128x128xbf16>
    %c0_208 = arith.constant 0 : index
    %c0_209 = arith.constant 0 : index
    %c0_210 = arith.constant 0 : index
    %255 = vector.load %arg6[%c0_208, %c0_209, %c0_210] : memref<9x128x128xbf16, #tpu.memory_space<vmem>>, vector<1x128x128xbf16>
    %256 = vector.shape_cast %255 : vector<1x128x128xbf16> to vector<128x128xbf16>
    %cst_211 = arith.constant dense<0.000000e+00> : vector<128x128xf32>
    %257 = tpu.matmul %254, %256, %cst_211 {dimension_numbers = #tpu.dot_dimension_numbers<[1], [0], [0], [1], [0, 0, 1, 1], [], []>} : vector<128x128xbf16>, vector<128x128xbf16>, vector<128x128xf32> -> vector<128x128xf32>
    %c6_212 = arith.constant 6 : index
    %c0_213 = arith.constant 0 : index
    %258 = vector.load %arg11[%c6_212, %c0_213] : memref<352x128xf32, #tpu.memory_space<vmem>>, vector<128x128xf32>
    %259 = arith.truncf %258 : vector<128x128xf32> to vector<128x128xbf16>
    %c1_214 = arith.constant 1 : index
    %c0_215 = arith.constant 0 : index
    %c0_216 = arith.constant 0 : index
    %260 = vector.load %arg6[%c1_214, %c0_215, %c0_216] : memref<9x128x128xbf16, #tpu.memory_space<vmem>>, vector<1x128x128xbf16>
    %261 = vector.shape_cast %260 : vector<1x128x128xbf16> to vector<128x128xbf16>
    %cst_217 = arith.constant dense<0.000000e+00> : vector<128x128xf32>
    %262 = tpu.matmul %259, %261, %cst_217 {dimension_numbers = #tpu.dot_dimension_numbers<[1], [0], [0], [1], [0, 0, 1, 1], [], []>} : vector<128x128xbf16>, vector<128x128xbf16>, vector<128x128xf32> -> vector<128x128xf32>
    %263 = arith.addf %257, %262 : vector<128x128xf32>
    %c7_218 = arith.constant 7 : index
    %c0_219 = arith.constant 0 : index
    %264 = vector.load %arg11[%c7_218, %c0_219] : memref<352x128xf32, #tpu.memory_space<vmem>>, vector<128x128xf32>
    %265 = arith.truncf %264 : vector<128x128xf32> to vector<128x128xbf16>
    %c2_220 = arith.constant 2 : index
    %c0_221 = arith.constant 0 : index
    %c0_222 = arith.constant 0 : index
    %266 = vector.load %arg6[%c2_220, %c0_221, %c0_222] : memref<9x128x128xbf16, #tpu.memory_space<vmem>>, vector<1x128x128xbf16>
    %267 = vector.shape_cast %266 : vector<1x128x128xbf16> to vector<128x128xbf16>
    %cst_223 = arith.constant dense<0.000000e+00> : vector<128x128xf32>
    %268 = tpu.matmul %265, %267, %cst_223 {dimension_numbers = #tpu.dot_dimension_numbers<[1], [0], [0], [1], [0, 0, 1, 1], [], []>} : vector<128x128xbf16>, vector<128x128xbf16>, vector<128x128xf32> -> vector<128x128xf32>
    %269 = arith.addf %263, %268 : vector<128x128xf32>
    %c23 = arith.constant 23 : index
    %c0_224 = arith.constant 0 : index
    %270 = vector.load %arg11[%c23, %c0_224] : memref<352x128xf32, #tpu.memory_space<vmem>>, vector<128x128xf32>
    %271 = arith.truncf %270 : vector<128x128xf32> to vector<128x128xbf16>
    %c3_225 = arith.constant 3 : index
    %c0_226 = arith.constant 0 : index
    %c0_227 = arith.constant 0 : index
    %272 = vector.load %arg6[%c3_225, %c0_226, %c0_227] : memref<9x128x128xbf16, #tpu.memory_space<vmem>>, vector<1x128x128xbf16>
    %273 = vector.shape_cast %272 : vector<1x128x128xbf16> to vector<128x128xbf16>
    %cst_228 = arith.constant dense<0.000000e+00> : vector<128x128xf32>
    %274 = tpu.matmul %271, %273, %cst_228 {dimension_numbers = #tpu.dot_dimension_numbers<[1], [0], [0], [1], [0, 0, 1, 1], [], []>} : vector<128x128xbf16>, vector<128x128xbf16>, vector<128x128xf32> -> vector<128x128xf32>
    %275 = arith.addf %269, %274 : vector<128x128xf32>
    %c24_229 = arith.constant 24 : index
    %c0_230 = arith.constant 0 : index
    %276 = vector.load %arg11[%c24_229, %c0_230] : memref<352x128xf32, #tpu.memory_space<vmem>>, vector<128x128xf32>
    %277 = arith.truncf %276 : vector<128x128xf32> to vector<128x128xbf16>
    %c4_231 = arith.constant 4 : index
    %c0_232 = arith.constant 0 : index
    %c0_233 = arith.constant 0 : index
    %278 = vector.load %arg6[%c4_231, %c0_232, %c0_233] : memref<9x128x128xbf16, #tpu.memory_space<vmem>>, vector<1x128x128xbf16>
    %279 = vector.shape_cast %278 : vector<1x128x128xbf16> to vector<128x128xbf16>
    %cst_234 = arith.constant dense<0.000000e+00> : vector<128x128xf32>
    %280 = tpu.matmul %277, %279, %cst_234 {dimension_numbers = #tpu.dot_dimension_numbers<[1], [0], [0], [1], [0, 0, 1, 1], [], []>} : vector<128x128xbf16>, vector<128x128xbf16>, vector<128x128xf32> -> vector<128x128xf32>
    %281 = arith.addf %275, %280 : vector<128x128xf32>
    %c25 = arith.constant 25 : index
    %c0_235 = arith.constant 0 : index
    %282 = vector.load %arg11[%c25, %c0_235] : memref<352x128xf32, #tpu.memory_space<vmem>>, vector<128x128xf32>
    %283 = arith.truncf %282 : vector<128x128xf32> to vector<128x128xbf16>
    %c5_236 = arith.constant 5 : index
    %c0_237 = arith.constant 0 : index
    %c0_238 = arith.constant 0 : index
    %284 = vector.load %arg6[%c5_236, %c0_237, %c0_238] : memref<9x128x128xbf16, #tpu.memory_space<vmem>>, vector<1x128x128xbf16>
    %285 = vector.shape_cast %284 : vector<1x128x128xbf16> to vector<128x128xbf16>
    %cst_239 = arith.constant dense<0.000000e+00> : vector<128x128xf32>
    %286 = tpu.matmul %283, %285, %cst_239 {dimension_numbers = #tpu.dot_dimension_numbers<[1], [0], [0], [1], [0, 0, 1, 1], [], []>} : vector<128x128xbf16>, vector<128x128xbf16>, vector<128x128xf32> -> vector<128x128xf32>
    %287 = arith.addf %281, %286 : vector<128x128xf32>
    %c41 = arith.constant 41 : index
    %c0_240 = arith.constant 0 : index
    %288 = vector.load %arg11[%c41, %c0_240] : memref<352x128xf32, #tpu.memory_space<vmem>>, vector<128x128xf32>
    %289 = arith.truncf %288 : vector<128x128xf32> to vector<128x128xbf16>
    %c6_241 = arith.constant 6 : index
    %c0_242 = arith.constant 0 : index
    %c0_243 = arith.constant 0 : index
    %290 = vector.load %arg6[%c6_241, %c0_242, %c0_243] : memref<9x128x128xbf16, #tpu.memory_space<vmem>>, vector<1x128x128xbf16>
    %291 = vector.shape_cast %290 : vector<1x128x128xbf16> to vector<128x128xbf16>
    %cst_244 = arith.constant dense<0.000000e+00> : vector<128x128xf32>
    %292 = tpu.matmul %289, %291, %cst_244 {dimension_numbers = #tpu.dot_dimension_numbers<[1], [0], [0], [1], [0, 0, 1, 1], [], []>} : vector<128x128xbf16>, vector<128x128xbf16>, vector<128x128xf32> -> vector<128x128xf32>
    %293 = arith.addf %287, %292 : vector<128x128xf32>
    %c42 = arith.constant 42 : index
    %c0_245 = arith.constant 0 : index
    %294 = vector.load %arg11[%c42, %c0_245] : memref<352x128xf32, #tpu.memory_space<vmem>>, vector<128x128xf32>
    %295 = arith.truncf %294 : vector<128x128xf32> to vector<128x128xbf16>
    %c7_246 = arith.constant 7 : index
    %c0_247 = arith.constant 0 : index
    %c0_248 = arith.constant 0 : index
    %296 = vector.load %arg6[%c7_246, %c0_247, %c0_248] : memref<9x128x128xbf16, #tpu.memory_space<vmem>>, vector<1x128x128xbf16>
    %297 = vector.shape_cast %296 : vector<1x128x128xbf16> to vector<128x128xbf16>
    %cst_249 = arith.constant dense<0.000000e+00> : vector<128x128xf32>
    %298 = tpu.matmul %295, %297, %cst_249 {dimension_numbers = #tpu.dot_dimension_numbers<[1], [0], [0], [1], [0, 0, 1, 1], [], []>} : vector<128x128xbf16>, vector<128x128xbf16>, vector<128x128xf32> -> vector<128x128xf32>
    %299 = arith.addf %293, %298 : vector<128x128xf32>
    %c43 = arith.constant 43 : index
    %c0_250 = arith.constant 0 : index
    %300 = vector.load %arg11[%c43, %c0_250] : memref<352x128xf32, #tpu.memory_space<vmem>>, vector<128x128xf32>
    %301 = arith.truncf %300 : vector<128x128xf32> to vector<128x128xbf16>
    %c8_251 = arith.constant 8 : index
    %c0_252 = arith.constant 0 : index
    %c0_253 = arith.constant 0 : index
    %302 = vector.load %arg6[%c8_251, %c0_252, %c0_253] : memref<9x128x128xbf16, #tpu.memory_space<vmem>>, vector<1x128x128xbf16>
    %303 = vector.shape_cast %302 : vector<1x128x128xbf16> to vector<128x128xbf16>
    %cst_254 = arith.constant dense<0.000000e+00> : vector<128x128xf32>
    %304 = tpu.matmul %301, %303, %cst_254 {dimension_numbers = #tpu.dot_dimension_numbers<[1], [0], [0], [1], [0, 0, 1, 1], [], []>} : vector<128x128xbf16>, vector<128x128xbf16>, vector<128x128xf32> -> vector<128x128xf32>
    %305 = arith.addf %299, %304 : vector<128x128xf32>
    %c0_255 = arith.constant 0 : index
    %c0_256 = arith.constant 0 : index
    %306 = vector.load %arg2[%c0_255, %c0_256] : memref<288x1xf32, #tpu.memory_space<vmem>>, vector<128x1xf32>
    %307 = vector.broadcast %306 : vector<128x1xf32> to vector<128x128xf32>
    %308 = arith.mulf %305, %307 : vector<128x128xf32>
    %cst_257 = arith.constant dense<0.000000e+00> : vector<128xf32>
    %309 = vector.multi_reduction <add>, %308, %cst_257 [0] : vector<128x128xf32> to vector<128xf32>
    %310 = vector.shape_cast %309 : vector<128xf32> to vector<1x128xf32>
    %311 = arith.addf %251, %310 : vector<1x128xf32>
    %312 = arith.mulf %305, %305 : vector<128x128xf32>
    %313 = vector.broadcast %306 : vector<128x1xf32> to vector<128x128xf32>
    %314 = arith.mulf %312, %313 : vector<128x128xf32>
    %cst_258 = arith.constant dense<0.000000e+00> : vector<128xf32>
    %315 = vector.multi_reduction <add>, %314, %cst_258 [0] : vector<128x128xf32> to vector<128xf32>
    %316 = vector.shape_cast %315 : vector<128xf32> to vector<1x128xf32>
    %317 = arith.addf %252, %316 : vector<1x128xf32>
    %c0_259 = arith.constant 0 : index
    %c0_260 = arith.constant 0 : index
    %318 = vector.load %arg10[%c0_259, %c0_260] : memref<288x128xf32, #tpu.memory_space<vmem>>, vector<128x128xf32>
    tpu.vector_store %arg10[%c0_259, %c0_260], %305 {strides = array<i32>} : memref<288x128xf32, #tpu.memory_space<vmem>>, vector<128x128xf32>,
    %c133 = arith.constant 133 : index
    %c0_261 = arith.constant 0 : index
    %319 = vector.load %arg11[%c133, %c0_261] : memref<352x128xf32, #tpu.memory_space<vmem>>, vector<128x128xf32>
    %320 = arith.truncf %319 : vector<128x128xf32> to vector<128x128xbf16>
    %c0_262 = arith.constant 0 : index
    %c0_263 = arith.constant 0 : index
    %c0_264 = arith.constant 0 : index
    %321 = vector.load %arg6[%c0_262, %c0_263, %c0_264] : memref<9x128x128xbf16, #tpu.memory_space<vmem>>, vector<1x128x128xbf16>
    %322 = vector.shape_cast %321 : vector<1x128x128xbf16> to vector<128x128xbf16>
    %cst_265 = arith.constant dense<0.000000e+00> : vector<128x128xf32>
    %323 = tpu.matmul %320, %322, %cst_265 {dimension_numbers = #tpu.dot_dimension_numbers<[1], [0], [0], [1], [0, 0, 1, 1], [], []>} : vector<128x128xbf16>, vector<128x128xbf16>, vector<128x128xf32> -> vector<128x128xf32>
    %c134 = arith.constant 134 : index
    %c0_266 = arith.constant 0 : index
    %324 = vector.load %arg11[%c134, %c0_266] : memref<352x128xf32, #tpu.memory_space<vmem>>, vector<128x128xf32>
    %325 = arith.truncf %324 : vector<128x128xf32> to vector<128x128xbf16>
    %c1_267 = arith.constant 1 : index
    %c0_268 = arith.constant 0 : index
    %c0_269 = arith.constant 0 : index
    %326 = vector.load %arg6[%c1_267, %c0_268, %c0_269] : memref<9x128x128xbf16, #tpu.memory_space<vmem>>, vector<1x128x128xbf16>
    %327 = vector.shape_cast %326 : vector<1x128x128xbf16> to vector<128x128xbf16>
    %cst_270 = arith.constant dense<0.000000e+00> : vector<128x128xf32>
    %328 = tpu.matmul %325, %327, %cst_270 {dimension_numbers = #tpu.dot_dimension_numbers<[1], [0], [0], [1], [0, 0, 1, 1], [], []>} : vector<128x128xbf16>, vector<128x128xbf16>, vector<128x128xf32> -> vector<128x128xf32>
    %329 = arith.addf %323, %328 : vector<128x128xf32>
    %c135 = arith.constant 135 : index
    %c0_271 = arith.constant 0 : index
    %330 = vector.load %arg11[%c135, %c0_271] : memref<352x128xf32, #tpu.memory_space<vmem>>, vector<128x128xf32>
    %331 = arith.truncf %330 : vector<128x128xf32> to vector<128x128xbf16>
    %c2_272 = arith.constant 2 : index
    %c0_273 = arith.constant 0 : index
    %c0_274 = arith.constant 0 : index
    %332 = vector.load %arg6[%c2_272, %c0_273, %c0_274] : memref<9x128x128xbf16, #tpu.memory_space<vmem>>, vector<1x128x128xbf16>
    %333 = vector.shape_cast %332 : vector<1x128x128xbf16> to vector<128x128xbf16>
    %cst_275 = arith.constant dense<0.000000e+00> : vector<128x128xf32>
    %334 = tpu.matmul %331, %333, %cst_275 {dimension_numbers = #tpu.dot_dimension_numbers<[1], [0], [0], [1], [0, 0, 1, 1], [], []>} : vector<128x128xbf16>, vector<128x128xbf16>, vector<128x128xf32> -> vector<128x128xf32>
    %335 = arith.addf %329, %334 : vector<128x128xf32>
    %c151 = arith.constant 151 : index
    %c0_276 = arith.constant 0 : index
    %336 = vector.load %arg11[%c151, %c0_276] : memref<352x128xf32, #tpu.memory_space<vmem>>, vector<128x128xf32>
    %337 = arith.truncf %336 : vector<128x128xf32> to vector<128x128xbf16>
    %c3_277 = arith.constant 3 : index
    %c0_278 = arith.constant 0 : index
    %c0_279 = arith.constant 0 : index
    %338 = vector.load %arg6[%c3_277, %c0_278, %c0_279] : memref<9x128x128xbf16, #tpu.memory_space<vmem>>, vector<1x128x128xbf16>
    %339 = vector.shape_cast %338 : vector<1x128x128xbf16> to vector<128x128xbf16>
    %cst_280 = arith.constant dense<0.000000e+00> : vector<128x128xf32>
    %340 = tpu.matmul %337, %339, %cst_280 {dimension_numbers = #tpu.dot_dimension_numbers<[1], [0], [0], [1], [0, 0, 1, 1], [], []>} : vector<128x128xbf16>, vector<128x128xbf16>, vector<128x128xf32> -> vector<128x128xf32>
    %341 = arith.addf %335, %340 : vector<128x128xf32>
    %c152_281 = arith.constant 152 : index
    %c0_282 = arith.constant 0 : index
    %342 = vector.load %arg11[%c152_281, %c0_282] : memref<352x128xf32, #tpu.memory_space<vmem>>, vector<128x128xf32>
    %343 = arith.truncf %342 : vector<128x128xf32> to vector<128x128xbf16>
    %c4_283 = arith.constant 4 : index
    %c0_284 = arith.constant 0 : index
    %c0_285 = arith.constant 0 : index
    %344 = vector.load %arg6[%c4_283, %c0_284, %c0_285] : memref<9x128x128xbf16, #tpu.memory_space<vmem>>, vector<1x128x128xbf16>
    %345 = vector.shape_cast %344 : vector<1x128x128xbf16> to vector<128x128xbf16>
    %cst_286 = arith.constant dense<0.000000e+00> : vector<128x128xf32>
    %346 = tpu.matmul %343, %345, %cst_286 {dimension_numbers = #tpu.dot_dimension_numbers<[1], [0], [0], [1], [0, 0, 1, 1], [], []>} : vector<128x128xbf16>, vector<128x128xbf16>, vector<128x128xf32> -> vector<128x128xf32>
    %347 = arith.addf %341, %346 : vector<128x128xf32>
    %c153 = arith.constant 153 : index
    %c0_287 = arith.constant 0 : index
    %348 = vector.load %arg11[%c153, %c0_287] : memref<352x128xf32, #tpu.memory_space<vmem>>, vector<128x128xf32>
    %349 = arith.truncf %348 : vector<128x128xf32> to vector<128x128xbf16>
    %c5_288 = arith.constant 5 : index
    %c0_289 = arith.constant 0 : index
    %c0_290 = arith.constant 0 : index
    %350 = vector.load %arg6[%c5_288, %c0_289, %c0_290] : memref<9x128x128xbf16, #tpu.memory_space<vmem>>, vector<1x128x128xbf16>
    %351 = vector.shape_cast %350 : vector<1x128x128xbf16> to vector<128x128xbf16>
    %cst_291 = arith.constant dense<0.000000e+00> : vector<128x128xf32>
    %352 = tpu.matmul %349, %351, %cst_291 {dimension_numbers = #tpu.dot_dimension_numbers<[1], [0], [0], [1], [0, 0, 1, 1], [], []>} : vector<128x128xbf16>, vector<128x128xbf16>, vector<128x128xf32> -> vector<128x128xf32>
    %353 = arith.addf %347, %352 : vector<128x128xf32>
    %c169 = arith.constant 169 : index
    %c0_292 = arith.constant 0 : index
    %354 = vector.load %arg11[%c169, %c0_292] : memref<352x128xf32, #tpu.memory_space<vmem>>, vector<128x128xf32>
    %355 = arith.truncf %354 : vector<128x128xf32> to vector<128x128xbf16>
    %c6_293 = arith.constant 6 : index
    %c0_294 = arith.constant 0 : index
    %c0_295 = arith.constant 0 : index
    %356 = vector.load %arg6[%c6_293, %c0_294, %c0_295] : memref<9x128x128xbf16, #tpu.memory_space<vmem>>, vector<1x128x128xbf16>
    %357 = vector.shape_cast %356 : vector<1x128x128xbf16> to vector<128x128xbf16>
    %cst_296 = arith.constant dense<0.000000e+00> : vector<128x128xf32>
    %358 = tpu.matmul %355, %357, %cst_296 {dimension_numbers = #tpu.dot_dimension_numbers<[1], [0], [0], [1], [0, 0, 1, 1], [], []>} : vector<128x128xbf16>, vector<128x128xbf16>, vector<128x128xf32> -> vector<128x128xf32>
    %359 = arith.addf %353, %358 : vector<128x128xf32>
    %c170 = arith.constant 170 : index
    %c0_297 = arith.constant 0 : index
    %360 = vector.load %arg11[%c170, %c0_297] : memref<352x128xf32, #tpu.memory_space<vmem>>, vector<128x128xf32>
    %361 = arith.truncf %360 : vector<128x128xf32> to vector<128x128xbf16>
    %c7_298 = arith.constant 7 : index
    %c0_299 = arith.constant 0 : index
    %c0_300 = arith.constant 0 : index
    %362 = vector.load %arg6[%c7_298, %c0_299, %c0_300] : memref<9x128x128xbf16, #tpu.memory_space<vmem>>, vector<1x128x128xbf16>
    %363 = vector.shape_cast %362 : vector<1x128x128xbf16> to vector<128x128xbf16>
    %cst_301 = arith.constant dense<0.000000e+00> : vector<128x128xf32>
    %364 = tpu.matmul %361, %363, %cst_301 {dimension_numbers = #tpu.dot_dimension_numbers<[1], [0], [0], [1], [0, 0, 1, 1], [], []>} : vector<128x128xbf16>, vector<128x128xbf16>, vector<128x128xf32> -> vector<128x128xf32>
    %365 = arith.addf %359, %364 : vector<128x128xf32>
    %c171 = arith.constant 171 : index
    %c0_302 = arith.constant 0 : index
    %366 = vector.load %arg11[%c171, %c0_302] : memref<352x128xf32, #tpu.memory_space<vmem>>, vector<128x128xf32>
    %367 = arith.truncf %366 : vector<128x128xf32> to vector<128x128xbf16>
    %c8_303 = arith.constant 8 : index
    %c0_304 = arith.constant 0 : index
    %c0_305 = arith.constant 0 : index
    %368 = vector.load %arg6[%c8_303, %c0_304, %c0_305] : memref<9x128x128xbf16, #tpu.memory_space<vmem>>, vector<1x128x128xbf16>
    %369 = vector.shape_cast %368 : vector<1x128x128xbf16> to vector<128x128xbf16>
    %cst_306 = arith.constant dense<0.000000e+00> : vector<128x128xf32>
    %370 = tpu.matmul %367, %369, %cst_306 {dimension_numbers = #tpu.dot_dimension_numbers<[1], [0], [0], [1], [0, 0, 1, 1], [], []>} : vector<128x128xbf16>, vector<128x128xbf16>, vector<128x128xf32> -> vector<128x128xf32>
    %371 = arith.addf %365, %370 : vector<128x128xf32>
    %c128_307 = arith.constant 128 : index
    %c0_308 = arith.constant 0 : index
    %372 = vector.load %arg2[%c128_307, %c0_308] : memref<288x1xf32, #tpu.memory_space<vmem>>, vector<128x1xf32>
    %373 = vector.broadcast %372 : vector<128x1xf32> to vector<128x128xf32>
    %374 = arith.mulf %371, %373 : vector<128x128xf32>
    %cst_309 = arith.constant dense<0.000000e+00> : vector<128xf32>
    %375 = vector.multi_reduction <add>, %374, %cst_309 [0] : vector<128x128xf32> to vector<128xf32>
    %376 = vector.shape_cast %375 : vector<128xf32> to vector<1x128xf32>
    %377 = arith.addf %311, %376 : vector<1x128xf32>
    %378 = arith.mulf %371, %371 : vector<128x128xf32>
    %379 = vector.broadcast %372 : vector<128x1xf32> to vector<128x128xf32>
    %380 = arith.mulf %378, %379 : vector<128x128xf32>
    %cst_310 = arith.constant dense<0.000000e+00> : vector<128xf32>
    %381 = vector.multi_reduction <add>, %380, %cst_310 [0] : vector<128x128xf32> to vector<128xf32>
    %382 = vector.shape_cast %381 : vector<128xf32> to vector<1x128xf32>
    %383 = arith.addf %317, %382 : vector<1x128xf32>
    %c128_311 = arith.constant 128 : index
    %c0_312 = arith.constant 0 : index
    %384 = vector.load %arg10[%c128_311, %c0_312] : memref<288x128xf32, #tpu.memory_space<vmem>>, vector<128x128xf32>
    tpu.vector_store %arg10[%c128_311, %c0_312], %371 {strides = array<i32>} : memref<288x128xf32, #tpu.memory_space<vmem>>, vector<128x128xf32>,
    %c261 = arith.constant 261 : index
    %c0_313 = arith.constant 0 : index
    %385 = vector.load %arg11[%c261, %c0_313] : memref<352x128xf32, #tpu.memory_space<vmem>>, vector<32x128xf32>
    %386 = arith.truncf %385 : vector<32x128xf32> to vector<32x128xbf16>
    %c0_314 = arith.constant 0 : index
    %c0_315 = arith.constant 0 : index
    %c0_316 = arith.constant 0 : index
    %387 = vector.load %arg6[%c0_314, %c0_315, %c0_316] : memref<9x128x128xbf16, #tpu.memory_space<vmem>>, vector<1x128x128xbf16>
    %388 = vector.shape_cast %387 : vector<1x128x128xbf16> to vector<128x128xbf16>
    %cst_317 = arith.constant dense<0.000000e+00> : vector<32x128xf32>
    %389 = tpu.matmul %386, %388, %cst_317 {dimension_numbers = #tpu.dot_dimension_numbers<[1], [0], [0], [1], [0, 0, 1, 1], [], []>} : vector<32x128xbf16>, vector<128x128xbf16>, vector<32x128xf32> -> vector<32x128xf32>
    %c262 = arith.constant 262 : index
    %c0_318 = arith.constant 0 : index
    %390 = vector.load %arg11[%c262, %c0_318] : memref<352x128xf32, #tpu.memory_space<vmem>>, vector<32x128xf32>
    %391 = arith.truncf %390 : vector<32x128xf32> to vector<32x128xbf16>
    %c1_319 = arith.constant 1 : index
    %c0_320 = arith.constant 0 : index
    %c0_321 = arith.constant 0 : index
    %392 = vector.load %arg6[%c1_319, %c0_320, %c0_321] : memref<9x128x128xbf16, #tpu.memory_space<vmem>>, vector<1x128x128xbf16>
    %393 = vector.shape_cast %392 : vector<1x128x128xbf16> to vector<128x128xbf16>
    %cst_322 = arith.constant dense<0.000000e+00> : vector<32x128xf32>
    %394 = tpu.matmul %391, %393, %cst_322 {dimension_numbers = #tpu.dot_dimension_numbers<[1], [0], [0], [1], [0, 0, 1, 1], [], []>} : vector<32x128xbf16>, vector<128x128xbf16>, vector<32x128xf32> -> vector<32x128xf32>
    %395 = arith.addf %389, %394 : vector<32x128xf32>
    %c263 = arith.constant 263 : index
    %c0_323 = arith.constant 0 : index
    %396 = vector.load %arg11[%c263, %c0_323] : memref<352x128xf32, #tpu.memory_space<vmem>>, vector<32x128xf32>
    %397 = arith.truncf %396 : vector<32x128xf32> to vector<32x128xbf16>
    %c2_324 = arith.constant 2 : index
    %c0_325 = arith.constant 0 : index
    %c0_326 = arith.constant 0 : index
    %398 = vector.load %arg6[%c2_324, %c0_325, %c0_326] : memref<9x128x128xbf16, #tpu.memory_space<vmem>>, vector<1x128x128xbf16>
    %399 = vector.shape_cast %398 : vector<1x128x128xbf16> to vector<128x128xbf16>
    %cst_327 = arith.constant dense<0.000000e+00> : vector<32x128xf32>
    %400 = tpu.matmul %397, %399, %cst_327 {dimension_numbers = #tpu.dot_dimension_numbers<[1], [0], [0], [1], [0, 0, 1, 1], [], []>} : vector<32x128xbf16>, vector<128x128xbf16>, vector<32x128xf32> -> vector<32x128xf32>
    %401 = arith.addf %395, %400 : vector<32x128xf32>
    %c279 = arith.constant 279 : index
    %c0_328 = arith.constant 0 : index
    %402 = vector.load %arg11[%c279, %c0_328] : memref<352x128xf32, #tpu.memory_space<vmem>>, vector<32x128xf32>
    %403 = arith.truncf %402 : vector<32x128xf32> to vector<32x128xbf16>
    %c3_329 = arith.constant 3 : index
    %c0_330 = arith.constant 0 : index
    %c0_331 = arith.constant 0 : index
    %404 = vector.load %arg6[%c3_329, %c0_330, %c0_331] : memref<9x128x128xbf16, #tpu.memory_space<vmem>>, vector<1x128x128xbf16>
    %405 = vector.shape_cast %404 : vector<1x128x128xbf16> to vector<128x128xbf16>
    %cst_332 = arith.constant dense<0.000000e+00> : vector<32x128xf32>
    %406 = tpu.matmul %403, %405, %cst_332 {dimension_numbers = #tpu.dot_dimension_numbers<[1], [0], [0], [1], [0, 0, 1, 1], [], []>} : vector<32x128xbf16>, vector<128x128xbf16>, vector<32x128xf32> -> vector<32x128xf32>
    %407 = arith.addf %401, %406 : vector<32x128xf32>
    %c280_333 = arith.constant 280 : index
    %c0_334 = arith.constant 0 : index
    %408 = vector.load %arg11[%c280_333, %c0_334] : memref<352x128xf32, #tpu.memory_space<vmem>>, vector<32x128xf32>
    %409 = arith.truncf %408 : vector<32x128xf32> to vector<32x128xbf16>
    %c4_335 = arith.constant 4 : index
    %c0_336 = arith.constant 0 : index
    %c0_337 = arith.constant 0 : index
    %410 = vector.load %arg6[%c4_335, %c0_336, %c0_337] : memref<9x128x128xbf16, #tpu.memory_space<vmem>>, vector<1x128x128xbf16>
    %411 = vector.shape_cast %410 : vector<1x128x128xbf16> to vector<128x128xbf16>
    %cst_338 = arith.constant dense<0.000000e+00> : vector<32x128xf32>
    %412 = tpu.matmul %409, %411, %cst_338 {dimension_numbers = #tpu.dot_dimension_numbers<[1], [0], [0], [1], [0, 0, 1, 1], [], []>} : vector<32x128xbf16>, vector<128x128xbf16>, vector<32x128xf32> -> vector<32x128xf32>
    %413 = arith.addf %407, %412 : vector<32x128xf32>
    %c281 = arith.constant 281 : index
    %c0_339 = arith.constant 0 : index
    %414 = vector.load %arg11[%c281, %c0_339] : memref<352x128xf32, #tpu.memory_space<vmem>>, vector<32x128xf32>
    %415 = arith.truncf %414 : vector<32x128xf32> to vector<32x128xbf16>
    %c5_340 = arith.constant 5 : index
    %c0_341 = arith.constant 0 : index
    %c0_342 = arith.constant 0 : index
    %416 = vector.load %arg6[%c5_340, %c0_341, %c0_342] : memref<9x128x128xbf16, #tpu.memory_space<vmem>>, vector<1x128x128xbf16>
    %417 = vector.shape_cast %416 : vector<1x128x128xbf16> to vector<128x128xbf16>
    %cst_343 = arith.constant dense<0.000000e+00> : vector<32x128xf32>
    %418 = tpu.matmul %415, %417, %cst_343 {dimension_numbers = #tpu.dot_dimension_numbers<[1], [0], [0], [1], [0, 0, 1, 1], [], []>} : vector<32x128xbf16>, vector<128x128xbf16>, vector<32x128xf32> -> vector<32x128xf32>
    %419 = arith.addf %413, %418 : vector<32x128xf32>
    %c297 = arith.constant 297 : index
    %c0_344 = arith.constant 0 : index
    %420 = vector.load %arg11[%c297, %c0_344] : memref<352x128xf32, #tpu.memory_space<vmem>>, vector<32x128xf32>
    %421 = arith.truncf %420 : vector<32x128xf32> to vector<32x128xbf16>
    %c6_345 = arith.constant 6 : index
    %c0_346 = arith.constant 0 : index
    %c0_347 = arith.constant 0 : index
    %422 = vector.load %arg6[%c6_345, %c0_346, %c0_347] : memref<9x128x128xbf16, #tpu.memory_space<vmem>>, vector<1x128x128xbf16>
    %423 = vector.shape_cast %422 : vector<1x128x128xbf16> to vector<128x128xbf16>
    %cst_348 = arith.constant dense<0.000000e+00> : vector<32x128xf32>
    %424 = tpu.matmul %421, %423, %cst_348 {dimension_numbers = #tpu.dot_dimension_numbers<[1], [0], [0], [1], [0, 0, 1, 1], [], []>} : vector<32x128xbf16>, vector<128x128xbf16>, vector<32x128xf32> -> vector<32x128xf32>
    %425 = arith.addf %419, %424 : vector<32x128xf32>
    %c298 = arith.constant 298 : index
    %c0_349 = arith.constant 0 : index
    %426 = vector.load %arg11[%c298, %c0_349] : memref<352x128xf32, #tpu.memory_space<vmem>>, vector<32x128xf32>
    %427 = arith.truncf %426 : vector<32x128xf32> to vector<32x128xbf16>
    %c7_350 = arith.constant 7 : index
    %c0_351 = arith.constant 0 : index
    %c0_352 = arith.constant 0 : index
    %428 = vector.load %arg6[%c7_350, %c0_351, %c0_352] : memref<9x128x128xbf16, #tpu.memory_space<vmem>>, vector<1x128x128xbf16>
    %429 = vector.shape_cast %428 : vector<1x128x128xbf16> to vector<128x128xbf16>
    %cst_353 = arith.constant dense<0.000000e+00> : vector<32x128xf32>
    %430 = tpu.matmul %427, %429, %cst_353 {dimension_numbers = #tpu.dot_dimension_numbers<[1], [0], [0], [1], [0, 0, 1, 1], [], []>} : vector<32x128xbf16>, vector<128x128xbf16>, vector<32x128xf32> -> vector<32x128xf32>
    %431 = arith.addf %425, %430 : vector<32x128xf32>
    %c299 = arith.constant 299 : index
    %c0_354 = arith.constant 0 : index
    %432 = vector.load %arg11[%c299, %c0_354] : memref<352x128xf32, #tpu.memory_space<vmem>>, vector<32x128xf32>
    %433 = arith.truncf %432 : vector<32x128xf32> to vector<32x128xbf16>
    %c8_355 = arith.constant 8 : index
    %c0_356 = arith.constant 0 : index
    %c0_357 = arith.constant 0 : index
    %434 = vector.load %arg6[%c8_355, %c0_356, %c0_357] : memref<9x128x128xbf16, #tpu.memory_space<vmem>>, vector<1x128x128xbf16>
    %435 = vector.shape_cast %434 : vector<1x128x128xbf16> to vector<128x128xbf16>
    %cst_358 = arith.constant dense<0.000000e+00> : vector<32x128xf32>
    %436 = tpu.matmul %433, %435, %cst_358 {dimension_numbers = #tpu.dot_dimension_numbers<[1], [0], [0], [1], [0, 0, 1, 1], [], []>} : vector<32x128xbf16>, vector<128x128xbf16>, vector<32x128xf32> -> vector<32x128xf32>
    %437 = arith.addf %431, %436 : vector<32x128xf32>
    %c256_359 = arith.constant 256 : index
    %c0_360 = arith.constant 0 : index
    %438 = vector.load %arg2[%c256_359, %c0_360] : memref<288x1xf32, #tpu.memory_space<vmem>>, vector<32x1xf32>
    %439 = vector.broadcast %438 : vector<32x1xf32> to vector<32x128xf32>
    %440 = arith.mulf %437, %439 : vector<32x128xf32>
    %cst_361 = arith.constant dense<0.000000e+00> : vector<128xf32>
    %441 = vector.multi_reduction <add>, %440, %cst_361 [0] : vector<32x128xf32> to vector<128xf32>
    %442 = vector.shape_cast %441 : vector<128xf32> to vector<1x128xf32>
    %443 = arith.addf %377, %442 : vector<1x128xf32>
    %444 = arith.mulf %437, %437 : vector<32x128xf32>
    %445 = vector.broadcast %438 : vector<32x1xf32> to vector<32x128xf32>
    %446 = arith.mulf %444, %445 : vector<32x128xf32>
    %cst_362 = arith.constant dense<0.000000e+00> : vector<128xf32>
    %447 = vector.multi_reduction <add>, %446, %cst_362 [0] : vector<32x128xf32> to vector<128xf32>
    %448 = vector.shape_cast %447 : vector<128xf32> to vector<1x128xf32>
    %449 = arith.addf %383, %448 : vector<1x128xf32>
    %c256_363 = arith.constant 256 : index
    %c0_364 = arith.constant 0 : index
    %450 = vector.load %arg10[%c256_363, %c0_364] : memref<288x128xf32, #tpu.memory_space<vmem>>, vector<32x128xf32>
    tpu.vector_store %arg10[%c256_363, %c0_364], %437 {strides = array<i32>} : memref<288x128xf32, #tpu.memory_space<vmem>>, vector<32x128xf32>,
    %cst_365 = arith.constant 3.906250e-03 : f32
    %451 = vector.broadcast %cst_365 : f32 to vector<1x128xf32>
    %452 = arith.mulf %443, %451 : vector<1x128xf32>
    %cst_366 = arith.constant 3.906250e-03 : f32
    %453 = vector.broadcast %cst_366 : f32 to vector<1x128xf32>
    %454 = arith.mulf %449, %453 : vector<1x128xf32>
    %455 = arith.mulf %452, %452 : vector<1x128xf32>
    %456 = arith.subf %454, %455 : vector<1x128xf32>
    %cst_367 = arith.constant 0.000000e+00 : f32
    %457 = vector.broadcast %cst_367 : f32 to vector<1x128xf32>
    %458 = arith.maximumf %456, %457 : vector<1x128xf32>
    %c0_368 = arith.constant 0 : index
    %c0_369 = arith.constant 0 : index
    %459 = vector.load %arg7[%c0_368, %c0_369] : memref<1x128xf32, #tpu.memory_space<vmem>>, vector<1x128xf32>
    %c0_370 = arith.constant 0 : index
    %c0_371 = arith.constant 0 : index
    %460 = vector.load %arg8[%c0_370, %c0_371] : memref<1x128xf32, #tpu.memory_space<vmem>>, vector<1x128xf32>
    %cst_372 = arith.constant 9.99999974E-6 : f32
    %461 = vector.broadcast %cst_372 : f32 to vector<1x128xf32>
    %462 = arith.addf %458, %461 : vector<1x128xf32>
    %463 = math.rsqrt %462 : vector<1x128xf32>
    %464 = arith.mulf %459, %463 : vector<1x128xf32>
    %465 = arith.mulf %452, %464 : vector<1x128xf32>
    %466 = arith.subf %460, %465 : vector<1x128xf32>
    %c0_373 = arith.constant 0 : index
    %c0_374 = arith.constant 0 : index
    %467 = vector.load %arg10[%c0_373, %c0_374] : memref<288x128xf32, #tpu.memory_space<vmem>>, vector<128x128xf32>
    %468 = vector.broadcast %464 : vector<1x128xf32> to vector<128x128xf32>
    %469 = arith.mulf %467, %468 : vector<128x128xf32>
    %470 = vector.broadcast %466 : vector<1x128xf32> to vector<128x128xf32>
    %471 = arith.addf %469, %470 : vector<128x128xf32>
    %cst_375 = arith.constant 0.000000e+00 : f32
    %472 = vector.broadcast %cst_375 : f32 to vector<128x128xf32>
    %473 = arith.maximumf %471, %472 : vector<128x128xf32>
    %c0_376 = arith.constant 0 : index
    %c0_377 = arith.constant 0 : index
    %c0_378 = arith.constant 0 : index
    %474 = vector.load %arg9[%c0_376, %c0_377, %c0_378] : memref<1x288x128xf32, #tpu.memory_space<vmem>>, vector<1x128x128xf32>
    %475 = vector.shape_cast %474 : vector<1x128x128xf32> to vector<128x128xf32>
    %476 = vector.shape_cast %473 : vector<128x128xf32> to vector<1x128x128xf32>
    tpu.vector_store %arg9[%c0_376, %c0_377, %c0_378], %476 {strides = array<i32>} : memref<1x288x128xf32, #tpu.memory_space<vmem>>, vector<1x128x128xf32>,
    %c128_379 = arith.constant 128 : index
    %c0_380 = arith.constant 0 : index
    %477 = vector.load %arg10[%c128_379, %c0_380] : memref<288x128xf32, #tpu.memory_space<vmem>>, vector<128x128xf32>
    %478 = vector.broadcast %464 : vector<1x128xf32> to vector<128x128xf32>
    %479 = arith.mulf %477, %478 : vector<128x128xf32>
    %480 = vector.broadcast %466 : vector<1x128xf32> to vector<128x128xf32>
    %481 = arith.addf %479, %480 : vector<128x128xf32>
    %cst_381 = arith.constant 0.000000e+00 : f32
    %482 = vector.broadcast %cst_381 : f32 to vector<128x128xf32>
    %483 = arith.maximumf %481, %482 : vector<128x128xf32>
    %c0_382 = arith.constant 0 : index
    %c128_383 = arith.constant 128 : index
    %c0_384 = arith.constant 0 : index
    %484 = vector.load %arg9[%c0_382, %c128_383, %c0_384] : memref<1x288x128xf32, #tpu.memory_space<vmem>>, vector<1x128x128xf32>
    %485 = vector.shape_cast %484 : vector<1x128x128xf32> to vector<128x128xf32>
    %486 = vector.shape_cast %483 : vector<128x128xf32> to vector<1x128x128xf32>
    tpu.vector_store %arg9[%c0_382, %c128_383, %c0_384], %486 {strides = array<i32>} : memref<1x288x128xf32, #tpu.memory_space<vmem>>, vector<1x128x128xf32>,
    %c256_385 = arith.constant 256 : index
    %c0_386 = arith.constant 0 : index
    %487 = vector.load %arg10[%c256_385, %c0_386] : memref<288x128xf32, #tpu.memory_space<vmem>>, vector<32x128xf32>
    %488 = vector.broadcast %464 : vector<1x128xf32> to vector<32x128xf32>
    %489 = arith.mulf %487, %488 : vector<32x128xf32>
    %490 = vector.broadcast %466 : vector<1x128xf32> to vector<32x128xf32>
    %491 = arith.addf %489, %490 : vector<32x128xf32>
    %cst_387 = arith.constant 0.000000e+00 : f32
    %492 = vector.broadcast %cst_387 : f32 to vector<32x128xf32>
    %493 = arith.maximumf %491, %492 : vector<32x128xf32>
    %c0_388 = arith.constant 0 : index
    %c256_389 = arith.constant 256 : index
    %c0_390 = arith.constant 0 : index
    %494 = vector.load %arg9[%c0_388, %c256_389, %c0_390] : memref<1x288x128xf32, #tpu.memory_space<vmem>>, vector<1x32x128xf32>
    %495 = vector.shape_cast %494 : vector<1x32x128xf32> to vector<32x128xf32>
    %496 = vector.shape_cast %493 : vector<32x128xf32> to vector<1x32x128xf32>
    tpu.vector_store %arg9[%c0_388, %c256_389, %c0_390], %496 {strides = array<i32>} : memref<1x288x128xf32, #tpu.memory_space<vmem>>, vector<1x32x128xf32>,
    return
  }
  func.func @transform_0(%arg0: i32) -> (i32, i32, i32) {
    %c0_i32 = arith.constant 0 : i32
    %c0_i32_0 = arith.constant 0 : i32
    %c0_i32_1 = arith.constant 0 : i32
    return %arg0, %c0_i32, %c0_i32_0 : i32, i32, i32
  }
  func.func @transform_1(%arg0: i32) -> (i32, i32) {
    %c0_i32 = arith.constant 0 : i32
    %c0_i32_0 = arith.constant 0 : i32
    %c0_i32_1 = arith.constant 0 : i32
    return %c0_i32, %c0_i32_0 : i32, i32
  }
  func.func @transform_2(%arg0: i32) -> (i32, i32, i32) {
    %c0_i32 = arith.constant 0 : i32
    %c0_i32_0 = arith.constant 0 : i32
    %c0_i32_1 = arith.constant 0 : i32
    %c0_i32_2 = arith.constant 0 : i32
    return %c0_i32, %c0_i32_0, %c0_i32_1 : i32, i32, i32
  }
  func.func @transform_3(%arg0: i32) -> (i32, i32) {
    %c0_i32 = arith.constant 0 : i32
    %c0_i32_0 = arith.constant 0 : i32
    %c0_i32_1 = arith.constant 0 : i32
    return %c0_i32, %c0_i32_0 : i32, i32
  }
  func.func @transform_4(%arg0: i32) -> (i32, i32) {
    %c0_i32 = arith.constant 0 : i32
    %c0_i32_0 = arith.constant 0 : i32
    %c0_i32_1 = arith.constant 0 : i32
    return %c0_i32, %c0_i32_0 : i32, i32
  }
  func.func @transform_5(%arg0: i32) -> (i32, i32, i32) {
    %c0_i32 = arith.constant 0 : i32
    %c0_i32_0 = arith.constant 0 : i32
    %c0_i32_1 = arith.constant 0 : i32
    %c0_i32_2 = arith.constant 0 : i32
    return %c0_i32, %c0_i32_0, %c0_i32_1 : i32, i32, i32
  }
  func.func @transform_6(%arg0: i32) -> (i32, i32) {
    %c0_i32 = arith.constant 0 : i32
    %c0_i32_0 = arith.constant 0 : i32
    %c0_i32_1 = arith.constant 0 : i32
    return %c0_i32, %c0_i32_0 : i32, i32
  }
  func.func @transform_7(%arg0: i32) -> (i32, i32) {
    %c0_i32 = arith.constant 0 : i32
    %c0_i32_0 = arith.constant 0 : i32
    %c0_i32_1 = arith.constant 0 : i32
    return %c0_i32, %c0_i32_0 : i32, i32
  }
  func.func @transform_8(%arg0: i32) -> (i32, i32, i32) {
    %c0_i32 = arith.constant 0 : i32
    %c0_i32_0 = arith.constant 0 : i32
    %c0_i32_1 = arith.constant 0 : i32
    return %arg0, %c0_i32, %c0_i32_0 : i32, i32, i32
  }
}

</mosaic_0001>

<bundles_post_ra>
// kernel: double_conv.1
= control target key start
LH: loop header
LB: loop body
LE: loop exit
PB: predicated region body
PF: predicated region fallthrough
CT: control target
= control target key end

     0   :  { %s16923_s27 = smov 0   ;;  %s20649_s0 = inlined_call_operand.vmem [shape: bf16[2,344,128], index: 0, kind: input, shape index: {}]   ;;  %s20650_s1 = inlined_call_operand.vmem [shape: f32[288,1], index: 1, kind: input, shape index: {}]   ;;  %s20651_s2 = inlined_call_operand.vmem [shape: bf16[9,128,128], index: 2, kind: input, shape index: {}]   ;;  %s20652_s3 = inlined_call_operand.vmem [shape: f32[1,128], index: 3, kind: input, shape index: {}]   ;;  %s20653_s4 = inlined_call_operand.vmem [shape: f32[1,128], index: 4, kind: input, shape index: {}]   ;;  %s20654_s5 = inlined_call_operand.vmem [shape: bf16[9,128,128], index: 5, kind: input, shape index: {}]   ;;  %s20655_s6 = inlined_call_operand.vmem [shape: f32[1,128], index: 6, kind: input, shape index: {}]   ;;  %s20656_s7 = inlined_call_operand.vmem [shape: f32[1,128], index: 7, kind: input, shape index: {}]   ;;  %s20657_s8 = inlined_call_operand.vmem [shape: f32[2,288,128], index: 8, kind: output, shape index: {}]  }
   0x1 LB: > { %s12203_s28 = sadd.s32 4294967295, %s16874_s27   ;;  %p12207_p0 = scmp.ge.s32.totalorder %s16874_s27, 1  ;;  %s16874_s27 = sphi %s16923_s27, %s18_s27  }
   0x2   : > { %p262_p1 = scmp.lt.s32.totalorder %s16874_s27, 3 }
   0x4   : > { %p263_p2 = pnand %p12207_p0, %p262_p1 }
   0x6   : > { %266 = sbr.rel (%p263_p2) target bundleno = 1731 (0x6c3), region = 52 }
   0xd   : > { %v16348_v0 = vld [vmem:[%s20651_s2 + $0x40] sm:$0xff]   ;;  %p296_p3 = scmp.lt.s32.totalorder %s12203_s28, 1  ;;  %v16350_v2 = vld [vmem:[%s20651_s2 + $0x48] sm:$0xff]   ;;  %v16352_v4 = vld [vmem:[%s20651_s2 + $0x50] sm:$0xff]   ;;  %vm444_vm0 = vsmask.f32 7424 }
   0xe   : > { %v16349_v1 = vld [vmem:[%s20651_s2 + $0x40] sm:$0xff]   ;;  %14246 = vmatprep.subr.bf16.mxu0 %v16348_v0  ;;  %v16351_v3 = vld [vmem:[%s20651_s2 + $0x48] sm:$0xff]   ;;  %v16353_v5 = vld [vmem:[%s20651_s2 + $0x50] sm:$0xff]   ;;  %vm840_vm1 = vcmask 1046528   ;;  %vm1582_vm2 = vcmask 1045504   ;;  %vm2324_vm4 = vcmask 1044480  }
   0xf   : > { %14534 = vmatprep.subr.bf16.mxu1 %v16349_v1  ;;  %14247 = vmatpush3.bf16.msra.mxu0 %v16348_v0  ;;  %s20757_s28 = smov (!%p296_p3, %s12203_s28), 1  ;;  %v16354_v6 = vld [vmem:[%s20651_s2 + $0x58] sm:$0xff]   ;;  %v16356_v8 = vld [vmem:[%s20651_s2 + $0x60] sm:$0xff]   ;;  %v16358_v10 = vld [vmem:[%s20651_s2 + $0x68] sm:$0xff]   ;;  %vm1311_vm3 = vsmask.f32 6400 }
  0x10   : > { %14535 = vmatpush3.bf16.msra.mxu1 %v16349_v1  ;;  %14248 = vmatprep.subr.bf16.mxu0 %v16350_v2  ;;  %v16355_v7 = vld [vmem:[%s20651_s2 + $0x58] sm:$0xff]   ;;  %s16334_s23 = smul.u32 172, %s20757_s28  ;;  %v16357_v9 = vld [vmem:[%s20651_s2 + $0x60] sm:$0xff]   ;;  %v16359_v11 = vld [vmem:[%s20651_s2 + $0x68] sm:$0xff]   ;;  %vm2053_vm5 = vsmask.f32 5376 }
  0x11   : > { %14536 = vmatprep.subr.bf16.mxu1 %v16351_v3  ;;  %v16360_v17 = vld [vmem:[%s20651_s2 + $0x70] sm:$0xff]   ;;  %v16362_v31 = vld [vmem:[%s20651_s2 + $0x78] sm:$0xff]   ;;  %v16369_v44 = vld [vmem:[%s20651_s2] sm:$0xff]   ;;  %s16335_s26 = smul.u32 288, %s20757_s28 }
  0x12   : > { %s16967_s10 = scalar_lea.vmem %s20649_s0, %s16334_s23  ;;  %v16361_v25 = vld [vmem:[%s20651_s2 + $0x70] sm:$0xff]   ;;  %v16363_v40 = vld [vmem:[%s20651_s2 + $0x78] sm:$0xff]   ;;  %v16371_v48 = vld [vmem:[%s20651_s2] sm:$0xff]  }
  0x13   : > { %14249 = vmatpush3.bf16.msra.mxu0 %v16350_v2  ;;  %v351_v12 = vld [vmem:[%s16967_s10] sm:$0xf]  ;;  %v16977_v13 = vld [vmem:[%s16967_s10 + $0x4] sm:$0xf]  ;;  %v16983_v15 = vld [vmem:[%s16967_s10 + $0x8] sm:$0xff]   ;;  %s20550_s30 = scalar_lea.vmem %s20657_s8, %s16335_s26 }
  0x14   : > { %14537 = vmatpush3.bf16.msra.mxu1 %v16351_v3  ;;  %14250 = vmatprep.subr.bf16.mxu0 %v16352_v4  ;;  %v16980_v14 = vcombine.low %v351_v12, %v16977_v13  ;;  %v16986_v16 = vld [vmem:[%s16967_s10 + $0x48] sm:$0xff]   ;;  %v2715_v18 = vld [vmem:[%s16967_s10 + $0x40] sm:$0xf]  ;;  %v16993_v19 = vld [vmem:[%s16967_s10 + $0x44] sm:$0xf]  ;;  %v453_v22 = vshll.u32 %v16983_v15, 16 }
  0x15   : > { %14538 = vmatprep.subr.bf16.mxu1 %v16353_v5  ;;  %v16999_v23 = vcombine.low %v2715_v18, %v16993_v19  ;;  %v17002_v24 = vld [vmem:[%s16967_s10 + $0x10] sm:$0xff]   ;;  %v2815_v26 = vshll.u32 %v16986_v16, 16  ;;  %v457_v32 = vshrl.u32 %v16983_v15, 16  ;;  %v2819_v38 = vshrl.u32 %v16986_v16, 16  ;;  %v17034_v52 = vld [vmem:[%s16967_s10 + $0x18] sm:$0xff]   ;;  %v16372_v54 = vld [vmem:[%s20651_s2 + $0x8] sm:$0xff]  }
  0x16   : > { %v446_v20 = vshrl.u32 %v16980_v14, 16  ;;  %v448_v21 = vshll.u32 %v16980_v14, 16  ;;  %v455_v28 = vrot.slane %v453_v22, 1  ;;  %v461_v33 = vshll.u32 %v17002_v24, 16  ;;  %v17016_v34 = vld [vmem:[%s16967_s10 + $0x50] sm:$0xff]   ;;  %v17037_v53 = vld [vmem:[%s16967_s10 + $0x58] sm:$0xff]  }
  0x17   : > { %14251 = vmatpush3.bf16.msra.mxu0 %v16352_v4  ;;  %v2808_v29 = vshrl.u32 %v16999_v23, 16  ;;  %v2810_v30 = vshll.u32 %v16999_v23, 16  ;;  %v2817_v37 = vrot.slane %v2815_v26, 1  ;;  %v2823_v39 = vshll.u32 %v17016_v34, 16  ;;  %v17044_v57 = vld [vmem:[%s16967_s10 + $0x20] sm:$0xff]   ;;  %v16373_v0 = vld [vmem:[%s20651_s2 + $0x8] sm:$0xff]  }
  0x18   : > { %14539 = vmatpush3.bf16.msra.mxu1 %v16353_v5  ;;  %14252 = vmatprep.subr.bf16.mxu0 %v16354_v6  ;;  %v450_v27 = vrot.slane %v448_v21, 1  ;;  %v463_v43 = vrot.slane %v461_v33, 1  ;;  %v465_v45 = vshrl.u32 %v17002_v24, 16  ;;  %v459_v47 = vor.u32 %v457_v32, %v455_v28  ;;  %v17050_v62 = vld [vmem:[%s16967_s10 + $0x60] sm:$0xff]   ;;  %v16379_v12 = vld [vmem:[%s20651_s2 + $0x10] sm:$0xff]   ;;  %v17068_v18 = vld [vmem:[%s16967_s10 + $0x28] sm:$0xff]  }
  0x19   : > { %14540 = vmatprep.subr.bf16.mxu1 %v16355_v7  ;;  %v2812_v36 = vrot.slane %v2810_v30, 1  ;;  %v2827_v49 = vshrl.u32 %v17016_v34, 16  ;;  %v2821_v50 = vor.u32 %v2819_v38, %v2817_v37  ;;  %v2825_v51 = vrot.slane %v2823_v39, 1  ;;  %v17072_v21 = vld [vmem:[%s16967_s10 + $0x68] sm:$0xff]   ;;  %v17091_v38 = vld [vmem:[%s16967_s10 + $0x70] sm:$0xff]  }
  0x1a   : > { %v451_v35 = vor.u32 %v450_v27, %v446_v20  ;;  %v467_v55 = vor.u32 %v465_v45, %v463_v43  ;;  %v469_v56 = vshll.u32 %v17034_v52, 16  ;;  %v473_v58 = vshrl.u32 %v17034_v52, 16 }
  0x1b   : > { %14253 = vmatpush3.bf16.msra.mxu0 %v16354_v6  ;;  %v2813_v42 = vor.u32 %v2812_v36, %v2808_v29  ;;  %v464_v59 = vsel %vm444_vm0, %v459_v47, %v463_v43  ;;  %v2829_v60 = vor.u32 %v2827_v49, %v2825_v51  ;;  %v2831_v61 = vshll.u32 %v17037_v53, 16  ;;  %v16385_v43 = vld [vmem:[%s20651_s2 + $0x20] sm:$0xff]  }
  0x1c   : > { %14541 = vmatpush3.bf16.msra.mxu1 %v16355_v7  ;;  %14254 = vmatprep.subr.bf16.mxu0 %v16356_v8  ;;  %v456_v41 = vsel %vm444_vm0, %v451_v35, %v455_v28  ;;  %v2826_v63 = vsel %vm444_vm0, %v2821_v50, %v2825_v51  ;;  %v471_v1 = vrot.slane %v469_v56, 1  ;;  %v477_v2 = vshll.u32 %v17044_v57, 16  ;;  %v16377_v7 = vld [vmem:[%s20651_s2 + $0x10] sm:$0xff]   ;;  %v16381_v35 = vld [vmem:[%s20651_s2 + $0x18] sm:$0xff]   ;;  %v16387_v50 = vld [vmem:[%s20651_s2 + $0x20] sm:$0xff]  }
  0x1d   : > { %14542 = vmatprep.subr.bf16.mxu1 %v16357_v9  ;;  %14262 = vmatprep.mubr.bf16.mxu0 %v456_v41  ;;  %v2818_v46 = vsel %vm444_vm0, %v2813_v42, %v2817_v37  ;;  %v2835_v3 = vshrl.u32 %v17037_v53, 16  ;;  %v2833_v4 = vrot.slane %v2831_v61, 1  ;;  %v2839_v5 = vshll.u32 %v17050_v62, 16  ;;  %v17080_v28 = vld [vmem:[%s16967_s10 + $0x30] sm:$0xff]   ;;  %v17105_v51 = vld [vmem:[%s16967_s10 + $0x38] sm:$0xff]  }
  0x1e   : > { %14550 = vmatprep.mubr.bf16.mxu1 %v2818_v46  ;;  %v472_v6 = vsel %vm444_vm0, %v467_v55, %v471_v1  ;;  %v481_v20 = vshrl.u32 %v17044_v57, 16  ;;  %v2843_v22 = vshrl.u32 %v17050_v62, 16  ;;  %v485_v27 = vshll.u32 %v17068_v18, 16  ;;  %v16388_v55 = vld [vmem:[%s20651_s2 + $0x28] sm:$0xff]   ;;  %v17112_v56 = vld [vmem:[%s16967_s10 + $0x78] sm:$0xff]  }
  0x1f   : > { %14255 = vmatpush3.bf16.msra.mxu0 %v16356_v8  ;;  %v2834_v8 = vsel %vm444_vm0, %v2829_v60, %v2833_v4  ;;  %v489_v32 = vshrl.u32 %v17068_v18, 16  ;;  %v493_v37 = vshll.u32 %v17080_v28, 16  ;;  %v842_v45 = vrot.slane %v16983_v15, 1  ;;  %v16389_v60 = vld [vmem:[%s20651_s2 + $0x28] sm:$0xff]  }
  0x20   : > { %14543 = vmatpush3.bf16.msra.mxu1 %v16357_v9  ;;  %14256 = vmatprep.subr.bf16.mxu0 %v16358_v10  ;;  %v475_v9 = vor.u32 %v473_v58, %v471_v1  ;;  %v487_v36 = vrot.slane %v485_v27, 1  ;;  %v2859_v58 = vshrl.u32 %v17091_v38, 16  ;;  %v505_v1 = vshrl.u32 %v17105_v51, 16  ;;  %v16395_v27 = vld [vmem:[%s20651_s2 + $0x30] sm:$0xff]  }
  0x21   : > { %14544 = vmatprep.subr.bf16.mxu1 %v16359_v11  ;;  %v495_v42 = vrot.slane %v493_v37, 1  ;;  %v846_v37 = vrot.slane %v17034_v52, 1 }
  0x22   : > { %v491_v47 = vor.u32 %v489_v32, %v487_v36 }
  0x23   : > { %14257 = vmatpush3.bf16.msra.mxu0 %v16358_v10  ;;  %v479_v10 = vrot.slane %v477_v2, 1 }
  0x24   : > { %14545 = vmatpush3.bf16.msra.mxu1 %v16359_v11  ;;  %14258 = vmatprep.subr.bf16.mxu0 %v16360_v17  ;;  %v2841_v11 = vrot.slane %v2839_v5, 1  ;;  %v2867_v5 = vshrl.u32 %v17112_v56, 16 }
  0x25   : > { %14546 = vmatprep.subr.bf16.mxu1 %v16361_v25  ;;  %v483_v26 = vor.u32 %v481_v20, %v479_v10  ;;  %v480_v29 = vsel %vm444_vm0, %v475_v9, %v479_v10  ;;  %v17129_v9 = vld [vmem:[%s16967_s10 + $0x80] ss:$0 sps:$4 sm:$0x11]  }
  0x26   : > { %v2845_v30 = vor.u32 %v2843_v22, %v2841_v11  ;;  %v16393_v22 = vld [vmem:[%s20651_s2 + $0x30] sm:$0xff]  }
  0x27   : > { %14259 = vmatpush3.bf16.msra.mxu0 %v16360_v17  ;;  %v2837_v17 = vor.u32 %v2835_v3, %v2833_v4  ;;  %v488_v41 = vsel %vm444_vm0, %v483_v26, %v487_v36  ;;  %v2863_v4 = vshll.u32 %v17112_v56, 16  ;;  %v2871_v26 = vshll.u32 %v17129_v9, 16  ;;  %v16396_v36 = vld [vmem:[%s20651_s2 + $0x38] sm:$0xff]  }
  0x28   : > { %14547 = vmatpush3.bf16.msra.mxu1 %v16361_v25  ;;  %14260 = vmatprep.subr.bf16.mxu0 %v16362_v31  ;;  %v16380_v25 = vld [vmem:[%s20651_s2 + $0x18] sm:$0xff]  }
  0x29   : > { %14548 = vmatprep.subr.bf16.mxu1 %v16363_v40  ;;  %v2842_v33 = vsel %vm444_vm0, %v2837_v17, %v2841_v11  ;;  %v3202_v17 = vrot.slane %v16986_v16, 1 }
  0x2b   : > { %14261 = vmatpush3.bf16.msra.mxu0 %v16362_v31  ;;  %v2847_v31 = vshll.u32 %v17072_v21, 16 }
  0x2c   : > { %14549 = vmatpush3.bf16.msra.mxu1 %v16363_v40  ;;  %14278 = vmatprep.subr.bf16.mxu0 %v16369_v44  ;;  %v2851_v40 = vshrl.u32 %v17072_v21, 16 }
  0x2d   : > { %14566 = vmatprep.subr.bf16.mxu1 %v16371_v48  ;;  %v2849_v39 = vrot.slane %v2847_v31, 1 }
  0x2e   : > { %14263 = vmatmul.mubr.bf16.vlgmr.msra.gmra.mrb[0].mxu0 %v464_v59  ;;  %v496_v59 = vsel %vm444_vm0, %v491_v47, %v495_v42  ;;  %v16398_v47 = vld [vmem:[%s20651_s2 + $0x80] sm:$0xff]  }
  0x2f   : > { %14551 = vmatmul.mubr.bf16.vlgmr.msra.gmra.mrb[0].mxu1 %v2826_v63  ;;  %14279 = vmatpush3.bf16.msra.mxu0 %v16369_v44  ;;  %v2855_v44 = vshll.u32 %v17091_v38, 16  ;;  %v2850_v46 = vsel %vm444_vm0, %v2845_v30, %v2849_v39  ;;  %v501_v63 = vshll.u32 %v17105_v51, 16  ;;  %v2873_v30 = vrot.slane %v2871_v26, 1 }
  0x30   : > { %14567 = vmatpush3.bf16.msra.mxu1 %v16371_v48  ;;  %14280 = vmatprep.subr.bf16.mxu0 %v16372_v54  ;;  %v2853_v48 = vor.u32 %v2851_v40, %v2849_v39  ;;  %v16397_v39 = vld [vmem:[%s20651_s2 + $0x38] sm:$0xff]  }
  0x31   : > { %14568 = vmatprep.subr.bf16.mxu1 %v16373_v0  ;;  %14266 = vmatprep.mubr.bf16.mxu0 %v472_v6  ;;  %v2857_v49 = vrot.slane %v2855_v44, 1  ;;  %v503_v6 = vrot.slane %v501_v63, 1 }
  0x32   : > { %14554 = vmatprep.mubr.bf16.mxu1 %v2834_v8  ;;  %v2865_v8 = vrot.slane %v2863_v4, 1 }
  0x33   : > { %14281 = vmatpush3.bf16.msra.mxu0 %v16372_v54  ;;  %v497_v54 = vshrl.u32 %v17080_v28, 16  ;;  %v2858_v2 = vsel %vm444_vm0, %v2853_v48, %v2857_v49  ;;  %v2861_v3 = vor.u32 %v2859_v58, %v2857_v49  ;;  %v507_v11 = vor.u32 %v505_v1, %v503_v6  ;;  %v16401_v1 = vld [vmem:[%s20651_s2 + $0x88] sm:$0xff]  }
  0x34   : > { %14569 = vmatpush3.bf16.msra.mxu1 %v16373_v0  ;;  %14282 = vmatprep.subr.bf16.mxu0 %v16377_v7  ;;  %v17121_v0 = vld [vmem:[%s16967_s10 + $0x40] ss:$0 sps:$4 sm:$0x11]   ;;  %v850_v49 = vrot.slane %v17068_v18, 1 }
  0x35   : > { %14570 = vmatprep.subr.bf16.mxu1 %v16379_v12  ;;  %v499_v61 = vor.u32 %v497_v54, %v495_v42  ;;  %v2866_v20 = vsel %vm444_vm0, %v2861_v3, %v2865_v8  ;;  %v3214_v3 = vrot.slane %v17112_v56, 1 }
  0x36   : > { %14267 = vmatmul.mubr.bf16.gmra.mrb[4].mxu0 %v480_v29  ;;  %v844_v29 = vrot.slane %v17002_v24, 1 }
  0x37   : > { %14555 = vmatmul.mubr.bf16.gmra.mrb[4].mxu1 %v2842_v33  ;;  %14283 = vmatpush3.bf16.msra.mxu0 %v16377_v7  ;;  %v509_v7 = vshll.u32 %v17121_v0, 16  ;;  %v504_v10 = vsel %vm444_vm0, %v499_v61, %v503_v6  ;;  %v3204_v33 = vrot.slane %v17016_v34, 1  ;;  %v16400_v61 = vld [vmem:[%s20651_s2 + $0x88] sm:$0xff]  }
  0x38   : > { %14571 = vmatpush3.bf16.msra.mxu1 %v16379_v12  ;;  %14284 = vmatprep.subr.bf16.mxu0 %v16380_v25  ;;  %v17146_v32 = vsel %vm840_vm1, %v842_v45, %v844_v29  ;;  %v17164_v42 = vsel %vm840_vm1, %v844_v29, %v846_v37  ;;  %v16423_v29 = vld [vmem:[%s20651_s2 + $0xd8] sm:$0xff]  }
  0x39   : > { %14572 = vmatprep.subr.bf16.mxu1 %v16381_v35  ;;  %14270 = vmatprep.mubr.bf16.mxu0 %v488_v41  ;;  %v511_v12 = vrot.slane %v509_v7, 1  ;;  %v17160_v40 = vsel %vm840_vm1, %v3202_v17, %v3204_v33  ;;  %v3206_v41 = vrot.slane %v17037_v53, 1  ;;  %v3216_v7 = vrot.slane %v17129_v9, 1 }
  0x3a   : > { %14558 = vmatprep.mubr.bf16.mxu1 %v2850_v46  ;;  %v3208_v46 = vrot.slane %v17050_v62, 1 }
  0x3b   : > { %14285 = vmatpush3.bf16.msra.mxu0 %v16380_v25  ;;  %v2869_v25 = vor.u32 %v2867_v5, %v2865_v8  ;;  %v512_v31 = vsel %vm444_vm0, %v507_v11, %v511_v12  ;;  %v17168_v44 = vsel %vm840_vm1, %v3204_v33, %v3206_v41  ;;  %v856_v5 = vrot.slane %v17121_v0, 1  ;;  %v16402_v8 = vld [vmem:[%s20651_s2 + $0x90] sm:$0xff]   ;;  %v819_v11 = vld [vmem:[%s16967_s10] sm:$0xe]  ;;  %v17322_v33 = vld [vmem:[%s16967_s10 + $0xc] sm:$0xf] }
  0x3c   : > { %14573 = vmatpush3.bf16.msra.mxu1 %v16381_v35  ;;  %14286 = vmatprep.subr.bf16.mxu0 %v16385_v43  ;;  %v17183_v54 = vsel %vm840_vm1, %v3206_v41, %v3208_v46  ;;  %v16403_v0 = vld [vmem:[%s20651_s2 + $0x90] sm:$0xff]   ;;  %v3181_v12 = vld [vmem:[%s16967_s10 + $0x40] sm:$0xe]  ;;  %v17232_v9 = vsel %vm840_vm1, %v3214_v3, %v3216_v7 }
  0x3d   : > { %14574 = vmatprep.subr.bf16.mxu1 %v16387_v50  ;;  %v2874_v35 = vsel %vm444_vm0, %v2869_v25, %v2873_v30  ;;  %v16424_v30 = vld [vmem:[%s20651_s2 + $0xe0] sm:$0xff]   ;;  %v17339_v41 = vld [vmem:[%s16967_s10 + $0x10] sm:$0xff]  }
  0x3e   : > { %14271 = vmatmul.mubr.bf16.gmra.mrb[8].mxu0 %v496_v59  ;;  %v852_v59 = vrot.slane %v17080_v28, 1 }
  0x3f   : > { %14559 = vmatmul.mubr.bf16.gmra.mrb[8].mxu1 %v2858_v2  ;;  %14287 = vmatpush3.bf16.msra.mxu0 %v16385_v43  ;;  %v848_v43 = vrot.slane %v17044_v57, 1 }
  0x40   : > { %14575 = vmatpush3.bf16.msra.mxu1 %v16387_v50  ;;  %14288 = vmatprep.subr.bf16.mxu0 %v16388_v55  ;;  %v16399_v50 = vld [vmem:[%s20651_s2 + $0x80] sm:$0xff]   ;;  %v17199_v63 = vsel %vm840_vm1, %v850_v49, %v852_v59 }
  0x41   : > { %14576 = vmatprep.subr.bf16.mxu1 %v16389_v60  ;;  %14274 = vmatprep.mubr.bf16.mxu0 %v504_v10  ;;  %v17175_v48 = vsel %vm840_vm1, %v846_v37, %v848_v43  ;;  %v17188_v58 = vsel %vm840_vm1, %v848_v43, %v850_v49  ;;  %v17330_v37 = vld [vmem:[%s16967_s10 + $0x4c] sm:$0xf]  ;;  %v17347_v43 = vld [vmem:[%s16967_s10 + $0x50] sm:$0xff]  }
  0x42   : > { %14562 = vmatprep.mubr.bf16.mxu1 %v2866_v20  ;;  %v12267_v20 = vcombine.low %v819_v11, %v16977_v13 }
  0x43   : > { %14289 = vmatpush3.bf16.msra.mxu0 %v16388_v55  ;;  %v3210_v55 = vrot.slane %v17072_v21, 1 }
  0x44   : > { %14577 = vmatpush3.bf16.msra.mxu1 %v16389_v60  ;;  %14290 = vmatprep.subr.bf16.mxu0 %v16393_v22  ;;  %v841_v25 = vrot.slane %v12267_v20, 1  ;;  %v17410_v20 = vld [vmem:[%s16967_s10 + $0x30] sm:$0xff]  }
  0x45   : > { %14578 = vmatprep.subr.bf16.mxu1 %v16395_v27  ;;  %v17192_v60 = vsel %vm840_vm1, %v3208_v46, %v3210_v55  ;;  %v16429_v46 = vld [vmem:[%s20651_s2 + $0xf0] sm:$0xff]  }
  0x46   : > { %14275 = vmatmul.mubr.bf16.gmra.mrb[12].mxu0 %v512_v31  ;;  %v843_v13 = vsel %vm840_vm1, %v841_v25, %v842_v45  ;;  %v16419_v45 = vld [vmem:[%s20651_s2 + $0xc8] sm:$0xff]   ;;  %v16425_v31 = vld [vmem:[%s20651_s2 + $0xe0] sm:$0xff]   ;;  %v1324_v25 = vshll.u32 %v17339_v41, 16 }
  0x47   : > { %14563 = vmatmul.mubr.bf16.gmra.mrb[12].mxu1 %v2874_v35  ;;  %14291 = vmatpush3.bf16.msra.mxu0 %v16393_v22  ;;  %v12499_v22 = vcombine.low %v3181_v12, %v16993_v19  ;;  %v16426_v35 = vld [vmem:[%s20651_s2 + $0xe8] sm:$0xff]  }
  0x48   : > { %14579 = vmatpush3.bf16.msra.mxu1 %v16395_v27  ;;  %14292 = vmatprep.subr.bf16.mxu0 %v16396_v36  ;;  %v16405_v27 = vld [vmem:[%s20651_s2 + $0x98] sm:$0xff]  }
  0x49   : > { %14580 = vmatprep.subr.bf16.mxu1 %v16397_v39  ;;  %14294 = vmatprep.mubr.bf16.mxu0 %v16980_v14  ;;  %v3212_v14 = vrot.slane %v17091_v38, 1  ;;  %v3201_v26 = vrot.slane %v12499_v22, 1  ;;  %v1321_v22 = vshrl.u32 %v17339_v41, 16 }
  0x4a   : > { %14582 = vmatprep.mubr.bf16.mxu1 %v16999_v23  ;;  %v854_v23 = vrot.slane %v17105_v51, 1 }
  0x4b   : > { %14293 = vmatpush3.bf16.msra.mxu0 %v16396_v36  ;;  %v17206_v2 = vsel %vm840_vm1, %v3210_v55, %v3212_v14  ;;  %v17216_v6 = vsel %vm840_vm1, %v3212_v14, %v3214_v3  ;;  %v3203_v19 = vsel %vm840_vm1, %v3201_v26, %v3202_v17  ;;  %v16422_v17 = vld [vmem:[%s20651_s2 + $0xd8] sm:$0xff]   ;;  %v3387_v36 = vld [vmem:[%s16967_s10 + $0x48] sm:$0xe]  ;;  %v17376_v14 = vld [vmem:[%s16967_s10 + $0x20] sm:$0xff]  }
  0x4c   : > { %14581 = vmatpush3.bf16.msra.mxu1 %v16397_v39  ;;  %14310 = vmatprep.subr.bf16.mxu0 %v16398_v47  ;;  %v17211_v4 = vsel %vm840_vm1, %v852_v59, %v854_v23  ;;  %v17223_v10 = vsel %vm840_vm1, %v854_v23, %v856_v5  ;;  %v16427_v39 = vld [vmem:[%s20651_s2 + $0xe8] sm:$0xff]   ;;  %v17365_v55 = vld [vmem:[%s16967_s10 + $0x58] sm:$0xff]   ;;  %v16437_v23 = vld [vmem:[%s20651_s2 + $0x100] sm:$0xff]   ;;  %v1109_v5 = vrot.slane %v17376_v14, 1 }
  0x4d   : > { %14598 = vmatprep.subr.bf16.mxu1 %v16399_v50  ;;  %v16431_v59 = vld [vmem:[%s20651_s2 + $0xf8] sm:$0xff]   ;;  %v16439_v3 = vld [vmem:[%s20651_s2 + $0x100] sm:$0xff]  }
  0x4e   : > { %14295 = vmatmul.mubr.bf16.vlgmr.msra.gmra.mrb[0].mxu0 %v16983_v15  ;;  %v16407_v15 = vld [vmem:[%s20651_s2 + $0xa0] sm:$0xff]  }
  0x4f   : > { %14583 = vmatmul.mubr.bf16.vlgmr.msra.gmra.mrb[0].mxu1 %v16986_v16  ;;  %14311 = vmatpush3.bf16.msra.mxu0 %v16398_v47  ;;  %v16408_v16 = vld [vmem:[%s20651_s2 + $0xa8] sm:$0xff]  }
  0x50   : > { %14599 = vmatpush3.bf16.msra.mxu1 %v16399_v50  ;;  %14312 = vmatprep.subr.bf16.mxu0 %v16400_v61  ;;  %v17361_v50 = vld [vmem:[%s16967_s10 + $0x18] sm:$0xff]  }
  0x51   : > { %14600 = vmatprep.subr.bf16.mxu1 %v16401_v1  ;;  %14298 = vmatprep.mubr.bf16.mxu0 %v17002_v24  ;;  %v16404_v24 = vld [vmem:[%s20651_s2 + $0x98] sm:$0xff]  }
  0x52   : > { %14586 = vmatprep.mubr.bf16.mxu1 %v17016_v34  ;;  %v16406_v34 = vld [vmem:[%s20651_s2 + $0xa0] sm:$0xff]  }
  0x53   : > { %14313 = vmatpush3.bf16.msra.mxu0 %v16400_v61 }
  0x54   : > { %14601 = vmatpush3.bf16.msra.mxu1 %v16401_v1  ;;  %14314 = vmatprep.subr.bf16.mxu0 %v16402_v8  ;;  %v3466_v1 = vrot.slane %v17365_v55, 1 }
  0x55   : > { %14602 = vmatprep.subr.bf16.mxu1 %v16403_v0 }
  0x56   : > { %14299 = vmatmul.mubr.bf16.gmra.mrb[4].mxu0 %v17034_v52  ;;  %v16409_v52 = vld [vmem:[%s20651_s2 + $0xa8] sm:$0xff]  }
  0x57   : > { %14587 = vmatmul.mubr.bf16.gmra.mrb[4].mxu1 %v17037_v53  ;;  %14315 = vmatpush3.bf16.msra.mxu0 %v16402_v8  ;;  %v16410_v53 = vld [vmem:[%s20651_s2 + $0xb0] sm:$0xff]   ;;  %v16441_v8 = vld [vmem:[%s20651_s2 + $0x108] sm:$0xff]  }
  0x58   : > { %14603 = vmatpush3.bf16.msra.mxu1 %v16403_v0  ;;  %14316 = vmatprep.subr.bf16.mxu0 %v16404_v24  ;;  %v17402_v0 = vld [vmem:[%s16967_s10 + $0x28] sm:$0xff]  }
  0x59   : > { %14604 = vmatprep.subr.bf16.mxu1 %v16405_v27  ;;  %14302 = vmatprep.mubr.bf16.mxu0 %v17044_v57  ;;  %v16411_v57 = vld [vmem:[%s20651_s2 + $0xb0] sm:$0xff]  }
  0x5a   : > { %14590 = vmatprep.mubr.bf16.mxu1 %v17050_v62  ;;  %v16412_v62 = vld [vmem:[%s20651_s2 + $0xb8] sm:$0xff]  }
  0x5b   : > { %14317 = vmatpush3.bf16.msra.mxu0 %v16404_v24  ;;  %v17414_v24 = vld [vmem:[%s16967_s10 + $0x70] sm:$0xff]  }
  0x5c   : > { %14605 = vmatpush3.bf16.msra.mxu1 %v16405_v27  ;;  %14318 = vmatprep.subr.bf16.mxu0 %v16406_v34  ;;  %v17419_v27 = vld [vmem:[%s16967_s10 + $0x38] sm:$0xff]  }
  0x5d   : > { %14606 = vmatprep.subr.bf16.mxu1 %v16407_v15 }
  0x5e   : > { %14303 = vmatmul.mubr.bf16.gmra.mrb[8].mxu0 %v17068_v18  ;;  %v16413_v18 = vld [vmem:[%s20651_s2 + $0xb8] sm:$0xff]  }
  0x5f   : > { %14591 = vmatmul.mubr.bf16.gmra.mrb[8].mxu1 %v17072_v21  ;;  %14319 = vmatpush3.bf16.msra.mxu0 %v16406_v34  ;;  %v16416_v21 = vld [vmem:[%s20651_s2 + $0xc0] sm:$0xff]   ;;  %v1111_v34 = vrot.slane %v17402_v0, 1 }
  0x60   : > { %14607 = vmatpush3.bf16.msra.mxu1 %v16407_v15  ;;  %14320 = vmatprep.subr.bf16.mxu0 %v16408_v16 }
  0x61   : > { %14608 = vmatprep.subr.bf16.mxu1 %v16409_v52  ;;  %14306 = vmatprep.mubr.bf16.mxu0 %v17080_v28  ;;  %v16417_v28 = vld [vmem:[%s20651_s2 + $0xc0] sm:$0xff]  }
  0x62   : > { %14594 = vmatprep.mubr.bf16.mxu1 %v17091_v38  ;;  %v16418_v38 = vld [vmem:[%s20651_s2 + $0xc8] sm:$0xff]  }
  0x63   : > { %14321 = vmatpush3.bf16.msra.mxu0 %v16408_v16  ;;  %v16445_v16 = vld [vmem:[%s20651_s2 + $0x110] sm:$0xff]  }
  0x64   : > { %14609 = vmatpush3.bf16.msra.mxu1 %v16409_v52  ;;  %14322 = vmatprep.subr.bf16.mxu0 %v16410_v53 }
  0x65   : > { %14610 = vmatprep.subr.bf16.mxu1 %v16411_v57 }
  0x66   : > { %14307 = vmatmul.mubr.bf16.gmra.mrb[12].mxu0 %v17105_v51  ;;  %v16420_v51 = vld [vmem:[%s20651_s2 + $0xd0] sm:$0xff]  }
  0x67   : > { %14595 = vmatmul.mubr.bf16.gmra.mrb[12].mxu1 %v17112_v56  ;;  %14323 = vmatpush3.bf16.msra.mxu0 %v16410_v53  ;;  %v16421_v56 = vld [vmem:[%s20651_s2 + $0xd0] sm:$0xff]  }
  0x68   : > { %14611 = vmatpush3.bf16.msra.mxu1 %v16411_v57  ;;  %14324 = vmatprep.subr.bf16.mxu0 %v16412_v62  ;;  %v16447_v53 = vld [vmem:[%s20651_s2 + $0x110] sm:$0xff]  }
  0x69   : > { %14612 = vmatprep.subr.bf16.mxu1 %v16413_v18  ;;  %14326 = vmatprep.mubr.bf16.mxu0 %v843_v13 }
  0x6a   : > { %14614 = vmatprep.mubr.bf16.mxu1 %v3203_v19 }
  0x6b   : > { %14325 = vmatpush3.bf16.msra.mxu0 %v16412_v62  ;;  %v1113_v62 = vrot.slane %v17410_v20, 1 }
  0x6c   : > { %14613 = vmatpush3.bf16.msra.mxu1 %v16413_v18  ;;  %14342 = vmatprep.subr.bf16.mxu0 %v16416_v21  ;;  %v3472_v18 = vrot.slane %v17414_v24, 1 }
  0x6d   : > { %14630 = vmatprep.subr.bf16.mxu1 %v16417_v28 }
  0x6e   : > { %14327 = vmatmul.mubr.bf16.vlgmr.msra.gmra.mrb[0].mxu0 %v17146_v32  ;;  %v1027_v32 = vld [vmem:[%s16967_s10 + $0x8] sm:$0xe] }
  0x6f   : > { %14615 = vmatmul.mubr.bf16.vlgmr.msra.gmra.mrb[0].mxu1 %v17160_v40  ;;  %14343 = vmatpush3.bf16.msra.mxu0 %v16416_v21  ;;  %v17336_v40 = vcombine.low %v1027_v32, %v17322_v33  ;;  %v17437_v21 = vrot.slane %v1321_v22, 1  ;;  %v17460_v32 = vld [vmem:[%s16967_s10 + $0x48] ss:$0 sps:$4 sm:$0x11]  }
  0x70   : > { %14631 = vmatpush3.bf16.msra.mxu1 %v16417_v28  ;;  %14344 = vmatprep.subr.bf16.mxu0 %v16418_v38  ;;  %v17439_v28 = vrot.slane %v1324_v25, 2 }
  0x71   : > { %14632 = vmatprep.subr.bf16.mxu1 %v16419_v45  ;;  %14330 = vmatprep.mubr.bf16.mxu0 %v17164_v42  ;;  %v17343_v42 = vcombine.low %v3387_v36, %v17330_v37  ;;  %v1104_v47 = vrot.slane %v17336_v40, 1  ;;  %v1316_v11 = vshll.u32 %v17336_v40, 16 }
  0x72   : > { %14618 = vmatprep.mubr.bf16.mxu1 %v17168_v44  ;;  %v16428_v44 = vld [vmem:[%s20651_s2 + $0xf0] sm:$0xff]  }
  0x73   : > { %14345 = vmatpush3.bf16.msra.mxu0 %v16418_v38  ;;  %v3463_v49 = vrot.slane %v17343_v42, 1  ;;  %v17425_v15 = vrot.slane %v1316_v11, 2  ;;  %v3670_v57 = vshrl.u32 %v17343_v42, 16  ;;  %v16448_v38 = vld [vmem:[%s20651_s2 + $0x118] sm:$0xff]  }
  0x74   : > { %14633 = vmatpush3.bf16.msra.mxu1 %v16419_v45  ;;  %14346 = vmatprep.subr.bf16.mxu0 %v16420_v51  ;;  %v1115_v45 = vrot.slane %v17419_v27, 1 }
  0x75   : > { %14634 = vmatprep.subr.bf16.mxu1 %v16421_v56  ;;  %v17463_v36 = vrot.slane %v3670_v57, 1  ;;  %v1348_v57 = vshrl.u32 %v17402_v0, 16 }
  0x76   : > { %14331 = vmatmul.mubr.bf16.gmra.mrb[4].mxu0 %v17175_v48  ;;  %v1105_v48 = vrot.slane %v17339_v41, 1  ;;  %v1116_v25 = vsel %vm840_vm1, %v1113_v62, %v1115_v45 }
  0x77   : > { %14619 = vmatmul.mubr.bf16.gmra.mrb[4].mxu1 %v17183_v54  ;;  %14347 = vmatpush3.bf16.msra.mxu0 %v16420_v51  ;;  %v3464_v54 = vrot.slane %v17347_v43, 1  ;;  %v17446_v51 = vld [vmem:[%s16967_s10 + $0x78] sm:$0xff]  }
  0x78   : > { %14635 = vmatpush3.bf16.msra.mxu1 %v16421_v56  ;;  %14348 = vmatprep.subr.bf16.mxu0 %v16422_v17  ;;  %v17449_v56 = vld [vmem:[%s16967_s10 + $0x40] sm:$0xff]  }
  0x79   : > { %14636 = vmatprep.subr.bf16.mxu1 %v16423_v29  ;;  %14334 = vmatprep.mubr.bf16.mxu0 %v17188_v58  ;;  %v16430_v58 = vld [vmem:[%s20651_s2 + $0xf8] sm:$0xff]   ;;  %v3465_v61 = vsel %vm840_vm1, %v3463_v49, %v3464_v54  ;;  %v3467_v12 = vsel %vm840_vm1, %v3464_v54, %v3466_v1  ;;  %v1333_v49 = vshll.u32 %v17361_v50, 16  ;;  %v3687_v54 = vshrl.u32 %v17365_v55, 16 }
  0x7a   : > { %14622 = vmatprep.mubr.bf16.mxu1 %v17192_v60  ;;  %v1106_v60 = vsel %vm840_vm1, %v1104_v47, %v1105_v48  ;;  %v16453_v47 = vld [vmem:[%s20651_s2 + $0x120] sm:$0xff]  }
  0x7b   : > { %14349 = vmatpush3.bf16.msra.mxu0 %v16422_v17  ;;  %v3673_v17 = vshll.u32 %v17343_v42, 16  ;;  %v17500_v11 = vrot.slane %v1333_v49, 2 }
  0x7c   : > { %14637 = vmatpush3.bf16.msra.mxu1 %v16423_v29  ;;  %14350 = vmatprep.subr.bf16.mxu0 %v16424_v30  ;;  %v1112_v29 = vsel %vm840_vm1, %v1109_v5, %v1111_v34 }
  0x7d   : > { %14638 = vmatprep.subr.bf16.mxu1 %v16425_v31 }
  0x7e   : > { %14335 = vmatmul.mubr.bf16.gmra.mrb[8].mxu0 %v17199_v63  ;;  %v1107_v63 = vrot.slane %v17361_v50, 1 }
  0x7f   : > { %14623 = vmatmul.mubr.bf16.gmra.mrb[8].mxu1 %v17206_v2  ;;  %14351 = vmatpush3.bf16.msra.mxu0 %v16424_v30  ;;  %v17386_v2 = vld [vmem:[%s16967_s10 + $0x60] sm:$0xff]   ;;  %v16449_v30 = vld [vmem:[%s20651_s2 + $0x118] sm:$0xff]  }
  0x80   : > { %14639 = vmatpush3.bf16.msra.mxu1 %v16425_v31  ;;  %14352 = vmatprep.subr.bf16.mxu0 %v16426_v35  ;;  %v1108_v7 = vsel %vm840_vm1, %v1105_v48, %v1107_v63  ;;  %v1110_v26 = vsel %vm840_vm1, %v1107_v63, %v1109_v5  ;;  %v17457_v31 = vld [vmem:[%s16967_s10 + $0x80] sm:$0xff]   ;;  %v1330_v48 = vshrl.u32 %v17361_v50, 16 }
  0x81   : > { %14640 = vmatprep.subr.bf16.mxu1 %v16427_v39  ;;  %14338 = vmatprep.mubr.bf16.mxu0 %v17211_v4  ;;  %v16440_v4 = vld [vmem:[%s20651_s2 + $0x108] sm:$0xff]   ;;  %v3476_v63 = vrot.slane %v17457_v31, 1 }
  0x82   : > { %14626 = vmatprep.mubr.bf16.mxu1 %v17216_v6  ;;  %v1313_v6 = vshrl.u32 %v17336_v40, 16  ;;  %v1114_v40 = vsel %vm840_vm1, %v1111_v34, %v1113_v62  ;;  %v3696_v34 = vshrl.u32 %v17386_v2, 16  ;;  %v1561_v62 = vld [vmem:[%s16967_s10 + $0x8] sm:$0xc] }
  0x83   : > { %14353 = vmatpush3.bf16.msra.mxu0 %v16426_v35 }
  0x84   : > { %14641 = vmatpush3.bf16.msra.mxu1 %v16427_v39  ;;  %14354 = vmatprep.subr.bf16.mxu0 %v16428_v44  ;;  %v17421_v13 = vrot.slane %v1313_v6, 1  ;;  %v3678_v39 = vshrl.u32 %v17347_v43, 16  ;;  %v1339_v6 = vshrl.u32 %v17376_v14, 16 }
  0x85   : > { %14642 = vmatprep.subr.bf16.mxu1 %v16429_v46 }
  0x86   : > { %14339 = vmatmul.mubr.bf16.gmra.mrb[12].mxu0 %v17223_v10  ;;  %v3468_v10 = vrot.slane %v17386_v2, 1 }
  0x87   : > { %14627 = vmatmul.mubr.bf16.gmra.mrb[12].mxu1 %v17232_v9  ;;  %14355 = vmatpush3.bf16.msra.mxu0 %v16428_v44  ;;  %v17407_v9 = vld [vmem:[%s16967_s10 + $0x68] sm:$0xff]  }
  0x88   : > { %14643 = vmatpush3.bf16.msra.mxu1 %v16429_v46  ;;  %14356 = vmatprep.subr.bf16.mxu0 %v16430_v58  ;;  %v3469_v19 = vsel %vm840_vm1, %v3466_v1, %v3468_v10  ;;  %v3470_v52 = vrot.slane %v17407_v9, 1  ;;  %v17471_v44 = vld [vmem:[%s16967_s10 + $0x88] ss:$0 sps:$4 sm:$0x11]   ;;  %v3681_v46 = vshll.u32 %v17347_v43, 16  ;;  %v1119_v1 = vrot.slane %v17460_v32, 1 }
  0x89   : > { %14644 = vmatprep.subr.bf16.mxu1 %v16431_v59  ;;  %14358 = vmatprep.mubr.bf16.mxu0 %v1106_v60  ;;  %v16455_v60 = vld [vmem:[%s20651_s2 + $0x120] sm:$0xff]   ;;  %v16463_v32 = vld [vmem:[%s20651_s2 + $0x130] sm:$0xff]  }
  0x8a   : > { %14646 = vmatprep.mubr.bf16.mxu1 %v3465_v61  ;;  %v3471_v35 = vsel %vm840_vm1, %v3468_v10, %v3470_v52  ;;  %v3473_v42 = vsel %vm840_vm1, %v3470_v52, %v3472_v18  ;;  %v1117_v61 = vrot.slane %v17449_v56, 1  ;;  %v3683_v5 = vrot.slane %v3681_v46, 2 }
  0x8b   : > { %14357 = vmatpush3.bf16.msra.mxu0 %v16430_v58  ;;  %v3690_v58 = vshll.u32 %v17365_v55, 16  ;;  %v17498_v10 = vrot.slane %v1330_v48, 1  ;;  %v16464_v48 = vld [vmem:[%s20651_s2 + $0x138] sm:$0xff]  }
  0x8c   : > { %14645 = vmatpush3.bf16.msra.mxu1 %v16431_v59  ;;  %14374 = vmatprep.subr.bf16.mxu0 %v16437_v23  ;;  %v3474_v59 = vrot.slane %v17446_v51, 1 }
  0x8d   : > { %14662 = vmatprep.subr.bf16.mxu1 %v16439_v3  ;;  %v17504_v22 = vrot.slane %v3690_v58, 2  ;;  %v1590_v58 = vrot.slane %v17402_v0, 2 }
  0x8e   : > { %14359 = vmatmul.mubr.bf16.vlgmr.msra.gmra.mrb[0].mxu0 %v1108_v7  ;;  %v1342_v7 = vshll.u32 %v17376_v14, 16  ;;  %v3475_v52 = vsel %vm840_vm1, %v3472_v18, %v3474_v59  ;;  %v12350_v18 = vcombine.low %v1561_v62, %v17322_v33  ;;  %v3477_v33 = vsel %vm840_vm1, %v3474_v59, %v3476_v63 }
  0x8f   : > { %14647 = vmatmul.mubr.bf16.vlgmr.msra.gmra.mrb[0].mxu1 %v3467_v12  ;;  %14375 = vmatpush3.bf16.msra.mxu0 %v16437_v23  ;;  %v17487_v23 = vrot.slane %v3673_v17, 2  ;;  %v17502_v12 = vrot.slane %v3687_v54, 1  ;;  %v3943_v54 = vrot.slane %v17386_v2, 2 }
  0x90   : > { %14663 = vmatpush3.bf16.msra.mxu1 %v16439_v3  ;;  %14376 = vmatprep.subr.bf16.mxu0 %v16440_v4  ;;  %v17490_v3 = vrot.slane %v3678_v39, 1  ;;  %v17531_v17 = vrot.slane %v1342_v7, 2  ;;  %v1583_v39 = vrot.slane %v12350_v18, 2  ;;  %v1336_v7 = vor.u32 %v17500_v11, %v17498_v10 }
  0x91   : > { %14664 = vmatprep.subr.bf16.mxu1 %v16441_v8  ;;  %14362 = vmatprep.mubr.bf16.mxu0 %v1110_v26  ;;  %v16457_v26 = vld [vmem:[%s20651_s2 + $0x128] sm:$0xff]   ;;  %v1360_v18 = vshll.u32 %v17410_v20, 16 }
  0x92   : > { %14650 = vmatprep.mubr.bf16.mxu1 %v3469_v19  ;;  %v1319_v19 = vor.u32 %v17425_v15, %v17421_v13  ;;  %v1118_v13 = vsel %vm840_vm1, %v1115_v45, %v1117_v61  ;;  %v17529_v15 = vrot.slane %v1339_v6, 1  ;;  %v1586_v45 = vrot.slane %v17361_v50, 2 }
  0x93   : > { %14377 = vmatpush3.bf16.msra.mxu0 %v16440_v4  ;;  %v3478_v4 = vrot.slane %v17471_v44, 1  ;;  %v17552_v50 = vrot.slane %v3696_v34, 1  ;;  %v3684_v59 = vor.u32 %v3683_v5, %v17490_v3  ;;  %v3947_v6 = vrot.slane %v17414_v24, 2 }
  0x94   : > { %14665 = vmatpush3.bf16.msra.mxu1 %v16441_v8  ;;  %14378 = vmatprep.subr.bf16.mxu0 %v16445_v16  ;;  %v16456_v8 = vld [vmem:[%s20651_s2 + $0x128] sm:$0xff]  }
  0x95   : > { %14666 = vmatprep.subr.bf16.mxu1 %v16447_v53 }
  0x96   : > { %14363 = vmatmul.mubr.bf16.gmra.mrb[4].mxu0 %v1112_v29  ;;  %v3918_v29 = vld [vmem:[%s16967_s10 + $0x48] sm:$0xc] }
  0x97   : > { %14651 = vmatmul.mubr.bf16.gmra.mrb[4].mxu1 %v3471_v35  ;;  %14379 = vmatpush3.bf16.msra.mxu0 %v16445_v16  ;;  %v3699_v16 = vshll.u32 %v17386_v2, 16  ;;  %v3676_v35 = vor.u32 %v17487_v23, %v17463_v36  ;;  %v1350_v23 = vrot.slane %v1348_v57, 1  ;;  %v1357_v57 = vshrl.u32 %v17410_v20, 16 }
  0x98   : > { %14667 = vmatpush3.bf16.msra.mxu1 %v16447_v53  ;;  %14380 = vmatprep.subr.bf16.mxu0 %v16448_v38  ;;  %v17521_v53 = vor.u32 %v17439_v28, %v17437_v21  ;;  %v16461_v21 = vld [vmem:[%s20651_s2 + $0x130] sm:$0xff]   ;;  %v1351_v28 = vshll.u32 %v17402_v0, 16 }
  0x99   : > { %14668 = vmatprep.subr.bf16.mxu1 %v16449_v30  ;;  %14366 = vmatprep.mubr.bf16.mxu0 %v1114_v40  ;;  %v3701_v44 = vrot.slane %v3699_v16, 2  ;;  %v3685_v34 = vsel %vm1311_vm3, %v3676_v35, %v3684_v59  ;;  %v16467_v16 = vld [vmem:[%s20651_s2 + $0x140] sm:$0xff]  }
  0x9a   : > { %14654 = vmatprep.mubr.bf16.mxu1 %v3473_v42  ;;  %v1328_v3 = vsel %vm1311_vm3, %v1319_v19, %v17521_v53  ;;  %v1594_v19 = vrot.slane %v17419_v27, 2 }
  0x9b   : > { %14381 = vmatpush3.bf16.msra.mxu0 %v16448_v38  ;;  %v1584_v38 = vrot.slane %v17339_v41, 2  ;;  %v12582_v41 = vcombine.low %v3918_v29, %v17330_v37  ;;  %v3941_v37 = vrot.slane %v17365_v55, 2  ;;  %v1588_v55 = vrot.slane %v17376_v14, 2  ;;  %v16465_v14 = vld [vmem:[%s20651_s2 + $0x138] sm:$0xff]  }
  0x9c   : > { %14669 = vmatpush3.bf16.msra.mxu1 %v16449_v30  ;;  %14382 = vmatprep.subr.bf16.mxu0 %v16453_v47  ;;  %v3939_v30 = vrot.slane %v17347_v43, 2  ;;  %v1120_v43 = vsel %vm840_vm1, %v1117_v61, %v1119_v1  ;;  %v1592_v1 = vrot.slane %v17410_v20, 2  ;;  %v3702_v20 = vor.u32 %v3701_v44, %v17552_v50 }
  0x9d   : > { %14670 = vmatprep.subr.bf16.mxu1 %v16455_v60  ;;  %v3938_v40 = vrot.slane %v12582_v41, 2  ;;  %v17555_v42 = vsel %vm1582_vm2, %v1584_v38, %v1586_v45  ;;  %v17558_v46 = vsel %vm1582_vm2, %v1583_v39, %v1584_v38  ;;  %v17581_v61 = vsel %vm1582_vm2, %v1586_v45, %v1588_v55  ;;  %v16470_v39 = vld [vmem:[%s20651_s2 + $0x150] sm:$0xff]  }
  0x9e   : > { %14367 = vmatmul.mubr.bf16.gmra.mrb[8].mxu0 %v1116_v25  ;;  %v17561_v36 = vsel %vm1582_vm2, %v3939_v30, %v3941_v37  ;;  %v17585_v2 = vsel %vm1582_vm2, %v3941_v37, %v3943_v54  ;;  %v17588_v0 = vsel %vm1582_vm2, %v1588_v55, %v1590_v58  ;;  %v3708_v25 = vshll.u32 %v17407_v9, 16  ;;  %v16471_v55 = vld [vmem:[%s20651_s2 + $0x150] sm:$0xff]  }
  0x9f   : > { %14655 = vmatmul.mubr.bf16.gmra.mrb[8].mxu1 %v3475_v52  ;;  %14383 = vmatpush3.bf16.msra.mxu0 %v16453_v47  ;;  %v3479_v47 = vsel %vm840_vm1, %v3476_v63, %v3478_v4  ;;  %v17571_v49 = vsel %vm1582_vm2, %v3938_v40, %v3939_v30  ;;  %v3945_v63 = vrot.slane %v17407_v9, 2  ;;  %v1353_v4 = vrot.slane %v1351_v28, 2 }
  0xa0   : > { %14671 = vmatpush3.bf16.msra.mxu1 %v16455_v60  ;;  %14384 = vmatprep.subr.bf16.mxu0 %v16456_v8  ;;  %v3705_v60 = vshrl.u32 %v17407_v9, 16  ;;  %v3949_v52 = vrot.slane %v17446_v51, 2  ;;  %v3693_v9 = vor.u32 %v17504_v22, %v17502_v12  ;;  %v17619_v62 = vsel %vm1582_vm2, %v1592_v1, %v1594_v19 }
  0xa1   : > { %14672 = vmatprep.subr.bf16.mxu1 %v16457_v26  ;;  %14370 = vmatprep.mubr.bf16.mxu0 %v1118_v13  ;;  %v17594_v5 = vsel %vm1582_vm2, %v3943_v54, %v3945_v63  ;;  %v17612_v11 = vsel %vm1582_vm2, %v3945_v63, %v3947_v6  ;;  %v1596_v38 = vrot.slane %v17449_v56, 2  ;;  %v1345_v13 = vor.u32 %v17531_v17, %v17529_v15  ;;  %v17667_v63 = vld [vmem:[%s16967_s10 + $0x48] ss:$0 sps:$4 sm:$0x33]  }
  0xa2   : > { %14658 = vmatprep.mubr.bf16.mxu1 %v3477_v33  ;;  %v3707_v10 = vrot.slane %v3705_v60, 1  ;;  %v17626_v29 = vsel %vm1582_vm2, %v3947_v6, %v3949_v52  ;;  %v1337_v12 = vsel %vm1311_vm3, %v17521_v53, %v1336_v7  ;;  %v3714_v22 = vshrl.u32 %v17414_v24, 16  ;;  %v16468_v53 = vld [vmem:[%s20651_s2 + $0x148] sm:$0xff]  }
  0xa3   : > { %14385 = vmatpush3.bf16.msra.mxu0 %v16456_v8  ;;  %v16466_v8 = vld [vmem:[%s20651_s2 + $0x140] sm:$0xff]   ;;  %v3717_v28 = vshll.u32 %v17414_v24, 16  ;;  %v17636_v41 = vsel %vm1582_vm2, %v1594_v19, %v1596_v38  ;;  %v3710_v15 = vrot.slane %v3708_v25, 2  ;;  %v1366_v17 = vshrl.u32 %v17419_v27, 16  ;;  %v16469_v33 = vld [vmem:[%s20651_s2 + $0x148] sm:$0xff]  }
  0xa4   : > { %14673 = vmatpush3.bf16.msra.mxu1 %v16457_v26  ;;  %14386 = vmatprep.subr.bf16.mxu0 %v16461_v21  ;;  %v17604_v26 = vsel %vm1582_vm2, %v1590_v58, %v1592_v1  ;;  %v3694_v24 = vsel %vm1311_vm3, %v3684_v59, %v3693_v9  ;;  %v1369_v45 = vshll.u32 %v17419_v27, 16  ;;  %v1354_v35 = vor.u32 %v1353_v4, %v1350_v23  ;;  %v16472_v23 = vld [vmem:[%s20651_s2 + $0x158] sm:$0xff]  }
  0xa5   : > { %14674 = vmatprep.subr.bf16.mxu1 %v16463_v32  ;;  %v1359_v37 = vrot.slane %v1357_v57, 1  ;;  %v3716_v50 = vrot.slane %v3714_v22, 1  ;;  %v3719_v40 = vrot.slane %v3717_v28, 2  ;;  %v3703_v27 = vsel %vm1311_vm3, %v3693_v9, %v3702_v20 }
  0xa6   : > { %14371 = vmatmul.mubr.bf16.gmra.mrb[12].mxu0 %v1120_v43  ;;  %v1362_v43 = vrot.slane %v1360_v18, 2  ;;  %v3711_v44 = vor.u32 %v3710_v15, %v3707_v10  ;;  %v1371_v54 = vrot.slane %v1369_v45, 2  ;;  %v3726_v58 = vshll.u32 %v17446_v51, 16 }
  0xa7   : > { %14659 = vmatmul.mubr.bf16.gmra.mrb[12].mxu1 %v3479_v47  ;;  %14387 = vmatpush3.bf16.msra.mxu0 %v16461_v21  ;;  %v3951_v21 = vrot.slane %v17457_v31, 2  ;;  %v1368_v47 = vrot.slane %v1366_v17, 1  ;;  %v1378_v59 = vshll.u32 %v17449_v56, 16  ;;  %v3732_v60 = vshrl.u32 %v17457_v31, 16  ;;  %v16475_v17 = vld [vmem:[%s20651_s2 + $0x160] sm:$0xff]  }
  0xa8   : > { %14675 = vmatpush3.bf16.msra.mxu1 %v16463_v32  ;;  %14388 = vmatprep.subr.bf16.mxu0 %v16464_v48  ;;  %v1346_v32 = vsel %vm1311_vm3, %v1336_v7, %v1345_v13  ;;  %v1363_v1 = vor.u32 %v1362_v43, %v1359_v37  ;;  %v3720_v4 = vor.u32 %v3719_v40, %v3716_v50  ;;  %v3735_v6 = vshll.u32 %v17457_v31, 16  ;;  %v17678_v7 = vld [vmem:[%s16967_s10 + $0x88] ss:$0 sps:$4 sm:$0x33]   ;;  %v16507_v31 = vld [vmem:[%s20651_s2 + $0x1c0] sm:$0xff]  }
  0xa9   : > { %14676 = vmatprep.subr.bf16.mxu1 %v16465_v14  ;;  %14390 = vmatprep.mubr.bf16.mxu0 %v1328_v3  ;;  %v17643_v30 = vsel %vm1582_vm2, %v3949_v52, %v3951_v21  ;;  %v1355_v3 = vsel %vm1311_vm3, %v1345_v13, %v1354_v35  ;;  %v3728_v19 = vrot.slane %v3726_v58, 2  ;;  %v16474_v52 = vld [vmem:[%s20651_s2 + $0x160] sm:$0xff]   ;;  %v3734_v9 = vrot.slane %v3732_v60, 1  ;;  %v16477_v50 = vld [vmem:[%s20651_s2 + $0x168] sm:$0xff]  }
  0xaa   : > { %14678 = vmatprep.mubr.bf16.mxu1 %v3685_v34  ;;  %v1364_v10 = vsel %vm1311_vm3, %v1354_v35, %v1363_v1  ;;  %v1384_v57 = vshrl.u32 %v17667_v63, 16  ;;  %v3721_v13 = vsel %vm1311_vm3, %v3711_v44, %v3720_v4  ;;  %v1372_v18 = vor.u32 %v1371_v54, %v1368_v47  ;;  %v16486_v60 = vld [vmem:[%s20651_s2 + $0x180] sm:$0xff]  }
  0xab   : > { %14389 = vmatpush3.bf16.msra.mxu0 %v16464_v48  ;;  %v3723_v48 = vshrl.u32 %v17446_v51, 16  ;;  %v16473_v51 = vld [vmem:[%s20651_s2 + $0x158] sm:$0xff]   ;;  %v1387_v22 = vshll.u32 %v17667_v63, 16  ;;  %v3744_v15 = vshll.u32 %v17678_v7, 16 }
  0xac   : > { %14677 = vmatpush3.bf16.msra.mxu1 %v16465_v14  ;;  %14406 = vmatprep.subr.bf16.mxu0 %v16466_v8  ;;  %v1375_v14 = vshrl.u32 %v17449_v56, 16  ;;  %v1373_v45 = vsel %vm1311_vm3, %v1363_v1, %v1372_v18  ;;  %v16488_v1 = vld [vmem:[%s20651_s2 + $0x188] sm:$0xff]   ;;  %v16501_v56 = vld [vmem:[%s20651_s2 + $0x1b8] sm:$0xff]  }
  0xad   : > { %14694 = vmatprep.subr.bf16.mxu1 %v16467_v16  ;;  %v3725_v25 = vrot.slane %v3723_v48, 1  ;;  %v1389_v35 = vrot.slane %v1387_v22, 2  ;;  %v3746_v43 = vrot.slane %v3744_v15, 2  ;;  %v16481_v48 = vld [vmem:[%s20651_s2 + $0x170] sm:$0xff]  }
  0xae   : > { %14391 = vmatmul.mubr.bf16.vlgmr.msra.gmra.mrb[0].mxu0 %v1337_v12  ;;  %v1377_v34 = vrot.slane %v1375_v14, 1  ;;  %v3737_v12 = vrot.slane %v3735_v6, 2  ;;  %v16482_v14 = vld [vmem:[%s20651_s2 + $0x178] sm:$0xff]   ;;  %v17766_v6 = vld [vmem:[%s16967_s10 + $0x54] sm:$0xf] }
  0xaf   : > { %14679 = vmatmul.mubr.bf16.vlgmr.msra.gmra.mrb[0].mxu1 %v3694_v24  ;;  %14407 = vmatpush3.bf16.msra.mxu0 %v16466_v8  ;;  %v3712_v8 = vsel %vm1311_vm3, %v3702_v20, %v3711_v44  ;;  %v3729_v28 = vor.u32 %v3728_v19, %v3725_v25  ;;  %v3741_v20 = vshrl.u32 %v17678_v7, 16  ;;  %v16476_v24 = vld [vmem:[%s20651_s2 + $0x168] sm:$0xff]   ;;  %v1598_v25 = vrot.slane %v17667_v63, 2  ;;  %v17795_v63 = vld [vmem:[%s16967_s10 + $0x20] sm:$0xff]   ;;  %v17825_v22 = vld [vmem:[%s16967_s10 + $0x30] sm:$0xff]  }
  0xb0   : > { %14695 = vmatpush3.bf16.msra.mxu1 %v16467_v16  ;;  %14408 = vmatprep.subr.bf16.mxu0 %v16468_v53  ;;  %v1380_v16 = vrot.slane %v1378_v59, 2  ;;  %v16483_v59 = vld [vmem:[%s20651_s2 + $0x178] sm:$0xff]  }
  0xb1   : > { %14696 = vmatprep.subr.bf16.mxu1 %v16469_v33  ;;  %14394 = vmatprep.mubr.bf16.mxu0 %v1346_v32  ;;  %v1386_v32 = vrot.slane %v1384_v57, 1  ;;  %v3743_v37 = vrot.slane %v3741_v20, 1  ;;  %v17809_v57 = vld [vmem:[%s16967_s10 + $0x60] sm:$0xff]  }
  0xb2   : > { %14682 = vmatprep.mubr.bf16.mxu1 %v3703_v27 }
  0xb3   : > { %14409 = vmatpush3.bf16.msra.mxu0 %v16468_v53  ;;  %v1381_v53 = vor.u32 %v1380_v16, %v1377_v34  ;;  %v1390_v44 = vor.u32 %v1389_v35, %v1386_v32  ;;  %v3747_v47 = vor.u32 %v3746_v43, %v3743_v37  ;;  %v17784_v34 = vld [vmem:[%s16967_s10 + $0x58] sm:$0xff]   ;;  %v3953_v16 = vrot.slane %v17678_v7, 2  ;;  %v2303_v32 = vld [vmem:[%s16967_s10 + $0x10] sm:$0x8] }
  0xb4   : > { %14697 = vmatpush3.bf16.msra.mxu1 %v16469_v33  ;;  %14410 = vmatprep.subr.bf16.mxu0 %v16470_v39  ;;  %v3738_v33 = vor.u32 %v3737_v12, %v3734_v9  ;;  %v17822_v12 = vld [vmem:[%s16967_s10 + $0x68] sm:$0xff]   ;;  %v1853_v43 = vrot.slane %v17825_v22, 2 }
  0xb5   : > { %14698 = vmatprep.subr.bf16.mxu1 %v16471_v55  ;;  %v1382_v40 = vsel %vm1311_vm3, %v1372_v18, %v1381_v53  ;;  %v1391_v54 = vsel %vm1311_vm3, %v1381_v53, %v1390_v44  ;;  %v3954_v18 = vsel %vm1582_vm2, %v3951_v21, %v3953_v16  ;;  %v17832_v21 = vld [vmem:[%s16967_s10 + $0x70] sm:$0xff]   ;;  %v16509_v53 = vld [vmem:[%s20651_s2 + $0x1c0] sm:$0xff]   ;;  %v4205_v37 = vrot.slane %v17822_v12, 2 }
  0xb6   : > { %14395 = vmatmul.mubr.bf16.gmra.mrb[4].mxu0 %v1355_v3  ;;  %v3739_v27 = vsel %vm1311_vm3, %v3729_v28, %v3738_v33  ;;  %v3748_v58 = vsel %vm1311_vm3, %v3738_v33, %v3747_v47  ;;  %v16489_v3 = vld [vmem:[%s20651_s2 + $0x188] sm:$0xff]   ;;  %v4207_v44 = vrot.slane %v17832_v21, 2  ;;  %v4676_v47 = vrot.slane %v17784_v34, 3 }
  0xb7   : > { %14683 = vmatmul.mubr.bf16.gmra.mrb[4].mxu1 %v3712_v8  ;;  %14411 = vmatpush3.bf16.msra.mxu0 %v16470_v39  ;;  %v3730_v39 = vsel %vm1311_vm3, %v3720_v4, %v3729_v28  ;;  %v4124_v4 = vld [vmem:[%s16967_s10 + $0x50] sm:$0xc]  ;;  %v17776_v8 = vld [vmem:[%s16967_s10 + $0x18] sm:$0xff]   ;;  %v4682_v16 = vrot.slane %v17832_v21, 3 }
  0xb8   : > { %14699 = vmatpush3.bf16.msra.mxu1 %v16471_v55  ;;  %14412 = vmatprep.subr.bf16.mxu0 %v16472_v23  ;;  %v16479_v55 = vld [vmem:[%s20651_s2 + $0x170] sm:$0xff]   ;;  %v17781_v19 = vcombine.low %v4124_v4, %v17766_v6  ;;  %v1847_v7 = vrot.slane %v17776_v8, 2  ;;  %v2063_v33 = vshrl.u32 %v17776_v8, 16  ;;  %v2326_v35 = vrot.slane %v17776_v8, 3 }
  0xb9   : > { %14700 = vmatprep.subr.bf16.mxu1 %v16473_v51  ;;  %14398 = vmatprep.mubr.bf16.mxu0 %v1364_v10  ;;  %v16500_v10 = vld [vmem:[%s20651_s2 + $0x1b8] sm:$0xff]   ;;  %v16515_v4 = vld [vmem:[%s20651_s2 + $0x1d0] sm:$0xff]  }
  0xba   : > { %14686 = vmatprep.mubr.bf16.mxu1 %v3721_v13  ;;  %v4200_v9 = vrot.slane %v17781_v19, 2  ;;  %v17812_v13 = vld [vmem:[%s16967_s10 + $0x28] sm:$0xff]  }
  0xbb   : > { %14413 = vmatpush3.bf16.msra.mxu0 %v16472_v23  ;;  %v16487_v23 = vld [vmem:[%s20651_s2 + $0x180] sm:$0xff]  }
  0xbc   : > { %14701 = vmatpush3.bf16.msra.mxu1 %v16473_v51  ;;  %14414 = vmatprep.subr.bf16.mxu0 %v16474_v52  ;;  %v17762_v51 = vld [vmem:[%s16967_s10 + $0x14] sm:$0xf] }
  0xbd   : > { %14702 = vmatprep.subr.bf16.mxu1 %v16475_v17 }
  0xbe   : > { %14399 = vmatmul.mubr.bf16.gmra.mrb[8].mxu0 %v1373_v45  ;;  %v1851_v45 = vrot.slane %v17812_v13, 2 }
  0xbf   : > { %14687 = vmatmul.mubr.bf16.gmra.mrb[8].mxu1 %v3730_v39  ;;  %14415 = vmatpush3.bf16.msra.mxu0 %v16474_v52 }
  0xc0   : > { %14703 = vmatpush3.bf16.msra.mxu1 %v16475_v17  ;;  %14416 = vmatprep.subr.bf16.mxu0 %v16476_v24 }
  0xc1   : > { %14704 = vmatprep.subr.bf16.mxu1 %v16477_v50  ;;  %14402 = vmatprep.mubr.bf16.mxu0 %v1382_v40  ;;  %v4655_v40 = vld [vmem:[%s16967_s10 + $0x50] sm:$0x8] }
  0xc2   : > { %14690 = vmatprep.mubr.bf16.mxu1 %v3739_v27  ;;  %v16510_v27 = vld [vmem:[%s20651_s2 + $0x1c8] sm:$0xff]  }
  0xc3   : > { %14417 = vmatpush3.bf16.msra.mxu0 %v16476_v24  ;;  %v4203_v24 = vrot.slane %v17809_v57, 2 }
  0xc4   : > { %14705 = vmatpush3.bf16.msra.mxu1 %v16477_v50  ;;  %14418 = vmatprep.subr.bf16.mxu0 %v16479_v55  ;;  %v12433_v50 = vcombine.low %v2303_v32, %v17762_v51 }
  0xc5   : > { %14706 = vmatprep.subr.bf16.mxu1 %v16481_v48 }
  0xc6   : > { %14403 = vmatmul.mubr.bf16.gmra.mrb[12].mxu0 %v1391_v54 }
  0xc7   : > { %14691 = vmatmul.mubr.bf16.gmra.mrb[12].mxu1 %v3748_v58  ;;  %14419 = vmatpush3.bf16.msra.mxu0 %v16479_v55  ;;  %v12665_v55 = vcombine.low %v4655_v40, %v17766_v6  ;;  %v16511_v58 = vld [vmem:[%s20651_s2 + $0x1c8] sm:$0xff]  }
  0xc8   : > { %14707 = vmatpush3.bf16.msra.mxu1 %v16481_v48  ;;  %14420 = vmatprep.subr.bf16.mxu0 %v16482_v14  ;;  %v2328_v48 = vrot.slane %v17795_v63, 3  ;;  %v17894_v6 = vld [vmem:[%s16967_s10 + $0x48] sm:$0xff]  }
  0xc9   : > { %14708 = vmatprep.subr.bf16.mxu1 %v16483_v59  ;;  %14422 = vmatprep.mubr.bf16.mxu0 %v17558_v46  ;;  %v16490_v46 = vld [vmem:[%s20651_s2 + $0x190] sm:$0xff]  }
  0xca   : > { %14710 = vmatprep.mubr.bf16.mxu1 %v17571_v49  ;;  %v16491_v49 = vld [vmem:[%s20651_s2 + $0x190] sm:$0xff]  }
  0xcb   : > { %14421 = vmatpush3.bf16.msra.mxu0 %v16482_v14 }
  0xcc   : > { %14709 = vmatpush3.bf16.msra.mxu1 %v16483_v59  ;;  %14438 = vmatprep.subr.bf16.mxu0 %v16486_v60  ;;  %v17863_v59 = vld [vmem:[%s16967_s10 + $0x38] sm:$0xff]  }
  0xcd   : > { %14726 = vmatprep.subr.bf16.mxu1 %v16487_v23 }
  0xce   : > { %14423 = vmatmul.mubr.bf16.vlgmr.msra.gmra.mrb[0].mxu0 %v17555_v42  ;;  %v16492_v42 = vld [vmem:[%s20651_s2 + $0x198] sm:$0xff]  }
  0xcf   : > { %14711 = vmatmul.mubr.bf16.vlgmr.msra.gmra.mrb[0].mxu1 %v17561_v36  ;;  %14439 = vmatpush3.bf16.msra.mxu0 %v16486_v60  ;;  %v16493_v36 = vld [vmem:[%s20651_s2 + $0x198] sm:$0xff]  }
  0xd0   : > { %14727 = vmatpush3.bf16.msra.mxu1 %v16487_v23  ;;  %14440 = vmatprep.subr.bf16.mxu0 %v16488_v1  ;;  %v17866_v60 = vld [vmem:[%s16967_s10 + $0x78] sm:$0xff]   ;;  %v2325_v23 = vrot.slane %v12433_v50, 3  ;;  %v4407_v50 = vshrl.u32 %v17781_v19, 16 }
  0xd1   : > { %14728 = vmatprep.subr.bf16.mxu1 %v16489_v3  ;;  %14426 = vmatprep.mubr.bf16.mxu0 %v17581_v61  ;;  %v16494_v61 = vld [vmem:[%s20651_s2 + $0x1a0] sm:$0xff]  }
  0xd2   : > { %14714 = vmatprep.mubr.bf16.mxu1 %v17585_v2  ;;  %v16495_v2 = vld [vmem:[%s20651_s2 + $0x1a0] sm:$0xff]  }
  0xd3   : > { %14441 = vmatpush3.bf16.msra.mxu0 %v16488_v1  ;;  %v4678_v1 = vrot.slane %v17809_v57, 3 }
  0xd4   : > { %14729 = vmatpush3.bf16.msra.mxu1 %v16489_v3  ;;  %14442 = vmatprep.subr.bf16.mxu0 %v16490_v46  ;;  %v17870_v3 = vld [vmem:[%s16967_s10 + $0x40] sm:$0xff]  }
  0xd5   : > { %14730 = vmatprep.subr.bf16.mxu1 %v16491_v49 }
  0xd6   : > { %14427 = vmatmul.mubr.bf16.gmra.mrb[4].mxu0 %v17588_v0  ;;  %v16496_v0 = vld [vmem:[%s20651_s2 + $0x1a8] sm:$0xff]  }
  0xd7   : > { %14715 = vmatmul.mubr.bf16.gmra.mrb[4].mxu1 %v17594_v5  ;;  %14443 = vmatpush3.bf16.msra.mxu0 %v16490_v46  ;;  %v1769_v5 = vld [vmem:[%s16967_s10 + $0x10] sm:$0xc]  ;;  %v4675_v46 = vrot.slane %v12665_v55, 3  ;;  %v4208_v55 = vsel %vm1582_vm2, %v4205_v37, %v4207_v44 }
  0xd8   : > { %14731 = vmatpush3.bf16.msra.mxu1 %v16491_v49  ;;  %14444 = vmatprep.subr.bf16.mxu0 %v16492_v42  ;;  %v17873_v49 = vsel %vm2324_vm4, %v2326_v35, %v2328_v48 }
  0xd9   : > { %14732 = vmatprep.subr.bf16.mxu1 %v16493_v36  ;;  %14430 = vmatprep.mubr.bf16.mxu0 %v17604_v26  ;;  %v16497_v26 = vld [vmem:[%s20651_s2 + $0x1a8] sm:$0xff]  }
  0xda   : > { %14718 = vmatprep.mubr.bf16.mxu1 %v17612_v11  ;;  %v17773_v11 = vcombine.low %v1769_v5, %v17762_v51  ;;  %v17887_v5 = vsel %vm2324_vm4, %v4676_v47, %v4678_v1  ;;  %v2332_v51 = vrot.slane %v17825_v22, 3 }
  0xdb   : > { %14445 = vmatpush3.bf16.msra.mxu0 %v16492_v42  ;;  %v2330_v42 = vrot.slane %v17812_v13, 3 }
  0xdc   : > { %14733 = vmatpush3.bf16.msra.mxu1 %v16493_v36  ;;  %14446 = vmatprep.subr.bf16.mxu0 %v16494_v61  ;;  %v1846_v52 = vrot.slane %v17773_v11, 2  ;;  %v2055_v20 = vshrl.u32 %v17773_v11, 16  ;;  %v2058_v15 = vshll.u32 %v17773_v11, 16  ;;  %v4680_v36 = vrot.slane %v17822_v12, 3  ;;  %v16523_v11 = vld [vmem:[%s20651_s2 + $0x1e0] sm:$0xff]  }
  0xdd   : > { %14734 = vmatprep.subr.bf16.mxu1 %v16495_v2 }
  0xde   : > { %14431 = vmatmul.mubr.bf16.gmra.mrb[8].mxu0 %v17619_v62  ;;  %v16498_v62 = vld [vmem:[%s20651_s2 + $0x1b0] sm:$0xff]   ;;  %v1848_v28 = vsel %vm1582_vm2, %v1846_v52, %v1847_v7  ;;  %v2334_v52 = vrot.slane %v17863_v59, 3 }
  0xdf   : > { %14719 = vmatmul.mubr.bf16.gmra.mrb[8].mxu1 %v17626_v29  ;;  %14447 = vmatpush3.bf16.msra.mxu0 %v16494_v61  ;;  %v16499_v29 = vld [vmem:[%s20651_s2 + $0x1b0] sm:$0xff]   ;;  %v4206_v61 = vsel %vm1582_vm2, %v4203_v24, %v4205_v37 }
  0xe0   : > { %14735 = vmatpush3.bf16.msra.mxu1 %v16495_v2  ;;  %14448 = vmatprep.subr.bf16.mxu0 %v16496_v0  ;;  %v17881_v2 = vld [vmem:[%s16967_s10 + $0x80] sm:$0xff]  }
  0xe1   : > { %14736 = vmatprep.subr.bf16.mxu1 %v16497_v26  ;;  %14434 = vmatprep.mubr.bf16.mxu0 %v17636_v41  ;;  %v1599_v41 = vsel %vm1582_vm2, %v1596_v38, %v1598_v25  ;;  %v1849_v38 = vrot.slane %v17795_v63, 2  ;;  %v17900_v25 = vsel %vm2324_vm4, %v2328_v48, %v2330_v42  ;;  %v17966_v48 = vrot.slane %v2055_v20, 2 }
  0xe2   : > { %14722 = vmatprep.mubr.bf16.mxu1 %v17643_v30  ;;  %v4201_v30 = vrot.slane %v17784_v34, 2 }
  0xe3   : > { %14449 = vmatpush3.bf16.msra.mxu0 %v16496_v0  ;;  %v1850_v39 = vsel %vm1582_vm2, %v1847_v7, %v1849_v38  ;;  %v1852_v14 = vsel %vm1582_vm2, %v1849_v38, %v1851_v45  ;;  %v17884_v0 = vsel %vm2324_vm4, %v2325_v23, %v2326_v35  ;;  %v4684_v7 = vrot.slane %v17866_v60, 3  ;;  %v16517_v38 = vld [vmem:[%s20651_s2 + $0x1d0] sm:$0xff]  }
  0xe4   : > { %14737 = vmatpush3.bf16.msra.mxu1 %v16497_v26  ;;  %14450 = vmatprep.subr.bf16.mxu0 %v16498_v62  ;;  %v4202_v17 = vsel %vm1582_vm2, %v4200_v9, %v4201_v30  ;;  %v4204_v54 = vsel %vm1582_vm2, %v4201_v30, %v4203_v24  ;;  %v17897_v26 = vsel %vm2324_vm4, %v4675_v46, %v4676_v47  ;;  %v16519_v47 = vld [vmem:[%s20651_s2 + $0x1d8] sm:$0xff]   ;;  %v4415_v46 = vshrl.u32 %v17784_v34, 16 }
  0xe5   : > { %14738 = vmatprep.subr.bf16.mxu1 %v16499_v29  ;;  %v1854_v9 = vsel %vm1582_vm2, %v1851_v45, %v1853_v43  ;;  %v17919_v30 = vsel %vm2324_vm4, %v4680_v36, %v4682_v16  ;;  %v2066_v45 = vshll.u32 %v17776_v8, 16  ;;  %v16525_v8 = vld [vmem:[%s20651_s2 + $0x1e0] sm:$0xff]  }
  0xe6   : > { %14435 = vmatmul.mubr.bf16.gmra.mrb[12].mxu0 %v1599_v41  ;;  %v2336_v41 = vrot.slane %v17870_v3, 3 }
  0xe7   : > { %14723 = vmatmul.mubr.bf16.gmra.mrb[12].mxu1 %v3954_v18  ;;  %14451 = vmatpush3.bf16.msra.mxu0 %v16498_v62  ;;  %v17903_v62 = vsel %vm2324_vm4, %v4678_v1, %v4680_v36  ;;  %v4686_v18 = vrot.slane %v17881_v2, 3  ;;  %v2068_v23 = vrot.slane %v2066_v45, 3  ;;  %v1857_v1 = vrot.slane %v17870_v3, 2  ;;  %v16530_v36 = vld [vmem:[%s16967_s10 + $0x50] ss:$0 sps:$4 sm:$0x33]  }
  0xe8   : > { %14739 = vmatpush3.bf16.msra.mxu1 %v16499_v29  ;;  %14452 = vmatprep.subr.bf16.mxu0 %v16500_v10  ;;  %v17907_v29 = vld [vmem:[%s16967_s10 + $0x88] sm:$0xff]   ;;  %v1861_v45 = vrot.slane %v16530_v36, 2 }
  0xe9   : > { %14740 = vmatprep.subr.bf16.mxu1 %v16501_v56  ;;  %14454 = vmatprep.mubr.bf16.mxu0 %v1848_v28  ;;  %v17927_v28 = vsel %vm2324_vm4, %v2332_v51, %v2334_v52  ;;  %v4688_v24 = vrot.slane %v17907_v29, 3  ;;  %v17939_v32 = vsel %vm2324_vm4, %v4684_v7, %v4686_v18 }
  0xea   : > { %14742 = vmatprep.mubr.bf16.mxu1 %v4202_v17  ;;  %v17933_v17 = vsel %vm2324_vm4, %v2334_v52, %v2336_v41 }
  0xeb   : > { %14453 = vmatpush3.bf16.msra.mxu0 %v16500_v10  ;;  %v17910_v10 = vsel %vm2324_vm4, %v2330_v42, %v2332_v51  ;;  %v17951_v40 = vsel %vm2324_vm4, %v4686_v18, %v4688_v24  ;;  %v16526_v42 = vld [vmem:[%s20651_s2 + $0x1e8] sm:$0xff]   ;;  %v2072_v18 = vshrl.u32 %v17795_v63, 16 }
  0xec   : > { %14741 = vmatpush3.bf16.msra.mxu1 %v16501_v56  ;;  %14470 = vmatprep.subr.bf16.mxu0 %v16507_v31  ;;  %v2338_v56 = vrot.slane %v17894_v6, 3  ;;  %v16527_v51 = vld [vmem:[%s20651_s2 + $0x1e8] sm:$0xff]  }
  0xed   : > { %14758 = vmatprep.subr.bf16.mxu1 %v16509_v53 }
  0xee   : > { %14455 = vmatmul.mubr.bf16.vlgmr.msra.gmra.mrb[0].mxu0 %v1850_v39  ;;  %v17944_v35 = vsel %vm2324_vm4, %v2336_v41, %v2338_v56  ;;  %v4209_v39 = vrot.slane %v17866_v60, 2  ;;  %v4861_v41 = vld [vmem:[%s20650_s1 + $0x80] sm:$0xff] }
  0xef   : > { %14743 = vmatmul.mubr.bf16.vlgmr.msra.gmra.mrb[0].mxu1 %v4204_v54  ;;  %14471 = vmatpush3.bf16.msra.mxu0 %v16507_v31  ;;  %v17930_v31 = vsel %vm2324_vm4, %v4682_v16, %v4684_v7  ;;  %v16876_v54 = vmov 0   ;;  %v4418_v16 = vshll.u32 %v17784_v34, 16  ;;  %v16532_v7 = vld [vmem:[%s16967_s10 + $0x90] ss:$0 sps:$4 sm:$0x33]  }
  0xf0   : > { %14759 = vmatpush3.bf16.msra.mxu1 %v16509_v53  ;;  %14472 = vmatprep.subr.bf16.mxu0 %v16510_v27  ;;  %v1855_v53 = vrot.slane %v17863_v59, 2  ;;  %v4210_v20 = vsel %vm1582_vm2, %v4207_v44, %v4209_v39  ;;  %v1859_v44 = vrot.slane %v17894_v6, 2 }
  0xf1   : > { %14760 = vmatprep.subr.bf16.mxu1 %v16511_v58  ;;  %14458 = vmatprep.mubr.bf16.mxu0 %v1852_v14  ;;  %v2065_v14 = vrot.slane %v2063_v33, 2  ;;  %v4211_v33 = vrot.slane %v17881_v2, 2 }
  0xf2   : > { %14746 = vmatprep.mubr.bf16.mxu1 %v4206_v61  ;;  %16346 = vset.pattern.permute.xlu0 %v16876_v54  ;;  %v1856_v37 = vsel %vm1582_vm2, %v1853_v43, %v1855_v53  ;;  %v4410_v43 = vshll.u32 %v17781_v19, 16  ;;  %v2511_v61 = vld [vmem:[%s20650_s1] sm:$0xff]  ;;  %v1858_v19 = vsel %vm1582_vm2, %v1855_v53, %v1857_v1  ;;  %v4424_v53 = vshrl.u32 %v17809_v57, 16 }
  0xf3   : > { %14473 = vmatpush3.bf16.msra.mxu0 %v16510_v27  ;;  %v16518_v27 = vld [vmem:[%s20651_s2 + $0x1d8] sm:$0xff]   ;;  %16347 = vset.pattern.permute.xlu1 %v16876_v54  ;;  %v4212_v52 = vsel %vm1582_vm2, %v4209_v39, %v4211_v33  ;;  %v1860_v34 = vsel %vm1582_vm2, %v1857_v1, %v1859_v44  ;;  %v4427_v39 = vshll.u32 %v17809_v57, 16  ;;  %v4215_v54 = vrot.slane %v16532_v7, 2 }
  0xf4   : > { %14761 = vmatpush3.bf16.msra.mxu1 %v16511_v58  ;;  %14474 = vmatprep.subr.bf16.mxu0 %v16515_v4  ;;  %v17973_v58 = vrot.slane %v2058_v15, 3  ;;  %v17987_v15 = vrot.slane %v4407_v50, 2  ;;  %v2069_v1 = vor.u32 %v2068_v23, %v2065_v14  ;;  %v1862_v36 = vsel %vm1582_vm2, %v1859_v44, %v1861_v45  ;;  %v16534_v44 = vld [vmem:[%s20651_s2 + $0x1f8] sm:$0xff]   ;;  %v4863_v45 = vld [vmem:[%s20650_s1 + $0x90] sm:$0xff] }
  0xf5   : > { %14762 = vmatprep.subr.bf16.mxu1 %v16517_v38  ;;  %2529 = vperm.xlu0 %16346, %v2511_v61   ;;  %v4436_v23 = vshll.u32 %v17822_v12, 16 }
  0xf6   : > { %14459 = vmatmul.mubr.bf16.gmra.mrb[4].mxu0 %v1854_v9  ;;  %v18011_v9 = vrot.slane %v4410_v43, 3  ;;  %4879 = vperm.xlu1 %16347, %v4861_v41   ;;  %v2061_v57 = vor.u32 %v17973_v58, %v17966_v48  ;;  %v4426_v43 = vrot.slane %v4424_v53, 2  ;;  %v2084_v48 = vshll.u32 %v17812_v13, 16 }
  0xf7   : > { %14747 = vmatmul.mubr.bf16.gmra.mrb[4].mxu1 %v4208_v55  ;;  %14475 = vmatpush3.bf16.msra.mxu0 %v16515_v4  ;;  %v4213_v4 = vrot.slane %v17907_v29, 2  ;;  %v16531_v55 = vld [vmem:[%s20651_s2 + $0x1f0] sm:$0xff]   ;;  %v4433_v58 = vshrl.u32 %v17822_v12, 16  ;;  %v2090_v12 = vshrl.u32 %v17825_v22, 16  ;;  %v4438_v53 = vrot.slane %v4436_v23, 3 }
  0xf8   : > { %14763 = vmatpush3.bf16.msra.mxu1 %v16517_v38  ;;  %14476 = vmatprep.subr.bf16.mxu0 %v16518_v27  ;;  %v2075_v38 = vshll.u32 %v17795_v63, 16  ;;  %v4420_v63 = vrot.slane %v4418_v16, 3  ;;  %v4413_v61 = vor.u32 %v18011_v9, %v17987_v15  ;;  %v16535_v15 = vld [vmem:[%s20651_s2 + $0x1f8] sm:$0xff]   ;;  %v2086_v9 = vrot.slane %v2084_v48, 3 }
  0xf9   : > { %14764 = vmatprep.subr.bf16.mxu1 %v16519_v47  ;;  %14462 = vmatprep.mubr.bf16.mxu0 %v1856_v37  ;;  %v4214_v50 = vsel %vm1582_vm2, %v4211_v33, %v4213_v4  ;;  %v4862_v37 = vld [vmem:[%s20650_s1 + $0x88] sm:$0xff]  ;;  %v4864_v48 = vld [vmem:[%s20650_s1 + $0x98] sm:$0xff]  ;;  %v2120_v23 = vshll.u32 %v17894_v6, 16 }
  0xfa   : > { %14750 = vmatprep.mubr.bf16.mxu1 %v4210_v20  ;;  %v16533_v20 = vld [vmem:[%s20651_s2 + $0x1f0] sm:$0xff]   ;;  %v2077_v33 = vrot.slane %v2075_v38, 3  ;;  %4884 = vperm.xlu1 %16347, %v4862_v37  }
  0xfb   : > { %14477 = vmatpush3.bf16.msra.mxu0 %v16518_v27  ;;  %v4417_v27 = vrot.slane %v4415_v46, 2  ;;  %v2081_v46 = vshrl.u32 %v17812_v13, 16  ;;  %v4216_v13 = vsel %vm1582_vm2, %v4213_v4, %v4215_v54  ;;  %v16536_v4 = vld [vmem:[%s20651_s2 + $0x200] sm:$0xff]  }
  0xfc   : > { %14765 = vmatpush3.bf16.msra.mxu1 %v16519_v47  ;;  %14478 = vmatprep.subr.bf16.mxu0 %v16523_v11  ;;  %v18025_v47 = vld [vmem:[%s20650_s1 + $0x8] sm:$0xff] }
  0xfd   : > { %14766 = vmatprep.subr.bf16.mxu1 %v16525_v8  ;;  %2534 = vperm.xlu0 %16346, %v18025_v47   ;;  %v4421_v14 = vor.u32 %v4420_v63, %v4417_v27  ;;  %v2083_v41 = vrot.slane %v2081_v46, 2  ;;  %v2092_v27 = vrot.slane %v2090_v12, 2  ;;  %v2108_v46 = vshrl.u32 %v17870_v3, 16 }
  0xfe   : > { %14463 = vmatmul.mubr.bf16.gmra.mrb[8].mxu0 %v1858_v19  ;;  %v18046_v19 = vld [vmem:[%s20650_s1 + $0x10] sm:$0xff]  ;;  %4889 = vperm.xlu1 %16347, %v4863_v45  }
  0xff   : > { %14751 = vmatmul.mubr.bf16.gmra.mrb[8].mxu1 %v4212_v52  ;;  %14479 = vmatpush3.bf16.msra.mxu0 %v16523_v11  ;;  %v2074_v11 = vrot.slane %v2072_v18, 2  ;;  %v2093_v52 = vshll.u32 %v17825_v22, 16  ;;  %v4435_v18 = vrot.slane %v4433_v58, 2  ;;  %v4422_v38 = vsel %vm2053_vm5, %v4413_v61, %v4421_v14 }
 0x100   : > { %14767 = vmatpush3.bf16.msra.mxu1 %v16525_v8  ;;  %14480 = vmatprep.subr.bf16.mxu0 %v16526_v42  ;;  %v4429_v8 = vrot.slane %v4427_v39, 3  ;;  %v4445_v22 = vshll.u32 %v17832_v21, 16  ;;  %v2102_v39 = vshll.u32 %v17863_v59, 16  ;;  %v2087_v37 = vor.u32 %v2086_v9, %v2083_v41  ;;  %v16541_v41 = vld [vmem:[%s20651_s2 + $0x210] sm:$0xff]  }
 0x101   : > { %14768 = vmatprep.subr.bf16.mxu1 %v16527_v51  ;;  %14466 = vmatprep.mubr.bf16.mxu0 %v1860_v34  ;;  %v2078_v16 = vor.u32 %v2077_v33, %v2074_v11  ;;  %v2099_v34 = vshrl.u32 %v17863_v59, 16  ;;  %v2095_v63 = vrot.slane %v2093_v52, 3  ;;  %v16538_v59 = vld [vmem:[%s20651_s2 + $0x208] sm:$0xff]   ;;  %v4454_v11 = vshll.u32 %v17866_v60, 16 }
 0x102   : > { %14754 = vmatprep.mubr.bf16.mxu1 %v4214_v50  ;;  %v4430_v7 = vor.u32 %v4429_v8, %v4426_v43  ;;  %2539 = vperm.xlu0 %16346, %v18046_v19   ;;  %v18073_v50 = vld [vmem:[%s20650_s1 + $0x18] sm:$0xff]  ;;  %v4439_v33 = vor.u32 %v4438_v53, %v4435_v18  ;;  %v4447_v43 = vrot.slane %v4445_v22, 3  ;;  %v2111_v58 = vshll.u32 %v17870_v3, 16 }
 0x103   : > { %14481 = vmatpush3.bf16.msra.mxu0 %v16526_v42  ;;  %v2070_v42 = vsel %vm2053_vm5, %v2061_v57, %v2069_v1  ;;  %v2101_v8 = vrot.slane %v2099_v34, 2  ;;  %v4463_v61 = vshll.u32 %v17881_v2, 16  ;;  %v4456_v12 = vrot.slane %v4454_v11, 3  ;;  %4894 = vperm.xlu1 %16347, %v4864_v48   ;;  %v16542_v34 = vld [vmem:[%s20651_s2 + $0x218] sm:$0xff]   ;;  %v18135_v11 = vld [vmem:[%s20650_s1 + $0x28] sm:$0xff] }
 0x104   : > { %14769 = vmatpush3.bf16.msra.mxu1 %v16527_v51  ;;  %14482 = vmatprep.subr.bf16.mxu0 %v16531_v55  ;;  %v4442_v51 = vshrl.u32 %v17832_v21, 16  ;;  %v16537_v21 = vld [vmem:[%s20651_s2 + $0x200] sm:$0xff]   ;;  %v4431_v57 = vsel %vm2053_vm5, %v4421_v14, %v4430_v7  ;;  %v2117_v14 = vshrl.u32 %v17894_v6, 16  ;;  %v4469_v3 = vshrl.u32 %v17907_v29, 16  ;;  %v18368_v6 = vld [vmem:[%s20650_s1 + $0x78] sm:$0xff] }
 0x105   : > { %14770 = vmatprep.subr.bf16.mxu1 %v16533_v20  ;;  %v2096_v52 = vor.u32 %v2095_v63, %v2092_v27  ;;  %v2110_v9 = vrot.slane %v2108_v46, 2  ;;  %v2113_v18 = vrot.slane %v2111_v58, 3  ;;  %v4465_v53 = vrot.slane %v4463_v61, 3  ;;  %v16543_v63 = vld [vmem:[%s20651_s2 + $0x218] sm:$0xff]   ;;  %v16544_v46 = vld [vmem:[%s20651_s2 + $0x220] sm:$0xff]   ;;  %v18157_v61 = vld [vmem:[%s20650_s1 + $0x30] sm:$0xff] }
 0x106   : > { %14467 = vmatmul.mubr.bf16.gmra.mrb[12].mxu0 %v1862_v36  ;;  %v4444_v54 = vrot.slane %v4442_v51, 2  ;;  %2544 = vperm.xlu0 %16346, %v18073_v50   ;;  %v4460_v36 = vshrl.u32 %v17881_v2, 16  ;;  %v4440_v2 = vsel %vm2053_vm5, %v4430_v7, %v4439_v33  ;;  %v2119_v7 = vrot.slane %v2117_v14, 2 }
 0x107   : > { %14755 = vmatmul.mubr.bf16.gmra.mrb[12].mxu1 %v4216_v13  ;;  %14483 = vmatpush3.bf16.msra.mxu0 %v16531_v55  ;;  %v2079_v55 = vsel %vm2053_vm5, %v2069_v1, %v2078_v16  ;;  %v16539_v1 = vld [vmem:[%s20651_s2 + $0x208] sm:$0xff]   ;;  %v2088_v13 = vsel %vm2053_vm5, %v2078_v16, %v2087_v37  ;;  %v18110_v16 = vld [vmem:[%s20650_s1 + $0x20] sm:$0xff]  ;;  %v2122_v22 = vrot.slane %v2120_v23, 3  ;;  %v2097_v27 = vsel %vm2053_vm5, %v2087_v37, %v2096_v52 }
 0x108   : > { %14771 = vmatpush3.bf16.msra.mxu1 %v16533_v20  ;;  %14484 = vmatprep.subr.bf16.mxu0 %v16534_v44  ;;  %v4451_v20 = vshrl.u32 %v17866_v60, 16  ;;  %v2104_v60 = vrot.slane %v2102_v39, 3  ;;  %v4448_v51 = vor.u32 %v4447_v43, %v4444_v54 }
 0x109   : > { %14772 = vmatprep.subr.bf16.mxu1 %v16535_v15  ;;  %14486 = vmatprep.mubr.bf16.mxu0 %v2070_v42  ;;  %v18104_v42 = vld [vmem:[%s16967_s10 + $0x50] ss:$0 sps:$4 sm:$0x77]  }
 0x10a   : > { %14774 = vmatprep.mubr.bf16.mxu1 %v4422_v38  ;;  %v4462_v38 = vrot.slane %v4460_v36, 2  ;;  %v2105_v45 = vor.u32 %v2104_v60, %v2101_v8  ;;  %2549 = vperm.xlu0 %16346, %v18110_v16   ;;  %v2126_v54 = vshrl.u32 %v18104_v42, 16  ;;  %v2114_v8 = vor.u32 %v2113_v18, %v2110_v9  ;;  %v18152_v36 = vld [vmem:[%s20650_s1 + $0xa8] sm:$0xff]  ;;  %v16549_v18 = vld [vmem:[%s20651_s2 + $0x230] sm:$0xff]  }
 0x10b   : > { %14485 = vmatpush3.bf16.msra.mxu0 %v16534_v44  ;;  %v16540_v44 = vld [vmem:[%s20651_s2 + $0x210] sm:$0xff]  }
 0x10c   : > { %14773 = vmatpush3.bf16.msra.mxu1 %v16535_v15  ;;  %14502 = vmatprep.subr.bf16.mxu0 %v16536_v4  ;;  %v4453_v15 = vrot.slane %v4451_v20, 2  ;;  %v18130_v20 = vld [vmem:[%s16967_s10 + $0x90] ss:$0 sps:$4 sm:$0x77]   ;;  %v2106_v37 = vsel %vm2053_vm5, %v2096_v52, %v2105_v45  ;;  %v2128_v48 = vrot.slane %v2126_v54, 2  ;;  %v4466_v14 = vor.u32 %v4465_v53, %v4462_v38  ;;  %v16556_v54 = vld [vmem:[%s20651_s2 + $0x40] sm:$0xff]  }
 0x10d   : > { %14790 = vmatprep.subr.bf16.mxu1 %v16537_v21  ;;  %v4478_v60 = vshrl.u32 %v18130_v20, 16  ;;  %v4481_v58 = vshll.u32 %v18130_v20, 16  ;;  %v2115_v23 = vsel %vm2053_vm5, %v2105_v45, %v2114_v8  ;;  %v16552_v45 = vld [vmem:[%s20651_s2 + $0x238] sm:$0xff]  }
 0x10e   : > { %14487 = vmatmul.mubr.bf16.vlgmr.msra.gmra.mrb[0].mxu0 %v2079_v55  ;;  %v4457_v39 = vor.u32 %v4456_v12, %v4453_v15  ;;  %v4471_v55 = vrot.slane %v4469_v3, 2  ;;  %2554 = vperm.xlu0 %16346, %v18135_v11   ;;  %v16547_v15 = vld [vmem:[%s20651_s2 + $0x228] sm:$0xff]  }
 0x10f   : > { %14775 = vmatmul.mubr.bf16.vlgmr.msra.gmra.mrb[0].mxu1 %v4431_v57  ;;  %14503 = vmatpush3.bf16.msra.mxu0 %v16536_v4  ;;  %v4865_v4 = vld [vmem:[%s20650_s1 + $0xa0] sm:$0xff]  ;;  %v2129_v57 = vshll.u32 %v18104_v42, 16  ;;  %v4483_v52 = vrot.slane %v4481_v58, 3 }
 0x110   : > { %14791 = vmatpush3.bf16.msra.mxu1 %v16537_v21  ;;  %14504 = vmatprep.subr.bf16.mxu0 %v16538_v59  ;;  %v4472_v21 = vshll.u32 %v17907_v29, 16  ;;  %v4458_v43 = vsel %vm2053_vm5, %v4448_v51, %v4457_v39  ;;  %v18376_v29 = vld [vmem:[%s20650_s1 + $0xf8] sm:$0xff] }
 0x111   : > { %14792 = vmatprep.subr.bf16.mxu1 %v16539_v1  ;;  %14490 = vmatprep.mubr.bf16.mxu0 %v2088_v13  ;;  %v2123_v13 = vor.u32 %v2122_v22, %v2119_v7  ;;  %v2131_v3 = vrot.slane %v2129_v57, 3  ;;  %v18186_v7 = vld [vmem:[%s20650_s1 + $0x38] sm:$0xff]  ;;  %v5065_v57 = vld [vmem:[%s16967_s10 + $0x80] sm:$0xf] }
 0x112   : > { %14778 = vmatprep.mubr.bf16.mxu1 %v4440_v2  ;;  %4899 = vperm.xlu1 %16347, %v4865_v4   ;;  %v4480_v2 = vrot.slane %v4478_v60, 2  ;;  %v16551_v4 = vld [vmem:[%s20651_s2 + $0x230] sm:$0xff]   ;;  %v18191_v22 = vld [vmem:[%s20650_s1 + $0xb8] sm:$0xff] }
 0x113   : > { %14505 = vmatpush3.bf16.msra.mxu0 %v16538_v59  ;;  %v4449_v59 = vsel %vm2053_vm5, %v4439_v33, %v4448_v51  ;;  %v4474_v33 = vrot.slane %v4472_v21, 3  ;;  %2559 = vperm.xlu0 %16346, %v18157_v61   ;;  %v18171_v51 = vld [vmem:[%s20650_s1 + $0xb0] sm:$0xff]  ;;  %v2124_v9 = vsel %vm2053_vm5, %v2114_v8, %v2123_v13  ;;  %v2132_v53 = vor.u32 %v2131_v3, %v2128_v48  ;;  %v18205_v21 = vld [vmem:[%s20650_s1 + $0x40] sm:$0xff] }
 0x114   : > { %14793 = vmatpush3.bf16.msra.mxu1 %v16539_v1  ;;  %14506 = vmatprep.subr.bf16.mxu0 %v16540_v44  ;;  %v16545_v1 = vld [vmem:[%s20651_s2 + $0x220] sm:$0xff]   ;;  %v18250_v48 = vld [vmem:[%s20650_s1 + $0x50] sm:$0xff] }
 0x115   : > { %14794 = vmatprep.subr.bf16.mxu1 %v16541_v41  ;;  %v4475_v12 = vor.u32 %v4474_v33, %v4471_v55  ;;  %v16553_v55 = vld [vmem:[%s20651_s2 + $0x238] sm:$0xff]   ;;  %v16558_v60 = vld [vmem:[%s20651_s2 + $0x50] sm:$0xff]  }
 0x116   : > { %14491 = vmatmul.mubr.bf16.gmra.mrb[4].mxu0 %v2097_v27  ;;  %4904 = vperm.xlu1 %16347, %v18152_v36   ;;  %v18323_v3 = vld [vmem:[%s16967_s10 + $0x90] ss:$0 sps:$4 sm:$0x11]  }
 0x117   : > { %14779 = vmatmul.mubr.bf16.gmra.mrb[4].mxu1 %v4449_v59  ;;  %14507 = vmatpush3.bf16.msra.mxu0 %v16540_v44  ;;  %v16546_v44 = vld [vmem:[%s20651_s2 + $0x228] sm:$0xff]   ;;  %v4476_v38 = vsel %vm2053_vm5, %v4466_v14, %v4475_v12  ;;  %v18218_v59 = vld [vmem:[%s16967_s10 + $0x84] sm:$0xf] }
 0x118   : > { %14795 = vmatpush3.bf16.msra.mxu1 %v16541_v41  ;;  %14508 = vmatprep.subr.bf16.mxu0 %v16542_v34  ;;  %v4467_v41 = vsel %vm2053_vm5, %v4457_v39, %v4466_v14  ;;  %v2133_v39 = vsel %vm2053_vm5, %v2123_v13, %v2132_v53  ;;  %v18233_v8 = vcombine.low %v5065_v57, %v18218_v59  ;;  %v18262_v14 = vld [vmem:[%s20650_s1 + $0xd0] sm:$0xff]  ;;  %v16560_v13 = vld [vmem:[%s20651_s2 + $0x60] sm:$0xff]   ;;  %v16572_v57 = vld [vmem:[%s20651_s2 + $0x28] sm:$0xff]  }
 0x119   : > { %14796 = vmatprep.subr.bf16.mxu1 %v16543_v63  ;;  %14494 = vmatprep.mubr.bf16.mxu0 %v2106_v37  ;;  %v18224_v37 = vld [vmem:[%s20650_s1 + $0x48] sm:$0xff] }
 0x11a   : > { %14782 = vmatprep.mubr.bf16.mxu1 %v4458_v43  ;;  %4909 = vperm.xlu1 %16347, %v18171_v51   ;;  %v16557_v43 = vld [vmem:[%s20651_s2 + $0x48] sm:$0xff]   ;;  %v5116_v33 = vshrl.u32 %v18233_v8, 16  ;;  %v5118_v58 = vshll.u32 %v18233_v8, 16 }
 0x11b   : > { %14509 = vmatpush3.bf16.msra.mxu0 %v16542_v34  ;;  %v4484_v34 = vor.u32 %v4483_v52, %v4480_v2  ;;  %2564 = vperm.xlu0 %16346, %v18186_v7   ;;  %v16562_v2 = vld [vmem:[%s20651_s2 + $0x70] sm:$0xff]  }
 0x11c   : > { %14797 = vmatpush3.bf16.msra.mxu1 %v16543_v63  ;;  %14510 = vmatprep.subr.bf16.mxu0 %v16544_v46  ;;  %v18211_v63 = vld [vmem:[%s20650_s1 + $0xc0] sm:$0xff] }
 0x11d   : > { %14798 = vmatprep.subr.bf16.mxu1 %v16545_v1  ;;  %v4485_v27 = vsel %vm2053_vm5, %v4475_v12, %v4484_v34  ;;  %v5120_v12 = vrot.slane %v5118_v58, 1  ;;  %v16569_v34 = vld [vmem:[%s20651_s2 + $0x10] sm:$0xff]   ;;  %v16578_v58 = vld [vmem:[%s20651_s2 + $0x98] sm:$0xff]  }
 0x11e   : > { %14495 = vmatmul.mubr.bf16.gmra.mrb[8].mxu0 %v2115_v23  ;;  %4914 = vperm.xlu1 %16347, %v18191_v22  }
 0x11f   : > { %14783 = vmatmul.mubr.bf16.gmra.mrb[8].mxu1 %v4467_v41  ;;  %14511 = vmatpush3.bf16.msra.mxu0 %v16544_v46  ;;  %v18239_v46 = vld [vmem:[%s20650_s1 + $0xc8] sm:$0xff]  ;;  %v18335_v41 = vld [vmem:[%s20650_s1 + $0xf0] sm:$0xff] }
 0x120   : > { %14799 = vmatpush3.bf16.msra.mxu1 %v16545_v1  ;;  %14512 = vmatprep.subr.bf16.mxu0 %v16546_v44  ;;  %v18244_v1 = vld [vmem:[%s16967_s10 + $0x88] sm:$0xff]  }
 0x121   : > { %14800 = vmatprep.subr.bf16.mxu1 %v16547_v15  ;;  %14498 = vmatprep.mubr.bf16.mxu0 %v2124_v9  ;;  %v5123_v23 = vshll.u32 %v18244_v1, 16  ;;  %v5121_v9 = vor.u32 %v5120_v12, %v5116_v33  ;;  %v16581_v12 = vld [vmem:[%s20651_s2 + $0xb0] sm:$0xff]  }
 0x122   : > { %14786 = vmatprep.mubr.bf16.mxu1 %v4476_v38  ;;  %2569 = vperm.xlu0 %16346, %v18205_v21  }
 0x123   : > { %14513 = vmatpush3.bf16.msra.mxu0 %v16546_v44  ;;  %4919 = vperm.xlu1 %16347, %v18211_v63   ;;  %v5127_v44 = vshrl.u32 %v18244_v1, 16  ;;  %v5125_v52 = vrot.slane %v5123_v23, 1  ;;  %v16864_v23 = vld [vmem:[%s20650_s1 + $0x88] sm:$0xff] }
 0x124   : > { %14801 = vmatpush3.bf16.msra.mxu1 %v16547_v15  ;;  %14514 = vmatprep.subr.bf16.mxu0 %v16549_v18  ;;  %v18298_v15 = vld [vmem:[%s20650_s1 + $0xe0] sm:$0xff] }
 0x125   : > { %14802 = vmatprep.subr.bf16.mxu1 %v16551_v4 }
 0x126   : > { %14499 = vmatmul.mubr.bf16.gmra.mrb[12].mxu0 %v2133_v39  ;;  %2574 = vperm.xlu0 %16346, %v18224_v37   ;;  %v16570_v39 = vld [vmem:[%s20651_s2 + $0x18] sm:$0xff]  }
 0x127   : > { %14787 = vmatmul.mubr.bf16.gmra.mrb[12].mxu1 %v4485_v27  ;;  %14515 = vmatpush3.bf16.msra.mxu0 %v16549_v18  ;;  %v5131_v18 = vshll.u32 %v18323_v3, 16  ;;  %v16862_v27 = vld [vmem:[%s20650_s1] sm:$0xff] }
 0x128   : > { %14803 = vmatpush3.bf16.msra.mxu1 %v16551_v4  ;;  %14516 = vmatprep.subr.bf16.mxu0 %v16552_v45  ;;  %v16568_v4 = vld [vmem:[%s20651_s2 + $0x8] sm:$0xff]  }
 0x129   : > { %14804 = vmatprep.subr.bf16.mxu1 %v16553_v55  ;;  %14518 = vmatprep.mubr.bf16.mxu0 %v17884_v0  ;;  %v2340_v0 = vrot.slane %v18104_v42, 3  ;;  %v5129_v42 = vor.u32 %v5127_v44, %v5125_v52  ;;  %v16866_v44 = vld [vmem:[%s20650_s1 + $0x98] sm:$0xff] }
 0x12a   : > { %14806 = vmatprep.mubr.bf16.mxu1 %v17897_v26  ;;  %v4690_v26 = vrot.slane %v18130_v20, 3  ;;  %4924 = vperm.xlu1 %16347, %v18239_v46   ;;  %v5133_v20 = vrot.slane %v5131_v18, 1 }
 0x12b   : > { %14517 = vmatpush3.bf16.msra.mxu0 %v16552_v45  ;;  %2579 = vperm.xlu0 %16346, %v18250_v48   ;;  %v18394_v45 = vld [vmem:[%s20650_s1 + $0x110] sm:$0xff] }
 0x12c   : > { %14805 = vmatpush3.bf16.msra.mxu1 %v16553_v55  ;;  %14822 = vmatprep.subr.bf16.mxu0 %v16556_v54  ;;  %v4691_v38 = vsel %vm2324_vm4, %v4688_v24, %v4690_v26  ;;  %v16566_v24 = vld [vmem:[%s20651_s2] sm:$0xff]   ;;  %v5134_v53 = vsel %vm444_vm0, %v5129_v42, %v5133_v20  ;;  %v18403_v55 = vld [vmem:[%s20650_s1 + $0x118] sm:$0xff] }
 0x12d   : > { %v16594_v42 = vld [vmem:[%s20651_s2 + $0x100] sm:$0xff]  }
 0x12e   : > { %14519 = vmatmul.mubr.bf16.vlgmr.msra.gmra.mrb[0].mxu0 %v17873_v49  ;;  %v18268_v49 = vld [vmem:[%s20650_s1 + $0x58] sm:$0xff]  ;;  %4929 = vperm.xlu1 %16347, %v18262_v14  }
 0x12f   : > { %14807 = vmatmul.mubr.bf16.vlgmr.msra.gmra.mrb[0].mxu1 %v17887_v5  ;;  %14823 = vmatpush3.bf16.msra.mxu0 %v16556_v54  ;;  %v16559_v5 = vld [vmem:[%s20651_s2 + $0x58] sm:$0xff]   ;;  %v16571_v54 = vld [vmem:[%s20651_s2 + $0x20] sm:$0xff]  }
 0x130   : > { %14824 = vmatprep.subr.bf16.mxu0 %v16557_v43  ;;  %14522 = vmatprep.mubr.bf16.mxu0 %v17900_v25  ;;  %v18280_v25 = vld [vmem:[%s20650_s1 + $0xd8] sm:$0xff] }
 0x131   : > { %14810 = vmatprep.mubr.bf16.mxu1 %v17903_v62  ;;  %v18285_v62 = vld [vmem:[%s20650_s1 + $0x60] sm:$0xff]  ;;  %2584 = vperm.xlu0 %16346, %v18268_v49  }
 0x132   : > { %4934 = vperm.xlu1 %16347, %v18280_v25  }
 0x133   : > { %14825 = vmatpush3.bf16.msra.mxu0 %v16557_v43  ;;  %v16573_v43 = vld [vmem:[%s20651_s2 + $0x30] sm:$0xff]  }
 0x134   : > { %14826 = vmatprep.subr.bf16.mxu0 %v16558_v60 }
 0x135   : > { %2589 = vperm.xlu0 %16346, %v18285_v62  }
 0x136   : > { %14523 = vmatmul.mubr.bf16.gmra.mrb[4].mxu0 %v17910_v10  ;;  %v18304_v10 = vld [vmem:[%s20650_s1 + $0x68] sm:$0xff]  ;;  %4939 = vperm.xlu1 %16347, %v18298_v15  }
 0x137   : > { %14811 = vmatmul.mubr.bf16.gmra.mrb[4].mxu1 %v17919_v30  ;;  %14827 = vmatpush3.bf16.msra.mxu0 %v16558_v60  ;;  %v16561_v30 = vld [vmem:[%s20651_s2 + $0x68] sm:$0xff]  }
 0x138   : > { %14828 = vmatprep.subr.bf16.mxu0 %v16559_v5  ;;  %14526 = vmatprep.mubr.bf16.mxu0 %v17927_v28  ;;  %v18315_v28 = vld [vmem:[%s20650_s1 + $0xe8] sm:$0xff] }
 0x139   : > { %14814 = vmatprep.mubr.bf16.mxu1 %v17930_v31  ;;  %v18320_v31 = vld [vmem:[%s20650_s1 + $0x70] sm:$0xff]  ;;  %2594 = vperm.xlu0 %16346, %v18304_v10  }
 0x13a   : > { %4944 = vperm.xlu1 %16347, %v18315_v28  }
 0x13b   : > { %14829 = vmatpush3.bf16.msra.mxu0 %v16559_v5  ;;  %v16579_v5 = vld [vmem:[%s20651_s2 + $0xa0] sm:$0xff]  }
 0x13c   : > { %14830 = vmatprep.subr.bf16.mxu0 %v16560_v13 }
 0x13d   : > { %2599 = vperm.xlu0 %16346, %v18320_v31  }
 0x13e   : > { %14527 = vmatmul.mubr.bf16.gmra.mrb[8].mxu0 %v17933_v17  ;;  %v18341_v17 = vld [vmem:[%s20650_s1 + $0x100] sm:$0xff]  ;;  %4949 = vperm.xlu1 %16347, %v18335_v41  }
 0x13f   : > { %14815 = vmatmul.mubr.bf16.gmra.mrb[8].mxu1 %v17939_v32  ;;  %14831 = vmatpush3.bf16.msra.mxu0 %v16560_v13  ;;  %v16563_v32 = vld [vmem:[%s20651_s2 + $0x78] sm:$0xff]   ;;  %v16580_v13 = vld [vmem:[%s20651_s2 + $0xa8] sm:$0xff]  }
 0x140   : > { %14832 = vmatprep.subr.bf16.mxu0 %v16561_v30  ;;  %14530 = vmatprep.mubr.bf16.mxu0 %v17944_v35  ;;  %v2341_v35 = vsel %vm2324_vm4, %v2338_v56, %v2340_v0  ;;  %v5126_v56 = vsel %vm444_vm0, %v5121_v9, %v5125_v52  ;;  %v18437_v0 = vld [vmem:[%s16967_s10 + $0x90] sm:$0xff]   ;;  %v16584_v9 = vld [vmem:[%s20651_s2 + $0xc0] sm:$0xff]  }
 0x141   : > { %14818 = vmatprep.mubr.bf16.mxu1 %v17951_v40  ;;  %v18358_v40 = vld [vmem:[%s20650_s1 + $0x108] sm:$0xff]  ;;  %6305 = vperm.xlu0 %16346, %v18341_v17  }
 0x142   : > { %6310 = vperm.xlu1 %16347, %v18358_v40  }
 0x143   : > { %14833 = vmatpush3.bf16.msra.mxu0 %v16561_v30  ;;  %v16867_v30 = vld [vmem:[%s20650_s1 + $0xa0] sm:$0xff] }
 0x144   : > { %14834 = vmatprep.subr.bf16.mxu0 %v16562_v2 }
 0x145   : > { %2604 = vperm.xlu0 %16346, %v18368_v6  }
 0x146   : > { %14531 = vmatmul.mubr.bf16.gmra.mrb[12].mxu0 %v2341_v35  ;;  %4954 = vperm.xlu1 %16347, %v18376_v29  }
 0x147   : > { %14819 = vmatmul.mubr.bf16.gmra.mrb[12].mxu1 %v4691_v38  ;;  %14835 = vmatpush3.bf16.msra.mxu0 %v16562_v2  ;;  %v16582_v2 = vld [vmem:[%s20651_s2 + $0xb8] sm:$0xff]  }
 0x148   : > { %14836 = vmatprep.subr.bf16.mxu0 %v16563_v32  ;;  %14838 = vmatprep.mubr.bf16.mxu0 %v5126_v56  ;;  %v16591_v56 = vld [vmem:[%s20651_s2 + $0xf8] sm:$0xff]  }
 0x149   : > { %6315 = vperm.xlu0 %16346, %v18394_v45  }
 0x14a   : > { %6320 = vperm.xlu1 %16347, %v18403_v55  }
 0x14b   : > { %14837 = vmatpush3.bf16.msra.mxu0 %v16563_v32  ;;  %v5635_v32 = vshll.u32 %v18437_v0, 16 }
 0x14c   : > { %14842 = vmatprep.subr.bf16.mxu0 %v16566_v24 }
 0x14d   : > { %6465 = vperm.xlu0 %16346, %v16862_v27   ;;  %v10582_v27 = vld [vmem:[%s20650_s1 + $0x88] sm:$0xff] }
 0x14e   : > { %14839 = vmatmul.mubr.bf16.vlgmr.msra.gmra.mrb[16].mxu0 %v5134_v53  ;;  %6470 = vperm.xlu1 %16347, %v18025_v47   ;;  %v5333_v47 = vld [vmem:[%s16967_s10 + $0x80] sm:$0xe] }
 0x14f   : > { %14843 = vmatpush3.bf16.msra.mxu0 %v16566_v24  ;;  %14858 = vmatprep.mubr.bf16.mxu0 %v18233_v8  ;;  %v5462_v8 = vld [vmem:[%s16967_s10 + $0x8c] sm:$0xf] }
 0x150   : > { %14844 = vmatprep.subr.bf16.mxu0 %v16568_v4 }
 0x151   : > { %6475 = vperm.xlu0 %16346, %v18046_v19   ;;  %v16574_v19 = vld [vmem:[%s20651_s2 + $0x38] sm:$0xff]  }
 0x152   : > { %6480 = vperm.xlu1 %16347, %v18073_v50   ;;  %v12725_v50 = vcombine.low %v5333_v47, %v18218_v59  ;;  %v5752_v59 = vld [vmem:[%s16967_s10 + $0x88] sm:$0xc]  ;;  %v16598_v47 = vld [vmem:[%s20651_s2 + $0x118] sm:$0xff]  }
 0x153   : > { %14845 = vmatpush3.bf16.msra.mxu0 %v16568_v4  ;;  %v12802_v26 = vcombine.low %v5752_v59, %v5462_v8  ;;  %v8601_v4 = vld [vmem:[%s20650_s1 + $0x8] sm:$0xff] }
 0x154   : > { %14846 = vmatprep.subr.bf16.mxu0 %v16569_v34  ;;  %v8605_v59 = vld [vmem:[%s20650_s1 + $0x28] sm:$0xff] }
 0x155   : > { %6485 = vperm.xlu0 %16346, %v18110_v16   ;;  %v5354_v16 = vrot.slane %v18244_v1, 1  ;;  %v5772_v60 = vrot.slane %v12802_v26, 2  ;;  %v16600_v26 = vld [vmem:[%s20651_s2 + $0x128] sm:$0xff]  }
 0x156   : > { %6490 = vperm.xlu1 %16347, %v18135_v11   ;;  %v16575_v11 = vld [vmem:[%s20651_s2 + $0x80] sm:$0xff]  }
 0x157   : > { %14847 = vmatpush3.bf16.msra.mxu0 %v16569_v34  ;;  %v16596_v34 = vld [vmem:[%s20651_s2 + $0x108] sm:$0xff]  }
 0x158   : > { %14848 = vmatprep.subr.bf16.mxu0 %v16570_v39 }
 0x159   : > { %6495 = vperm.xlu0 %16346, %v18157_v61   ;;  %v5353_v61 = vrot.slane %v12725_v50, 1  ;;  %v10584_v50 = vld [vmem:[%s20650_s1 + $0x98] sm:$0xff] }
 0x15a   : > { %6500 = vperm.xlu1 %16347, %v18186_v7   ;;  %v5773_v7 = vrot.slane %v18437_v0, 2 }
 0x15b   : > { %14849 = vmatpush3.bf16.msra.mxu0 %v16570_v39  ;;  %v5355_v33 = vsel %vm840_vm1, %v5353_v61, %v5354_v16  ;;  %v10581_v39 = vld [vmem:[%s20650_s1 + $0x80] sm:$0xff]  ;;  %v18590_v61 = vld [vmem:[%s16967_s10 + $0x98] ss:$0 sps:$4 sm:$0x33]  }
 0x15c   : > { %14850 = vmatprep.subr.bf16.mxu0 %v16571_v54 }
 0x15d   : > { %6505 = vperm.xlu0 %16346, %v18205_v21   ;;  %v16576_v21 = vld [vmem:[%s20651_s2 + $0x88] sm:$0xff]  }
 0x15e   : > { %6510 = vperm.xlu1 %16347, %v18224_v37   ;;  %v18455_v37 = vsel %vm1582_vm2, %v5772_v60, %v5773_v7 }
 0x15f   : > { %14851 = vmatpush3.bf16.msra.mxu0 %v16571_v54  ;;  %v8602_v54 = vld [vmem:[%s20650_s1 + $0x10] sm:$0xff] }
 0x160   : > { %14852 = vmatprep.subr.bf16.mxu0 %v16572_v57 }
 0x161   : > { %6515 = vperm.xlu0 %16346, %v18250_v48   ;;  %v16577_v48 = vld [vmem:[%s20651_s2 + $0x90] sm:$0xff]  }
 0x162   : > { %6520 = vperm.xlu1 %16347, %v18268_v49   ;;  %v16863_v49 = vld [vmem:[%s20650_s1 + $0x80] sm:$0xff] }
 0x163   : > { %14853 = vmatpush3.bf16.msra.mxu0 %v16572_v57  ;;  %v16597_v57 = vld [vmem:[%s20651_s2 + $0x110] sm:$0xff]  }
 0x164   : > { %14854 = vmatprep.subr.bf16.mxu0 %v16573_v43 }
 0x165   : > { %6525 = vperm.xlu0 %16346, %v18285_v62   ;;  %v16865_v62 = vld [vmem:[%s20650_s1 + $0x90] sm:$0xff] }
 0x166   : > { %6530 = vperm.xlu1 %16347, %v18304_v10   ;;  %v5461_v10 = vld [vmem:[%s16967_s10 + $0x88] sm:$0xe] }
 0x167   : > { %14855 = vmatpush3.bf16.msra.mxu0 %v16573_v43  ;;  %v12750_v52 = vcombine.low %v5461_v10, %v5462_v8  ;;  %v10583_v43 = vld [vmem:[%s20650_s1 + $0x90] sm:$0xff]  ;;  %v10585_v8 = vld [vmem:[%s20650_s1 + $0xa0] sm:$0xff] }
 0x168   : > { %14856 = vmatprep.subr.bf16.mxu0 %v16574_v19 }
 0x169   : > { %6535 = vperm.xlu0 %16346, %v18320_v31   ;;  %v5356_v31 = vrot.slane %v18323_v3, 1  ;;  %v5496_v3 = vrot.slane %v18437_v0, 1 }
 0x16a   : > { %6540 = vperm.xlu1 %16347, %v18368_v6   ;;  %v5637_v6 = vrot.slane %v5635_v32, 2  ;;  %v8610_v32 = vld [vmem:[%s20650_s1 + $0x50] sm:$0xff] }
 0x16b   : > { %14857 = vmatpush3.bf16.msra.mxu0 %v16574_v19  ;;  %v8603_v19 = vld [vmem:[%s20650_s1 + $0x18] sm:$0xff] }
 0x16c   : > { %14862 = vmatprep.subr.bf16.mxu0 %v16575_v11 }
 0x16d   : > { %6657 = vperm.xlu0 %16346, %v16863_v49   ;;  %v5644_v49 = vshll.u32 %v18590_v61, 16 }
 0x16e   : > { %14859 = vmatmul.mubr.bf16.vlgmr.msra.gmra.mrb[16].mxu0 %v18244_v1  ;;  %6662 = vperm.xlu1 %16347, %v16864_v23   ;;  %v5624_v1 = vshrl.u32 %v12750_v52, 16  ;;  %v10587_v23 = vld [vmem:[%s20650_s1 + $0xb0] sm:$0xff] }
 0x16f   : > { %14863 = vmatpush3.bf16.msra.mxu0 %v16575_v11  ;;  %14878 = vmatprep.mubr.bf16.mxu0 %v5355_v33  ;;  %v8604_v11 = vld [vmem:[%s20650_s1 + $0x20] sm:$0xff]  ;;  %v8606_v33 = vld [vmem:[%s20650_s1 + $0x30] sm:$0xff]  ;;  %v5646_v10 = vrot.slane %v5644_v49, 2 }
 0x170   : > { %14864 = vmatprep.subr.bf16.mxu0 %v16576_v21  ;;  %v5626_v35 = vrot.slane %v5624_v1, 1  ;;  %v16613_v49 = vld [vmem:[%s20651_s2 + $0x180] sm:$0xff]  }
 0x171   : > { %6667 = vperm.xlu0 %16346, %v16865_v62   ;;  %v8607_v62 = vld [vmem:[%s20650_s1 + $0x38] sm:$0xff] }
 0x172   : > { %6672 = vperm.xlu1 %16347, %v16866_v44  }
 0x173   : > { %14865 = vmatpush3.bf16.msra.mxu0 %v16576_v21  ;;  %v10586_v21 = vld [vmem:[%s20650_s1 + $0xa8] sm:$0xff] }
 0x174   : > { %14866 = vmatprep.subr.bf16.mxu0 %v16577_v48  ;;  %v18607_v60 = vpop.permute.xlu0 %2529 }
 0x175   : > { %6677 = vperm.xlu0 %16346, %v16867_v30   ;;  %v10588_v30 = vld [vmem:[%s20650_s1 + $0xb8] sm:$0xff] }
 0x176   : > { %6682 = vperm.xlu1 %16347, %v18152_v36   ;;  %v5495_v36 = vrot.slane %v12750_v52, 1 }
 0x177   : > { %14867 = vmatpush3.bf16.msra.mxu0 %v16577_v48  ;;  %v16601_v48 = vld [vmem:[%s20651_s2 + $0x130] sm:$0xff]  }
 0x178   : > { %14868 = vmatprep.subr.bf16.mxu0 %v16578_v58 }
 0x179   : > { %6687 = vperm.xlu0 %16346, %v18171_v51   ;;  %v5357_v51 = vsel %vm840_vm1, %v5354_v16, %v5356_v31  ;;  %v16599_v16 = vld [vmem:[%s20651_s2 + $0x120] sm:$0xff]  }
 0x17a   : > { %6692 = vperm.xlu1 %16347, %v18191_v22   ;;  %v16585_v22 = vld [vmem:[%s20651_s2 + $0xc8] sm:$0xff]   ;;  %v8608_v31 = vld [vmem:[%s20650_s1 + $0x40] sm:$0xff] }
 0x17b   : > { %14869 = vmatpush3.bf16.msra.mxu0 %v16578_v58  ;;  %v5641_v58 = vshrl.u32 %v18590_v61, 16 }
 0x17c   : > { %14870 = vmatprep.subr.bf16.mxu0 %v16579_v5 }
 0x17d   : > { %6697 = vperm.xlu0 %16346, %v18211_v63   ;;  %v5497_v63 = vsel %vm840_vm1, %v5495_v36, %v5496_v3  ;;  %v5643_v44 = vrot.slane %v5641_v58, 1  ;;  %v18639_v36 = vld [vmem:[%s16967_s10 + $0x98] sm:$0xff]  }
 0x17e   : > { %6702 = vperm.xlu1 %16347, %v18239_v46   ;;  %v16586_v46 = vld [vmem:[%s20651_s2 + $0xd0] sm:$0xff]   ;;  %v10596_v58 = vld [vmem:[%s20650_s1 + $0xf8] sm:$0xff] }
 0x17f   : > { %14871 = vmatpush3.bf16.msra.mxu0 %v16579_v5  ;;  %v18614_v5 = vpop.permute.xlu1 %4879 }
 0x180   : > { %14872 = vmatprep.subr.bf16.mxu0 %v16580_v13 }
 0x181   : > { %6707 = vperm.xlu0 %16346, %v18262_v14   ;;  %v5627_v14 = vshll.u32 %v12750_v52, 16  ;;  %v16603_v52 = vld [vmem:[%s20651_s2 + $0x140] sm:$0xff]  }
 0x182   : > { %6712 = vperm.xlu1 %16347, %v18280_v25   ;;  %v16587_v25 = vld [vmem:[%s20651_s2 + $0xd8] sm:$0xff]  }
 0x183   : > { %14873 = vmatpush3.bf16.msra.mxu0 %v16580_v13  ;;  %v5629_v18 = vrot.slane %v5627_v14, 2  ;;  %v16602_v13 = vld [vmem:[%s20651_s2 + $0x138] sm:$0xff]  }
 0x184   : > { %14874 = vmatprep.subr.bf16.mxu0 %v16581_v12 }
 0x185   : > { %6717 = vperm.xlu0 %16346, %v18298_v15   ;;  %v5632_v15 = vshrl.u32 %v18437_v0, 16  ;;  %v5630_v24 = vor.u32 %v5629_v18, %v5626_v35 }
 0x186   : > { %6722 = vperm.xlu1 %16347, %v18315_v28   ;;  %v16588_v28 = vld [vmem:[%s20651_s2 + $0xe0] sm:$0xff]  }
 0x187   : > { %14875 = vmatpush3.bf16.msra.mxu0 %v16581_v12  ;;  %v5634_v38 = vrot.slane %v5632_v15, 1  ;;  %v18628_v12 = vpop.permute.xlu0 %2534  ;;  %v10590_v15 = vld [vmem:[%s20650_s1 + $0xc8] sm:$0xff] }
 0x188   : > { %14876 = vmatprep.subr.bf16.mxu0 %v16582_v2 }
 0x189   : > { %6727 = vperm.xlu0 %16346, %v18335_v41   ;;  %v16589_v41 = vld [vmem:[%s20651_s2 + $0xe8] sm:$0xff]   ;;  %v18548_v53 = vor.u32 %v5637_v6, %v5634_v38  ;;  %v10591_v38 = vld [vmem:[%s20650_s1 + $0xd0] sm:$0xff]  ;;  %v16877_v6 = vmov 0.0  }
 0x18a   : > { %6732 = vperm.xlu1 %16347, %v18376_v29   ;;  %v8600_v29 = vld [vmem:[%s20650_s1] sm:$0xff]  ;;  %307 = vst [vmem:[#allocation3] sm:$0xff] %v16877_v6  ;;  %308 = vst [vmem:[#allocation3 + $0x8] sm:$0xff] %v16877_v6 }
 0x18b   : > { %14877 = vmatpush3.bf16.msra.mxu0 %v16582_v2  ;;  %v18633_v2 = vpop.permute.xlu1 %4884  ;;  %v18652_v1 = vpop.permute.xlu0 %2539  ;;  %309 = vst [vmem:[#allocation3 + $0x10] sm:$0xff] %v16877_v6  ;;  %346 = vst [vmem:[#allocation3 + $0x138] sm:$0xff] %v16877_v6 }
 0x18c   : > { %14882 = vmatprep.subr.bf16.mxu0 %v16584_v9  ;;  %347 = vst [vmem:[#allocation3 + $0x140] sm:$0xff] %v16877_v6  ;;  %348 = vst [vmem:[#allocation3 + $0x148] sm:$0xff] %v16877_v6 }
 0x18d   : > { %6789 = vperm.xlu0 %16346, %v18341_v17   ;;  %v16590_v17 = vld [vmem:[%s20651_s2 + $0xf0] sm:$0xff]  }
 0x18e   : > { %14879 = vmatmul.mubr.bf16.vlgmr.msra.gmra.mrb[16].mxu0 %v5357_v51  ;;  %6794 = vperm.xlu1 %16347, %v18358_v40   ;;  %v16595_v40 = vld [vmem:[%s16967_s10 + $0x98] ss:$0 sps:$4 sm:$0x11]   ;;  %v5880_v51 = vld [vmem:[%s16967_s10 + $0x90] sm:$0xc] }
 0x18f   : > { %14883 = vmatpush3.bf16.msra.mxu0 %v16584_v9  ;;  %14898 = vmatprep.mubr.bf16.mxu0 %v5497_v63  ;;  %v5498_v20 = vrot.slane %v16595_v40, 1  ;;  %v5647_v9 = vor.u32 %v5646_v10, %v5643_v44  ;;  %v8609_v63 = vld [vmem:[%s20650_s1 + $0x48] sm:$0xff]  ;;  %v16606_v40 = vld [vmem:[%s20651_s2 + $0x150] sm:$0xff]   ;;  %v11887_v10 = vld [vmem:[%s20650_s1 + $0x118] sm:$0xff] }
 0x190   : > { %14884 = vmatprep.subr.bf16.mxu0 %v16585_v22 }
 0x191   : > { %6799 = vperm.xlu0 %16346, %v18394_v45   ;;  %v5499_v45 = vsel %vm840_vm1, %v5496_v3, %v5498_v20  ;;  %v10589_v3 = vld [vmem:[%s20650_s1 + $0xc0] sm:$0xff]  ;;  %v5648_v14 = vsel %vm1311_vm3, %v18548_v53, %v5647_v9  ;;  %v5775_v20 = vrot.slane %v18590_v61, 2  ;;  %v16610_v61 = vld [vmem:[%s20651_s2 + $0x170] sm:$0xff]   ;;  %v16616_v9 = vld [vmem:[%s20651_s2 + $0x198] sm:$0xff]  }
 0x192   : > { %6804 = vperm.xlu1 %16347, %v18403_v55   ;;  %v5639_v55 = vsel %vm1311_vm3, %v5630_v24, %v18548_v53  ;;  %v5915_v24 = vrot.slane %v18639_v36, 2  ;;  %v8611_v53 = vld [vmem:[%s20650_s1 + $0x58] sm:$0xff] }
 0x193   : > { %14885 = vmatpush3.bf16.msra.mxu0 %v16585_v22  ;;  %v5881_v22 = vld [vmem:[%s16967_s10 + $0x94] sm:$0xf]  ;;  %v5776_v44 = vsel %vm1582_vm2, %v5773_v7, %v5775_v20 }
 0x194   : > { %14886 = vmatprep.subr.bf16.mxu0 %v16586_v46  ;;  %v18666_v18 = vcombine.low %v5880_v51, %v5881_v22  ;;  %v16615_v7 = vld [vmem:[%s20651_s2 + $0x190] sm:$0xff]  }
 0x195   : > { %8618 = vperm.xlu0 %16346, %v8600_v29  }
 0x196   : > { %8623 = vperm.xlu1 %16347, %v8601_v4   ;;  %v5914_v29 = vrot.slane %v18666_v18, 2  ;;  %v10592_v4 = vld [vmem:[%s20650_s1 + $0xd8] sm:$0xff] }
 0x197   : > { %14887 = vmatpush3.bf16.msra.mxu0 %v16586_v46  ;;  %v16605_v46 = vld [vmem:[%s20651_s2 + $0x148] sm:$0xff]  }
 0x198   : > { %14888 = vmatprep.subr.bf16.mxu0 %v16587_v25 }
 0x199   : > { %10599 = vperm.xlu0 %16346, %v10581_v39   ;;  %v10593_v39 = vld [vmem:[%s20650_s1 + $0xe0] sm:$0xff] }
 0x19a   : > { %10604 = vperm.xlu1 %16347, %v10582_v27  }
 0x19b   : > { %14889 = vmatpush3.bf16.msra.mxu0 %v16587_v25  ;;  %v18656_v25 = vpop.permute.xlu1 %4889 }
 0x19c   : > { %14890 = vmatprep.subr.bf16.mxu0 %v16588_v28 }
 0x19d   : > { %8628 = vperm.xlu0 %16346, %v8602_v54  }
 0x19e   : > { %10609 = vperm.xlu1 %16347, %v10583_v43   ;;  %v10594_v43 = vld [vmem:[%s20650_s1 + $0xe8] sm:$0xff] }
 0x19f   : > { %14891 = vmatpush3.bf16.msra.mxu0 %v16588_v28  ;;  %v6171_v28 = vld [vmem:[%s16967_s10 + $0x90] sm:$0x8] }
 0x1a0   : > { %14892 = vmatprep.subr.bf16.mxu0 %v16589_v41  ;;  %v12879_v35 = vcombine.low %v6171_v28, %v5881_v22  ;;  %v16617_v22 = vld [vmem:[%s20651_s2 + $0x1a0] sm:$0xff]   ;;  %v6043_v28 = vshrl.u32 %v18666_v18, 16 }
 0x1a1   : > { %8633 = vperm.xlu0 %16346, %v8603_v19   ;;  %v8614_v19 = vld [vmem:[%s20650_s1 + $0x70] sm:$0xff] }
 0x1a2   : > { %10614 = vperm.xlu1 %16347, %v10584_v50  }
 0x1a3   : > { %14893 = vmatpush3.bf16.msra.mxu0 %v16589_v41  ;;  %v20658_v41 = vrot.slane %v18639_v36, 3 }
 0x1a4   : > { %14894 = vmatprep.subr.bf16.mxu0 %v16590_v17 }
 0x1a5   : > { %8638 = vperm.xlu0 %16346, %v8604_v11   ;;  %v10595_v11 = vld [vmem:[%s20650_s1 + $0xf0] sm:$0xff] }
 0x1a6   : > { %10619 = vperm.xlu1 %16347, %v10585_v8   ;;  %v11884_v8 = vld [vmem:[%s20650_s1 + $0x100] sm:$0xff] }
 0x1a7   : > { %14895 = vmatpush3.bf16.msra.mxu0 %v16590_v17  ;;  %v6191_v17 = vrot.slane %v12879_v35, 3  ;;  %v6046_v35 = vshll.u32 %v18666_v18, 16 }
 0x1a8   : > { %14896 = vmatprep.subr.bf16.mxu0 %v16591_v56 }
 0x1a9   : > { %8643 = vperm.xlu0 %16346, %v8605_v59   ;;  %v11885_v59 = vld [vmem:[%s20650_s1 + $0x108] sm:$0xff]  ;;  %v18813_v18 = vrot.slane %v6046_v35, 3 }
 0x1aa   : > { %10624 = vperm.xlu1 %16347, %v10586_v21  }
 0x1ab   : > { %14897 = vmatpush3.bf16.msra.mxu0 %v16591_v56  ;;  %v18675_v56 = vpop.permute.xlu0 %2544 }
 0x1ac   : > { %14902 = vmatprep.subr.bf16.mxu0 %v16594_v42 }
 0x1ad   : > { %8648 = vperm.xlu0 %16346, %v8606_v33  }
 0x1ae   : > { %14899 = vmatmul.mubr.bf16.vlgmr.msra.gmra.mrb[16].mxu0 %v5499_v45  ;;  %10629 = vperm.xlu1 %16347, %v10587_v23   ;;  %v8612_v45 = vld [vmem:[%s20650_s1 + $0x60] sm:$0xff]  ;;  %v11886_v23 = vld [vmem:[%s20650_s1 + $0x110] sm:$0xff] }
 0x1af   : > { %14903 = vmatpush3.bf16.msra.mxu0 %v16594_v42  ;;  %14918 = vmatprep.mubr.bf16.mxu0 %v5639_v55  ;;  %v18682_v42 = vpop.permute.xlu1 %4894  ;;  %v16608_v55 = vld [vmem:[%s20651_s2 + $0x160] sm:$0xff]   ;;  %v18705_v27 = vpop.permute.xlu0 %2549 }
 0x1b0   : > { %14904 = vmatprep.subr.bf16.mxu0 %v16596_v34 }
 0x1b1   : > { %8653 = vperm.xlu0 %16346, %v8607_v62  }
 0x1b2   : > { %10634 = vperm.xlu1 %16347, %v10588_v30   ;;  %v16614_v30 = vld [vmem:[%s20651_s2 + $0x188] sm:$0xff]  }
 0x1b3   : > { %14905 = vmatpush3.bf16.msra.mxu0 %v16596_v34  ;;  %v16607_v34 = vld [vmem:[%s20651_s2 + $0x158] sm:$0xff]   ;;  %v18707_v54 = vpop.permute.xlu1 %4899  ;;  %v18721_v50 = vpop.permute.xlu0 %2554 }
 0x1b4   : > { %14906 = vmatprep.subr.bf16.mxu0 %v16597_v57 }
 0x1b5   : > { %8658 = vperm.xlu0 %16346, %v8608_v31   ;;  %v5916_v31 = vsel %vm1582_vm2, %v5914_v29, %v5915_v24  ;;  %v16619_v29 = vld [vmem:[%s20651_s2 + $0x1b0] sm:$0xff]  }
 0x1b6   : > { %10639 = vperm.xlu1 %16347, %v10589_v3  }
 0x1b7   : > { %14907 = vmatpush3.bf16.msra.mxu0 %v16597_v57  ;;  %v8613_v57 = vld [vmem:[%s20650_s1 + $0x68] sm:$0xff]  ;;  %v18740_v21 = vpop.permute.xlu0 %2559 }
 0x1b8   : > { %14908 = vmatprep.subr.bf16.mxu0 %v16598_v47 }
 0x1b9   : > { %8663 = vperm.xlu0 %16346, %v8609_v63  }
 0x1ba   : > { %10644 = vperm.xlu1 %16347, %v10590_v15   ;;  %v18795_v15 = vld [vmem:[%s16967_s10 + $0xa0] ss:$0 sps:$4 sm:$0x77]  }
 0x1bb   : > { %14909 = vmatpush3.bf16.msra.mxu0 %v16598_v47  ;;  %v16609_v47 = vld [vmem:[%s20651_s2 + $0x168] sm:$0xff]   ;;  %v18756_v62 = vpop.permute.xlu0 %2564  ;;  %v6063_v20 = vshll.u32 %v18795_v15, 16 }
 0x1bc   : > { %14910 = vmatprep.subr.bf16.mxu0 %v16599_v16 }
 0x1bd   : > { %8668 = vperm.xlu0 %16346, %v8610_v32   ;;  %v16618_v32 = vld [vmem:[%s20651_s2 + $0x1a8] sm:$0xff]  }
 0x1be   : > { %10649 = vperm.xlu1 %16347, %v10591_v38   ;;  %v6054_v38 = vshll.u32 %v18639_v36, 16 }
 0x1bf   : > { %14911 = vmatpush3.bf16.msra.mxu0 %v16599_v16  ;;  %v18723_v16 = vpop.permute.xlu1 %4904 }
 0x1c0   : > { %14912 = vmatprep.subr.bf16.mxu0 %v16600_v26 }
 0x1c1   : > { %8673 = vperm.xlu0 %16346, %v8611_v53  }
 0x1c2   : > { %10654 = vperm.xlu1 %16347, %v10592_v4   ;;  %v18811_v4 = vrot.slane %v6043_v28, 2 }
 0x1c3   : > { %14913 = vmatpush3.bf16.msra.mxu0 %v16600_v26  ;;  %v16611_v26 = vld [vmem:[%s20651_s2 + $0x178] sm:$0xff]   ;;  %v18742_v33 = vpop.permute.xlu1 %4909 }
 0x1c4   : > { %14914 = vmatprep.subr.bf16.mxu0 %v16601_v48 }
 0x1c5   : > { %8678 = vperm.xlu0 %16346, %v8612_v45   ;;  %v6056_v45 = vrot.slane %v6054_v38, 3 }
 0x1c6   : > { %10659 = vperm.xlu1 %16347, %v10593_v39  }
 0x1c7   : > { %14915 = vmatpush3.bf16.msra.mxu0 %v16601_v48  ;;  %v8615_v48 = vld [vmem:[%s20650_s1 + $0x78] sm:$0xff] }
 0x1c8   : > { %14916 = vmatprep.subr.bf16.mxu0 %v16602_v13 }
 0x1c9   : > { %8683 = vperm.xlu0 %16346, %v8613_v57  }
 0x1ca   : > { %10664 = vperm.xlu1 %16347, %v10594_v43  }
 0x1cb   : > { %14917 = vmatpush3.bf16.msra.mxu0 %v16602_v13  ;;  %v18758_v13 = vpop.permute.xlu1 %4914 }
 0x1cc   : > { %14922 = vmatprep.subr.bf16.mxu0 %v16603_v52 }
 0x1cd   : > { %8688 = vperm.xlu0 %16346, %v8614_v19  }
 0x1ce   : > { %14919 = vmatmul.mubr.bf16.vlgmr.msra.gmra.mrb[16].mxu0 %v5648_v14  ;;  %10669 = vperm.xlu1 %16347, %v10595_v11   ;;  %v16624_v14 = vld [vmem:[%s16967_s10 + $0xa0] ss:$0 sps:$4 sm:$0x33]  }
 0x1cf   : > { %14923 = vmatpush3.bf16.msra.mxu0 %v16603_v52  ;;  %14938 = vmatprep.mubr.bf16.mxu0 %v18455_v37  ;;  %v18680_v37 = vsel %vm2324_vm4, %v6191_v17, %v20658_v41  ;;  %v18772_v52 = vpop.permute.xlu0 %2569  ;;  %v18774_v0 = vpop.permute.xlu1 %4919  ;;  %v6051_v17 = vshrl.u32 %v18639_v36, 16  ;;  %v5917_v6 = vrot.slane %v16624_v14, 2 }
 0x1d0   : > { %14924 = vmatprep.subr.bf16.mxu0 %v16605_v46 }
 0x1d1   : > { %11890 = vperm.xlu0 %16346, %v11884_v8   ;;  %v18830_v11 = vsel %vm1582_vm2, %v5915_v24, %v5917_v6  ;;  %v18834_v8 = vrot.slane %v6063_v20, 3  ;;  %v16620_v24 = vld [vmem:[%s20651_s2 + $0x1b8] sm:$0xff]  }
 0x1d2   : > { %11895 = vperm.xlu1 %16347, %v11885_v59  }
 0x1d3   : > { %14925 = vmatpush3.bf16.msra.mxu0 %v16605_v46  ;;  %v18782_v3 = vpop.permute.xlu0 %2574  ;;  %v18784_v51 = vpop.permute.xlu1 %4924 }
 0x1d4   : > { %14926 = vmatprep.subr.bf16.mxu0 %v16606_v40 }
 0x1d5   : > { %8693 = vperm.xlu0 %16346, %v8615_v48  }
 0x1d6   : > { %10674 = vperm.xlu1 %16347, %v10596_v58  }
 0x1d7   : > { %14927 = vmatpush3.bf16.msra.mxu0 %v16606_v40  ;;  %v18789_v63 = vpop.permute.xlu0 %2579  ;;  %v18791_v46 = vpop.permute.xlu1 %4929  ;;  %v6060_v40 = vshrl.u32 %v18795_v15, 16 }
 0x1d8   : > { %14928 = vmatprep.subr.bf16.mxu0 %v16607_v34 }
 0x1d9   : > { %11900 = vperm.xlu0 %16346, %v11886_v23  }
 0x1da   : > { %11905 = vperm.xlu1 %16347, %v11887_v10  }
 0x1db   : > { %14929 = vmatpush3.bf16.msra.mxu0 %v16607_v34  ;;  %v18809_v53 = vpop.permute.xlu0 %2584  ;;  %v6053_v34 = vrot.slane %v6051_v17, 2 }
 0x1dc   : > { %14930 = vmatprep.subr.bf16.mxu0 %v16608_v55 }
 0x1dd   : > { %v18849_v23 = vor.u32 %v6056_v45, %v6053_v34 }
 0x1df   : > { %14931 = vmatpush3.bf16.msra.mxu0 %v16608_v55  ;;  %v18817_v55 = vpop.permute.xlu1 %4934 }
 0x1e0   : > { %14932 = vmatprep.subr.bf16.mxu0 %v16609_v47 }
 0x1e3   : > { %14933 = vmatpush3.bf16.msra.mxu0 %v16609_v47 }
 0x1e4   : > { %14934 = vmatprep.subr.bf16.mxu0 %v16610_v61 }
 0x1e7   : > { %14935 = vmatpush3.bf16.msra.mxu0 %v16610_v61  ;;  %v18832_v61 = vrot.slane %v6060_v40, 2 }
 0x1e8   : > { %14936 = vmatprep.subr.bf16.mxu0 %v16611_v26 }
 0x1eb   : > { %14937 = vmatpush3.bf16.msra.mxu0 %v16611_v26 }
 0x1ec   : > { %14942 = vmatprep.subr.bf16.mxu0 %v16613_v49 }
 0x1ee   : > { %14939 = vmatmul.mubr.bf16.vlgmr.msra.gmra.mrb[16].mxu0 %v5776_v44 }
 0x1ef   : > { %14943 = vmatpush3.bf16.msra.mxu0 %v16613_v49  ;;  %14958 = vmatprep.mubr.bf16.mxu0 %v5916_v31  ;;  %v6049_v49 = vor.u32 %v18813_v18, %v18811_v4  ;;  %v16623_v18 = vld [vmem:[%s20651_s2 + $0x1c0] sm:$0xff]  }
 0x1f0   : > { %14944 = vmatprep.subr.bf16.mxu0 %v16614_v30 }
 0x1f3   : > { %14945 = vmatpush3.bf16.msra.mxu0 %v16614_v30 }
 0x1f4   : > { %14946 = vmatprep.subr.bf16.mxu0 %v16615_v7 }
 0x1f7   : > { %14947 = vmatpush3.bf16.msra.mxu0 %v16615_v7 }
 0x1f8   : > { %14948 = vmatprep.subr.bf16.mxu0 %v16616_v9 }
 0x1fb   : > { %14949 = vmatpush3.bf16.msra.mxu0 %v16616_v9 }
 0x1fc   : > { %14950 = vmatprep.subr.bf16.mxu0 %v16617_v22 }
 0x1ff   : > { %14951 = vmatpush3.bf16.msra.mxu0 %v16617_v22 }
 0x200   : > { %14952 = vmatprep.subr.bf16.mxu0 %v16618_v32 }
 0x201   : > { %v18815_v39 = vpop.f32.mrb[0].mxu0 }
 0x202   : > { %v18819_v57 = vpop.f32.mrb[0].mxu1  ;;  %v18821_v43 = vpop.f32.mrb[1].mxu0  ;;  %v2609_v44 = vmul.f32 %v18815_v39, %v18652_v1  ;;  %v2647_v10 = vmul.f32 %v18815_v39, %v18815_v39 }
 0x203   : > { %20678 = vst [vmem:[#allocation4_spill] sm:$0xff] %v18819_v57  ;;  %v18823_v47 = vpop.f32.mrb[1].mxu1  ;;  %v18825_v19 = vpop.f32.mrb[2].mxu0  ;;  %14953 = vmatpush3.bf16.msra.mxu0 %v16618_v32  ;;  %v2645_v59 = vmul.f32 %v18821_v43, %v18821_v43  ;;  %v4997_v30 = vmul.f32 %v18819_v57, %v18819_v57  ;;  %v4959_v9 = vmul.f32 %v18819_v57, %v18656_v25 }
 0x204   : > { %20679 = vst [vmem:[#allocation5_spill] sm:$0xff] %v18823_v47  ;;  %v4995_v26 = vmul.f32 %v18823_v47, %v18823_v47  ;;  %v18840_v48 = vpop.f32.mrb[2].mxu1  ;;  %v18842_v58 = vpop.f32.mrb[3].mxu0  ;;  %14954 = vmatprep.subr.bf16.mxu0 %v16619_v29  ;;  %v4957_v31 = vmul.f32 %v18614_v5, %v18823_v47  ;;  %v2607_v22 = vmul.f32 %v18607_v60, %v18821_v43 }
 0x205   : > { %20680 = vst [vmem:[#allocation6_spill] sm:$0xff] %v18840_v48  ;;  %v18859_v7 = vpop.f32.mrb[3].mxu1  ;;  %v2608_v14 = vmul.f32 %v18628_v12, %v18842_v58  ;;  %v2646_v32 = vmul.f32 %v18842_v58, %v18842_v58  ;;  %v4998_v35 = vmul.f32 %v18840_v48, %v18840_v48  ;;  %v2661_v6 = vmul.f32 %v2645_v59, %v18607_v60 }
 0x206   : > { %20681 = vst [vmem:[#allocation7_spill] sm:$0xff] %v18859_v7  ;;  %v5011_v28 = vmul.f32 %v4995_v26, %v18614_v5  ;;  %v4958_v17 = vmul.f32 %v18633_v2, %v18859_v7  ;;  %v4996_v38 = vmul.f32 %v18859_v7, %v18859_v7  ;;  %v2648_v40 = vmul.f32 %v18825_v19, %v18825_v19  ;;  %v18880_v5 = vpop.permute.xlu0 %2589  ;;  %v18890_v26 = vpop.permute.xlu1 %4939 }
 0x207   : > { %14955 = vmatpush3.bf16.msra.mxu0 %v16619_v29  ;;  %v2623_v20 = vadd.f32 %v2608_v14, %v2607_v22  ;;  %v2662_v4 = vmul.f32 %v2646_v32, %v18628_v12  ;;  %v2663_v34 = vmul.f32 %v2647_v10, %v18652_v1  ;;  %v5013_v45 = vmul.f32 %v4997_v30, %v18656_v25 }
 0x208   : > { %14956 = vmatprep.subr.bf16.mxu0 %v16620_v24  ;;  %v4973_v29 = vadd.f32 %v4958_v17, %v4957_v31  ;;  %v5012_v60 = vmul.f32 %v4996_v38, %v18633_v2  ;;  %v2610_v12 = vmul.f32 %v18825_v19, %v18675_v56  ;;  %v4960_v22 = vmul.f32 %v18840_v48, %v18682_v42 }
 0x209   : > { %v18888_v59 = vpop.f32.mrb[4].mxu0  ;;  %v2624_v14 = vadd.f32 %v2623_v20, %v2609_v44  ;;  %v2677_v32 = vadd.f32 %v2662_v4, %v2661_v6  ;;  %v5014_v25 = vmul.f32 %v4998_v35, %v18682_v42  ;;  %v2664_v38 = vmul.f32 %v2648_v40, %v18675_v56 }
 0x20a   : > { %v18896_v41 = vpop.f32.mrb[4].mxu1  ;;  %v18898_v1 = vpop.f32.mrb[5].mxu0  ;;  %v4974_v10 = vadd.f32 %v4973_v29, %v4959_v9  ;;  %v5027_v2 = vadd.f32 %v5012_v60, %v5011_v28  ;;  %v16625_v9 = vld [vmem:[%s20651_s2 + $0x1c8] sm:$0xff]   ;;  %v6058_v40 = vsel %vm2053_vm5, %v6049_v49, %v18849_v23  ;;  %v2613_v49 = vmul.f32 %v18888_v59, %v18740_v21 }
 0x20b   : > { %20682 = vst [vmem:[#allocation8_spill] sm:$0xff] %v18896_v41  ;;  %v18901_v30 = vpop.f32.mrb[5].mxu1  ;;  %v18903_v31 = vpop.f32.mrb[6].mxu0  ;;  %14957 = vmatpush3.bf16.msra.mxu0 %v16620_v24  ;;  %v2678_v44 = vadd.f32 %v2677_v32, %v2663_v34  ;;  %v2611_v6 = vmul.f32 %v18705_v27, %v18898_v1  ;;  %v2625_v20 = vadd.f32 %v2624_v14, %v2610_v12 }
 0x20c   : > { %20683 = vst [vmem:[#allocation9_spill] sm:$0xff] %v18901_v30  ;;  %v18910_v4 = vpop.f32.mrb[6].mxu1  ;;  %v18912_v42 = vpop.f32.mrb[7].mxu0  ;;  %14962 = vmatprep.subr.bf16.mxu0 %v16623_v18  ;;  %v5028_v24 = vadd.f32 %v5027_v2, %v5013_v45  ;;  %v2649_v28 = vmul.f32 %v18898_v1, %v18898_v1  ;;  %v4961_v56 = vmul.f32 %v18707_v54, %v18901_v30 }
 0x20d   : > { %20684 = vst [vmem:[#allocation10_spill] sm:$0xff] %v18910_v4  ;;  %v18921_v35 = vpop.f32.mrb[7].mxu1  ;;  %v2626_v34 = vadd.f32 %v2625_v20, %v2611_v6  ;;  %v2679_v29 = vadd.f32 %v2678_v44, %v2664_v38  ;;  %v4975_v60 = vadd.f32 %v4974_v10, %v4960_v22  ;;  %v4999_v12 = vmul.f32 %v18901_v30, %v18901_v30  ;;  %v16626_v44 = vld [vmem:[%s20651_s2 + $0x1d0] sm:$0xff]  }
 0x20e   : > { %20685 = vst [vmem:[#allocation11_spill] sm:$0xff] %v18921_v35  ;;  %14959 = vmatmul.mubr.bf16.vlgmr.msra.gmra.mrb[16].mxu0 %v18830_v11  ;;  %v2651_v45 = vmul.f32 %v18888_v59, %v18888_v59  ;;  %v5001_v14 = vmul.f32 %v18896_v41, %v18896_v41  ;;  %v2665_v32 = vmul.f32 %v2649_v28, %v18705_v27  ;;  %v18938_v11 = vpop.permute.xlu0 %2594 }
 0x20f   : > { %v5029_v2 = vadd.f32 %v5028_v24, %v5014_v25  ;;  %14963 = vmatpush3.bf16.msra.mxu0 %v16623_v18  ;;  %v4963_v22 = vmul.f32 %v18896_v41, %v18742_v33  ;;  %v4976_v10 = vadd.f32 %v4975_v60, %v4961_v56  ;;  %v5015_v38 = vmul.f32 %v4999_v12, %v18707_v54  ;;  %v18951_v54 = vpop.permute.xlu1 %4944 }
 0x210   : > { %14964 = vmatprep.subr.bf16.mxu0 %v16625_v9  ;;  %v2680_v6 = vadd.f32 %v2679_v29, %v2665_v32  ;;  %v2652_v27 = vmul.f32 %v18903_v31, %v18903_v31  ;;  %v2612_v18 = vmul.f32 %v18721_v50, %v18912_v42  ;;  %v2650_v25 = vmul.f32 %v18912_v42, %v18912_v42 }
 0x211   : > { %v18949_v20 = vpop.f32.mrb[8].mxu0  ;;  %14978 = vmatprep.mubr.bf16.mxu0 %v6058_v40  ;;  %v5030_v24 = vadd.f32 %v5029_v2, %v5015_v38  ;;  %v5002_v28 = vmul.f32 %v18910_v4, %v18910_v4  ;;  %v4962_v56 = vmul.f32 %v18723_v16, %v18921_v35  ;;  %v5000_v29 = vmul.f32 %v18921_v35, %v18921_v35 }
 0x212   : > { %v18959_v60 = vpop.f32.mrb[8].mxu1  ;;  %v18961_v12 = vpop.f32.mrb[9].mxu0  ;;  %v2667_v32 = vmul.f32 %v2651_v45, %v18740_v21  ;;  %v5017_v17 = vmul.f32 %v5001_v14, %v18742_v33  ;;  %v2627_v41 = vadd.f32 %v2626_v34, %v2612_v18  ;;  %v2666_v40 = vmul.f32 %v2650_v25, %v18721_v50  ;;  %v16627_v50 = vld [vmem:[%s20651_s2 + $0x1d8] sm:$0xff]  }
 0x213   : > { %20686 = vst [vmem:[#allocation12_spill] sm:$0xff] %v18959_v60  ;;  %v18966_v2 = vpop.f32.mrb[9].mxu1  ;;  %v18968_v38 = vpop.f32.mrb[10].mxu0  ;;  %14965 = vmatpush3.bf16.msra.mxu0 %v16625_v9  ;;  %v2614_v30 = vmul.f32 %v18903_v31, %v18756_v62  ;;  %v4964_v35 = vmul.f32 %v18910_v4, %v18758_v13  ;;  %v4977_v48 = vadd.f32 %v4976_v10, %v4962_v56 }
 0x214   : > { %20687 = vst [vmem:[#allocation13_spill] sm:$0xff] %v18966_v2  ;;  %v5016_v57 = vmul.f32 %v5000_v29, %v18723_v16  ;;  %v18975_v21 = vpop.f32.mrb[10].mxu1  ;;  %v18977_v33 = vpop.f32.mrb[11].mxu0  ;;  %14966 = vmatprep.subr.bf16.mxu0 %v16626_v44  ;;  %v2668_v9 = vmul.f32 %v2652_v27, %v18756_v62  ;;  %v2628_v34 = vadd.f32 %v2627_v41, %v2613_v49 }
 0x215   : > { %v2681_v45 = vadd.f32 %v2680_v6, %v2666_v40  ;;  %v2615_v14 = vmul.f32 %v18772_v52, %v18961_v12  ;;  %v18985_v18 = vpop.f32.mrb[11].mxu1  ;;  %v5018_v16 = vmul.f32 %v5002_v28, %v18758_v13  ;;  %v4978_v10 = vadd.f32 %v4977_v48, %v4963_v22 }
 0x216   : > { %20688 = vst [vmem:[#allocation14_spill] sm:$0xff] %v18985_v18  ;;  %v5031_v25 = vadd.f32 %v5030_v24, %v5016_v57  ;;  %v2653_v56 = vmul.f32 %v18961_v12, %v18961_v12  ;;  %v2629_v4 = vadd.f32 %v2628_v34, %v2614_v30  ;;  %v4965_v7 = vmul.f32 %v18774_v0, %v18966_v2  ;;  %v18997_v57 = vpop.permute.xlu1 %4949  ;;  %v16628_v30 = vld [vmem:[%s20651_s2 + $0x1e0] sm:$0xff]  }
 0x217   : > { %v2682_v29 = vadd.f32 %v2681_v45, %v2667_v32  ;;  %v5003_v41 = vmul.f32 %v18966_v2, %v18966_v2  ;;  %14967 = vmatpush3.bf16.msra.mxu0 %v16626_v44  ;;  %v2655_v49 = vmul.f32 %v18949_v20, %v18949_v20  ;;  %v4979_v48 = vadd.f32 %v4978_v10, %v4964_v35  ;;  %v19005_v44 = vpop.permute.xlu0 %2599 }
 0x218   : > { %v5032_v62 = vadd.f32 %v5031_v25, %v5017_v17  ;;  %v2669_v13 = vmul.f32 %v2653_v56, %v18772_v52  ;;  %14968 = vmatprep.subr.bf16.mxu0 %v16627_v50  ;;  %v5005_v22 = vmul.f32 %v18959_v60, %v18959_v60  ;;  %v2630_v6 = vadd.f32 %v2629_v4, %v2615_v14 }
 0x219   : > { %v2683_v27 = vadd.f32 %v2682_v29, %v2668_v9  ;;  %v5019_v17 = vmul.f32 %v5003_v41, %v18774_v0  ;;  %v19007_v24 = vpop.f32.mrb[12].mxu0  ;;  %v2617_v52 = vmul.f32 %v18949_v20, %v18789_v63  ;;  %v4967_v35 = vmul.f32 %v18959_v60, %v18791_v46 }
 0x21a   : > { %v4980_v28 = vadd.f32 %v4979_v48, %v4965_v7  ;;  %v5033_v32 = vadd.f32 %v5032_v62, %v5018_v16  ;;  %v19013_v40 = vpop.f32.mrb[12].mxu1  ;;  %v19015_v34 = vpop.f32.mrb[13].mxu0  ;;  %v2656_v0 = vmul.f32 %v18968_v38, %v18968_v38  ;;  %v2616_v9 = vmul.f32 %v18782_v3, %v18977_v33  ;;  %v16629_v62 = vld [vmem:[%s20651_s2 + $0x1e8] sm:$0xff]  }
 0x21b   : > { %v2684_v4 = vadd.f32 %v2683_v27, %v2669_v13  ;;  %v2654_v45 = vmul.f32 %v18977_v33, %v18977_v33  ;;  %v19023_v14 = vpop.f32.mrb[13].mxu1  ;;  %v19025_v10 = vpop.f32.mrb[14].mxu0  ;;  %14969 = vmatpush3.bf16.msra.mxu0 %v16627_v50  ;;  %v5006_v16 = vmul.f32 %v18975_v21, %v18975_v21  ;;  %v4966_v25 = vmul.f32 %v18784_v51, %v18985_v18 }
 0x21c   : > { %v5034_v7 = vadd.f32 %v5033_v32, %v5019_v17  ;;  %v5004_v56 = vmul.f32 %v18985_v18, %v18985_v18  ;;  %v19033_v29 = vpop.f32.mrb[14].mxu1  ;;  %v19035_v41 = vpop.f32.mrb[15].mxu0  ;;  %14970 = vmatprep.subr.bf16.mxu0 %v16628_v30  ;;  %v2671_v50 = vmul.f32 %v2655_v49, %v18789_v63  ;;  %v5021_v13 = vmul.f32 %v5005_v22, %v18791_v46 }
 0x21d   : > { %v2631_v48 = vadd.f32 %v2630_v6, %v2616_v9  ;;  %v2670_v27 = vmul.f32 %v2654_v45, %v18782_v3  ;;  %v19043_v17 = vpop.f32.mrb[15].mxu1  ;;  %v2618_v32 = vmul.f32 %v18968_v38, %v18809_v53  ;;  %v4968_v60 = vmul.f32 %v18975_v21, %v18817_v55  ;;  %v19050_v47 = vpop.permute.xlu1 %6310 }
 0x21e   : > { %v4981_v18 = vadd.f32 %v4980_v28, %v4966_v25  ;;  %v5020_v2 = vmul.f32 %v5004_v56, %v18784_v51  ;;  %v2672_v63 = vmul.f32 %v2656_v0, %v18809_v53  ;;  %v19053_v22 = vpop.permute.xlu0 %6305  ;;  %v2619_v3 = vmul.f32 %v18880_v5, %v19015_v34  ;;  %v16630_v51 = vld [vmem:[%s20651_s2 + $0x1f0] sm:$0xff]  }
 0x21f   : > { %v2632_v49 = vadd.f32 %v2631_v48, %v2617_v52  ;;  %v2685_v46 = vadd.f32 %v2684_v4, %v2670_v27  ;;  %14971 = vmatpush3.bf16.msra.mxu0 %v16628_v30  ;;  %v5022_v6 = vmul.f32 %v5006_v16, %v18817_v55  ;;  %v2657_v28 = vmul.f32 %v19015_v34, %v19015_v34 }
 0x220   : > { %v4982_v9 = vadd.f32 %v4981_v18, %v4967_v35  ;;  %v5035_v45 = vadd.f32 %v5034_v7, %v5020_v2  ;;  %14972 = vmatprep.subr.bf16.mxu0 %v16629_v62  ;;  %v4969_v4 = vmul.f32 %v18890_v26, %v19023_v14  ;;  %v5007_v30 = vmul.f32 %v19023_v14, %v19023_v14 }
 0x221   : > { %v2686_v53 = vadd.f32 %v2685_v46, %v2671_v50  ;;  %v2633_v52 = vadd.f32 %v2632_v49, %v2618_v32  ;;  %v2621_v55 = vmul.f32 %v19007_v24, %v19005_v44  ;;  %v2673_v2 = vmul.f32 %v2657_v28, %v18880_v5  ;;  %v4955_v27 = vpop.permute.xlu1 %4954  ;;  %v16631_v5 = vld [vmem:[%s20651_s2 + $0x1f8] sm:$0xff]  }
 0x222   : > { %v5036_v0 = vadd.f32 %v5035_v45, %v5021_v13  ;;  %v4983_v18 = vadd.f32 %v4982_v9, %v4968_v60  ;;  %v2659_v35 = vmul.f32 %v19007_v24, %v19007_v24  ;;  %v5023_v25 = vmul.f32 %v5007_v30, %v18890_v26  ;;  %v2605_v26 = vpop.permute.xlu0 %2604 }
 0x223   : > { %v2634_v7 = vadd.f32 %v2633_v52, %v2619_v3  ;;  %v2687_v16 = vadd.f32 %v2686_v53, %v2672_v63  ;;  %14973 = vmatpush3.bf16.msra.mxu0 %v16629_v62  ;;  %v5009_v56 = vmul.f32 %v19013_v40, %v19013_v40  ;;  %v2620_v13 = vmul.f32 %v18938_v11, %v19035_v41 }
 0x224   : > { %v4984_v50 = vadd.f32 %v4983_v18, %v4969_v4  ;;  %v5037_v48 = vadd.f32 %v5036_v0, %v5022_v6  ;;  %14974 = vmatprep.subr.bf16.mxu0 %v16630_v51  ;;  %v4971_v60 = vmul.f32 %v19013_v40, %v18997_v57  ;;  %v2658_v62 = vmul.f32 %v19035_v41, %v19035_v41 }
 0x225   : > { %v2688_v32 = vadd.f32 %v2687_v16, %v2673_v2  ;;  %v4970_v63 = vmul.f32 %v18951_v54, %v19043_v17  ;;  %v5010_v46 = vmul.f32 %v19033_v29, %v19033_v29  ;;  %v2635_v3 = vadd.f32 %v2634_v7, %v2620_v13  ;;  %v16632_v2 = vld [vmem:[%s20651_s2 + $0x200] sm:$0xff]  }
 0x226   : > { %v5038_v49 = vadd.f32 %v5037_v48, %v5023_v25  ;;  %v5008_v6 = vmul.f32 %v19043_v17, %v19043_v17  ;;  %v2660_v9 = vmul.f32 %v19025_v10, %v19025_v10  ;;  %v2674_v45 = vmul.f32 %v2658_v62, %v18938_v11 }
 0x227   : > { %v4985_v28 = vadd.f32 %v4984_v50, %v4970_v63  ;;  %v4972_v53 = vmul.f32 %v19033_v29, %v4955_v27  ;;  %14975 = vmatpush3.bf16.msra.mxu0 %v16630_v51  ;;  %v5025_v52 = vmul.f32 %v5009_v56, %v18997_v57  ;;  %v2622_v4 = vmul.f32 %v19025_v10, %v2605_v26 }
 0x228   : > { %v2636_v30 = vadd.f32 %v2635_v3, %v2621_v55  ;;  %v5024_v0 = vmul.f32 %v5008_v6, %v18951_v54  ;;  %14976 = vmatprep.subr.bf16.mxu0 %v16631_v5  ;;  %v2675_v18 = vmul.f32 %v2659_v35, %v19005_v44  ;;  %v2689_v7 = vadd.f32 %v2688_v32, %v2674_v45  ;;  %v16634_v44 = vld [vmem:[%s20651_s2 + $0x208] sm:$0xff]  }
 0x229   : > { %v4986_v11 = vadd.f32 %v4985_v28, %v4971_v60  ;;  %v5026_v50 = vmul.f32 %v5010_v46, %v4955_v27  ;;  %v2676_v51 = vmul.f32 %v2660_v9, %v2605_v26  ;;  %v20689_v55 = vor.u32 %v18834_v8, %v18832_v61 }
 0x22a   : > { %v2637_v16 = vadd.f32 %v2636_v30, %v2622_v4  ;;  %v5039_v25 = vadd.f32 %v5038_v49, %v5024_v0  ;;  %v2690_v48 = vadd.f32 %v2689_v7, %v2675_v18  ;;  %v16637_v18 = vld [vmem:[%s20651_s2 + $0x220] sm:$0xff]  }
 0x22b   : > { %v4987_v57 = vadd.f32 %v4986_v11, %v4972_v53  ;;  %14977 = vmatpush3.bf16.msra.mxu0 %v16631_v5  ;;  %v6067_v54 = vsel %vm2053_vm5, %v18849_v23, %v20689_v55  ;;  %v16635_v23 = vld [vmem:[%s20651_s2 + $0x210] sm:$0xff]   ;;  %v20690_v55 = vrot.slane %v18639_v36, 3  ;;  %v16645_v36 = vld [vmem:[%s20654_s5 + $0x48] sm:$0xff]  }
 0x22c   : > { %v2638_v56 = vrot.slane %v2637_v16, 4  ;;  %v5040_v13 = vadd.f32 %v5039_v25, %v5025_v52  ;;  %14982 = vmatprep.subr.bf16.mxu0 %v16632_v2  ;;  %v2691_v35 = vadd.f32 %v2690_v48, %v2676_v51  ;;  %v16639_v51 = vld [vmem:[%s20651_s2 + $0x230] sm:$0xff]   ;;  %v16640_v48 = vld [vmem:[%s20651_s2 + $0x238] sm:$0xff]  }
 0x22d   : > { %v4988_v60 = vrot.slane %v4987_v57, 4 }
 0x22e   : > { %v2639_v27 = vadd.f32 %v2638_v56, %v2637_v16  ;;  %v5041_v32 = vadd.f32 %v5040_v13, %v5026_v50  ;;  %14979 = vmatmul.mubr.bf16.vlgmr.msra.gmra.mrb[16].mxu0 %v6067_v54  ;;  %v2692_v26 = vrot.slane %v2691_v35, 4  ;;  %v16638_v50 = vld [vmem:[%s20651_s2 + $0x228] sm:$0xff]   ;;  %v16642_v56 = vld [vmem:[%s20654_s5 + $0x40] sm:$0xff]  }
 0x22f   : > { %v4989_v5 = vadd.f32 %v4988_v60, %v4987_v57  ;;  %14983 = vmatpush3.bf16.msra.mxu0 %v16632_v2  ;;  %14998 = vmatprep.mubr.bf16.mxu0 %v18680_v37  ;;  %v16636_v37 = vld [vmem:[%s20651_s2 + $0x218] sm:$0xff]   ;;  %v6194_v57 = vrot.slane %v18795_v15, 3  ;;  %v16643_v13 = vld [vmem:[%s20654_s5 + $0x40] sm:$0xff]   ;;  %v16644_v15 = vld [vmem:[%s20654_s5 + $0x48] sm:$0xff]  }
 0x230   : > { %v2640_v61 = vrot.slane %v2639_v27, 2  ;;  %v5042_v8 = vrot.slane %v5041_v32, 4  ;;  %14984 = vmatprep.subr.bf16.mxu0 %v16634_v44  ;;  %v2693_v62 = vadd.f32 %v2692_v26, %v2691_v35  ;;  %15002 = vmatprep.subr.bf16.mxu1 %v16642_v56  ;;  %v16647_v35 = vld [vmem:[%s20654_s5 + $0x50] sm:$0xff]   ;;  %v16648_v60 = vld [vmem:[%s20654_s5 + $0x58] sm:$0xff]   ;;  %v19163_v26 = vpop.permute.xlu1 %6320 }
 0x231   : > { %v4990_v63 = vrot.slane %v4989_v5, 2  ;;  %v6195_v54 = vsel %vm2324_vm4, %v20690_v55, %v6194_v57  ;;  %15003 = vmatpush3.bf16.msra.mxu1 %v16642_v56 }
 0x232   : > { %v2641_v49 = vadd.f32 %v2640_v61, %v2639_v27  ;;  %v5043_v46 = vadd.f32 %v5042_v8, %v5041_v32  ;;  %v2694_v3 = vrot.slane %v2693_v62, 2  ;;  %15004 = vmatprep.subr.bf16.mxu1 %v16644_v15  ;;  %v16649_v27 = vld [vmem:[%s20654_s5 + $0x58] sm:$0xff]   ;;  %v16650_v32 = vld [vmem:[%s20654_s5 + $0x60] sm:$0xff]   ;;  %v16652_v61 = vld [vmem:[%s20654_s5 + $0x68] sm:$0xff]  }
 0x233   : > { %v4991_v6 = vadd.f32 %v4990_v63, %v4989_v5  ;;  %14985 = vmatpush3.bf16.msra.mxu0 %v16634_v44  ;;  %v16646_v44 = vld [vmem:[%s20654_s5 + $0x50] sm:$0xff]   ;;  %v16651_v5 = vld [vmem:[%s20654_s5 + $0x60] sm:$0xff]   ;;  %v16653_v8 = vld [vmem:[%s20654_s5 + $0x68] sm:$0xff]  }
 0x234   : > { %v2642_v9 = vrot.slane %v2641_v49, 1  ;;  %v5044_v45 = vrot.slane %v5043_v46, 2  ;;  %14986 = vmatprep.subr.bf16.mxu0 %v16635_v23  ;;  %v2695_v28 = vadd.f32 %v2694_v3, %v2693_v62  ;;  %v16654_v62 = vld [vmem:[%s20654_s5 + $0x70] sm:$0xff]   ;;  %v6855_v3 = vld [vmem:[#allocation3 + $0x6] sm:$0xff] }
 0x235   : > { %v4992_v53 = vrot.slane %v4991_v6, 1  ;;  %15005 = vmatpush3.bf16.msra.mxu1 %v16644_v15  ;;  %v16655_v63 = vld [vmem:[%s20654_s5 + $0x70] sm:$0xff]  }
 0x236   : > { %v2643_v52 = vadd.f32 %v2642_v9, %v2641_v49  ;;  %v5045_v4 = vadd.f32 %v5044_v45, %v5043_v46  ;;  %v2696_v30 = vrot.slane %v2695_v28, 1  ;;  %15006 = vmatprep.subr.bf16.mxu1 %v16646_v44  ;;  %v16656_v49 = vld [vmem:[%s20654_s5 + $0x78] sm:$0xff]   ;;  %v19191_v45 = vld [vmem:[%s20654_s5] sm:$0xff]  }
 0x237   : > { %v4993_v0 = vadd.f32 %v4992_v53, %v4991_v6  ;;  %14987 = vmatpush3.bf16.msra.mxu0 %v16635_v23  ;;  %v19174_v23 = vpop.permute.xlu1 %6470  ;;  %v16657_v46 = vld [vmem:[%s20654_s5 + $0x78] sm:$0xff]   ;;  %v6856_v6 = vld [vmem:[#allocation3 + $0xe] sm:$0xff]  ;;  %20691 = vst [vmem:[#allocation15_spill] sm:$0xff] %v19191_v45 }
 0x238   : > { %v5046_v2 = vrot.slane %v5045_v4, 1  ;;  %14988 = vmatprep.subr.bf16.mxu0 %v16636_v37  ;;  %v2697_v7 = vadd.f32 %v2696_v30, %v2695_v28  ;;  %v6871_v9 = vpack.c.bf16 %v6856_v6, %v6855_v3  ;;  %v19198_v28 = vld [vmem:[%s20654_s5] sm:$0xff]  }
 0x239   : > { %v19119_v11 = vadd.f32 %v4993_v0, %v2643_v52  ;;  %15007 = vmatpush3.bf16.msra.mxu1 %v16646_v44  ;;  %20692 = vst [vmem:[#allocation16_spill] sm:$0xff] %v19198_v28  ;;  %v6316_v52 = vpop.permute.xlu0 %6315 }
 0x23a   : > { %v5047_v16 = vadd.f32 %v5046_v2, %v5045_v4  ;;  %15008 = vmatprep.subr.bf16.mxu1 %v16648_v60  ;;  %15018 = vmatprep.mubr.bf16.mxu1 %v6871_v9 }
 0x23b   : > { %14989 = vmatpush3.bf16.msra.mxu0 %v16636_v37  ;;  %v19193_v37 = vpop.permute.xlu1 %6480 }
 0x23c   : > { %v19121_v25 = vadd.f32 %v5047_v16, %v2697_v7  ;;  %14990 = vmatprep.subr.bf16.mxu0 %v16637_v18 }
 0x23d   : > { %15009 = vmatpush3.bf16.msra.mxu1 %v16648_v60  ;;  %v19206_v30 = vpop.permute.xlu0 %6465 }
 0x23e   : > { %15010 = vmatprep.subr.bf16.mxu1 %v16650_v32 }
 0x23f   : > { %14991 = vmatpush3.bf16.msra.mxu0 %v16637_v18  ;;  %v19202_v53 = vpop.permute.xlu1 %6490 }
 0x240   : > { %14992 = vmatprep.subr.bf16.mxu0 %v16638_v50 }
 0x241   : > { %15011 = vmatpush3.bf16.msra.mxu1 %v16650_v32  ;;  %v19210_v2 = vpop.permute.xlu0 %6475 }
 0x242   : > { %15012 = vmatprep.subr.bf16.mxu1 %v16652_v61 }
 0x243   : > { %14993 = vmatpush3.bf16.msra.mxu0 %v16638_v50  ;;  %v19204_v4 = vpop.permute.xlu1 %6500 }
 0x244   : > { %14994 = vmatprep.subr.bf16.mxu0 %v16639_v51 }
 0x245   : > { %15013 = vmatpush3.bf16.msra.mxu1 %v16652_v61  ;;  %v19214_v7 = vpop.permute.xlu0 %6485 }
 0x246   : > { %15014 = vmatprep.subr.bf16.mxu1 %v16654_v62 }
 0x247   : > { %14995 = vmatpush3.bf16.msra.mxu0 %v16639_v51  ;;  %v19208_v0 = vpop.permute.xlu1 %6510 }
 0x248   : > { %14996 = vmatprep.subr.bf16.mxu0 %v16640_v48 }
 0x249   : > { %15015 = vmatpush3.bf16.msra.mxu1 %v16654_v62 }
 0x24a   : > { %15016 = vmatprep.subr.bf16.mxu1 %v16656_v49 }
 0x24b   : > { %14997 = vmatpush3.bf16.msra.mxu0 %v16640_v48  ;;  %v19212_v18 = vpop.permute.xlu1 %6520 }
 0x24c   : > { %15290 = vmatprep.subr.bf16.mxu0 %v16643_v13 }
 0x24d   : > { %15017 = vmatpush3.bf16.msra.mxu1 %v16656_v49 }
 0x24e   : > { %14999 = vmatmul.mubr.bf16.vlgmr.msra.gmra.mrb[16].mxu0 %v6195_v54  ;;  %15034 = vmatprep.subr.bf16.mxu1 %v19191_v45  ;;  %v19228_v54 = vpop.permute.xlu0 %6495 }
 0x24f   : > { %15291 = vmatpush3.bf16.msra.mxu0 %v16643_v13  ;;  %v19216_v16 = vpop.permute.xlu1 %6530 }
 0x250   : > { %15292 = vmatprep.subr.bf16.mxu0 %v16645_v36 }
 0x252   : > { %v19247_v49 = vpop.permute.xlu0 %6505 }
 0x253   : > { %15293 = vmatpush3.bf16.msra.mxu0 %v16645_v36  ;;  %v19230_v56 = vpop.permute.xlu1 %6540 }
 0x254   : > { %15294 = vmatprep.subr.bf16.mxu0 %v16647_v35 }
 0x257   : > { %15295 = vmatpush3.bf16.msra.mxu0 %v16647_v35 }
 0x258   : > { %15296 = vmatprep.subr.bf16.mxu0 %v16649_v27 }
 0x25b   : > { %15297 = vmatpush3.bf16.msra.mxu0 %v16649_v27 }
 0x25c   : > { %15298 = vmatprep.subr.bf16.mxu0 %v16651_v5 }
 0x25f   : > { %15299 = vmatpush3.bf16.msra.mxu0 %v16651_v5 }
 0x260   : > { %15300 = vmatprep.subr.bf16.mxu0 %v16653_v8 }
 0x263   : > { %15301 = vmatpush3.bf16.msra.mxu0 %v16653_v8 }
 0x264   : > { %15302 = vmatprep.subr.bf16.mxu0 %v16655_v63 }
 0x267   : > { %15303 = vmatpush3.bf16.msra.mxu0 %v16655_v63 }
 0x268   : > { %15304 = vmatprep.subr.bf16.mxu0 %v16657_v46 }
 0x26b   : > { %15305 = vmatpush3.bf16.msra.mxu0 %v16657_v46  ;;  %v19249_v46 = vpop.permute.xlu1 %6662 }
 0x26c   : > { %15322 = vmatprep.subr.bf16.mxu0 %v19198_v28  ;;  %20693 = vst [vmem:[#allocation17_spill] sm:$0xff] %v19249_v46 }
 0x321   : > { %v19218_v50 = vpop.f32.mrb[16].mxu0 }
 0x322   : > { %v19220_v51 = vpop.f32.mrb[17].mxu0  ;;  %v6339_v13 = vmul.f32 %v19218_v50, %v19218_v50  ;;  %v6325_v35 = vmul.f32 %v19218_v50, %v6316_v52 }
 0x323   : > { %v6337_v48 = vmul.f32 %v19220_v51, %v19220_v51  ;;  %v19224_v57 = vpop.f32.mrb[18].mxu0  ;;  %v6323_v15 = vmul.f32 %v19053_v22, %v19220_v51 }
 0x324   : > { %v19226_v55 = vpop.f32.mrb[19].mxu0  ;;  %v6340_v27 = vmul.f32 %v19224_v57, %v19224_v57  ;;  %v6343_v61 = vmul.f32 %v6339_v13, %v6316_v52  ;;  %v6326_v8 = vmul.f32 %v19224_v57, %v19163_v26 }
 0x325   : > { %v6324_v36 = vmul.f32 %v19050_v47, %v19226_v55  ;;  %v6338_v44 = vmul.f32 %v19226_v55, %v19226_v55  ;;  %v6341_v60 = vmul.f32 %v6337_v48, %v19053_v22 }
 0x326   : > { %v6344_v3 = vmul.f32 %v6340_v27, %v19163_v26 }
 0x327   : > { %v6327_v32 = vadd.f32 %v6324_v36, %v6323_v15  ;;  %v6342_v5 = vmul.f32 %v6338_v44, %v19050_v47  ;;  %v19252_v36 = vpop.permute.xlu0 %6515  ;;  %v19254_v47 = vpop.permute.xlu1 %6672 }
 0x328   : > { %20694 = vst [vmem:[#allocation18_spill] sm:$0xff] %v19254_v47 }
 0x329   : > { %v6328_v62 = vadd.f32 %v6327_v32, %v6325_v35  ;;  %v6345_v63 = vadd.f32 %v6342_v5, %v6341_v60 }
 0x32b   : > { %v6329_v6 = vadd.f32 %v6328_v62, %v6326_v8  ;;  %v6346_v22 = vadd.f32 %v6345_v63, %v6343_v61  ;;  %v19256_v5 = vpop.permute.xlu0 %6525  ;;  %v19258_v45 = vpop.permute.xlu1 %6682 }
 0x32c   : > { %20695 = vst [vmem:[#allocation19_spill] sm:$0xff] %v19258_v45  ;;  %v20714_v45 = vld [vmem:[#allocation10_spill] sm:$0xff] }
 0x32d   : > { %v6330_v9 = vrot.slane %v6329_v6, 4  ;;  %v6347_v48 = vadd.f32 %v6346_v22, %v6344_v3 }
 0x32f   : > { %v6331_v28 = vadd.f32 %v6330_v9, %v6329_v6  ;;  %v6348_v15 = vrot.slane %v6347_v48, 4  ;;  %v19262_v3 = vpop.permute.xlu0 %6535  ;;  %v19264_v6 = vpop.permute.xlu1 %6692 }
 0x330   : > { %20696 = vst [vmem:[#allocation20_spill] sm:$0xff] %v19264_v6 }
 0x331   : > { %v6332_v52 = vrot.slane %v6331_v28, 2  ;;  %v6349_v13 = vadd.f32 %v6348_v15, %v6347_v48 }
 0x333   : > { %v6333_v44 = vadd.f32 %v6332_v52, %v6331_v28  ;;  %v6350_v35 = vrot.slane %v6349_v13, 2  ;;  %v19266_v15 = vpop.permute.xlu0 %6657  ;;  %v19268_v52 = vpop.permute.xlu1 %6702 }
 0x334   : > { %20697 = vst [vmem:[#allocation21_spill] sm:$0xff] %v19266_v15  ;;  %20698 = vst [vmem:[#allocation22_spill] sm:$0xff] %v19268_v52 }
 0x335   : > { %v6334_v60 = vrot.slane %v6333_v44, 1  ;;  %v6351_v32 = vadd.f32 %v6350_v35, %v6349_v13 }
 0x337   : > { %v6335_v26 = vadd.f32 %v6334_v60, %v6333_v44  ;;  %v6352_v27 = vrot.slane %v6351_v32, 1  ;;  %v6388_v44 = vlaneseq  ;;  %v19272_v35 = vpop.permute.xlu1 %6712  ;;  %v6364_v60 = vld [vmem:[%s20652_s3] sm:$0x1] }
 0x338   : > { %20700 = vst [vmem:[#allocation24_spill] sm:$0xff] %v19272_v35 }
 0x339   : > { %v6336_v61 = vadd.f32 %v6335_v26, %v19119_v11  ;;  %v6353_v8 = vadd.f32 %v6352_v27, %v6351_v32  ;;  %v19270_v11 = vpop.permute.xlu0 %6667 }
 0x33a   : > { %20699 = vst [vmem:[#allocation23_spill] sm:$0xff] %v19270_v11 }
 0x33b   : > { %v6354_v62 = vadd.f32 %v6353_v8, %v19121_v25  ;;  %v6359_v63 = vmul.f32 0.00390625, %v6336_v61  ;;  %v6389_v25 = vshrl.u32 %v6388_v44, 7  ;;  %v19281_v61 = vpop.permute.xlu1 %6722 }
 0x33c   : > { %20703 = vst [vmem:[#allocation27_spill] sm:$0xff] %v19281_v61 }
 0x33d   : > { %v6360_v28 = vmul.f32 0.00390625, %v6354_v62  ;;  %v6361_v22 = vmul.f32 %v6359_v63, %v6359_v63  ;;  %v19277_v32 = vsub.s32 0, %v6389_v25  ;;  %v19279_v27 = vpop.permute.xlu0 %6677  ;;  %v6365_v62 = vld [vmem:[%s20653_s4] sm:$0x1] }
 0x33e   : > { %20702 = vst [vmem:[#allocation26_spill] sm:$0xff] %v19279_v27 }
 0x33f   : > { %v6362_v9 = vsub.f32 %v6360_v28, %v6361_v22  ;;  %20701 = vst [vmem:[#allocation25_spill] sm:$0xff] %v19277_v32  ;;  %v19292_v35 = vpop.permute.xlu1 %6732 }
 0x340   : > { %20705 = vst [vmem:[#allocation29_spill] sm:$0xff] %v19292_v35 }
 0x341   : > { %v6363_v48 = vmax.f32 %v6362_v9, 0.0  ;;  %v19290_v25 = vpop.permute.xlu0 %6687 }
 0x342   : > { %20704 = vst [vmem:[#allocation28_spill] sm:$0xff] %v19290_v25 }
 0x343   : > { %v6366_v13 = vadd.f32 1e-05, %v6363_v48 }
 0x345   : > { %16858 = vrsqrt.f32 %v6366_v13 }
 0x34f   : > { %v16859_v26 = vpop.eup %16858 }
 0x350   : > { %v6368_v8 = vmul.f32 %v16859_v26, %v6364_v60 }
 0x352   : > { %v6369_v28 = vmul.f32 %v6368_v8, %v6359_v63  ;;  %v6391_v22 = vrot.slane %v6368_v8, %v19277_v32 }
 0x354   : > { %v6370_v9 = vsub.f32 %v6365_v62, %v6369_v28  ;;  %v6772_v48 = vmul.f32 %v6391_v22, %v19226_v55  ;;  %v6393_v13 = vmul.f32 %v6391_v22, %v18821_v43  ;;  %v6394_v44 = vmul.f32 %v6391_v22, %v18842_v58 }
 0x355   : > { %v6395_v60 = vmul.f32 %v18815_v39, %v6391_v22  ;;  %v6396_v26 = vmul.f32 %v18825_v19, %v6391_v22  ;;  %v6397_v61 = vmul.f32 %v6391_v22, %v18898_v1  ;;  %v6398_v63 = vmul.f32 %v6391_v22, %v18912_v42 }
 0x356   : > { %v19299_v8 = vrot.slane %v6370_v9, %v19277_v32  ;;  %v6399_v55 = vmul.f32 %v18888_v59, %v6391_v22  ;;  %v6400_v43 = vmul.f32 %v18903_v31, %v6391_v22  ;;  %v6401_v58 = vmul.f32 %v6391_v22, %v18961_v12  ;;  %v20706_v32 = vld [vmem:[#allocation5_spill] sm:$0xff]  ;;  %v20707_v12 = vld [vmem:[#allocation7_spill] sm:$0xff] }
 0x357   : > { %v6402_v62 = vmul.f32 %v6391_v22, %v18977_v33  ;;  %v6403_v28 = vmul.f32 %v18949_v20, %v6391_v22  ;;  %v6404_v39 = vmul.f32 %v18968_v38, %v6391_v22  ;;  %v6405_v19 = vmul.f32 %v6391_v22, %v19015_v34  ;;  %v20708_v33 = vld [vmem:[#allocation4_spill] sm:$0xff]  ;;  %v20709_v38 = vld [vmem:[#allocation6_spill] sm:$0xff] }
 0x358   : > { %v6776_v1 = vadd.f32 %v6772_v48, %v19299_v8  ;;  %v6406_v42 = vmul.f32 %v6391_v22, %v19035_v41  ;;  %v6407_v9 = vmul.f32 %v19007_v24, %v6391_v22  ;;  %v6408_v59 = vmul.f32 %v19025_v10, %v6391_v22  ;;  %v20710_v48 = vld [vmem:[#allocation9_spill] sm:$0xff]  ;;  %v20711_v41 = vld [vmem:[#allocation11_spill] sm:$0xff]  ;;  %v20712_v10 = vld [vmem:[#allocation8_spill] sm:$0xff] }
 0x359   : > { %v19313_v31 = vmul.f32 %v6391_v22, %v20706_v32  ;;  %v19316_v35 = vmul.f32 %v6391_v22, %v20707_v12  ;;  %v19319_v20 = vmul.f32 %v20708_v33, %v6391_v22  ;;  %v19322_v52 = vmul.f32 %v20709_v38, %v6391_v22  ;;  %v19333_v32 = vpop.permute.xlu0 %6697  ;;  %v6795_v12 = vpop.permute.xlu1 %6794  ;;  %v20715_v33 = vld [vmem:[#allocation13_spill] sm:$0xff]  ;;  %v20716_v38 = vld [vmem:[#allocation14_spill] sm:$0xff] }
 0x35a   : > { %v6780_v34 = vmax.f32 %v6776_v1, 0.0  ;;  %v19325_v6 = vmul.f32 %v6391_v22, %v20710_v48  ;;  %v19328_v24 = vmul.f32 %v6391_v22, %v20711_v41  ;;  %v19331_v25 = vmul.f32 %v20712_v10, %v6391_v22  ;;  %20713 = vst [vmem:[#allocation5_spill] sm:$0xff] %v19333_v32  ;;  %v20717_v48 = vld [vmem:[#allocation12_spill] sm:$0xff] }
 0x35b   : > { %v19336_v27 = vmul.f32 %v20714_v45, %v6391_v22  ;;  %v19339_v47 = vmul.f32 %v6391_v22, %v20715_v33  ;;  %v19342_v1 = vmul.f32 %v6391_v22, %v20716_v38  ;;  %v19345_v11 = vmul.f32 %v20717_v48, %v6391_v22 }
 0x35c   : > { %v6808_v41 = vmul.f32 %v6795_v12, %v6780_v34  ;;  %v19348_v46 = vmul.f32 %v18975_v21, %v6391_v22  ;;  %v19351_v10 = vmul.f32 %v6391_v22, %v19023_v14  ;;  %v19354_v32 = vmul.f32 %v6391_v22, %v19043_v17 }
 0x35d   : > { %v19357_v45 = vmul.f32 %v19013_v40, %v6391_v22  ;;  %v19360_v33 = vmul.f32 %v19033_v29, %v6391_v22  ;;  %v19363_v38 = vmul.f32 %v6391_v22, %v19220_v51  ;;  %v19366_v34 = vmul.f32 %v19218_v50, %v6391_v22 }
 0x35e   : > { %20718 = vst [vmem:[#allocation7_spill] sm:$0xff] %v19354_v32  ;;  %6812 = vst [vmem:[#allocation3 + $0x120] sm:$0xff] %v6808_v41  ;;  %v19369_v21 = vmul.f32 %v19224_v57, %v6391_v22  ;;  %v6415_v14 = vadd.f32 %v19299_v8, %v6393_v13  ;;  %v6416_v17 = vadd.f32 %v19299_v8, %v6394_v44  ;;  %v19382_v13 = vpop.permute.xlu0 %6707 }
 0x35f   : > { %20719 = vst [vmem:[#allocation4_spill] sm:$0xff] %v19357_v45  ;;  %20720 = vst [vmem:[#allocation6_spill] sm:$0xff] %v19360_v33  ;;  %v6417_v40 = vadd.f32 %v19299_v8, %v6395_v60  ;;  %v6418_v12 = vadd.f32 %v19299_v8, %v6396_v26  ;;  %v6419_v29 = vadd.f32 %v19299_v8, %v6397_v61 }
 0x360   : > { %20721 = vst [vmem:[#allocation9_spill] sm:$0xff] %v19363_v38  ;;  %20722 = vst [vmem:[#allocation11_spill] sm:$0xff] %v19366_v34  ;;  %v6420_v51 = vadd.f32 %v19299_v8, %v6398_v63  ;;  %v6421_v48 = vadd.f32 %v19299_v8, %v6399_v55  ;;  %v6422_v50 = vadd.f32 %v19299_v8, %v6400_v43  ;;  %v6431_v55 = vmax.f32 %v6415_v14, 0.0 }
 0x361   : > { %20723 = vst [vmem:[#allocation8_spill] sm:$0xff] %v19369_v21  ;;  %v6423_v41 = vadd.f32 %v19299_v8, %v6401_v58  ;;  %v6424_v57 = vadd.f32 %v19299_v8, %v6402_v62  ;;  %v6425_v22 = vadd.f32 %v19299_v8, %v6403_v28  ;;  %20724 = vst [vmem:[#allocation10_spill] sm:$0xff] %v19382_v13  ;;  %v6432_v43 = vmax.f32 %v6416_v17, 0.0 }
 0x362   : > { %v6426_v44 = vadd.f32 %v19299_v8, %v6404_v39  ;;  %v6427_v60 = vadd.f32 %v19299_v8, %v6405_v19  ;;  %v6428_v61 = vadd.f32 %v19299_v8, %v6406_v42  ;;  %v6429_v26 = vadd.f32 %v19299_v8, %v6407_v9  ;;  %v19392_v17 = vpop.permute.xlu0 %6717 }
 0x363   : > { %v6430_v63 = vadd.f32 %v19299_v8, %v6408_v59  ;;  %v6433_v21 = vmax.f32 %v6417_v40, 0.0  ;;  %v6434_v58 = vmax.f32 %v6418_v12, 0.0  ;;  %v6435_v34 = vmax.f32 %v6419_v29, 0.0 }
 0x364   : > { %v6436_v62 = vmax.f32 %v6420_v51, 0.0  ;;  %v6437_v38 = vmax.f32 %v6421_v48, 0.0  ;;  %v6438_v28 = vmax.f32 %v6422_v50, 0.0  ;;  %v6439_v15 = vmax.f32 %v6423_v41, 0.0 }
 0x365   : > { %v6440_v13 = vmax.f32 %v6424_v57, 0.0  ;;  %v6441_v33 = vmax.f32 %v6425_v22, 0.0  ;;  %v6442_v39 = vmax.f32 %v6426_v44, 0.0  ;;  %v6443_v45 = vmax.f32 %v6427_v60, 0.0 }
 0x366   : > { %v6444_v19 = vmax.f32 %v6428_v61, 0.0  ;;  %v6445_v32 = vmax.f32 %v6429_v26, 0.0  ;;  %v6446_v42 = vmax.f32 %v6430_v63, 0.0  ;;  %v6543_v9 = vmul.f32 %v19206_v30, %v6431_v55  ;;  %v20728_v26 = vld [vmem:[#allocation21_spill] sm:$0xff] }
 0x367   : > { %v6544_v59 = vmul.f32 %v19174_v23, %v6432_v43  ;;  %v6545_v14 = vmul.f32 %v19210_v2, %v6433_v21  ;;  %v6546_v40 = vmul.f32 %v19193_v37, %v6434_v58  ;;  %v6547_v12 = vmul.f32 %v19214_v7, %v6435_v34  ;;  %v20729_v55 = vld [vmem:[#allocation17_spill] sm:$0xff]  ;;  %v20730_v58 = vld [vmem:[#allocation23_spill] sm:$0xff] }
 0x368   : > { %v6548_v29 = vmul.f32 %v19202_v53, %v6436_v62  ;;  %v6549_v51 = vmul.f32 %v19228_v54, %v6437_v38  ;;  %v6550_v48 = vmul.f32 %v19204_v4, %v6438_v28  ;;  %v6551_v50 = vmul.f32 %v19247_v49, %v6439_v15  ;;  %6559 = vst [vmem:[#allocation3 + $0x18] sm:$0xff] %v6543_v9 }
 0x369   : > { %v6552_v30 = vmul.f32 %v19208_v0, %v6440_v13  ;;  %v6553_v23 = vmul.f32 %v19252_v36, %v6441_v33  ;;  %6560 = vst [vmem:[#allocation3 + $0x20] sm:$0xff] %v6544_v59  ;;  %6561 = vst [vmem:[#allocation3 + $0x28] sm:$0xff] %v6545_v14  ;;  %v6554_v2 = vmul.f32 %v19212_v18, %v6442_v39  ;;  %v20731_v39 = vld [vmem:[#allocation18_spill] sm:$0xff]  ;;  %v20733_v59 = vld [vmem:[#allocation19_spill] sm:$0xff] }
 0x36a   : > { %v6555_v37 = vmul.f32 %v19256_v5, %v6443_v45  ;;  %v6556_v7 = vmul.f32 %v19216_v16, %v6444_v19  ;;  %v6557_v53 = vmul.f32 %v19262_v3, %v6445_v32  ;;  %6562 = vst [vmem:[#allocation3 + $0x30] sm:$0xff] %v6546_v40  ;;  %6563 = vst [vmem:[#allocation3 + $0x38] sm:$0xff] %v6547_v12  ;;  %v20734_v40 = vld [vmem:[#allocation28_spill] sm:$0xff] }
 0x36b   : > { %6564 = vst [vmem:[#allocation3 + $0x40] sm:$0xff] %v6548_v29  ;;  %6565 = vst [vmem:[#allocation3 + $0x48] sm:$0xff] %v6549_v51  ;;  %v6558_v4 = vmul.f32 %v19230_v56, %v6446_v42  ;;  %v6607_v0 = vadd.f32 %v19313_v31, %v19299_v8  ;;  %v6608_v18 = vadd.f32 %v19316_v35, %v19299_v8  ;;  %v20725_v31 = vld [vmem:[#allocation7_spill] sm:$0xff]  ;;  %v20732_v42 = vld [vmem:[#allocation26_spill] sm:$0xff] }
 0x36c   : > { %6566 = vst [vmem:[#allocation3 + $0x50] sm:$0xff] %v6550_v48  ;;  %6567 = vst [vmem:[#allocation3 + $0x58] sm:$0xff] %v6551_v50  ;;  %v6609_v16 = vadd.f32 %v19319_v20, %v19299_v8  ;;  %v6610_v54 = vadd.f32 %v19322_v52, %v19299_v8  ;;  %v6611_v56 = vadd.f32 %v19325_v6, %v19299_v8  ;;  %v6728_v6 = vpop.permute.xlu0 %6727  ;;  %v20735_v50 = vld [vmem:[#allocation20_spill] sm:$0xff] }
 0x36d   : > { %6568 = vst [vmem:[#allocation3 + $0x60] sm:$0xff] %v6552_v30  ;;  %6569 = vst [vmem:[#allocation3 + $0x68] sm:$0xff] %v6553_v23  ;;  %v6612_v49 = vadd.f32 %v19328_v24, %v19299_v8  ;;  %v6613_v36 = vadd.f32 %v19331_v25, %v19299_v8  ;;  %v6614_v5 = vadd.f32 %v19336_v27, %v19299_v8  ;;  %v20726_v27 = vld [vmem:[#allocation4_spill] sm:$0xff]  ;;  %v6624_v45 = vmax.f32 %v6608_v18, 0.0  ;;  %v20736_v23 = vld [vmem:[#allocation5_spill] sm:$0xff] }
 0x36e   : > { %6570 = vst [vmem:[#allocation3 + $0x70] sm:$0xff] %v6554_v2  ;;  %6571 = vst [vmem:[#allocation3 + $0x78] sm:$0xff] %v6555_v37  ;;  %v6615_v3 = vadd.f32 %v19339_v47, %v19299_v8  ;;  %v6616_v15 = vadd.f32 %v19342_v1, %v19299_v8  ;;  %v6617_v52 = vadd.f32 %v19345_v11, %v19299_v8  ;;  %v20727_v47 = vld [vmem:[#allocation6_spill] sm:$0xff]  ;;  %v6623_v1 = vmax.f32 %v6607_v0, 0.0 }
 0x36f   : > { %6572 = vst [vmem:[#allocation3 + $0x80] sm:$0xff] %v6556_v7  ;;  %6573 = vst [vmem:[#allocation3 + $0x88] sm:$0xff] %v6557_v53  ;;  %v6618_v35 = vadd.f32 %v19348_v46, %v19299_v8  ;;  %v6619_v25 = vadd.f32 %v19351_v10, %v19299_v8  ;;  %v6620_v20 = vadd.f32 %v20725_v31, %v19299_v8  ;;  %v6625_v33 = vmax.f32 %v6609_v16, 0.0  ;;  %v6857_v29 = vld [vmem:[#allocation3 + $0x16] sm:$0xff] }
 0x370   : > { %6574 = vst [vmem:[#allocation3 + $0x90] sm:$0xff] %v6558_v4  ;;  %v6621_v24 = vadd.f32 %v20726_v27, %v19299_v8  ;;  %v6622_v32 = vadd.f32 %v20727_v47, %v19299_v8  ;;  %v6626_v11 = vmax.f32 %v6610_v54, 0.0  ;;  %v6627_v38 = vmax.f32 %v6611_v56, 0.0  ;;  %v6790_v28 = vpop.permute.xlu0 %6789  ;;  %v6858_v51 = vld [vmem:[#allocation3 + $0x1e] sm:$0xff]  ;;  %v6859_v48 = vld [vmem:[#allocation3 + $0x26] sm:$0xff]  ;;  %v20737_v37 = vld [vmem:[#allocation22_spill] sm:$0xff] }
 0x371   : > { %v6628_v34 = vmax.f32 %v6612_v49, 0.0  ;;  %v6629_v21 = vmax.f32 %v6613_v36, 0.0  ;;  %v6630_v46 = vmax.f32 %v6614_v5, 0.0  ;;  %v6631_v41 = vmax.f32 %v6615_v3, 0.0  ;;  %v20738_v53 = vld [vmem:[#allocation10_spill] sm:$0xff]  ;;  %v20739_v54 = vld [vmem:[#allocation24_spill] sm:$0xff] }
 0x372   : > { %v6632_v57 = vmax.f32 %v6616_v15, 0.0  ;;  %v6633_v10 = vmax.f32 %v6617_v52, 0.0  ;;  %v6634_v22 = vmax.f32 %v6618_v35, 0.0  ;;  %v6635_v13 = vmax.f32 %v6619_v25, 0.0  ;;  %v6860_v16 = vld [vmem:[#allocation3 + $0x2e] sm:$0xff]  ;;  %v20740_v36 = vld [vmem:[#allocation27_spill] sm:$0xff] }
 0x373   : > { %v6636_v44 = vmax.f32 %v6620_v20, 0.0  ;;  %v6637_v60 = vmax.f32 %v6621_v24, 0.0  ;;  %v6638_v61 = vmax.f32 %v6622_v32, 0.0  ;;  %v6735_v63 = vmul.f32 %v20728_v26, %v6623_v1  ;;  %v20741_v15 = vld [vmem:[#allocation29_spill] sm:$0xff]  ;;  %v20743_v31 = vld [vmem:[#allocation11_spill] sm:$0xff] }
 0x374   : > { %v6736_v43 = vmul.f32 %v20729_v55, %v6624_v45  ;;  %v6737_v62 = vmul.f32 %v20730_v58, %v6625_v33  ;;  %v6738_v19 = vmul.f32 %v20731_v39, %v6626_v11  ;;  %v6739_v9 = vmul.f32 %v20732_v42, %v6627_v38  ;;  %v20742_v35 = vld [vmem:[#allocation9_spill] sm:$0xff]  ;;  %v6800_v11 = vpop.permute.xlu0 %6799  ;;  %v6805_v38 = vpop.permute.xlu1 %6804  ;;  %v6862_v26 = vld [vmem:[#allocation3 + $0x3e] sm:$0xff] }
 0x375   : > { %v6740_v14 = vmul.f32 %v20733_v59, %v6628_v34  ;;  %v6741_v12 = vmul.f32 %v20734_v40, %v6629_v21  ;;  %v6742_v30 = vmul.f32 %v20735_v50, %v6630_v46  ;;  %v6743_v2 = vmul.f32 %v20736_v23, %v6631_v41  ;;  %6751 = vst [vmem:[#allocation3 + $0x98] sm:$0xff] %v6735_v63  ;;  %v16660_v32 = vld [vmem:[%s20654_s5 + $0x8] sm:$0xff]   ;;  %v20745_v46 = vld [vmem:[#allocation15_spill] sm:$0xff]  ;;  %v20746_v58 = vld [vmem:[#allocation16_spill] sm:$0xff] }
 0x376   : > { %v6744_v7 = vmul.f32 %v20737_v37, %v6632_v57  ;;  %v6745_v4 = vmul.f32 %v20738_v53, %v6633_v10  ;;  %6752 = vst [vmem:[#allocation3 + $0xa0] sm:$0xff] %v6736_v43  ;;  %6753 = vst [vmem:[#allocation3 + $0xa8] sm:$0xff] %v6737_v62  ;;  %v8844_v0 = vld [vmem:[#allocation3 + $0x86] sm:$0xff]  ;;  %v6746_v56 = vmul.f32 %v20739_v54, %v6634_v22  ;;  %v16662_v57 = vld [vmem:[%s20654_s5 + $0x10] sm:$0xff]  }
 0x377   : > { %v8845_v18 = vld [vmem:[#allocation3 + $0x8e] sm:$0xff]  ;;  %v6747_v49 = vmul.f32 %v19392_v17, %v6635_v13  ;;  %v6748_v5 = vmul.f32 %v20740_v36, %v6636_v44  ;;  %v6749_v3 = vmul.f32 %v6728_v6, %v6637_v60  ;;  %6754 = vst [vmem:[#allocation3 + $0xb0] sm:$0xff] %v6738_v19  ;;  %6755 = vst [vmem:[#allocation3 + $0xb8] sm:$0xff] %v6739_v9  ;;  %v20744_v17 = vld [vmem:[#allocation8_spill] sm:$0xff] }
 0x378   : > { %6756 = vst [vmem:[#allocation3 + $0xc0] sm:$0xff] %v6740_v14  ;;  %6757 = vst [vmem:[#allocation3 + $0xc8] sm:$0xff] %v6741_v12  ;;  %v6750_v52 = vmul.f32 %v20741_v15, %v6638_v61  ;;  %v6775_v25 = vadd.f32 %v20742_v35, %v19299_v8  ;;  %v6777_v20 = vadd.f32 %v20743_v31, %v19299_v8  ;;  %v16661_v41 = vld [vmem:[%s20654_s5 + $0x8] sm:$0xff]   ;;  %v6861_v61 = vld [vmem:[#allocation3 + $0x36] sm:$0xff] }
 0x379   : > { %6758 = vst [vmem:[#allocation3 + $0xd0] sm:$0xff] %v6742_v30  ;;  %6759 = vst [vmem:[#allocation3 + $0xd8] sm:$0xff] %v6743_v2  ;;  %v6778_v27 = vadd.f32 %v20744_v17, %v19299_v8  ;;  %v6872_v6 = vpack.c.bf16 %v6858_v51, %v6857_v29  ;;  %v8860_v24 = vpack.c.bf16 %v8845_v18, %v8844_v0  ;;  %v6863_v55 = vld [vmem:[#allocation3 + $0x46] sm:$0xff]  ;;  %v6864_v43 = vld [vmem:[#allocation3 + $0x4e] sm:$0xff] }
 0x37a   : > { %6760 = vst [vmem:[#allocation3 + $0xe0] sm:$0xff] %v6744_v7  ;;  %6761 = vst [vmem:[#allocation3 + $0xe8] sm:$0xff] %v6745_v4  ;;  %v6873_v47 = vpack.c.bf16 %v6860_v16, %v6859_v48  ;;  %v6779_v1 = vmax.f32 %v6775_v25, 0.0  ;;  %v6781_v45 = vmax.f32 %v6777_v20, 0.0  ;;  %v6874_v62 = vpack.c.bf16 %v6862_v26, %v6861_v61  ;;  %v16663_v19 = vld [vmem:[%s20654_s5 + $0x10] sm:$0xff]   ;;  %v16665_v40 = vld [vmem:[%s20654_s5 + $0x18] sm:$0xff]  }
 0x37b   : > { %6762 = vst [vmem:[#allocation3 + $0xf0] sm:$0xff] %v6746_v56  ;;  %6763 = vst [vmem:[#allocation3 + $0xf8] sm:$0xff] %v6747_v49  ;;  %v6782_v33 = vmax.f32 %v6778_v27, 0.0  ;;  %15019 = vmatmul.mubr.bf16.vlgmr.msra.gmra.mrb[16].mxu1 %v6872_v6  ;;  %15306 = vmatprep.mubr.bf16.mxu0 %v8860_v24  ;;  %v6875_v39 = vpack.c.bf16 %v6864_v43, %v6863_v55  ;;  %v16666_v29 = vld [vmem:[%s20654_s5 + $0x20] sm:$0xff]   ;;  %v6865_v51 = vld [vmem:[#allocation3 + $0x56] sm:$0xff] }
 0x37c   : > { %6764 = vst [vmem:[#allocation3 + $0x100] sm:$0xff] %v6748_v5  ;;  %6765 = vst [vmem:[#allocation3 + $0x108] sm:$0xff] %v6749_v3  ;;  %v6807_v8 = vmul.f32 %v6790_v28, %v6779_v1  ;;  %v6809_v34 = vmul.f32 %v6800_v11, %v6781_v45  ;;  %15035 = vmatpush3.bf16.msra.mxu1 %v20745_v46  ;;  %15022 = vmatprep.mubr.bf16.mxu1 %v6873_v47  ;;  %v8846_v10 = vld [vmem:[#allocation3 + $0x96] sm:$0xff]  ;;  %v6866_v48 = vld [vmem:[#allocation3 + $0x5e] sm:$0xff] }
 0x37d   : > { %6766 = vst [vmem:[#allocation3 + $0x110] sm:$0xff] %v6750_v52  ;;  %v6810_v21 = vmul.f32 %v6805_v38, %v6782_v33  ;;  %v8847_v22 = vld [vmem:[#allocation3 + $0x9e] sm:$0xff]  ;;  %v8848_v13 = vld [vmem:[#allocation3 + $0xa6] sm:$0xff]  ;;  %15036 = vmatprep.subr.bf16.mxu1 %v16660_v32  ;;  %v6868_v23 = vld [vmem:[#allocation3 + $0x6e] sm:$0xff]  ;;  %v6876_v2 = vpack.c.bf16 %v6866_v48, %v6865_v51 }
 0x37e   : > { %6811 = vst [vmem:[#allocation3 + $0x118] sm:$0xff] %v6807_v8  ;;  %6813 = vst [vmem:[#allocation3 + $0x128] sm:$0xff] %v6809_v34  ;;  %v8861_v44 = vpack.c.bf16 %v8847_v22, %v8846_v10  ;;  %v8849_v60 = vld [vmem:[#allocation3 + $0xae] sm:$0xff]  ;;  %v16664_v28 = vld [vmem:[%s20654_s5 + $0x18] sm:$0xff]  }
 0x37f   : > { %6814 = vst [vmem:[#allocation3 + $0x130] sm:$0xff] %v6810_v21  ;;  %v8862_v63 = vpack.c.bf16 %v8849_v60, %v8848_v13  ;;  %v8850_v42 = vld [vmem:[#allocation3 + $0xb6] sm:$0xff]  ;;  %v8851_v9 = vld [vmem:[#allocation3 + $0xbe] sm:$0xff]  ;;  %v8852_v59 = vld [vmem:[#allocation3 + $0xc6] sm:$0xff] }
 0x380   : > { %15307 = vmatmul.mubr.bf16.vlgmr.msra.gmra.mrb[20].mxu0 %v8861_v44  ;;  %15037 = vmatpush3.bf16.msra.mxu1 %v16660_v32  ;;  %v8853_v14 = vld [vmem:[#allocation3 + $0xce] sm:$0xff]  ;;  %v8863_v12 = vpack.c.bf16 %v8851_v9, %v8850_v42  ;;  %v6867_v30 = vld [vmem:[#allocation3 + $0x66] sm:$0xff]  ;;  %v8854_v4 = vld [vmem:[#allocation3 + $0xd6] sm:$0xff] }
 0x381   : > { %15310 = vmatprep.mubr.bf16.mxu0 %v8862_v63  ;;  %15323 = vmatpush3.bf16.msra.mxu0 %v20746_v58  ;;  %v8864_v50 = vpack.c.bf16 %v8853_v14, %v8852_v59  ;;  %v16668_v37 = vld [vmem:[%s20654_s5 + $0x28] sm:$0xff]   ;;  %v6877_v7 = vpack.c.bf16 %v6868_v23, %v6867_v30  ;;  %v16667_v53 = vld [vmem:[%s20654_s5 + $0x20] sm:$0xff]   ;;  %v16670_v5 = vld [vmem:[%s20654_s5 + $0x30] sm:$0xff]  }
 0x382   : > { %15324 = vmatprep.subr.bf16.mxu0 %v16661_v41  ;;  %15038 = vmatprep.subr.bf16.mxu1 %v16662_v57  ;;  %v8855_v0 = vld [vmem:[#allocation3 + $0xde] sm:$0xff]  ;;  %v8856_v18 = vld [vmem:[#allocation3 + $0xe6] sm:$0xff]  ;;  %v8857_v16 = vld [vmem:[#allocation3 + $0xee] sm:$0xff] }
 0x383   : > { %15023 = vmatmul.mubr.bf16.gmra.mrb[20].mxu1 %v6874_v62  ;;  %v16669_v54 = vld [vmem:[%s20654_s5 + $0x28] sm:$0xff]   ;;  %v8865_v36 = vpack.c.bf16 %v8855_v0, %v8854_v4  ;;  %v6869_v3 = vld [vmem:[#allocation3 + $0x76] sm:$0xff]  ;;  %v6870_v15 = vld [vmem:[#allocation3 + $0x7e] sm:$0xff]  ;;  %v8866_v52 = vpack.c.bf16 %v8857_v16, %v8856_v18 }
 0x384   : > { %15039 = vmatpush3.bf16.msra.mxu1 %v16662_v57  ;;  %15026 = vmatprep.mubr.bf16.mxu1 %v6875_v39  ;;  %v6815_v56 = vld [vmem:[#allocation3 + $0x5] sm:$0xff]  ;;  %v6816_v49 = vld [vmem:[#allocation3 + $0xd] sm:$0xff]  ;;  %v6878_v25 = vpack.c.bf16 %v6870_v15, %v6869_v3  ;;  %v16672_v31 = vld [vmem:[%s20654_s5 + $0x38] sm:$0xff]  }
 0x385   : > { %15325 = vmatpush3.bf16.msra.mxu0 %v16661_v41  ;;  %15040 = vmatprep.subr.bf16.mxu1 %v16664_v28  ;;  %v6831_v35 = vpack.c.bf16 %v6816_v49, %v6815_v56  ;;  %v16671_v20 = vld [vmem:[%s20654_s5 + $0x30] sm:$0xff]   ;;  %v8859_v27 = vld [vmem:[#allocation3 + $0xfe] sm:$0xff]  ;;  %v16676_v21 = vld [vmem:[%s20654_s5 + $0x88] sm:$0xff]  }
 0x386   : > { %15326 = vmatprep.subr.bf16.mxu0 %v16663_v19  ;;  %v8858_v17 = vld [vmem:[#allocation3 + $0xf6] sm:$0xff]  ;;  %v8804_v6 = vld [vmem:[#allocation3 + $0x85] sm:$0xff]  ;;  %v8805_v24 = vld [vmem:[#allocation3 + $0x8d] sm:$0xff] }
 0x387   : > { %v16673_v47 = vld [vmem:[%s20654_s5 + $0x38] sm:$0xff]   ;;  %v8867_v32 = vpack.c.bf16 %v8859_v27, %v8858_v17  ;;  %v16674_v1 = vld [vmem:[%s20654_s5 + $0x80] sm:$0xff]   ;;  %v8820_v11 = vpack.c.bf16 %v8805_v24, %v8804_v6  ;;  %v6820_v8 = vld [vmem:[#allocation3 + $0x2d] sm:$0xff] }
 0x388   : > { %15311 = vmatmul.mubr.bf16.gmra.mrb[24].mxu0 %v8863_v12  ;;  %15041 = vmatpush3.bf16.msra.mxu1 %v16664_v28  ;;  %v6817_v45 = vld [vmem:[#allocation3 + $0x15] sm:$0xff]  ;;  %v6818_v33 = vld [vmem:[#allocation3 + $0x1d] sm:$0xff]  ;;  %v6819_v38 = vld [vmem:[#allocation3 + $0x25] sm:$0xff] }
 0x389   : > { %15314 = vmatprep.mubr.bf16.mxu0 %v8864_v50  ;;  %15327 = vmatpush3.bf16.msra.mxu0 %v16663_v19  ;;  %v6832_v34 = vpack.c.bf16 %v6818_v33, %v6817_v45  ;;  %v6833_v46 = vpack.c.bf16 %v6820_v8, %v6819_v38  ;;  %v16675_v41 = vld [vmem:[%s20654_s5 + $0x80] sm:$0xff]   ;;  %v8806_v57 = vld [vmem:[#allocation3 + $0x95] sm:$0xff]  ;;  %v8809_v13 = vld [vmem:[#allocation3 + $0xad] sm:$0xff] }
 0x38a   : > { %15328 = vmatprep.subr.bf16.mxu0 %v16665_v40  ;;  %15042 = vmatprep.subr.bf16.mxu1 %v16666_v29  ;;  %v8807_v10 = vld [vmem:[#allocation3 + $0x9d] sm:$0xff]  ;;  %v8808_v22 = vld [vmem:[#allocation3 + $0xa5] sm:$0xff]  ;;  %v16678_v61 = vld [vmem:[%s20654_s5 + $0x90] sm:$0xff]  }
 0x38b   : > { %15027 = vmatmul.mubr.bf16.gmra.mrb[24].mxu1 %v6876_v2  ;;  %v16677_v44 = vld [vmem:[%s20654_s5 + $0x88] sm:$0xff]   ;;  %v8821_v60 = vpack.c.bf16 %v8807_v10, %v8806_v57  ;;  %v6821_v26 = vld [vmem:[#allocation3 + $0x35] sm:$0xff]  ;;  %v6822_v63 = vld [vmem:[#allocation3 + $0x3d] sm:$0xff]  ;;  %v8822_v55 = vpack.c.bf16 %v8809_v13, %v8808_v22 }
 0x38c   : > { %15043 = vmatpush3.bf16.msra.mxu1 %v16666_v29  ;;  %15030 = vmatprep.mubr.bf16.mxu1 %v6877_v7  ;;  %v6823_v43 = vld [vmem:[#allocation3 + $0x45] sm:$0xff]  ;;  %v6824_v58 = vld [vmem:[#allocation3 + $0x4d] sm:$0xff]  ;;  %v6834_v62 = vpack.c.bf16 %v6822_v63, %v6821_v26  ;;  %v16680_v28 = vld [vmem:[%s20654_s5 + $0x98] sm:$0xff]  }
 0x38d   : > { %15329 = vmatpush3.bf16.msra.mxu0 %v16665_v40  ;;  %15044 = vmatprep.subr.bf16.mxu1 %v16668_v37  ;;  %v6835_v39 = vpack.c.bf16 %v6824_v58, %v6823_v43  ;;  %v16679_v19 = vld [vmem:[%s20654_s5 + $0x90] sm:$0xff]   ;;  %v8811_v9 = vld [vmem:[#allocation3 + $0xbd] sm:$0xff]  ;;  %v8812_v59 = vld [vmem:[#allocation3 + $0xc5] sm:$0xff] }
 0x38e   : > { %15330 = vmatprep.subr.bf16.mxu0 %v16667_v53  ;;  %v8810_v42 = vld [vmem:[#allocation3 + $0xb5] sm:$0xff]  ;;  %v8813_v14 = vld [vmem:[#allocation3 + $0xcd] sm:$0xff]  ;;  %v16682_v29 = vld [vmem:[%s20654_s5 + $0xa0] sm:$0xff]  }
 0x38f   : > { %v16681_v40 = vld [vmem:[%s20654_s5 + $0x98] sm:$0xff]   ;;  %v8823_v12 = vpack.c.bf16 %v8811_v9, %v8810_v42  ;;  %v8824_v50 = vpack.c.bf16 %v8813_v14, %v8812_v59  ;;  %v6827_v30 = vld [vmem:[#allocation3 + $0x65] sm:$0xff]  ;;  %v6828_v23 = vld [vmem:[#allocation3 + $0x6d] sm:$0xff] }
 0x390   : > { %15315 = vmatmul.mubr.bf16.gmra.mrb[28].mxu0 %v8865_v36  ;;  %15045 = vmatpush3.bf16.msra.mxu1 %v16668_v37  ;;  %v6825_v51 = vld [vmem:[#allocation3 + $0x55] sm:$0xff]  ;;  %v6826_v48 = vld [vmem:[#allocation3 + $0x5d] sm:$0xff]  ;;  %v16684_v37 = vld [vmem:[%s20654_s5 + $0xa8] sm:$0xff]   ;;  %v6837_v7 = vpack.c.bf16 %v6828_v23, %v6827_v30 }
 0x391   : > { %15318 = vmatprep.mubr.bf16.mxu0 %v8866_v52  ;;  %15331 = vmatpush3.bf16.msra.mxu0 %v16667_v53  ;;  %v6836_v2 = vpack.c.bf16 %v6826_v48, %v6825_v51  ;;  %v16683_v53 = vld [vmem:[%s20654_s5 + $0xa0] sm:$0xff]   ;;  %v8814_v4 = vld [vmem:[#allocation3 + $0xd5] sm:$0xff]  ;;  %v8817_v16 = vld [vmem:[#allocation3 + $0xed] sm:$0xff] }
 0x392   : > { %15332 = vmatprep.subr.bf16.mxu0 %v16669_v54  ;;  %15046 = vmatprep.subr.bf16.mxu1 %v16670_v5  ;;  %v8815_v0 = vld [vmem:[#allocation3 + $0xdd] sm:$0xff]  ;;  %v8816_v18 = vld [vmem:[#allocation3 + $0xe5] sm:$0xff]  ;;  %v7187_v49 = vld [vmem:[#allocation3 + $0xf] sm:$0xff] }
 0x393   : > { %15031 = vmatmul.mubr.bf16.gmra.mrb[28].mxu1 %v6878_v25  ;;  %v7186_v56 = vld [vmem:[#allocation3 + $0x7] sm:$0xff]  ;;  %v8825_v36 = vpack.c.bf16 %v8815_v0, %v8814_v4  ;;  %v6829_v3 = vld [vmem:[#allocation3 + $0x75] sm:$0xff]  ;;  %v6830_v15 = vld [vmem:[#allocation3 + $0x7d] sm:$0xff]  ;;  %v8826_v52 = vpack.c.bf16 %v8817_v16, %v8816_v18 }
 0x394   : > { %15047 = vmatpush3.bf16.msra.mxu1 %v16670_v5  ;;  %15050 = vmatprep.mubr.bf16.mxu1 %v6831_v35  ;;  %v16686_v5 = vld [vmem:[%s20654_s5 + $0xb0] sm:$0xff]   ;;  %v7202_v35 = vpack.c.bf16 %v7187_v49, %v7186_v56  ;;  %v6838_v25 = vpack.c.bf16 %v6830_v15, %v6829_v3  ;;  %v8819_v27 = vld [vmem:[#allocation3 + $0xfd] sm:$0xff]  ;;  %v9174_v6 = vld [vmem:[#allocation3 + $0x87] sm:$0xff] }
 0x395   : > { %15333 = vmatpush3.bf16.msra.mxu0 %v16669_v54  ;;  %15048 = vmatprep.subr.bf16.mxu1 %v16672_v31  ;;  %v16685_v54 = vld [vmem:[%s20654_s5 + $0xa8] sm:$0xff]   ;;  %v8818_v17 = vld [vmem:[#allocation3 + $0xf5] sm:$0xff]  ;;  %v7189_v33 = vld [vmem:[#allocation3 + $0x1f] sm:$0xff] }
 0x396   : > { %15334 = vmatprep.subr.bf16.mxu0 %v16671_v20  ;;  %v9175_v24 = vld [vmem:[#allocation3 + $0x8f] sm:$0xff]  ;;  %v7188_v45 = vld [vmem:[#allocation3 + $0x17] sm:$0xff]  ;;  %v7190_v38 = vld [vmem:[#allocation3 + $0x27] sm:$0xff] }
 0x397   : > { %v7191_v8 = vld [vmem:[#allocation3 + $0x2f] sm:$0xff]  ;;  %v9176_v57 = vld [vmem:[#allocation3 + $0x97] sm:$0xff]  ;;  %v9177_v10 = vld [vmem:[#allocation3 + $0x9f] sm:$0xff] }
 0x398   : > { %15319 = vmatmul.mubr.bf16.gmra.mrb[32].mxu0 %v8867_v32  ;;  %15049 = vmatpush3.bf16.msra.mxu1 %v16672_v31  ;;  %v16688_v31 = vld [vmem:[%s20654_s5 + $0xb8] sm:$0xff]   ;;  %v8827_v32 = vpack.c.bf16 %v8819_v27, %v8818_v17  ;;  %v9178_v22 = vld [vmem:[#allocation3 + $0xa7] sm:$0xff]  ;;  %v9179_v13 = vld [vmem:[#allocation3 + $0xaf] sm:$0xff] }
 0x399   : > { %15335 = vmatpush3.bf16.msra.mxu0 %v16671_v20  ;;  %15338 = vmatprep.mubr.bf16.mxu0 %v8820_v11  ;;  %v16687_v20 = vld [vmem:[%s20654_s5 + $0xb0] sm:$0xff]   ;;  %v19555_v11 = vpack.c.bf16 %v9175_v24, %v9174_v6  ;;  %v7193_v63 = vld [vmem:[#allocation3 + $0x3f] sm:$0xff]  ;;  %v7194_v43 = vld [vmem:[#allocation3 + $0x47] sm:$0xff] }
 0x39a   : > { %15336 = vmatprep.subr.bf16.mxu0 %v16673_v47  ;;  %15066 = vmatprep.subr.bf16.mxu1 %v16674_v1  ;;  %v7192_v26 = vld [vmem:[#allocation3 + $0x37] sm:$0xff]  ;;  %v7195_v58 = vld [vmem:[#allocation3 + $0x4f] sm:$0xff]  ;;  %v9181_v9 = vld [vmem:[#allocation3 + $0xbf] sm:$0xff] }
 0x39b   : > { %15051 = vmatmul.mubr.bf16.vlgmr.msra.gmra.mrb[16].mxu1 %v6832_v34  ;;  %v19558_v34 = vpack.c.bf16 %v7189_v33, %v7188_v45  ;;  %v9180_v42 = vld [vmem:[#allocation3 + $0xb7] sm:$0xff]  ;;  %v9182_v59 = vld [vmem:[#allocation3 + $0xc7] sm:$0xff]  ;;  %v9183_v14 = vld [vmem:[#allocation3 + $0xcf] sm:$0xff] }
 0x39c   : > { %15067 = vmatpush3.bf16.msra.mxu1 %v16674_v1  ;;  %15054 = vmatprep.mubr.bf16.mxu1 %v6833_v46  ;;  %v16690_v1 = vld [vmem:[%s20654_s5 + $0xc0] sm:$0xff]   ;;  %v19563_v46 = vpack.c.bf16 %v7191_v8, %v7190_v38  ;;  %v7196_v51 = vld [vmem:[#allocation3 + $0x57] sm:$0xff]  ;;  %v7199_v23 = vld [vmem:[#allocation3 + $0x6f] sm:$0xff] }
 0x39d   : > { %15337 = vmatpush3.bf16.msra.mxu0 %v16673_v47  ;;  %15068 = vmatprep.subr.bf16.mxu1 %v16676_v21  ;;  %v16689_v47 = vld [vmem:[%s20654_s5 + $0xb8] sm:$0xff]   ;;  %v7198_v30 = vld [vmem:[#allocation3 + $0x67] sm:$0xff]  ;;  %v9187_v16 = vld [vmem:[#allocation3 + $0xef] sm:$0xff] }
 0x39e   : > { %15354 = vmatprep.subr.bf16.mxu0 %v16675_v41  ;;  %v7197_v48 = vld [vmem:[#allocation3 + $0x5f] sm:$0xff]  ;;  %v9184_v4 = vld [vmem:[#allocation3 + $0xd7] sm:$0xff]  ;;  %v9186_v18 = vld [vmem:[#allocation3 + $0xe7] sm:$0xff] }
 0x39f   : > { %v9185_v0 = vld [vmem:[#allocation3 + $0xdf] sm:$0xff]  ;;  %v16702_v49 = vld [vmem:[%s20654_s5 + $0xf0] sm:$0xff]   ;;  %v19624_v3 = vpack.c.bf16 %v9187_v16, %v9186_v18  ;;  %v16708_v6 = vld [vmem:[%s20654_s5 + $0x108] sm:$0xff]  }
 0x3a0   : > { %15339 = vmatmul.mubr.bf16.vlgmr.msra.gmra.mrb[20].mxu0 %v8821_v60  ;;  %15069 = vmatpush3.bf16.msra.mxu1 %v16676_v21  ;;  %v16692_v21 = vld [vmem:[%s20654_s5 + $0xc8] sm:$0xff]   ;;  %v19573_v60 = vpack.c.bf16 %v9177_v10, %v9176_v57  ;;  %v9195_v56 = vpack.c.bf16 %v9185_v0, %v9184_v4  ;;  %v16705_v17 = vld [vmem:[%s20654_s5 + $0xf8] sm:$0xff]   ;;  %v16706_v27 = vld [vmem:[%s20654_s5 + $0x100] sm:$0xff]  }
 0x3a1   : > { %15342 = vmatprep.mubr.bf16.mxu0 %v8822_v55  ;;  %15355 = vmatpush3.bf16.msra.mxu0 %v16675_v41  ;;  %v16691_v41 = vld [vmem:[%s20654_s5 + $0xc0] sm:$0xff]   ;;  %v19578_v55 = vpack.c.bf16 %v9179_v13, %v9178_v22  ;;  %v16711_v45 = vld [vmem:[%s20654_s5 + $0x110] sm:$0xff]   ;;  %v16713_v33 = vld [vmem:[%s20654_s5 + $0x118] sm:$0xff]  }
 0x3a2   : > { %15356 = vmatprep.subr.bf16.mxu0 %v16677_v44  ;;  %15070 = vmatprep.subr.bf16.mxu1 %v16678_v61  ;;  %v16707_v24 = vld [vmem:[%s20654_s5 + $0x100] sm:$0xff]   ;;  %v16716_v8 = vld [vmem:[%s20654_s5 + $0x128] sm:$0xff]   ;;  %v16720_v10 = vld [vmem:[%s20654_s5 + $0x138] sm:$0xff]  }
 0x3a3   : > { %15055 = vmatmul.mubr.bf16.gmra.mrb[20].mxu1 %v6834_v62  ;;  %v19582_v62 = vpack.c.bf16 %v7193_v63, %v7192_v26  ;;  %v16714_v38 = vld [vmem:[%s20654_s5 + $0x120] sm:$0xff]   ;;  %v16719_v13 = vld [vmem:[%s20654_s5 + $0x130] sm:$0xff]   ;;  %v16721_v63 = vld [vmem:[%s20654_s5 + $0x138] sm:$0xff]  }
 0x3a4   : > { %15071 = vmatpush3.bf16.msra.mxu1 %v16678_v61  ;;  %15058 = vmatprep.mubr.bf16.mxu1 %v6835_v39  ;;  %v16694_v61 = vld [vmem:[%s20654_s5 + $0xd0] sm:$0xff]   ;;  %v19587_v39 = vpack.c.bf16 %v7195_v58, %v7194_v43  ;;  %v7591_v57 = vld [vmem:[#allocation3 + $0x20] sm:$0xff]  ;;  %v7592_v58 = vld [vmem:[#allocation3 + $0x28] sm:$0xff] }
 0x3a5   : > { %15357 = vmatpush3.bf16.msra.mxu0 %v16677_v44  ;;  %15072 = vmatprep.subr.bf16.mxu1 %v16680_v28  ;;  %v16693_v44 = vld [vmem:[%s20654_s5 + $0xc8] sm:$0xff]   ;;  %v9577_v26 = vld [vmem:[#allocation3 + $0xa0] sm:$0xff]  ;;  %v16728_v4 = vld [vmem:[%s20654_s5 + $0x158] sm:$0xff]  }
 0x3a6   : > { %15358 = vmatprep.subr.bf16.mxu0 %v16679_v19  ;;  %v16722_v43 = vld [vmem:[%s20654_s5 + $0x140] sm:$0xff]   ;;  %v16727_v18 = vld [vmem:[%s20654_s5 + $0x150] sm:$0xff]   ;;  %v9582_v16 = vld [vmem:[#allocation3 + $0xc8] sm:$0xff] }
 0x3a8   : > { %15343 = vmatmul.mubr.bf16.gmra.mrb[24].mxu0 %v8823_v12  ;;  %15073 = vmatpush3.bf16.msra.mxu1 %v16680_v28  ;;  %v16696_v28 = vld [vmem:[%s20654_s5 + $0xd8] sm:$0xff]   ;;  %v19597_v12 = vpack.c.bf16 %v9181_v9, %v9180_v42  ;;  %v16724_v42 = vld [vmem:[%s20654_s5 + $0x148] sm:$0xff]  }
 0x3a9   : > { %15346 = vmatprep.mubr.bf16.mxu0 %v8824_v50  ;;  %15359 = vmatpush3.bf16.msra.mxu0 %v16679_v19  ;;  %v16695_v19 = vld [vmem:[%s20654_s5 + $0xd0] sm:$0xff]   ;;  %v19602_v50 = vpack.c.bf16 %v9183_v14, %v9182_v59  ;;  %v16723_v59 = vld [vmem:[%s20654_s5 + $0x140] sm:$0xff]   ;;  %v9578_v14 = vld [vmem:[#allocation3 + $0xa8] sm:$0xff] }
 0x3aa   : > { %15360 = vmatprep.subr.bf16.mxu0 %v16681_v40  ;;  %15074 = vmatprep.subr.bf16.mxu1 %v16682_v29 }
 0x3ab   : > { %15059 = vmatmul.mubr.bf16.gmra.mrb[24].mxu1 %v6836_v2  ;;  %v19606_v2 = vpack.c.bf16 %v7197_v48, %v7196_v51  ;;  %v16725_v51 = vld [vmem:[%s20654_s5 + $0x148] sm:$0xff]  }
 0x3ac   : > { %15075 = vmatpush3.bf16.msra.mxu1 %v16682_v29  ;;  %15062 = vmatprep.mubr.bf16.mxu1 %v6837_v7  ;;  %v16698_v29 = vld [vmem:[%s20654_s5 + $0xe0] sm:$0xff]   ;;  %v19611_v7 = vpack.c.bf16 %v7199_v23, %v7198_v30  ;;  %v7596_v30 = vld [vmem:[#allocation3 + $0x48] sm:$0xff]  ;;  %v7597_v23 = vld [vmem:[#allocation3 + $0x50] sm:$0xff] }
 0x3ad   : > { %15361 = vmatpush3.bf16.msra.mxu0 %v16681_v40  ;;  %15076 = vmatprep.subr.bf16.mxu1 %v16684_v37  ;;  %v16697_v40 = vld [vmem:[%s20654_s5 + $0xd8] sm:$0xff]  }
 0x3ae   : > { %15362 = vmatprep.subr.bf16.mxu0 %v16683_v53 }
 0x3b0   : > { %15347 = vmatmul.mubr.bf16.gmra.mrb[28].mxu0 %v8825_v36  ;;  %15077 = vmatpush3.bf16.msra.mxu1 %v16684_v37  ;;  %v16700_v37 = vld [vmem:[%s20654_s5 + $0xe8] sm:$0xff]   ;;  %v7200_v36 = vld [vmem:[#allocation3 + $0x77] sm:$0xff] }
 0x3b1   : > { %15350 = vmatprep.mubr.bf16.mxu0 %v8826_v52  ;;  %15363 = vmatpush3.bf16.msra.mxu0 %v16683_v53  ;;  %v16699_v53 = vld [vmem:[%s20654_s5 + $0xe0] sm:$0xff]   ;;  %v16704_v52 = vld [vmem:[%s20654_s5 + $0xf8] sm:$0xff]  }
 0x3b2   : > { %15364 = vmatprep.subr.bf16.mxu0 %v16685_v54  ;;  %15078 = vmatprep.subr.bf16.mxu1 %v16686_v5 }
 0x3b3   : > { %15063 = vmatmul.mubr.bf16.gmra.mrb[28].mxu1 %v6838_v25  ;;  %v9188_v25 = vld [vmem:[#allocation3 + $0xf7] sm:$0xff] }
 0x3b4   : > { %15079 = vmatpush3.bf16.msra.mxu1 %v16686_v5  ;;  %15082 = vmatprep.mubr.bf16.mxu1 %v7202_v35  ;;  %v7201_v5 = vld [vmem:[#allocation3 + $0x7f] sm:$0xff]  ;;  %v16703_v35 = vld [vmem:[%s20654_s5 + $0xf0] sm:$0xff]  }
 0x3b5   : > { %15365 = vmatpush3.bf16.msra.mxu0 %v16685_v54  ;;  %15080 = vmatprep.subr.bf16.mxu1 %v16688_v31  ;;  %v16701_v54 = vld [vmem:[%s20654_s5 + $0xe8] sm:$0xff]   ;;  %v7209_v15 = vpack.c.bf16 %v7201_v5, %v7200_v36  ;;  %v16729_v36 = vld [vmem:[%s20654_s5 + $0x158] sm:$0xff]  }
 0x3b6   : > { %15366 = vmatprep.subr.bf16.mxu0 %v16687_v20 }
 0x3b8   : > { %15351 = vmatmul.mubr.bf16.gmra.mrb[32].mxu0 %v8827_v32  ;;  %15081 = vmatpush3.bf16.msra.mxu1 %v16688_v31  ;;  %v9189_v31 = vld [vmem:[#allocation3 + $0xff] sm:$0xff]  ;;  %v16710_v32 = vld [vmem:[%s20654_s5 + $0x110] sm:$0xff]  }
 0x3b9   : > { %15367 = vmatpush3.bf16.msra.mxu0 %v16687_v20  ;;  %15370 = vmatprep.mubr.bf16.mxu0 %v19555_v11  ;;  %v9197_v20 = vpack.c.bf16 %v9189_v31, %v9188_v25  ;;  %v7602_v25 = vld [vmem:[#allocation3 + $0x78] sm:$0xff]  ;;  %v7603_v31 = vld [vmem:[#allocation3 + $0x80] sm:$0xff] }
 0x3ba   : > { %15368 = vmatprep.subr.bf16.mxu0 %v16689_v47  ;;  %15098 = vmatprep.subr.bf16.mxu1 %v16690_v1 }
 0x3bb   : > { %15083 = vmatmul.mubr.bf16.vlgmr.msra.gmra.mrb[16].mxu1 %v19558_v34 }
 0x3bc   : > { %15099 = vmatpush3.bf16.msra.mxu1 %v16690_v1  ;;  %15086 = vmatprep.mubr.bf16.mxu1 %v19563_v46  ;;  %v16712_v1 = vld [vmem:[%s20654_s5 + $0x118] sm:$0xff]  }
 0x3bd   : > { %15369 = vmatpush3.bf16.msra.mxu0 %v16689_v47  ;;  %15100 = vmatprep.subr.bf16.mxu1 %v16692_v21  ;;  %v16709_v47 = vld [vmem:[%s20654_s5 + $0x108] sm:$0xff]  }
 0x3be   : > { %15386 = vmatprep.subr.bf16.mxu0 %v16691_v41 }
 0x3c0   : > { %15371 = vmatmul.mubr.bf16.vlgmr.msra.gmra.mrb[20].mxu0 %v19573_v60  ;;  %15101 = vmatpush3.bf16.msra.mxu1 %v16692_v21  ;;  %v16717_v21 = vld [vmem:[%s20654_s5 + $0x128] sm:$0xff]  }
 0x3c1   : > { %15374 = vmatprep.mubr.bf16.mxu0 %v19578_v55  ;;  %15387 = vmatpush3.bf16.msra.mxu0 %v16691_v41  ;;  %v7590_v41 = vld [vmem:[#allocation3 + $0x18] sm:$0xff] }
 0x3c2   : > { %15388 = vmatprep.subr.bf16.mxu0 %v16693_v44  ;;  %15102 = vmatprep.subr.bf16.mxu1 %v16694_v61  ;;  %v7606_v22 = vpack.c.bf16 %v7591_v57, %v7590_v41  ;;  %v7793_v41 = vld [vmem:[#allocation3 + $0x21] sm:$0xff] }
 0x3c3   : > { %15087 = vmatmul.mubr.bf16.gmra.mrb[20].mxu1 %v19582_v62 }
 0x3c4   : > { %15103 = vmatpush3.bf16.msra.mxu1 %v16694_v61  ;;  %15090 = vmatprep.mubr.bf16.mxu1 %v19587_v39  ;;  %v9576_v61 = vld [vmem:[#allocation3 + $0x98] sm:$0xff] }
 0x3c5   : > { %15389 = vmatpush3.bf16.msra.mxu0 %v16693_v44  ;;  %15104 = vmatprep.subr.bf16.mxu1 %v16696_v28  ;;  %v9389_v44 = vld [vmem:[#allocation3 + $0x107] sm:$0xff] }
 0x3c6   : > { %15390 = vmatprep.subr.bf16.mxu0 %v16695_v19 }
 0x3c8   : > { %15375 = vmatmul.mubr.bf16.gmra.mrb[24].mxu0 %v19597_v12  ;;  %15105 = vmatpush3.bf16.msra.mxu1 %v16696_v28  ;;  %v7594_v28 = vld [vmem:[#allocation3 + $0x38] sm:$0xff] }
 0x3c9   : > { %15378 = vmatprep.mubr.bf16.mxu0 %v19602_v50  ;;  %15391 = vmatpush3.bf16.msra.mxu0 %v16695_v19 }
 0x3ca   : > { %15392 = vmatprep.subr.bf16.mxu0 %v16697_v40  ;;  %15106 = vmatprep.subr.bf16.mxu1 %v16698_v29 }
 0x3cb   : > { %15091 = vmatmul.mubr.bf16.gmra.mrb[24].mxu1 %v19606_v2 }
 0x3cc   : > { %15107 = vmatpush3.bf16.msra.mxu1 %v16698_v29  ;;  %15094 = vmatprep.mubr.bf16.mxu1 %v19611_v7  ;;  %v9581_v29 = vld [vmem:[#allocation3 + $0xc0] sm:$0xff] }
 0x3cd   : > { %15393 = vmatpush3.bf16.msra.mxu0 %v16697_v40  ;;  %15108 = vmatprep.subr.bf16.mxu1 %v16700_v37  ;;  %v9579_v40 = vld [vmem:[#allocation3 + $0xb0] sm:$0xff] }
 0x3ce   : > { %15394 = vmatprep.subr.bf16.mxu0 %v16699_v53  ;;  %v9593_v48 = vpack.c.bf16 %v9579_v40, %v9578_v14  ;;  %v9779_v14 = vld [vmem:[#allocation3 + $0xa9] sm:$0xff]  ;;  %v9780_v40 = vld [vmem:[#allocation3 + $0xb1] sm:$0xff] }
 0x3d0   : > { %15379 = vmatmul.mubr.bf16.gmra.mrb[28].mxu0 %v9195_v56  ;;  %15109 = vmatpush3.bf16.msra.mxu1 %v16700_v37  ;;  %v7598_v37 = vld [vmem:[#allocation3 + $0x58] sm:$0xff] }
 0x3d1   : > { %15382 = vmatprep.mubr.bf16.mxu0 %v19624_v3  ;;  %15395 = vmatpush3.bf16.msra.mxu0 %v16699_v53  ;;  %v7609_v53 = vpack.c.bf16 %v7597_v23, %v7596_v30  ;;  %v7798_v30 = vld [vmem:[#allocation3 + $0x49] sm:$0xff]  ;;  %v7799_v23 = vld [vmem:[#allocation3 + $0x51] sm:$0xff] }
 0x3d2   : > { %15396 = vmatprep.subr.bf16.mxu0 %v16701_v54  ;;  %15110 = vmatprep.subr.bf16.mxu1 %v16702_v49 }
 0x3d3   : > { %15095 = vmatmul.mubr.bf16.gmra.mrb[28].mxu1 %v7209_v15 }
 0x3d4   : > { %15111 = vmatpush3.bf16.msra.mxu1 %v16702_v49  ;;  %15114 = vmatprep.mubr.bf16.mxu1 %v19558_v34  ;;  %v16715_v34 = vld [vmem:[%s20654_s5 + $0x120] sm:$0xff]  }
 0x3d5   : > { %15397 = vmatpush3.bf16.msra.mxu0 %v16701_v54  ;;  %15112 = vmatprep.subr.bf16.mxu1 %v16704_v52  ;;  %v9583_v54 = vld [vmem:[#allocation3 + $0xd0] sm:$0xff]  ;;  %v9585_v49 = vld [vmem:[#allocation3 + $0xe0] sm:$0xff] }
 0x3d6   : > { %15398 = vmatprep.subr.bf16.mxu0 %v16703_v35  ;;  %v9595_v5 = vpack.c.bf16 %v9583_v54, %v9582_v16  ;;  %v9783_v16 = vld [vmem:[#allocation3 + $0xc9] sm:$0xff]  ;;  %v9784_v54 = vld [vmem:[#allocation3 + $0xd1] sm:$0xff] }
 0x3d8   : > { %15383 = vmatmul.mubr.bf16.gmra.mrb[32].mxu0 %v9197_v20  ;;  %15113 = vmatpush3.bf16.msra.mxu1 %v16704_v52  ;;  %v7601_v52 = vld [vmem:[#allocation3 + $0x70] sm:$0xff] }
 0x3d9   : > { %15399 = vmatpush3.bf16.msra.mxu0 %v16703_v35  ;;  %15402 = vmatprep.mubr.bf16.mxu0 %v19573_v60  ;;  %v9390_v60 = vld [vmem:[#allocation3 + $0x10f] sm:$0xff] }
 0x3da   : > { %15400 = vmatprep.subr.bf16.mxu0 %v16705_v17  ;;  %15130 = vmatprep.subr.bf16.mxu1 %v16706_v27 }
 0x3db   : > { %15115 = vmatmul.mubr.bf16.vlgmr.msra.gmra.mrb[16].mxu1 %v19563_v46  ;;  %v16718_v46 = vld [vmem:[%s20654_s5 + $0x130] sm:$0xff]  }
 0x3dc   : > { %15131 = vmatpush3.bf16.msra.mxu1 %v16706_v27  ;;  %15118 = vmatprep.mubr.bf16.mxu1 %v19582_v62  ;;  %v9592_v62 = vpack.c.bf16 %v9577_v26, %v9576_v61  ;;  %v7612_v27 = vpack.c.bf16 %v7603_v31, %v7602_v25  ;;  %v9777_v61 = vld [vmem:[#allocation3 + $0x99] sm:$0xff]  ;;  %v9778_v26 = vld [vmem:[#allocation3 + $0xa1] sm:$0xff] }
 0x3dd   : > { %15401 = vmatpush3.bf16.msra.mxu0 %v16705_v17  ;;  %15132 = vmatprep.subr.bf16.mxu1 %v16708_v6  ;;  %v16732_v17 = vld [vmem:[%s20654_s5 + $0x168] sm:$0xff]   ;;  %v7804_v25 = vld [vmem:[#allocation3 + $0x79] sm:$0xff] }
 0x3de   : > { %15418 = vmatprep.subr.bf16.mxu0 %v16707_v24  ;;  %v7805_v31 = vld [vmem:[#allocation3 + $0x81] sm:$0xff] }
 0x3e0   : > { %15403 = vmatmul.mubr.bf16.vlgmr.msra.gmra.mrb[20].mxu0 %v19578_v55  ;;  %15133 = vmatpush3.bf16.msra.mxu1 %v16708_v6  ;;  %v9398_v55 = vpack.c.bf16 %v9390_v60, %v9389_v44  ;;  %v16731_v6 = vld [vmem:[%s20654_s5 + $0x160] sm:$0xff]   ;;  %v9590_v44 = vld [vmem:[#allocation3 + $0x108] sm:$0xff]  ;;  %v9591_v60 = vld [vmem:[#allocation3 + $0x110] sm:$0xff] }
 0x3e1   : > { %15406 = vmatprep.mubr.bf16.mxu0 %v19597_v12  ;;  %15419 = vmatpush3.bf16.msra.mxu0 %v16707_v24  ;;  %v9580_v12 = vld [vmem:[#allocation3 + $0xb8] sm:$0xff]  ;;  %v9586_v24 = vld [vmem:[#allocation3 + $0xe8] sm:$0xff] }
 0x3e2   : > { %15420 = vmatprep.subr.bf16.mxu0 %v16709_v47  ;;  %15134 = vmatprep.subr.bf16.mxu1 %v16710_v32 }
 0x3e3   : > { %15119 = vmatmul.mubr.bf16.gmra.mrb[20].mxu1 %v19587_v39  ;;  %v7595_v39 = vld [vmem:[#allocation3 + $0x40] sm:$0xff] }
 0x3e4   : > { %15135 = vmatpush3.bf16.msra.mxu1 %v16710_v32  ;;  %15122 = vmatprep.mubr.bf16.mxu1 %v19606_v2  ;;  %v7608_v9 = vpack.c.bf16 %v7595_v39, %v7594_v28  ;;  %v9594_v2 = vpack.c.bf16 %v9581_v29, %v9580_v12  ;;  %v9588_v32 = vld [vmem:[#allocation3 + $0xf8] sm:$0xff]  ;;  %v7797_v39 = vld [vmem:[#allocation3 + $0x41] sm:$0xff] }
 0x3e5   : > { %15421 = vmatpush3.bf16.msra.mxu0 %v16709_v47  ;;  %15136 = vmatprep.subr.bf16.mxu1 %v16712_v1  ;;  %v9587_v47 = vld [vmem:[#allocation3 + $0xf0] sm:$0xff]  ;;  %v7796_v28 = vld [vmem:[#allocation3 + $0x39] sm:$0xff]  ;;  %v9782_v29 = vld [vmem:[#allocation3 + $0xc1] sm:$0xff] }
 0x3e6   : > { %15422 = vmatprep.subr.bf16.mxu0 %v16711_v45  ;;  %v9781_v12 = vld [vmem:[#allocation3 + $0xb9] sm:$0xff] }
 0x3e8   : > { %15407 = vmatmul.mubr.bf16.gmra.mrb[24].mxu0 %v19602_v50  ;;  %15137 = vmatpush3.bf16.msra.mxu1 %v16712_v1  ;;  %v16726_v50 = vld [vmem:[%s20654_s5 + $0x150] sm:$0xff]   ;;  %v9589_v1 = vld [vmem:[#allocation3 + $0x100] sm:$0xff] }
 0x3e9   : > { %15410 = vmatprep.mubr.bf16.mxu0 %v9195_v56  ;;  %15423 = vmatpush3.bf16.msra.mxu0 %v16711_v45  ;;  %v9584_v56 = vld [vmem:[#allocation3 + $0xd8] sm:$0xff]  ;;  %v16733_v45 = vld [vmem:[%s20654_s5 + $0x168] sm:$0xff]  }
 0x3ea   : > { %15424 = vmatprep.subr.bf16.mxu0 %v16713_v33  ;;  %15138 = vmatprep.subr.bf16.mxu1 %v16714_v38  ;;  %v9596_v35 = vpack.c.bf16 %v9585_v49, %v9584_v56  ;;  %v9785_v56 = vld [vmem:[#allocation3 + $0xd9] sm:$0xff]  ;;  %v9786_v49 = vld [vmem:[#allocation3 + $0xe1] sm:$0xff] }
 0x3eb   : > { %15123 = vmatmul.mubr.bf16.gmra.mrb[24].mxu1 %v19611_v7  ;;  %v7599_v7 = vld [vmem:[#allocation3 + $0x60] sm:$0xff] }
 0x3ec   : > { %15139 = vmatpush3.bf16.msra.mxu1 %v16714_v38  ;;  %15126 = vmatprep.mubr.bf16.mxu1 %v7209_v15  ;;  %v7610_v0 = vpack.c.bf16 %v7599_v7, %v7598_v37  ;;  %v7600_v15 = vld [vmem:[#allocation3 + $0x68] sm:$0xff]  ;;  %v16734_v38 = vld [vmem:[%s20654_s5 + $0x170] sm:$0xff]   ;;  %v7800_v37 = vld [vmem:[#allocation3 + $0x59] sm:$0xff] }
 0x3ed   : > { %15425 = vmatpush3.bf16.msra.mxu0 %v16713_v33  ;;  %15140 = vmatprep.subr.bf16.mxu1 %v16716_v8  ;;  %v9597_v33 = vpack.c.bf16 %v9587_v47, %v9586_v24  ;;  %v7801_v7 = vld [vmem:[#allocation3 + $0x61] sm:$0xff]  ;;  %v9787_v24 = vld [vmem:[#allocation3 + $0xe9] sm:$0xff]  ;;  %v9788_v47 = vld [vmem:[#allocation3 + $0xf1] sm:$0xff] }
 0x3ee   : > { %15426 = vmatprep.subr.bf16.mxu0 %v16715_v34 }
 0x3f0   : > { %15411 = vmatmul.mubr.bf16.gmra.mrb[28].mxu0 %v19624_v3  ;;  %15141 = vmatpush3.bf16.msra.mxu1 %v16716_v8  ;;  %v16730_v3 = vld [vmem:[%s20654_s5 + $0x160] sm:$0xff]   ;;  %v7604_v8 = vld [vmem:[#allocation3 + $0x88] sm:$0xff] }
 0x3f1   : > { %15414 = vmatprep.mubr.bf16.mxu0 %v9197_v20  ;;  %15427 = vmatpush3.bf16.msra.mxu0 %v16715_v34  ;;  %v7611_v20 = vpack.c.bf16 %v7601_v52, %v7600_v15  ;;  %v7605_v34 = vld [vmem:[#allocation3 + $0x90] sm:$0xff] }
 0x3f2   : > { %15428 = vmatprep.subr.bf16.mxu0 %v16717_v21  ;;  %15142 = vmatprep.subr.bf16.mxu1 %v16718_v46  ;;  %v7613_v57 = vpack.c.bf16 %v7605_v34, %v7604_v8  ;;  %v7802_v15 = vld [vmem:[#allocation3 + $0x69] sm:$0xff]  ;;  %v7803_v52 = vld [vmem:[#allocation3 + $0x71] sm:$0xff] }
 0x3f3   : > { %15127 = vmatmul.mubr.bf16.gmra.mrb[28].mxu1 %v19555_v11  ;;  %v7593_v11 = vld [vmem:[#allocation3 + $0x30] sm:$0xff] }
 0x3f4   : > { %15143 = vmatpush3.bf16.msra.mxu1 %v16718_v46  ;;  %15146 = vmatprep.mubr.bf16.mxu1 %v7606_v22  ;;  %v7607_v19 = vpack.c.bf16 %v7593_v11, %v7592_v58  ;;  %v7792_v46 = vld [vmem:[#allocation3 + $0x19] sm:$0xff]  ;;  %v7794_v58 = vld [vmem:[#allocation3 + $0x29] sm:$0xff]  ;;  %v7795_v11 = vld [vmem:[#allocation3 + $0x31] sm:$0xff] }
 0x3f5   : > { %15429 = vmatpush3.bf16.msra.mxu0 %v16717_v21  ;;  %15144 = vmatprep.subr.bf16.mxu1 %v16720_v10  ;;  %v9598_v21 = vpack.c.bf16 %v9589_v1, %v9588_v32  ;;  %v7808_v22 = vpack.c.bf16 %v7793_v41, %v7792_v46  ;;  %v9789_v32 = vld [vmem:[#allocation3 + $0xf9] sm:$0xff]  ;;  %v9790_v1 = vld [vmem:[#allocation3 + $0x101] sm:$0xff]  ;;  %v16750_v8 = vld [vmem:[%s20654_s5 + $0x1b0] sm:$0xff]  }
 0x3f6   : > { %15430 = vmatprep.subr.bf16.mxu0 %v16719_v13  ;;  %v7807_v34 = vld [vmem:[#allocation3 + $0x91] sm:$0xff] }
 0x3f7   : > { %v16752_v41 = vld [vmem:[%s20654_s5 + $0x1b8] sm:$0xff]  }
 0x3f8   : > { %15415 = vmatmul.mubr.bf16.gmra.mrb[32].mxu0 %v9398_v55  ;;  %15145 = vmatpush3.bf16.msra.mxu1 %v16720_v10  ;;  %v16736_v10 = vld [vmem:[%s20654_s5 + $0x178] sm:$0xff]   ;;  %v9599_v55 = vpack.c.bf16 %v9591_v60, %v9590_v44  ;;  %v16754_v60 = vld [vmem:[%s20654_s5 + $0x1c0] sm:$0xff]  }
 0x3f9   : > { %15431 = vmatpush3.bf16.msra.mxu0 %v16719_v13  ;;  %15434 = vmatprep.mubr.bf16.mxu0 %v9592_v62  ;;  %v16735_v13 = vld [vmem:[%s20654_s5 + $0x170] sm:$0xff]   ;;  %v19747_v62 = vpack.c.bf16 %v9778_v26, %v9777_v61  ;;  %v16753_v44 = vld [vmem:[%s20654_s5 + $0x1b8] sm:$0xff]   ;;  %v16756_v61 = vld [vmem:[%s20654_s5 + $0x1c8] sm:$0xff]  }
 0x3fa   : > { %15432 = vmatprep.subr.bf16.mxu0 %v16721_v63  ;;  %15162 = vmatprep.subr.bf16.mxu1 %v16722_v43  ;;  %v16755_v26 = vld [vmem:[%s20654_s5 + $0x1c0] sm:$0xff]  }
 0x3fb   : > { %15147 = vmatmul.mubr.bf16.vlgmr.msra.gmra.mrb[16].mxu1 %v7607_v19  ;;  %v19750_v19 = vpack.c.bf16 %v7795_v11, %v7794_v58  ;;  %v16759_v58 = vld [vmem:[%s20654_s5 + $0x1d0] sm:$0xff]   ;;  %v16761_v11 = vld [vmem:[%s20654_s5 + $0x1d8] sm:$0xff]  }
 0x3fc   : > { %15163 = vmatpush3.bf16.msra.mxu1 %v16722_v43  ;;  %15150 = vmatprep.mubr.bf16.mxu1 %v7608_v9  ;;  %v16738_v43 = vld [vmem:[%s20654_s5 + $0x180] sm:$0xff]   ;;  %v19755_v9 = vpack.c.bf16 %v7797_v39, %v7796_v28  ;;  %v16764_v39 = vld [vmem:[%s20654_s5 + $0x1e8] sm:$0xff]  }
 0x3fd   : > { %15433 = vmatpush3.bf16.msra.mxu0 %v16721_v63  ;;  %15164 = vmatprep.subr.bf16.mxu1 %v16724_v42  ;;  %v16737_v63 = vld [vmem:[%s20654_s5 + $0x178] sm:$0xff]   ;;  %v16762_v28 = vld [vmem:[%s20654_s5 + $0x1e0] sm:$0xff]  }
 0x3fe   : > { %15450 = vmatprep.subr.bf16.mxu0 %v16723_v59 }
 0x400   : > { %15435 = vmatmul.mubr.bf16.vlgmr.msra.gmra.mrb[20].mxu0 %v9593_v48  ;;  %15165 = vmatpush3.bf16.msra.mxu1 %v16724_v42  ;;  %v16740_v42 = vld [vmem:[%s20654_s5 + $0x188] sm:$0xff]   ;;  %v19765_v48 = vpack.c.bf16 %v9780_v40, %v9779_v14  ;;  %v8197_v14 = vld [vmem:[#allocation3 + $0x32] sm:$0xff] }
 0x401   : > { %15438 = vmatprep.mubr.bf16.mxu0 %v9594_v2  ;;  %15451 = vmatpush3.bf16.msra.mxu0 %v16723_v59  ;;  %v16739_v59 = vld [vmem:[%s20654_s5 + $0x180] sm:$0xff]   ;;  %v19770_v2 = vpack.c.bf16 %v9782_v29, %v9781_v12  ;;  %v16768_v40 = vld [vmem:[%s20654_s5 + $0x1f8] sm:$0xff]   ;;  %v16767_v29 = vld [vmem:[%s20654_s5 + $0x1f0] sm:$0xff]  }
 0x402   : > { %15452 = vmatprep.subr.bf16.mxu0 %v16725_v51  ;;  %15166 = vmatprep.subr.bf16.mxu1 %v16726_v50 }
 0x403   : > { %15151 = vmatmul.mubr.bf16.gmra.mrb[20].mxu1 %v7609_v53  ;;  %v19774_v53 = vpack.c.bf16 %v7799_v23, %v7798_v30  ;;  %v10180_v30 = vld [vmem:[#allocation3 + $0xb2] sm:$0xff]  ;;  %v8198_v23 = vld [vmem:[#allocation3 + $0x3a] sm:$0xff] }
 0x404   : > { %15167 = vmatpush3.bf16.msra.mxu1 %v16726_v50  ;;  %15154 = vmatprep.mubr.bf16.mxu1 %v7610_v0  ;;  %v16742_v50 = vld [vmem:[%s20654_s5 + $0x190] sm:$0xff]   ;;  %v19779_v0 = vpack.c.bf16 %v7801_v7, %v7800_v37  ;;  %v16769_v37 = vld [vmem:[%s20654_s5 + $0x1f8] sm:$0xff]   ;;  %v8199_v7 = vld [vmem:[#allocation3 + $0x42] sm:$0xff] }
 0x405   : > { %15453 = vmatpush3.bf16.msra.mxu0 %v16725_v51  ;;  %15168 = vmatprep.subr.bf16.mxu1 %v16728_v4  ;;  %v16741_v51 = vld [vmem:[%s20654_s5 + $0x188] sm:$0xff]  }
 0x406   : > { %15454 = vmatprep.subr.bf16.mxu0 %v16727_v18 }
 0x408   : > { %15439 = vmatmul.mubr.bf16.gmra.mrb[24].mxu0 %v9595_v5  ;;  %15169 = vmatpush3.bf16.msra.mxu1 %v16728_v4  ;;  %v16744_v4 = vld [vmem:[%s20654_s5 + $0x198] sm:$0xff]   ;;  %v19789_v5 = vpack.c.bf16 %v9784_v54, %v9783_v16  ;;  %v16772_v16 = vld [vmem:[%s20654_s5 + $0x208] sm:$0xff]  }
 0x409   : > { %15442 = vmatprep.mubr.bf16.mxu0 %v9596_v35  ;;  %15455 = vmatpush3.bf16.msra.mxu0 %v16727_v18  ;;  %v16743_v18 = vld [vmem:[%s20654_s5 + $0x190] sm:$0xff]   ;;  %v19794_v35 = vpack.c.bf16 %v9786_v49, %v9785_v56  ;;  %v16771_v56 = vld [vmem:[%s20654_s5 + $0x200] sm:$0xff]  }
 0x40a   : > { %15456 = vmatprep.subr.bf16.mxu0 %v16729_v36  ;;  %15170 = vmatprep.subr.bf16.mxu1 %v16730_v3  ;;  %v10181_v49 = vld [vmem:[#allocation3 + $0xba] sm:$0xff] }
 0x40b   : > { %15155 = vmatmul.mubr.bf16.gmra.mrb[24].mxu1 %v7611_v20  ;;  %v19798_v20 = vpack.c.bf16 %v7803_v52, %v7802_v15  ;;  %v8202_v15 = vld [vmem:[#allocation3 + $0x5a] sm:$0xff] }
 0x40c   : > { %15171 = vmatpush3.bf16.msra.mxu1 %v16730_v3  ;;  %15158 = vmatprep.mubr.bf16.mxu1 %v7612_v27  ;;  %v16746_v3 = vld [vmem:[%s20654_s5 + $0x1a0] sm:$0xff]   ;;  %v19803_v27 = vpack.c.bf16 %v7805_v31, %v7804_v25  ;;  %v16774_v25 = vld [vmem:[%s20654_s5 + $0x210] sm:$0xff]  }
 0x40d   : > { %15457 = vmatpush3.bf16.msra.mxu0 %v16729_v36  ;;  %15172 = vmatprep.subr.bf16.mxu1 %v16732_v17  ;;  %v16745_v36 = vld [vmem:[%s20654_s5 + $0x198] sm:$0xff]   ;;  %v8203_v31 = vld [vmem:[#allocation3 + $0x62] sm:$0xff] }
 0x40e   : > { %15458 = vmatprep.subr.bf16.mxu0 %v16731_v6 }
 0x410   : > { %15443 = vmatmul.mubr.bf16.gmra.mrb[28].mxu0 %v9597_v33  ;;  %15173 = vmatpush3.bf16.msra.mxu1 %v16732_v17  ;;  %v16748_v17 = vld [vmem:[%s20654_s5 + $0x1a8] sm:$0xff]   ;;  %v9798_v33 = vpack.c.bf16 %v9788_v47, %v9787_v24  ;;  %v16776_v24 = vld [vmem:[%s20654_s5 + $0x218] sm:$0xff]  }
 0x411   : > { %15446 = vmatprep.mubr.bf16.mxu0 %v9598_v21  ;;  %15459 = vmatpush3.bf16.msra.mxu0 %v16731_v6  ;;  %v16747_v6 = vld [vmem:[%s20654_s5 + $0x1a0] sm:$0xff]   ;;  %v19816_v21 = vpack.c.bf16 %v9790_v1, %v9789_v32  ;;  %v16775_v32 = vld [vmem:[%s20654_s5 + $0x210] sm:$0xff]  }
 0x412   : > { %15460 = vmatprep.subr.bf16.mxu0 %v16733_v45  ;;  %15174 = vmatprep.subr.bf16.mxu1 %v16734_v38  ;;  %v10185_v1 = vld [vmem:[#allocation3 + $0xda] sm:$0xff] }
 0x413   : > { %15159 = vmatmul.mubr.bf16.gmra.mrb[28].mxu1 %v7613_v57  ;;  %v16751_v57 = vld [vmem:[%s20654_s5 + $0x1b0] sm:$0xff]  }
 0x414   : > { %15175 = vmatpush3.bf16.msra.mxu1 %v16734_v38  ;;  %15178 = vmatprep.mubr.bf16.mxu1 %v7808_v22  ;;  %v16749_v38 = vld [vmem:[%s20654_s5 + $0x1a8] sm:$0xff]   ;;  %v9792_v22 = vld [vmem:[#allocation3 + $0x111] sm:$0xff] }
 0x415   : > { %15461 = vmatpush3.bf16.msra.mxu0 %v16733_v45  ;;  %15176 = vmatprep.subr.bf16.mxu1 %v16736_v10  ;;  %v7806_v45 = vld [vmem:[#allocation3 + $0x89] sm:$0xff] }
 0x416   : > { %15462 = vmatprep.subr.bf16.mxu0 %v16735_v13  ;;  %v7815_v46 = vpack.c.bf16 %v7807_v34, %v7806_v45  ;;  %v10186_v45 = vld [vmem:[#allocation3 + $0xe2] sm:$0xff] }
 0x417   : > { %v10198_v34 = vpack.c.bf16 %v10186_v45, %v10185_v1  ;;  %v10388_v1 = vld [vmem:[#allocation3 + $0xeb] sm:$0xff]  ;;  %v10389_v45 = vld [vmem:[#allocation3 + $0xf3] sm:$0xff] }
 0x418   : > { %15447 = vmatmul.mubr.bf16.gmra.mrb[32].mxu0 %v9599_v55  ;;  %15177 = vmatpush3.bf16.msra.mxu1 %v16736_v10  ;;  %v9791_v10 = vld [vmem:[#allocation3 + $0x109] sm:$0xff] }
 0x419   : > { %15463 = vmatpush3.bf16.msra.mxu0 %v16735_v13  ;;  %15466 = vmatprep.mubr.bf16.mxu0 %v19747_v62  ;;  %v9800_v13 = vpack.c.bf16 %v9792_v22, %v9791_v10  ;;  %v16758_v55 = vld [vmem:[%s20654_s5 + $0x1d0] sm:$0xff]  }
 0x41a   : > { %15464 = vmatprep.subr.bf16.mxu0 %v16737_v63  ;;  %15194 = vmatprep.subr.bf16.mxu1 %v16738_v43  ;;  %v8208_v10 = vld [vmem:[#allocation3 + $0x8a] sm:$0xff]  ;;  %v8209_v22 = vld [vmem:[#allocation3 + $0x92] sm:$0xff] }
 0x41b   : > { %15179 = vmatmul.mubr.bf16.vlgmr.msra.gmra.mrb[16].mxu1 %v19750_v19 }
 0x41c   : > { %15195 = vmatpush3.bf16.msra.mxu1 %v16738_v43  ;;  %15182 = vmatprep.mubr.bf16.mxu1 %v19755_v9  ;;  %v16760_v43 = vld [vmem:[%s20654_s5 + $0x1d8] sm:$0xff]  }
 0x41d   : > { %15465 = vmatpush3.bf16.msra.mxu0 %v16737_v63  ;;  %15196 = vmatprep.subr.bf16.mxu1 %v16740_v42  ;;  %v16757_v63 = vld [vmem:[%s20654_s5 + $0x1c8] sm:$0xff]  }
 0x41e   : > { %15482 = vmatprep.subr.bf16.mxu0 %v16739_v59 }
 0x420   : > { %15467 = vmatmul.mubr.bf16.vlgmr.msra.gmra.mrb[20].mxu0 %v19765_v48  ;;  %15197 = vmatpush3.bf16.msra.mxu1 %v16740_v42  ;;  %v16765_v42 = vld [vmem:[%s20654_s5 + $0x1e8] sm:$0xff]  }
 0x421   : > { %15470 = vmatprep.mubr.bf16.mxu0 %v19770_v2  ;;  %15483 = vmatpush3.bf16.msra.mxu0 %v16739_v59  ;;  %v8196_v59 = vld [vmem:[#allocation3 + $0x2a] sm:$0xff] }
 0x422   : > { %15484 = vmatprep.subr.bf16.mxu0 %v16741_v51  ;;  %15198 = vmatprep.subr.bf16.mxu1 %v16742_v50  ;;  %v8212_v12 = vpack.c.bf16 %v8197_v14, %v8196_v59  ;;  %v8399_v59 = vld [vmem:[#allocation3 + $0x33] sm:$0xff] }
 0x423   : > { %15183 = vmatmul.mubr.bf16.gmra.mrb[20].mxu1 %v19774_v53 }
 0x424   : > { %15199 = vmatpush3.bf16.msra.mxu1 %v16742_v50  ;;  %15186 = vmatprep.mubr.bf16.mxu1 %v19779_v0  ;;  %v10179_v50 = vld [vmem:[#allocation3 + $0xaa] sm:$0xff] }
 0x425   : > { %15485 = vmatpush3.bf16.msra.mxu0 %v16741_v51  ;;  %15200 = vmatprep.subr.bf16.mxu1 %v16744_v4  ;;  %v9992_v51 = vld [vmem:[#allocation3 + $0x119] sm:$0xff] }
 0x426   : > { %15486 = vmatprep.subr.bf16.mxu0 %v16743_v18 }
 0x428   : > { %15471 = vmatmul.mubr.bf16.gmra.mrb[24].mxu0 %v19789_v5  ;;  %15201 = vmatpush3.bf16.msra.mxu1 %v16744_v4  ;;  %v8200_v4 = vld [vmem:[#allocation3 + $0x4a] sm:$0xff] }
 0x429   : > { %15474 = vmatprep.mubr.bf16.mxu0 %v19794_v35  ;;  %15487 = vmatpush3.bf16.msra.mxu0 %v16743_v18  ;;  %v8213_v18 = vpack.c.bf16 %v8199_v7, %v8198_v23  ;;  %v8400_v23 = vld [vmem:[#allocation3 + $0x3b] sm:$0xff] }
 0x42a   : > { %15488 = vmatprep.subr.bf16.mxu0 %v16745_v36  ;;  %15202 = vmatprep.subr.bf16.mxu1 %v16746_v3  ;;  %v16786_v7 = vld [vmem:[%s20654_s5 + $0x40] sm:$0xff]  }
 0x42b   : > { %15187 = vmatmul.mubr.bf16.gmra.mrb[24].mxu1 %v19798_v20 }
 0x42c   : > { %15203 = vmatpush3.bf16.msra.mxu1 %v16746_v3  ;;  %15190 = vmatprep.mubr.bf16.mxu1 %v19803_v27  ;;  %v10184_v3 = vld [vmem:[#allocation3 + $0xd2] sm:$0xff] }
 0x42d   : > { %15489 = vmatpush3.bf16.msra.mxu0 %v16745_v36  ;;  %15204 = vmatprep.subr.bf16.mxu1 %v16748_v17  ;;  %v10182_v36 = vld [vmem:[#allocation3 + $0xc2] sm:$0xff] }
 0x42e   : > { %15490 = vmatprep.subr.bf16.mxu0 %v16747_v6  ;;  %v10196_v52 = vpack.c.bf16 %v10182_v36, %v10181_v49  ;;  %v10382_v49 = vld [vmem:[#allocation3 + $0xbb] sm:$0xff]  ;;  %v10383_v36 = vld [vmem:[#allocation3 + $0xc3] sm:$0xff] }
 0x430   : > { %15475 = vmatmul.mubr.bf16.gmra.mrb[28].mxu0 %v9798_v33  ;;  %15205 = vmatpush3.bf16.msra.mxu1 %v16748_v17  ;;  %v8204_v17 = vld [vmem:[#allocation3 + $0x6a] sm:$0xff] }
 0x431   : > { %15478 = vmatprep.mubr.bf16.mxu0 %v19816_v21  ;;  %15491 = vmatpush3.bf16.msra.mxu0 %v16747_v6  ;;  %v8215_v6 = vpack.c.bf16 %v8203_v31, %v8202_v15  ;;  %v16788_v15 = vld [vmem:[%s20654_s5 + $0x50] sm:$0xff]  }
 0x432   : > { %15492 = vmatprep.subr.bf16.mxu0 %v16749_v38  ;;  %15206 = vmatprep.subr.bf16.mxu1 %v16750_v8 }
 0x433   : > { %15191 = vmatmul.mubr.bf16.gmra.mrb[28].mxu1 %v7815_v46 }
 0x434   : > { %15207 = vmatpush3.bf16.msra.mxu1 %v16750_v8  ;;  %15210 = vmatprep.mubr.bf16.mxu1 %v19750_v19  ;;  %v16763_v19 = vld [vmem:[%s20654_s5 + $0x1e0] sm:$0xff]  }
 0x435   : > { %15493 = vmatpush3.bf16.msra.mxu0 %v16749_v38  ;;  %15208 = vmatprep.subr.bf16.mxu1 %v16752_v41  ;;  %v10188_v38 = vld [vmem:[#allocation3 + $0xf2] sm:$0xff]  ;;  %v8206_v8 = vld [vmem:[#allocation3 + $0x7a] sm:$0xff] }
 0x436   : > { %15494 = vmatprep.subr.bf16.mxu0 %v16751_v57 }
 0x438   : > { %15479 = vmatmul.mubr.bf16.gmra.mrb[32].mxu0 %v9800_v13  ;;  %15209 = vmatpush3.bf16.msra.mxu1 %v16752_v41  ;;  %v8207_v41 = vld [vmem:[#allocation3 + $0x82] sm:$0xff] }
 0x439   : > { %15495 = vmatpush3.bf16.msra.mxu0 %v16751_v57  ;;  %15498 = vmatprep.mubr.bf16.mxu0 %v19765_v48  ;;  %v9993_v48 = vld [vmem:[#allocation3 + $0x121] sm:$0xff] }
 0x43a   : > { %15496 = vmatprep.subr.bf16.mxu0 %v16753_v44  ;;  %15226 = vmatprep.subr.bf16.mxu1 %v16754_v60 }
 0x43b   : > { %15211 = vmatmul.mubr.bf16.vlgmr.msra.gmra.mrb[16].mxu1 %v19755_v9  ;;  %v16766_v9 = vld [vmem:[%s20654_s5 + $0x1f0] sm:$0xff]  }
 0x43c   : > { %15227 = vmatpush3.bf16.msra.mxu1 %v16754_v60  ;;  %15214 = vmatprep.mubr.bf16.mxu1 %v19774_v53  ;;  %v10195_v53 = vpack.c.bf16 %v10180_v30, %v10179_v50  ;;  %v8218_v60 = vpack.c.bf16 %v8209_v22, %v8208_v10  ;;  %v10380_v50 = vld [vmem:[#allocation3 + $0xab] sm:$0xff]  ;;  %v10381_v30 = vld [vmem:[#allocation3 + $0xb3] sm:$0xff] }
 0x43d   : > { %15497 = vmatpush3.bf16.msra.mxu0 %v16753_v44  ;;  %15228 = vmatprep.subr.bf16.mxu1 %v16756_v61  ;;  %v16780_v44 = vld [vmem:[%s20654_s5 + $0x228] sm:$0xff]  }
 0x43e   : > { %15514 = vmatprep.subr.bf16.mxu0 %v16755_v26  ;;  %v16791_v10 = vld [vmem:[%s20654_s5 + $0x68] sm:$0xff]  }
 0x440   : > { %15499 = vmatmul.mubr.bf16.vlgmr.msra.gmra.mrb[20].mxu0 %v19770_v2  ;;  %15229 = vmatpush3.bf16.msra.mxu1 %v16756_v61  ;;  %v19885_v2 = vpack.c.bf16 %v9993_v48, %v9992_v51  ;;  %v16779_v61 = vld [vmem:[%s20654_s5 + $0x220] sm:$0xff]  }
 0x441   : > { %15502 = vmatprep.mubr.bf16.mxu0 %v19789_v5  ;;  %15515 = vmatpush3.bf16.msra.mxu0 %v16755_v26  ;;  %v10183_v5 = vld [vmem:[#allocation3 + $0xca] sm:$0xff]  ;;  %v10189_v26 = vld [vmem:[#allocation3 + $0xfa] sm:$0xff]  ;;  %v10194_v48 = vld [vmem:[#allocation3 + $0x122] sm:$0xff] }
 0x442   : > { %15516 = vmatprep.subr.bf16.mxu0 %v16757_v63  ;;  %15230 = vmatprep.subr.bf16.mxu1 %v16758_v55  ;;  %v10193_v51 = vld [vmem:[#allocation3 + $0x11a] sm:$0xff] }
 0x443   : > { %15215 = vmatmul.mubr.bf16.gmra.mrb[20].mxu1 %v19779_v0  ;;  %v8201_v0 = vld [vmem:[#allocation3 + $0x52] sm:$0xff] }
 0x444   : > { %15231 = vmatpush3.bf16.msra.mxu1 %v16758_v55  ;;  %15218 = vmatprep.mubr.bf16.mxu1 %v19798_v20  ;;  %v8214_v54 = vpack.c.bf16 %v8201_v0, %v8200_v4  ;;  %v10197_v20 = vpack.c.bf16 %v10184_v3, %v10183_v5  ;;  %v10191_v55 = vld [vmem:[#allocation3 + $0x10a] sm:$0xff]  ;;  %v10396_v4 = vpack.c.bf16 %v10381_v30, %v10380_v50  ;;  %v10385_v3 = vld [vmem:[#allocation3 + $0xd3] sm:$0xff] }
 0x445   : > { %15517 = vmatpush3.bf16.msra.mxu0 %v16757_v63  ;;  %15232 = vmatprep.subr.bf16.mxu1 %v16760_v43  ;;  %v10190_v63 = vld [vmem:[#allocation3 + $0x102] sm:$0xff]  ;;  %v8402_v0 = vld [vmem:[#allocation3 + $0x4b] sm:$0xff] }
 0x446   : > { %15518 = vmatprep.subr.bf16.mxu0 %v16759_v58  ;;  %v10384_v5 = vld [vmem:[#allocation3 + $0xcb] sm:$0xff] }
 0x447   : > { %v10398_v31 = vpack.c.bf16 %v10385_v3, %v10384_v5  ;;  %v16795_v30 = vld [vmem:[%s20654_s5 + $0x8] sm:$0xff]  }
 0x448   : > { %15503 = vmatmul.mubr.bf16.gmra.mrb[24].mxu0 %v19794_v35  ;;  %15233 = vmatpush3.bf16.msra.mxu1 %v16760_v43  ;;  %v16773_v35 = vld [vmem:[%s20654_s5 + $0x208] sm:$0xff]   ;;  %v10192_v43 = vld [vmem:[#allocation3 + $0x112] sm:$0xff] }
 0x449   : > { %15506 = vmatprep.mubr.bf16.mxu0 %v9798_v33  ;;  %15519 = vmatpush3.bf16.msra.mxu0 %v16759_v58  ;;  %v10187_v33 = vld [vmem:[#allocation3 + $0xea] sm:$0xff]  ;;  %v8210_v58 = vld [vmem:[#allocation3 + $0x9a] sm:$0xff] }
 0x44a   : > { %15520 = vmatprep.subr.bf16.mxu0 %v16761_v11  ;;  %15234 = vmatprep.subr.bf16.mxu1 %v16762_v28  ;;  %v10199_v57 = vpack.c.bf16 %v10188_v38, %v10187_v33  ;;  %v16790_v33 = vld [vmem:[%s20654_s5 + $0x60] sm:$0xff]   ;;  %v16803_v5 = vld [vmem:[%s20654_s5 + $0x88] sm:$0xff]  }
 0x44b   : > { %15219 = vmatmul.mubr.bf16.gmra.mrb[24].mxu1 %v19803_v27  ;;  %v8205_v27 = vld [vmem:[#allocation3 + $0x72] sm:$0xff] }
 0x44c   : > { %15235 = vmatpush3.bf16.msra.mxu1 %v16762_v28  ;;  %15222 = vmatprep.mubr.bf16.mxu1 %v7815_v46  ;;  %v8216_v47 = vpack.c.bf16 %v8205_v27, %v8204_v17  ;;  %v16778_v46 = vld [vmem:[%s20654_s5 + $0x220] sm:$0xff]   ;;  %v16781_v28 = vld [vmem:[%s20654_s5 + $0x228] sm:$0xff]   ;;  %v8407_v17 = vld [vmem:[#allocation3 + $0x73] sm:$0xff] }
 0x44d   : > { %15521 = vmatpush3.bf16.msra.mxu0 %v16761_v11  ;;  %15236 = vmatprep.subr.bf16.mxu1 %v16764_v39  ;;  %v10200_v11 = vpack.c.bf16 %v10190_v63, %v10189_v26  ;;  %v16792_v26 = vld [vmem:[%s20654_s5 + $0x70] sm:$0xff]  }
 0x44e   : > { %15522 = vmatprep.subr.bf16.mxu0 %v16763_v19 }
 0x450   : > { %15507 = vmatmul.mubr.bf16.gmra.mrb[28].mxu0 %v19816_v21  ;;  %15237 = vmatpush3.bf16.msra.mxu1 %v16764_v39  ;;  %v16777_v21 = vld [vmem:[%s20654_s5 + $0x218] sm:$0xff]   ;;  %v16782_v39 = vld [vmem:[%s20654_s5 + $0x230] sm:$0xff]  }
 0x451   : > { %15510 = vmatprep.mubr.bf16.mxu0 %v9800_v13  ;;  %15523 = vmatpush3.bf16.msra.mxu0 %v16763_v19  ;;  %v8217_v13 = vpack.c.bf16 %v8207_v41, %v8206_v8  ;;  %v8211_v19 = vld [vmem:[#allocation3 + $0xa2] sm:$0xff]  ;;  %v8411_v41 = vld [vmem:[#allocation3 + $0x93] sm:$0xff] }
 0x452   : > { %15524 = vmatprep.subr.bf16.mxu0 %v16765_v42  ;;  %15238 = vmatprep.subr.bf16.mxu1 %v16766_v9  ;;  %v8219_v14 = vpack.c.bf16 %v8211_v19, %v8210_v58  ;;  %v8408_v8 = vld [vmem:[#allocation3 + $0x7b] sm:$0xff] }
 0x453   : > { %15223 = vmatmul.mubr.bf16.gmra.mrb[28].mxu1 %v19747_v62  ;;  %v16770_v62 = vld [vmem:[%s20654_s5 + $0x200] sm:$0xff]   ;;  %v16793_v19 = vld [vmem:[%s20654_s5 + $0x78] sm:$0xff]  }
 0x454   : > { %15239 = vmatpush3.bf16.msra.mxu1 %v16766_v9  ;;  %15242 = vmatprep.mubr.bf16.mxu1 %v8212_v12  ;;  %v8398_v9 = vld [vmem:[#allocation3 + $0x2b] sm:$0xff] }
 0x455   : > { %15525 = vmatpush3.bf16.msra.mxu0 %v16765_v42  ;;  %15240 = vmatprep.subr.bf16.mxu1 %v16768_v40  ;;  %v10201_v42 = vpack.c.bf16 %v10192_v43, %v10191_v55  ;;  %v8414_v12 = vpack.c.bf16 %v8399_v59, %v8398_v9  ;;  %v8412_v55 = vld [vmem:[#allocation3 + $0x9b] sm:$0xff]  ;;  %v8413_v43 = vld [vmem:[#allocation3 + $0xa3] sm:$0xff] }
 0x456   : > { %15526 = vmatprep.subr.bf16.mxu0 %v16767_v29  ;;  %v10394_v9 = vld [vmem:[#allocation3 + $0x11b] sm:$0xff]  ;;  %v10395_v59 = vld [vmem:[#allocation3 + $0x123] sm:$0xff] }
 0x458   : > { %15511 = vmatmul.mubr.bf16.gmra.mrb[32].mxu0 %v19885_v2  ;;  %15241 = vmatpush3.bf16.msra.mxu1 %v16768_v40  ;;  %v16784_v40 = vld [vmem:[%s20654_s5 + $0x238] sm:$0xff]  }
 0x459   : > { %15527 = vmatpush3.bf16.msra.mxu0 %v16767_v29  ;;  %15530 = vmatprep.mubr.bf16.mxu0 %v10195_v53  ;;  %v16783_v29 = vld [vmem:[%s20654_s5 + $0x230] sm:$0xff]   ;;  %v8401_v53 = vld [vmem:[#allocation3 + $0x43] sm:$0xff] }
 0x45a   : > { %15528 = vmatprep.subr.bf16.mxu0 %v16769_v37  ;;  %15258 = vmatprep.subr.bf16.mxu1 %v16770_v62 }
 0x45b   : > { %15243 = vmatmul.mubr.bf16.vlgmr.msra.gmra.mrb[16].mxu1 %v8213_v18  ;;  %v8403_v18 = vld [vmem:[#allocation3 + $0x53] sm:$0xff] }
 0x45c   : > { %15259 = vmatpush3.bf16.msra.mxu1 %v16770_v62  ;;  %15246 = vmatprep.mubr.bf16.mxu1 %v8214_v54  ;;  %v16785_v62 = vld [vmem:[%s20654_s5 + $0x238] sm:$0xff]   ;;  %v16787_v54 = vld [vmem:[%s20654_s5 + $0x48] sm:$0xff]  }
 0x45d   : > { %15529 = vmatpush3.bf16.msra.mxu0 %v16769_v37  ;;  %15260 = vmatprep.subr.bf16.mxu1 %v16772_v16  ;;  %v10202_v37 = vpack.c.bf16 %v10194_v48, %v10193_v51  ;;  %v10785_v51 = vld [vmem:[#allocation3 + $0x105] sm:$0xff]  ;;  %v10786_v48 = vld [vmem:[#allocation3 + $0x10d] sm:$0xff] }
 0x45e   : > { %15546 = vmatprep.subr.bf16.mxu0 %v16771_v56 }
 0x460   : > { %15531 = vmatmul.mubr.bf16.vlgmr.msra.gmra.mrb[20].mxu0 %v10196_v52  ;;  %15261 = vmatpush3.bf16.msra.mxu1 %v16772_v16  ;;  %v8415_v16 = vpack.c.bf16 %v8401_v53, %v8400_v23  ;;  %v10397_v52 = vpack.c.bf16 %v10383_v36, %v10382_v49  ;;  %v10789_v23 = vpack.c.bf16 %v10786_v48, %v10785_v51  ;;  %v16799_v53 = vld [vmem:[%s20654_s5 + $0x28] sm:$0xff]  }
 0x461   : > { %15534 = vmatprep.mubr.bf16.mxu0 %v10197_v20  ;;  %15547 = vmatpush3.bf16.msra.mxu0 %v16771_v56  ;;  %v8416_v56 = vpack.c.bf16 %v8403_v18, %v8402_v0  ;;  %v8406_v20 = vld [vmem:[#allocation3 + $0x6b] sm:$0xff]  ;;  %v16801_v0 = vld [vmem:[%s20654_s5 + $0x38] sm:$0xff]   ;;  %v16802_v18 = vld [vmem:[%s20654_s5 + $0x80] sm:$0xff]  }
 0x462   : > { %15548 = vmatprep.subr.bf16.mxu0 %v16773_v35  ;;  %15262 = vmatprep.subr.bf16.mxu1 %v16774_v25  ;;  %v11024_v49 = vld [vmem:[#allocation3 + $0x10f] sm:$0xff] }
 0x463   : > { %15247 = vmatmul.mubr.bf16.gmra.mrb[20].mxu1 %v8215_v6  ;;  %v16789_v6 = vld [vmem:[%s20654_s5 + $0x58] sm:$0xff]  }
 0x464   : > { %15263 = vmatpush3.bf16.msra.mxu1 %v16774_v25  ;;  %15250 = vmatprep.mubr.bf16.mxu1 %v8216_v47  ;;  %v8405_v25 = vld [vmem:[#allocation3 + $0x63] sm:$0xff]  ;;  %v10386_v47 = vld [vmem:[#allocation3 + $0xdb] sm:$0xff] }
 0x465   : > { %15549 = vmatpush3.bf16.msra.mxu0 %v16773_v35  ;;  %15264 = vmatprep.subr.bf16.mxu1 %v16776_v24  ;;  %v8404_v35 = vld [vmem:[#allocation3 + $0x5b] sm:$0xff] }
 0x466   : > { %15550 = vmatprep.subr.bf16.mxu0 %v16775_v32  ;;  %v8417_v27 = vpack.c.bf16 %v8405_v25, %v8404_v35  ;;  %v16806_v35 = vld [vmem:[%s20654_s5 + $0xa0] sm:$0xff]   ;;  %v16807_v25 = vld [vmem:[%s20654_s5 + $0xa8] sm:$0xff]  }
 0x468   : > { %15535 = vmatmul.mubr.bf16.gmra.mrb[24].mxu0 %v10198_v34  ;;  %15265 = vmatpush3.bf16.msra.mxu1 %v16776_v24  ;;  %v8418_v24 = vpack.c.bf16 %v8407_v17, %v8406_v20  ;;  %v8409_v34 = vld [vmem:[#allocation3 + $0x83] sm:$0xff]  ;;  %v16809_v20 = vld [vmem:[%s20654_s5 + $0xb8] sm:$0xff]  }
 0x469   : > { %15538 = vmatprep.mubr.bf16.mxu0 %v10199_v57  ;;  %15551 = vmatpush3.bf16.msra.mxu0 %v16775_v32  ;;  %v10387_v32 = vld [vmem:[#allocation3 + $0xe3] sm:$0xff]  ;;  %v8419_v57 = vpack.c.bf16 %v8409_v34, %v8408_v8  ;;  %v16817_v8 = vld [vmem:[%s20654_s5 + $0xf8] sm:$0xff]  }
 0x46a   : > { %15552 = vmatprep.subr.bf16.mxu0 %v16777_v21  ;;  %15266 = vmatprep.subr.bf16.mxu1 %v16778_v46  ;;  %v10399_v38 = vpack.c.bf16 %v10387_v32, %v10386_v47  ;;  %v16810_v17 = vld [vmem:[%s20654_s5 + $0xc0] sm:$0xff]   ;;  %v16811_v47 = vld [vmem:[%s20654_s5 + $0xc8] sm:$0xff]   ;;  %v16812_v32 = vld [vmem:[%s20654_s5 + $0xd0] sm:$0xff]  }
 0x46b   : > { %15251 = vmatmul.mubr.bf16.gmra.mrb[24].mxu1 %v8217_v13  ;;  %v10390_v13 = vld [vmem:[#allocation3 + $0xfb] sm:$0xff] }
 0x46c   : > { %15267 = vmatpush3.bf16.msra.mxu1 %v16778_v46  ;;  %15254 = vmatprep.mubr.bf16.mxu1 %v8218_v60  ;;  %v8410_v46 = vld [vmem:[#allocation3 + $0x8b] sm:$0xff]  ;;  %v16818_v34 = vld [vmem:[%s20654_s5 + $0x100] sm:$0xff]  }
 0x46d   : > { %15553 = vmatpush3.bf16.msra.mxu0 %v16777_v21  ;;  %15268 = vmatprep.subr.bf16.mxu1 %v16780_v44  ;;  %v10400_v21 = vpack.c.bf16 %v10389_v45, %v10388_v1  ;;  %v8420_v22 = vpack.c.bf16 %v8411_v41, %v8410_v46  ;;  %v10392_v60 = vld [vmem:[#allocation3 + $0x10b] sm:$0xff]  ;;  %v16813_v1 = vld [vmem:[%s20654_s5 + $0xd8] sm:$0xff]   ;;  %v16814_v45 = vld [vmem:[%s20654_s5 + $0xe0] sm:$0xff]  }
 0x46e   : > { %15554 = vmatprep.subr.bf16.mxu0 %v16779_v61  ;;  %v11149_v46 = vld [vmem:[#allocation3 + $0x12f] sm:$0xff]  ;;  %v11269_v41 = vld [vmem:[#allocation3 + $0x118] sm:$0xff] }
 0x470   : > { %15539 = vmatmul.mubr.bf16.gmra.mrb[28].mxu0 %v10200_v11  ;;  %15269 = vmatpush3.bf16.msra.mxu1 %v16780_v44  ;;  %v10391_v44 = vld [vmem:[#allocation3 + $0x103] sm:$0xff] }
 0x471   : > { %15542 = vmatprep.mubr.bf16.mxu0 %v10201_v42  ;;  %15555 = vmatpush3.bf16.msra.mxu0 %v16779_v61  ;;  %v10393_v61 = vld [vmem:[#allocation3 + $0x113] sm:$0xff]  ;;  %v10401_v63 = vpack.c.bf16 %v10391_v44, %v10390_v13  ;;  %v10807_v11 = vld [vmem:[#allocation3 + $0x106] sm:$0xff] }
 0x472   : > { %15556 = vmatprep.subr.bf16.mxu0 %v16781_v28  ;;  %15270 = vmatprep.subr.bf16.mxu1 %v16782_v39  ;;  %v10402_v58 = vpack.c.bf16 %v10393_v61, %v10392_v60  ;;  %v16820_v44 = vld [vmem:[%s20654_s5 + $0x110] sm:$0xff]   ;;  %v16821_v60 = vld [vmem:[%s20654_s5 + $0x118] sm:$0xff]   ;;  %v16822_v61 = vld [vmem:[%s20654_s5 + $0x120] sm:$0xff]  }
 0x473   : > { %15255 = vmatmul.mubr.bf16.gmra.mrb[28].mxu1 %v8219_v14  ;;  %v16794_v14 = vld [vmem:[%s20654_s5] sm:$0xff]  }
 0x474   : > { %15271 = vmatpush3.bf16.msra.mxu1 %v16782_v39  ;;  %15274 = vmatprep.mubr.bf16.mxu1 %v8414_v12  ;;  %v8421_v39 = vpack.c.bf16 %v8413_v43, %v8412_v55  ;;  %v10809_v12 = vld [vmem:[#allocation3 + $0x116] sm:$0xff]  ;;  %v20059_v43 = vpop.permute.xlu0 %8618 }
 0x475   : > { %15557 = vmatpush3.bf16.msra.mxu0 %v16781_v28  ;;  %15272 = vmatprep.subr.bf16.mxu1 %v16784_v40  ;;  %v10808_v28 = vld [vmem:[#allocation3 + $0x10e] sm:$0xff]  ;;  %v16825_v55 = vld [vmem:[%s20654_s5 + $0x138] sm:$0xff]  }
 0x476   : > { %15558 = vmatprep.subr.bf16.mxu0 %v16783_v29  ;;  %v10811_v42 = vpack.c.bf16 %v10808_v28, %v10807_v11  ;;  %v11271_v11 = vld [vmem:[#allocation3 + $0x128] sm:$0xff]  ;;  %v11272_v28 = vld [vmem:[#allocation3 + $0x130] sm:$0xff] }
 0x478   : > { %15543 = vmatmul.mubr.bf16.gmra.mrb[32].mxu0 %v10202_v37  ;;  %15273 = vmatpush3.bf16.msra.mxu1 %v16784_v40  ;;  %v10403_v40 = vpack.c.bf16 %v10395_v59, %v10394_v9  ;;  %v16796_v37 = vld [vmem:[%s20654_s5 + $0x10] sm:$0xff]   ;;  %v20069_v9 = vpop.permute.xlu0 %10599 }
 0x479   : > { %15559 = vmatpush3.bf16.msra.mxu0 %v16783_v29  ;;  %15562 = vmatprep.mubr.bf16.mxu0 %v10396_v4  ;;  %v10810_v29 = vld [vmem:[#allocation3 + $0x11e] sm:$0xff]  ;;  %v16800_v4 = vld [vmem:[%s20654_s5 + $0x30] sm:$0xff]  }
 0x47a   : > { %15560 = vmatprep.subr.bf16.mxu0 %v16785_v62  ;;  %15578 = vmatprep.subr.bf16.mxu1 %v16786_v7  ;;  %v10812_v50 = vpack.c.bf16 %v10810_v29, %v10809_v12  ;;  %v16829_v12 = vld [vmem:[%s20654_s5 + $0x158] sm:$0xff]  }
 0x47b   : > { %15275 = vmatmul.mubr.bf16.vlgmr.msra.gmra.mrb[16].mxu1 %v8415_v16  ;;  %v10787_v16 = vld [vmem:[#allocation3 + $0x115] sm:$0xff] }
 0x47c   : > { %15579 = vmatpush3.bf16.msra.mxu1 %v16786_v7  ;;  %15278 = vmatprep.mubr.bf16.mxu1 %v8416_v56  ;;  %v16798_v7 = vld [vmem:[%s20654_s5 + $0x20] sm:$0xff]  }
 0x47d   : > { %15561 = vmatpush3.bf16.msra.mxu0 %v16785_v62  ;;  %15580 = vmatprep.subr.bf16.mxu1 %v16787_v54  ;;  %v16797_v62 = vld [vmem:[%s20654_s5 + $0x18] sm:$0xff]   ;;  %v11023_v56 = vld [vmem:[#allocation3 + $0x107] sm:$0xff] }
 0x47e   : > { %v11027_v3 = vpack.c.bf16 %v11024_v49, %v11023_v56  ;;  %v16835_v56 = vld [vmem:[%s20654_s5 + $0x188] sm:$0xff]  }
 0x480   : > { %15563 = vmatmul.mubr.bf16.vlgmr.msra.gmra.mrb[20].mxu0 %v10397_v52  ;;  %15581 = vmatpush3.bf16.msra.mxu1 %v16787_v54  ;;  %v10788_v54 = vld [vmem:[#allocation3 + $0x11d] sm:$0xff] }
 0x481   : > { %15566 = vmatprep.mubr.bf16.mxu0 %v10398_v31  ;;  %15582 = vmatprep.subr.bf16.mxu1 %v16788_v15  ;;  %v10790_v36 = vpack.c.bf16 %v10788_v54, %v10787_v16  ;;  %v16805_v52 = vld [vmem:[%s20654_s5 + $0x98] sm:$0xff]   ;;  %v16808_v31 = vld [vmem:[%s20654_s5 + $0xb0] sm:$0xff]  }
 0x483   : > { %15279 = vmatmul.mubr.bf16.gmra.mrb[20].mxu1 %v8417_v27  ;;  %v11025_v27 = vld [vmem:[#allocation3 + $0x117] sm:$0xff] }
 0x484   : > { %15583 = vmatpush3.bf16.msra.mxu1 %v16788_v15  ;;  %15282 = vmatprep.mubr.bf16.mxu1 %v8418_v24  ;;  %v16804_v15 = vld [vmem:[%s20654_s5 + $0x90] sm:$0xff]  }
 0x485   : > { %15584 = vmatprep.subr.bf16.mxu1 %v16789_v6 }
 0x488   : > { %15567 = vmatmul.mubr.bf16.gmra.mrb[24].mxu0 %v10399_v38  ;;  %15585 = vmatpush3.bf16.msra.mxu1 %v16789_v6  ;;  %v11026_v6 = vld [vmem:[#allocation3 + $0x11f] sm:$0xff]  ;;  %v16816_v38 = vld [vmem:[%s20654_s5 + $0xf0] sm:$0xff]  }
 0x489   : > { %15570 = vmatprep.mubr.bf16.mxu0 %v10400_v21  ;;  %15586 = vmatprep.subr.bf16.mxu1 %v16790_v33  ;;  %v11028_v24 = vpack.c.bf16 %v11026_v6, %v11025_v27  ;;  %v11148_v21 = vld [vmem:[#allocation3 + $0x127] sm:$0xff]  ;;  %v16840_v27 = vld [vmem:[%s20654_s5 + $0x1b0] sm:$0xff]  }
 0x48b   : > { %15283 = vmatmul.mubr.bf16.gmra.mrb[24].mxu1 %v8419_v57  ;;  %v11270_v57 = vld [vmem:[#allocation3 + $0x120] sm:$0xff] }
 0x48c   : > { %15587 = vmatpush3.bf16.msra.mxu1 %v16790_v33  ;;  %15286 = vmatprep.mubr.bf16.mxu1 %v8420_v22  ;;  %v16815_v33 = vld [vmem:[%s20654_s5 + $0xe8] sm:$0xff]   ;;  %v11273_v13 = vpack.c.bf16 %v11270_v57, %v11269_v41  ;;  %v11517_v41 = vld [vmem:[#allocation3 + $0x139] sm:$0xff] }
 0x48d   : > { %15588 = vmatprep.subr.bf16.mxu1 %v16791_v10  ;;  %v16819_v22 = vld [vmem:[%s20654_s5 + $0x108] sm:$0xff]  }
 0x48e   : > { %v11518_v57 = vld [vmem:[#allocation3 + $0x141] sm:$0xff] }
 0x490   : > { %15571 = vmatmul.mubr.bf16.gmra.mrb[28].mxu0 %v10401_v63  ;;  %15589 = vmatpush3.bf16.msra.mxu1 %v16791_v10  ;;  %v11151_v10 = vpack.c.bf16 %v11149_v46, %v11148_v21  ;;  %v16824_v63 = vld [vmem:[%s20654_s5 + $0x130] sm:$0xff]  }
 0x491   : > { %15574 = vmatprep.mubr.bf16.mxu0 %v10402_v58  ;;  %15590 = vmatprep.subr.bf16.mxu1 %v16792_v26  ;;  %v16826_v58 = vld [vmem:[%s20654_s5 + $0x140] sm:$0xff]  }
 0x493   : > { %15287 = vmatmul.mubr.bf16.gmra.mrb[28].mxu1 %v8421_v39  ;;  %v20064_v39 = vpop.permute.xlu1 %8623 }
 0x494   : > { %15591 = vmatpush3.bf16.msra.mxu1 %v16792_v26  ;;  %15594 = vmatprep.mubr.bf16.mxu1 %v10811_v42  ;;  %v16823_v26 = vld [vmem:[%s20654_s5 + $0x128] sm:$0xff]  }
 0x495   : > { %15592 = vmatprep.subr.bf16.mxu1 %v16793_v19  ;;  %v16827_v42 = vld [vmem:[%s20654_s5 + $0x148] sm:$0xff]  }
 0x497   : > { %v20072_v59 = vpop.permute.xlu1 %10604 }
 0x498   : > { %15575 = vmatmul.mubr.bf16.gmra.mrb[32].mxu0 %v10403_v40  ;;  %15593 = vmatpush3.bf16.msra.mxu1 %v16793_v19  ;;  %v11274_v19 = vpack.c.bf16 %v11272_v28, %v11271_v11  ;;  %v20077_v40 = vpop.permute.xlu0 %8628 }
 0x499   : > { %15598 = vmatprep.subr.bf16.mxu1 %v16794_v14 }
 0x49b   : > { %15595 = vmatmul.mubr.bf16.vlgmr.msra.gmra.mrb[32].mxu1 %v10812_v50  ;;  %v20082_v29 = vpop.permute.xlu1 %10609  ;;  %v16831_v50 = vld [vmem:[%s20654_s5 + $0x168] sm:$0xff]  }
 0x49c   : > { %15599 = vmatpush3.bf16.msra.mxu1 %v16794_v14  ;;  %15614 = vmatprep.mubr.bf16.mxu1 %v10789_v23  ;;  %v16828_v14 = vld [vmem:[%s20654_s5 + $0x150] sm:$0xff]   ;;  %v20087_v51 = vpop.permute.xlu0 %8633 }
 0x49d   : > { %15600 = vmatprep.subr.bf16.mxu1 %v16795_v30  ;;  %v16832_v23 = vld [vmem:[%s20654_s5 + $0x170] sm:$0xff]  }
 0x49f   : > { %v20089_v48 = vpop.permute.xlu1 %10614 }
 0x4a0   : > { %15601 = vmatpush3.bf16.msra.mxu1 %v16795_v30  ;;  %v20094_v30 = vpop.permute.xlu0 %8638 }
 0x4a1   : > { %15602 = vmatprep.subr.bf16.mxu1 %v16796_v37 }
 0x4a4   : > { %15603 = vmatpush3.bf16.msra.mxu1 %v16796_v37  ;;  %v20099_v37 = vpop.permute.xlu1 %10619 }
 0x4a5   : > { %15604 = vmatprep.subr.bf16.mxu1 %v16797_v62 }
 0x4a8   : > { %15605 = vmatpush3.bf16.msra.mxu1 %v16797_v62  ;;  %v16833_v62 = vld [vmem:[%s20654_s5 + $0x178] sm:$0xff]  }
 0x4a9   : > { %15606 = vmatprep.subr.bf16.mxu1 %v16798_v7 }
 0x4ac   : > { %15607 = vmatpush3.bf16.msra.mxu1 %v16798_v7  ;;  %v20104_v7 = vpop.permute.xlu0 %8643 }
 0x4ad   : > { %15608 = vmatprep.subr.bf16.mxu1 %v16799_v53 }
 0x4b0   : > { %15609 = vmatpush3.bf16.msra.mxu1 %v16799_v53  ;;  %v20106_v53 = vpop.permute.xlu1 %10624  ;;  %v20111_v16 = vpop.permute.xlu0 %8648 }
 0x4b1   : > { %15610 = vmatprep.subr.bf16.mxu1 %v16800_v4 }
 0x4b4   : > { %15611 = vmatpush3.bf16.msra.mxu1 %v16800_v4  ;;  %v16834_v4 = vld [vmem:[%s20654_s5 + $0x180] sm:$0xff]   ;;  %v20116_v49 = vpop.permute.xlu1 %10629 }
 0x4b5   : > { %15612 = vmatprep.subr.bf16.mxu1 %v16801_v0 }
 0x4b8   : > { %15613 = vmatpush3.bf16.msra.mxu1 %v16801_v0  ;;  %v11394_v0 = vld [vmem:[#allocation3 + $0x129] sm:$0xff] }
 0x4b9   : > { %15618 = vmatprep.subr.bf16.mxu1 %v16802_v18 }
 0x4bb   : > { %15615 = vmatmul.mubr.bf16.vlgmr.msra.gmra.mrb[32].mxu1 %v10790_v36  ;;  %v16836_v36 = vld [vmem:[%s20654_s5 + $0x190] sm:$0xff]  }
 0x4bc   : > { %15619 = vmatpush3.bf16.msra.mxu1 %v16802_v18  ;;  %15634 = vmatprep.mubr.bf16.mxu1 %v11027_v3  ;;  %v11395_v18 = vld [vmem:[#allocation3 + $0x131] sm:$0xff]  ;;  %v20123_v3 = vpop.permute.xlu1 %10634 }
 0x4bd   : > { %15620 = vmatprep.subr.bf16.mxu1 %v16803_v5  ;;  %v11397_v54 = vpack.c.bf16 %v11395_v18, %v11394_v0 }
 0x4c0   : > { %15621 = vmatpush3.bf16.msra.mxu1 %v16803_v5  ;;  %v20121_v5 = vpop.permute.xlu0 %8653 }
 0x4c1   : > { %15622 = vmatprep.subr.bf16.mxu1 %v16804_v15 }
 0x4c4   : > { %15623 = vmatpush3.bf16.msra.mxu1 %v16804_v15  ;;  %v16837_v15 = vld [vmem:[%s20654_s5 + $0x198] sm:$0xff]  }
 0x4c5   : > { %15624 = vmatprep.subr.bf16.mxu1 %v16805_v52 }
 0x4c8   : > { %15625 = vmatpush3.bf16.msra.mxu1 %v16805_v52  ;;  %v20128_v52 = vpop.permute.xlu0 %8658 }
 0x4c9   : > { %15626 = vmatprep.subr.bf16.mxu1 %v16806_v35 }
 0x4cc   : > { %15627 = vmatpush3.bf16.msra.mxu1 %v16806_v35  ;;  %v16838_v35 = vld [vmem:[%s20654_s5 + $0x1a0] sm:$0xff]  }
 0x4cd   : > { %15628 = vmatprep.subr.bf16.mxu1 %v16807_v25 }
 0x4d0   : > { %15629 = vmatpush3.bf16.msra.mxu1 %v16807_v25  ;;  %v20133_v25 = vpop.permute.xlu1 %10639 }
 0x4d1   : > { %15630 = vmatprep.subr.bf16.mxu1 %v16808_v31 }
 0x4d4   : > { %15631 = vmatpush3.bf16.msra.mxu1 %v16808_v31  ;;  %v16839_v31 = vld [vmem:[%s20654_s5 + $0x1a8] sm:$0xff]  }
 0x4d5   : > { %15632 = vmatprep.subr.bf16.mxu1 %v16809_v20 }
 0x4d8   : > { %15633 = vmatpush3.bf16.msra.mxu1 %v16809_v20  ;;  %v20138_v20 = vpop.permute.xlu0 %8663 }
 0x4d9   : > { %15638 = vmatprep.subr.bf16.mxu1 %v16810_v17 }
 0x4db   : > { %15635 = vmatmul.mubr.bf16.vlgmr.msra.gmra.mrb[32].mxu1 %v11028_v24 }
 0x4dc   : > { %15639 = vmatpush3.bf16.msra.mxu1 %v16810_v17  ;;  %15654 = vmatprep.mubr.bf16.mxu1 %v11028_v24  ;;  %v20140_v17 = vpop.permute.xlu1 %10644 }
 0x4dd   : > { %15640 = vmatprep.subr.bf16.mxu1 %v16811_v47 }
 0x4e0   : > { %15641 = vmatpush3.bf16.msra.mxu1 %v16811_v47 }
 0x4e1   : > { %15642 = vmatprep.subr.bf16.mxu1 %v16812_v32 }
 0x4e4   : > { %15643 = vmatpush3.bf16.msra.mxu1 %v16812_v32 }
 0x4e5   : > { %15644 = vmatprep.subr.bf16.mxu1 %v16813_v1 }
 0x4e8   : > { %15645 = vmatpush3.bf16.msra.mxu1 %v16813_v1  ;;  %v20153_v1 = vpop.permute.xlu0 %8668 }
 0x4e9   : > { %15646 = vmatprep.subr.bf16.mxu1 %v16814_v45 }
 0x4ec   : > { %15647 = vmatpush3.bf16.msra.mxu1 %v16814_v45 }
 0x4ed   : > { %15648 = vmatprep.subr.bf16.mxu1 %v16815_v33 }
 0x4f0   : > { %15649 = vmatpush3.bf16.msra.mxu1 %v16815_v33 }
 0x4f1   : > { %15650 = vmatprep.subr.bf16.mxu1 %v16816_v38 }
 0x4f4   : > { %15651 = vmatpush3.bf16.msra.mxu1 %v16816_v38  ;;  %v16841_v38 = vld [vmem:[%s20654_s5 + $0x1b8] sm:$0xff]  }
 0x4f5   : > { %15652 = vmatprep.subr.bf16.mxu1 %v16817_v8 }
 0x4f8   : > { %15653 = vmatpush3.bf16.msra.mxu1 %v16817_v8  ;;  %v20162_v8 = vld [vmem:[#allocation3 + $0x12a] sm:$0xff] }
 0x4f9   : > { %15658 = vmatprep.subr.bf16.mxu1 %v16818_v34 }
 0x4fb   : > { %15655 = vmatmul.mubr.bf16.vlgmr.msra.gmra.mrb[32].mxu1 %v11151_v10  ;;  %v20170_v10 = vld [vmem:[#allocation3 + $0x132] sm:$0xff] }
 0x4fc   : > { %15659 = vmatpush3.bf16.msra.mxu1 %v16818_v34  ;;  %15674 = vmatprep.mubr.bf16.mxu1 %v11273_v13 }
 0x4fd   : > { %15660 = vmatprep.subr.bf16.mxu1 %v16819_v22 }
 0x500   : > { %15661 = vmatpush3.bf16.msra.mxu1 %v16819_v22  ;;  %v20172_v22 = vpop.permute.xlu1 %10649 }
 0x501   : > { %15662 = vmatprep.subr.bf16.mxu1 %v16820_v44 }
 0x504   : > { %15663 = vmatpush3.bf16.msra.mxu1 %v16820_v44 }
 0x505   : > { %15664 = vmatprep.subr.bf16.mxu1 %v16821_v60 }
 0x508   : > { %15665 = vmatpush3.bf16.msra.mxu1 %v16821_v60 }
 0x509   : > { %15666 = vmatprep.subr.bf16.mxu1 %v16822_v61 }
 0x50c   : > { %15667 = vmatpush3.bf16.msra.mxu1 %v16822_v61 }
 0x50d   : > { %15668 = vmatprep.subr.bf16.mxu1 %v16823_v26 }
 0x510   : > { %15669 = vmatpush3.bf16.msra.mxu1 %v16823_v26 }
 0x511   : > { %15670 = vmatprep.subr.bf16.mxu1 %v16824_v63 }
 0x514   : > { %15671 = vmatpush3.bf16.msra.mxu1 %v16824_v63 }
 0x515   : > { %15672 = vmatprep.subr.bf16.mxu1 %v16825_v55 }
 0x518   : > { %15673 = vmatpush3.bf16.msra.mxu1 %v16825_v55 }
 0x519   : > { %15678 = vmatprep.subr.bf16.mxu1 %v16826_v58 }
 0x51b   : > { %15675 = vmatmul.mubr.bf16.vlgmr.msra.gmra.mrb[32].mxu1 %v11274_v19  ;;  %v11520_v19 = vpack.c.bf16 %v11518_v57, %v11517_v41  ;;  %v16843_v41 = vld [vmem:[%s20654_s5 + $0x1c8] sm:$0xff]  }
 0x51c   : > { %15679 = vmatpush3.bf16.msra.mxu1 %v16826_v58  ;;  %15694 = vmatprep.mubr.bf16.mxu1 %v19885_v2  ;;  %v16830_v2 = vld [vmem:[%s20654_s5 + $0x160] sm:$0xff]  }
 0x51d   : > { %15680 = vmatprep.subr.bf16.mxu1 %v16827_v42 }
 0x520   : > { %15681 = vmatpush3.bf16.msra.mxu1 %v16827_v42  ;;  %v16842_v42 = vld [vmem:[%s20654_s5 + $0x1c0] sm:$0xff]  }
 0x521   : > { %15682 = vmatprep.subr.bf16.mxu1 %v16828_v14 }
 0x524   : > { %15683 = vmatpush3.bf16.msra.mxu1 %v16828_v14 }
 0x525   : > { %15684 = vmatprep.subr.bf16.mxu1 %v16829_v12 }
 0x528   : > { %15685 = vmatpush3.bf16.msra.mxu1 %v16829_v12 }
 0x529   : > { %15686 = vmatprep.subr.bf16.mxu1 %v16830_v2 }
 0x52c   : > { %15687 = vmatpush3.bf16.msra.mxu1 %v16830_v2 }
 0x52d   : > { %15688 = vmatprep.subr.bf16.mxu1 %v16831_v50 }
 0x530   : > { %15689 = vmatpush3.bf16.msra.mxu1 %v16831_v50 }
 0x531   : > { %15690 = vmatprep.subr.bf16.mxu1 %v16832_v23 }
 0x534   : > { %15691 = vmatpush3.bf16.msra.mxu1 %v16832_v23  ;;  %v20202_v23 = vpop.permute.xlu0 %8673 }
 0x535   : > { %15692 = vmatprep.subr.bf16.mxu1 %v16833_v62 }
 0x538   : > { %15693 = vmatpush3.bf16.msra.mxu1 %v16833_v62 }
 0x539   : > { %15698 = vmatprep.subr.bf16.mxu1 %v16834_v4 }
 0x53b   : > { %15695 = vmatmul.mubr.bf16.vlgmr.msra.gmra.mrb[32].mxu1 %v11397_v54 }
 0x53c   : > { %15699 = vmatpush3.bf16.msra.mxu1 %v16834_v4  ;;  %15714 = vmatprep.mubr.bf16.mxu1 %v11397_v54 }
 0x53d   : > { %15700 = vmatprep.subr.bf16.mxu1 %v16835_v56 }
 0x540   : > { %15701 = vmatpush3.bf16.msra.mxu1 %v16835_v56 }
 0x541   : > { %15702 = vmatprep.subr.bf16.mxu1 %v16836_v36 }
 0x544   : > { %15703 = vmatpush3.bf16.msra.mxu1 %v16836_v36 }
 0x545   : > { %15704 = vmatprep.subr.bf16.mxu1 %v16837_v15 }
 0x548   : > { %15705 = vmatpush3.bf16.msra.mxu1 %v16837_v15 }
 0x549   : > { %15706 = vmatprep.subr.bf16.mxu1 %v16838_v35 }
 0x54c   : > { %15707 = vmatpush3.bf16.msra.mxu1 %v16838_v35 }
 0x54d   : > { %15708 = vmatprep.subr.bf16.mxu1 %v16839_v31 }
 0x54e   : > { %v20145_v6 = vpop.f32.mrb[16].mxu1 }
 0x54f   : > { %v20147_v24 = vpop.f32.mrb[17].mxu1  ;;  %v8736_v45 = vmul.f32 %v20145_v6, %v20145_v6  ;;  %v8698_v60 = vmul.f32 %v20145_v6, %v20077_v40 }
 0x550   : > { %v8734_v47 = vmul.f32 %v20147_v24, %v20147_v24  ;;  %15709 = vmatpush3.bf16.msra.mxu1 %v16839_v31  ;;  %v20151_v32 = vpop.f32.mrb[18].mxu1  ;;  %v8696_v34 = vmul.f32 %v20059_v43, %v20147_v24  ;;  %v20220_v31 = vpop.permute.xlu1 %10654 }
 0x551   : > { %v20157_v33 = vpop.f32.mrb[19].mxu1  ;;  %15710 = vmatprep.subr.bf16.mxu1 %v16840_v27  ;;  %v8737_v44 = vmul.f32 %v20151_v32, %v20151_v32  ;;  %v8752_v58 = vmul.f32 %v8736_v45, %v20077_v40  ;;  %v8699_v14 = vmul.f32 %v20151_v32, %v20087_v51 }
 0x552   : > { %v8697_v21 = vmul.f32 %v20064_v39, %v20157_v33  ;;  %v8735_v46 = vmul.f32 %v20157_v33, %v20157_v33  ;;  %v8750_v61 = vmul.f32 %v8734_v47, %v20059_v43  ;;  %v11642_v43 = vpack.c.bf16 %v20170_v10, %v20162_v8 }
 0x553   : > { %v20174_v13 = vpop.f32.mrb[20].mxu0  ;;  %v8753_v62 = vmul.f32 %v8737_v44, %v20087_v51 }
 0x554   : > { %v20181_v26 = vpop.f32.mrb[21].mxu0  ;;  %v8712_v63 = vadd.f32 %v8697_v21, %v8696_v34  ;;  %v8751_v55 = vmul.f32 %v8735_v46, %v20064_v39  ;;  %15711 = vmatpush3.bf16.msra.mxu1 %v16840_v27  ;;  %v10717_v39 = vmul.f32 %v20174_v13, %v20174_v13  ;;  %v10679_v56 = vmul.f32 %v20174_v13, %v20082_v29 }
 0x555   : > { %v10715_v11 = vmul.f32 %v20181_v26, %v20181_v26  ;;  %v20187_v28 = vpop.f32.mrb[22].mxu0  ;;  %15712 = vmatprep.subr.bf16.mxu1 %v16841_v38  ;;  %v10677_v4 = vmul.f32 %v20069_v9, %v20181_v26 }
 0x556   : > { %v8713_v40 = vadd.f32 %v8712_v63, %v8698_v60  ;;  %v8766_v12 = vadd.f32 %v8751_v55, %v8750_v61  ;;  %v20198_v2 = vpop.f32.mrb[23].mxu0  ;;  %v20200_v50 = vpop.f32.mrb[20].mxu1  ;;  %v10718_v27 = vmul.f32 %v20187_v28, %v20187_v28 }
 0x557   : > { %v10678_v0 = vmul.f32 %v20072_v59, %v20198_v2  ;;  %v10716_v18 = vmul.f32 %v20198_v2, %v20198_v2  ;;  %v20211_v54 = vpop.f32.mrb[21].mxu1  ;;  %v10731_v36 = vmul.f32 %v10715_v11, %v20069_v9  ;;  %v10733_v9 = vmul.f32 %v10717_v39, %v20082_v29 }
 0x558   : > { %v8767_v15 = vadd.f32 %v8766_v12, %v8752_v58  ;;  %v8700_v51 = vmul.f32 %v20094_v30, %v20211_v54  ;;  %15713 = vmatpush3.bf16.msra.mxu1 %v16841_v38  ;;  %v20218_v35 = vpop.f32.mrb[22].mxu1  ;;  %v8714_v8 = vadd.f32 %v8713_v40, %v8699_v14  ;;  %v8740_v21 = vmul.f32 %v20200_v50, %v20200_v50  ;;  %v20246_v58 = vpop.permute.xlu0 %8678 }
 0x559   : > { %v10693_v47 = vadd.f32 %v10678_v0, %v10677_v4  ;;  %v10732_v45 = vmul.f32 %v10716_v18, %v20072_v59  ;;  %v20225_v34 = vpop.f32.mrb[23].mxu1  ;;  %15718 = vmatprep.subr.bf16.mxu1 %v16842_v42  ;;  %v8738_v38 = vmul.f32 %v20211_v54, %v20211_v54  ;;  %v10680_v59 = vmul.f32 %v20187_v28, %v20089_v48  ;;  %v20263_v18 = vpop.permute.xlu1 %10659 }
 0x55a   : > { %v8768_v46 = vadd.f32 %v8767_v15, %v8753_v62  ;;  %v8715_v44 = vadd.f32 %v8714_v8, %v8700_v51  ;;  %v8702_v29 = vmul.f32 %v20200_v50, %v20111_v16  ;;  %v8701_v55 = vmul.f32 %v20104_v7, %v20225_v34 }
 0x55b   : > { %v10694_v57 = vadd.f32 %v10693_v47, %v10679_v56  ;;  %v10747_v10 = vadd.f32 %v10732_v45, %v10731_v36  ;;  %v20237_v60 = vpop.f32.mrb[24].mxu0  ;;  %15715 = vmatmul.mubr.bf16.vlgmr.msra.gmra.mrb[32].mxu1 %v11520_v19  ;;  %v8754_v61 = vmul.f32 %v8738_v38, %v20094_v30  ;;  %v10734_v11 = vmul.f32 %v10718_v27, %v20089_v48  ;;  %v16844_v30 = vld [vmem:[%s20654_s5 + $0x1d0] sm:$0xff]  }
 0x55c   : > { %v20242_v63 = vpop.f32.mrb[25].mxu0  ;;  %15719 = vmatpush3.bf16.msra.mxu1 %v16842_v42  ;;  %15734 = vmatprep.mubr.bf16.mxu1 %v11642_v43  ;;  %v8756_v12 = vmul.f32 %v8740_v21, %v20111_v16  ;;  %v8716_v4 = vadd.f32 %v8715_v44, %v8701_v55  ;;  %v8741_v43 = vmul.f32 %v20218_v35, %v20218_v35 }
 0x55d   : > { %v10748_v39 = vadd.f32 %v10747_v10, %v10733_v9  ;;  %v10681_v14 = vmul.f32 %v20099_v37, %v20242_v63  ;;  %v10695_v19 = vadd.f32 %v10694_v57, %v10680_v59  ;;  %v20251_v40 = vpop.f32.mrb[26].mxu0  ;;  %v8769_v62 = vadd.f32 %v8768_v46, %v8754_v61  ;;  %15720 = vmatprep.subr.bf16.mxu1 %v16843_v41 }
 0x55e   : > { %v10719_v42 = vmul.f32 %v20242_v63, %v20242_v63  ;;  %v20259_v48 = vpop.f32.mrb[27].mxu0  ;;  %v20261_v0 = vpop.f32.mrb[24].mxu1  ;;  %v8739_v16 = vmul.f32 %v20225_v34, %v20225_v34  ;;  %v10721_v51 = vmul.f32 %v20237_v60, %v20237_v60  ;;  %v8717_v47 = vadd.f32 %v8716_v4, %v8702_v29 }
 0x55f   : > { %v10696_v56 = vadd.f32 %v10695_v19, %v10681_v14  ;;  %v10749_v36 = vadd.f32 %v10748_v39, %v10734_v11  ;;  %v20269_v15 = vpop.f32.mrb[25].mxu1  ;;  %v10682_v45 = vmul.f32 %v20106_v53, %v20259_v48  ;;  %v10683_v9 = vmul.f32 %v20237_v60, %v20116_v49  ;;  %v20294_v29 = vpop.permute.xlu0 %8683 }
 0x560   : > { %v10735_v27 = vmul.f32 %v10719_v42, %v20099_v37  ;;  %15721 = vmatpush3.bf16.msra.mxu1 %v16843_v41  ;;  %v20276_v8 = vpop.f32.mrb[26].mxu1  ;;  %v8703_v21 = vmul.f32 %v20218_v35, %v20121_v5  ;;  %v8755_v38 = vmul.f32 %v8739_v16, %v20104_v7  ;;  %v10720_v46 = vmul.f32 %v20259_v48, %v20259_v48  ;;  %v16845_v37 = vld [vmem:[%s20654_s5 + $0x1d8] sm:$0xff]  }
 0x561   : > { %v20285_v59 = vpop.f32.mrb[27].mxu1  ;;  %15722 = vmatprep.subr.bf16.mxu1 %v16844_v30  ;;  %v10722_v57 = vmul.f32 %v20251_v40, %v20251_v40  ;;  %v10697_v10 = vadd.f32 %v10696_v56, %v10682_v45  ;;  %v8704_v44 = vmul.f32 %v20128_v52, %v20269_v15  ;;  %v8757_v7 = vmul.f32 %v8741_v43, %v20121_v5 }
 0x562   : > { %v10750_v41 = vadd.f32 %v10749_v36, %v10735_v27  ;;  %v8770_v61 = vadd.f32 %v8769_v62, %v8755_v38  ;;  %v10736_v55 = vmul.f32 %v10720_v46, %v20106_v53  ;;  %v8718_v11 = vadd.f32 %v8717_v47, %v8703_v21  ;;  %v20307_v36 = vpop.permute.xlu1 %10664 }
 0x563   : > { %v20298_v39 = vpop.f32.mrb[28].mxu0  ;;  %v10737_v14 = vmul.f32 %v10721_v51, %v20116_v49  ;;  %v10698_v19 = vadd.f32 %v10697_v10, %v10683_v9  ;;  %v8744_v42 = vmul.f32 %v20261_v0, %v20261_v0  ;;  %v8742_v4 = vmul.f32 %v20269_v15, %v20269_v15  ;;  %v16846_v49 = vld [vmem:[%s20654_s5 + $0x1e0] sm:$0xff]  }
 0x564   : > { %20747 = vst [vmem:[#allocation13_spill] sm:$0xff] %v20298_v39  ;;  %v20305_v56 = vpop.f32.mrb[29].mxu0  ;;  %15723 = vmatpush3.bf16.msra.mxu1 %v16844_v30  ;;  %v8771_v5 = vadd.f32 %v8770_v61, %v8756_v12  ;;  %v10684_v53 = vmul.f32 %v20251_v40, %v20123_v3  ;;  %v10751_v62 = vadd.f32 %v10750_v41, %v10736_v55 }
 0x565   : > { %20748 = vst [vmem:[#allocation14_spill] sm:$0xff] %v20305_v56  ;;  %v8719_v43 = vadd.f32 %v8718_v11, %v8704_v44  ;;  %v20311_v16 = vpop.f32.mrb[30].mxu0  ;;  %15724 = vmatprep.subr.bf16.mxu1 %v16845_v37  ;;  %v10738_v51 = vmul.f32 %v10722_v57, %v20123_v3  ;;  %v8758_v27 = vmul.f32 %v8742_v4, %v20128_v52  ;;  %v8689_v44 = vpop.permute.xlu0 %8688 }
 0x566   : > { %v10685_v30 = vmul.f32 %v20133_v25, %v20305_v56  ;;  %v20320_v12 = vpop.f32.mrb[31].mxu0  ;;  %v20322_v47 = vpop.f32.mrb[28].mxu1  ;;  %v10752_v45 = vadd.f32 %v10751_v62, %v10737_v14  ;;  %v8772_v9 = vadd.f32 %v8771_v5, %v8757_v7  ;;  %v10699_v21 = vadd.f32 %v10698_v19, %v10684_v53 }
 0x567   : > { %20749 = vst [vmem:[#allocation12_spill] sm:$0xff] %v20320_v12  ;;  %v10723_v38 = vmul.f32 %v20305_v56, %v20305_v56  ;;  %v20326_v46 = vpop.f32.mrb[29].mxu1  ;;  %v8706_v3 = vmul.f32 %v20261_v0, %v20153_v1  ;;  %v8760_v52 = vmul.f32 %v8744_v42, %v20153_v1  ;;  %v8705_v41 = vmul.f32 %v20138_v20, %v20285_v59  ;;  %v16847_v1 = vld [vmem:[%s20654_s5 + $0x1e8] sm:$0xff]   ;;  %v20348_v5 = vpop.permute.xlu1 %10669 }
 0x568   : > { %v8743_v57 = vmul.f32 %v20285_v59, %v20285_v59  ;;  %15725 = vmatpush3.bf16.msra.mxu1 %v16845_v37  ;;  %v20335_v10 = vpop.f32.mrb[30].mxu1  ;;  %v8773_v7 = vadd.f32 %v8772_v9, %v8758_v27  ;;  %v10700_v61 = vadd.f32 %v10699_v21, %v10685_v30  ;;  %v10753_v11 = vadd.f32 %v10752_v45, %v10738_v51 }
 0x569   : > { %v10739_v55 = vmul.f32 %v10723_v38, %v20133_v25  ;;  %v20338_v14 = vpop.f32.mrb[31].mxu1  ;;  %15726 = vmatprep.subr.bf16.mxu1 %v16846_v49  ;;  %v8745_v19 = vmul.f32 %v20276_v8, %v20276_v8  ;;  %v8720_v42 = vadd.f32 %v8719_v43, %v8705_v41  ;;  %v10686_v4 = vmul.f32 %v20140_v17, %v20320_v12 }
 0x56a   : > { %v8759_v37 = vmul.f32 %v8743_v57, %v20138_v20  ;;  %v10687_v25 = vmul.f32 %v20298_v39, %v20172_v22  ;;  %v10725_v53 = vmul.f32 %v20298_v39, %v20298_v39  ;;  %v10724_v51 = vmul.f32 %v20320_v12, %v20320_v12 }
 0x56b   : > { %v10754_v62 = vadd.f32 %v10753_v11, %v10739_v55  ;;  %v20356_v27 = vpop.f32.mrb[32].mxu0  ;;  %v8707_v20 = vmul.f32 %v20276_v8, %v20202_v23  ;;  %v8721_v43 = vadd.f32 %v8720_v42, %v8706_v3  ;;  %v10701_v45 = vadd.f32 %v10700_v61, %v10686_v4  ;;  %v16848_v3 = vld [vmem:[%s20654_s5 + $0x1f0] sm:$0xff]  }
 0x56c   : > { %20750 = vst [vmem:[#allocation7_spill] sm:$0xff] %v20356_v27  ;;  %v8774_v30 = vadd.f32 %v8773_v7, %v8759_v37  ;;  %v20360_v9 = vpop.f32.mrb[33].mxu0  ;;  %15727 = vmatpush3.bf16.msra.mxu1 %v16846_v49  ;;  %v10726_v21 = vmul.f32 %v20311_v16, %v20311_v16  ;;  %v10740_v38 = vmul.f32 %v10724_v51, %v20140_v17  ;;  %v20377_v17 = vpop.permute.xlu0 %11890 }
 0x56d   : > { %v8708_v41 = vmul.f32 %v20246_v58, %v20326_v46  ;;  %v8746_v57 = vmul.f32 %v20326_v46, %v20326_v46  ;;  %v20369_v55 = vpop.f32.mrb[34].mxu0  ;;  %15728 = vmatprep.subr.bf16.mxu1 %v16847_v1  ;;  %v8761_v49 = vmul.f32 %v8745_v19, %v20202_v23  ;;  %v10702_v61 = vadd.f32 %v10701_v45, %v10687_v25  ;;  %v20387_v19 = vpop.permute.xlu1 %11895 }
 0x56e   : > { %v8775_v7 = vadd.f32 %v8774_v30, %v8760_v52  ;;  %v8722_v11 = vadd.f32 %v8721_v43, %v8707_v20  ;;  %v20375_v42 = vpop.f32.mrb[35].mxu0  ;;  %v10741_v37 = vmul.f32 %v10725_v53, %v20172_v22  ;;  %v10688_v4 = vmul.f32 %v20311_v16, %v20220_v31 }
 0x56f   : > { %v10755_v51 = vadd.f32 %v10754_v62, %v10740_v38  ;;  %v8762_v39 = vmul.f32 %v8746_v57, %v20246_v58  ;;  %v8748_v12 = vmul.f32 %v20322_v47, %v20322_v47  ;;  %v10689_v52 = vmul.f32 %v20263_v18, %v20360_v9  ;;  %v16849_v58 = vld [vmem:[%s20654_s5 + $0x1f8] sm:$0xff]  }
 0x570   : > { %v8723_v56 = vadd.f32 %v8722_v11, %v8708_v41  ;;  %v8776_v23 = vadd.f32 %v8775_v7, %v8761_v49  ;;  %15729 = vmatpush3.bf16.msra.mxu1 %v16847_v1  ;;  %v10742_v25 = vmul.f32 %v10726_v21, %v20220_v31  ;;  %v10703_v53 = vadd.f32 %v10702_v61, %v10688_v4  ;;  %v11640_v7 = vld [vmem:[#allocation3 + $0x13a] sm:$0xff]  ;;  %v11641_v61 = vld [vmem:[#allocation3 + $0x142] sm:$0xff]  ;;  %v8694_v11 = vpop.permute.xlu0 %8693 }
 0x571   : > { %v10756_v22 = vadd.f32 %v10755_v51, %v10741_v37  ;;  %v10727_v62 = vmul.f32 %v20360_v9, %v20360_v9  ;;  %15730 = vmatprep.subr.bf16.mxu1 %v16848_v3  ;;  %v8710_v20 = vmul.f32 %v20322_v47, %v8689_v44  ;;  %v8709_v1 = vmul.f32 %v20294_v29, %v20338_v14 }
 0x572   : > { %v8777_v43 = vadd.f32 %v8776_v23, %v8762_v39  ;;  %v8747_v30 = vmul.f32 %v20338_v14, %v20338_v14  ;;  %v8749_v31 = vmul.f32 %v20335_v10, %v20335_v10  ;;  %v10704_v45 = vadd.f32 %v10703_v53, %v10689_v52  ;;  %v10675_v23 = vpop.permute.xlu1 %10674 }
 0x573   : > { %v10743_v21 = vmul.f32 %v10727_v62, %v20263_v18  ;;  %v10757_v38 = vadd.f32 %v10756_v22, %v10742_v25  ;;  %v8764_v41 = vmul.f32 %v8748_v12, %v8689_v44  ;;  %v8724_v57 = vadd.f32 %v8723_v56, %v8709_v1  ;;  %v11761_v62 = vld [vmem:[#allocation3 + $0x12b] sm:$0xff]  ;;  %v11762_v1 = vld [vmem:[#allocation3 + $0x133] sm:$0xff] }
 0x574   : > { %v8763_v49 = vmul.f32 %v8747_v30, %v20294_v29  ;;  %v10690_v39 = vmul.f32 %v20307_v36, %v20375_v42  ;;  %15731 = vmatpush3.bf16.msra.mxu1 %v16848_v3  ;;  %v10691_v37 = vmul.f32 %v20356_v27, %v20348_v5  ;;  %v10729_v4 = vmul.f32 %v20356_v27, %v20356_v27  ;;  %v16850_v29 = vld [vmem:[%s20654_s5 + $0x200] sm:$0xff]  }
 0x575   : > { %v10758_v51 = vadd.f32 %v10757_v38, %v10743_v21  ;;  %v10728_v18 = vmul.f32 %v20375_v42, %v20375_v42  ;;  %15732 = vmatprep.subr.bf16.mxu1 %v16849_v58  ;;  %v8711_v56 = vmul.f32 %v20335_v10, %v8694_v11  ;;  %v8725_v12 = vadd.f32 %v8724_v57, %v8710_v20 }
 0x576   : > { %v8778_v44 = vadd.f32 %v8777_v43, %v8763_v49  ;;  %v10705_v3 = vadd.f32 %v10704_v45, %v10690_v39  ;;  %v8765_v52 = vmul.f32 %v8749_v31, %v8694_v11  ;;  %v10730_v25 = vmul.f32 %v20369_v55, %v20369_v55  ;;  %v16851_v31 = vld [vmem:[%s20654_s5 + $0x208] sm:$0xff]  }
 0x577   : > { %v10744_v22 = vmul.f32 %v10728_v18, %v20307_v36  ;;  %v11643_v53 = vpack.c.bf16 %v11641_v61, %v11640_v7  ;;  %v8726_v30 = vadd.f32 %v8725_v12, %v8711_v56  ;;  %v10692_v38 = vmul.f32 %v20369_v55, %v10675_v23 }
 0x578   : > { %v8779_v21 = vadd.f32 %v8778_v44, %v8764_v41  ;;  %v10706_v27 = vadd.f32 %v10705_v3, %v10691_v37  ;;  %15733 = vmatpush3.bf16.msra.mxu1 %v16849_v58  ;;  %v10745_v20 = vmul.f32 %v10729_v4, %v20348_v5  ;;  %v11765_v49 = vpack.c.bf16 %v11762_v1, %v11761_v62  ;;  %v16852_v5 = vld [vmem:[%s20654_s5 + $0x210] sm:$0xff]  }
 0x579   : > { %v10759_v43 = vadd.f32 %v10758_v51, %v10744_v22  ;;  %15738 = vmatprep.subr.bf16.mxu1 %v16850_v29  ;;  %v8727_v45 = vrot.slane %v8726_v30, 4  ;;  %v10746_v39 = vmul.f32 %v10730_v25, %v10675_v23 }
 0x57a   : > { %v8780_v57 = vadd.f32 %v8779_v21, %v8765_v52  ;;  %v10707_v36 = vadd.f32 %v10706_v27, %v10692_v38 }
 0x57b   : > { %v10760_v7 = vadd.f32 %v10759_v43, %v10745_v20  ;;  %15735 = vmatmul.mubr.bf16.vlgmr.msra.gmra.mrb[32].mxu1 %v11643_v53  ;;  %v8728_v41 = vadd.f32 %v8727_v45, %v8726_v30  ;;  %v16854_v30 = vld [vmem:[%s20654_s5 + $0x220] sm:$0xff]   ;;  %v16855_v45 = vld [vmem:[%s20654_s5 + $0x228] sm:$0xff]  }
 0x57c   : > { %v8781_v61 = vrot.slane %v8780_v57, 4  ;;  %v10708_v11 = vrot.slane %v10707_v36, 4  ;;  %15739 = vmatpush3.bf16.msra.mxu1 %v16850_v29  ;;  %15754 = vmatprep.mubr.bf16.mxu1 %v11765_v49  ;;  %v16853_v29 = vld [vmem:[%s20654_s5 + $0x218] sm:$0xff]  }
 0x57d   : > { %v10761_v58 = vadd.f32 %v10760_v7, %v10746_v39  ;;  %15740 = vmatprep.subr.bf16.mxu1 %v16851_v31  ;;  %v8729_v37 = vrot.slane %v8728_v41, 2  ;;  %v16857_v49 = vld [vmem:[%s20654_s5 + $0x238] sm:$0xff]   ;;  %v11764_v7 = vld [vmem:[#allocation3 + $0x143] sm:$0xff] }
 0x57e   : > { %v8782_v4 = vadd.f32 %v8781_v61, %v8780_v57  ;;  %v10709_v51 = vadd.f32 %v10708_v11, %v10707_v36  ;;  %v16856_v36 = vld [vmem:[%s20654_s5 + $0x230] sm:$0xff]   ;;  %v11763_v39 = vld [vmem:[#allocation3 + $0x13b] sm:$0xff] }
 0x57f   : > { %v10762_v18 = vrot.slane %v10761_v58, 4  ;;  %v8730_v27 = vadd.f32 %v8729_v37, %v8728_v41  ;;  %v11766_v41 = vpack.c.bf16 %v11764_v7, %v11763_v39 }
 0x580   : > { %v8783_v56 = vrot.slane %v8782_v4, 2  ;;  %v10710_v12 = vrot.slane %v10709_v51, 2  ;;  %15741 = vmatpush3.bf16.msra.mxu1 %v16851_v31 }
 0x581   : > { %v10763_v44 = vadd.f32 %v10762_v18, %v10761_v58  ;;  %15742 = vmatprep.subr.bf16.mxu1 %v16852_v5  ;;  %v8731_v3 = vrot.slane %v8730_v27, 1 }
 0x582   : > { %v8784_v23 = vadd.f32 %v8783_v56, %v8782_v4  ;;  %v10711_v52 = vadd.f32 %v10710_v12, %v10709_v51  ;;  %v11901_v4 = vpop.permute.xlu0 %11900 }
 0x583   : > { %v10764_v25 = vrot.slane %v10763_v44, 2  ;;  %v8732_v22 = vadd.f32 %v8731_v3, %v8730_v27 }
 0x584   : > { %v8785_v53 = vrot.slane %v8784_v23, 1  ;;  %v10712_v62 = vrot.slane %v10711_v52, 1  ;;  %15743 = vmatpush3.bf16.msra.mxu1 %v16852_v5 }
 0x585   : > { %v10765_v1 = vadd.f32 %v10764_v25, %v10763_v44  ;;  %15744 = vmatprep.subr.bf16.mxu1 %v16853_v29 }
 0x586   : > { %v10713_v21 = vadd.f32 %v10712_v62, %v10711_v52  ;;  %v8786_v38 = vadd.f32 %v8785_v53, %v8784_v23  ;;  %v11906_v52 = vpop.permute.xlu1 %11905 }
 0x587   : > { %v10766_v20 = vrot.slane %v10765_v1, 1 }
 0x588   : > { %v10714_v43 = vadd.f32 %v10713_v21, %v8732_v22  ;;  %15745 = vmatpush3.bf16.msra.mxu1 %v16853_v29 }
 0x589   : > { %v10767_v31 = vadd.f32 %v10766_v20, %v10765_v1  ;;  %15746 = vmatprep.subr.bf16.mxu1 %v16854_v30 }
 0x58b   : > { %v10768_v57 = vadd.f32 %v10767_v31, %v8786_v38 }
 0x58c   : > { %15747 = vmatpush3.bf16.msra.mxu1 %v16854_v30 }
 0x58d   : > { %15748 = vmatprep.subr.bf16.mxu1 %v16855_v45 }
 0x590   : > { %15749 = vmatpush3.bf16.msra.mxu1 %v16855_v45 }
 0x591   : > { %15750 = vmatprep.subr.bf16.mxu1 %v16856_v36 }
 0x594   : > { %15751 = vmatpush3.bf16.msra.mxu1 %v16856_v36 }
 0x595   : > { %15752 = vmatprep.subr.bf16.mxu1 %v16857_v49 }
 0x598   : > { %15753 = vmatpush3.bf16.msra.mxu1 %v16857_v49 }
 0x59b   : > { %15755 = vmatmul.mubr.bf16.vlgmr.msra.gmra.mrb[32].mxu1 %v11766_v41 }
 0x66e   : > { %v20442_v61 = vpop.f32.mrb[32].mxu1 }
 0x66f   : > { %v20444_v11 = vpop.f32.mrb[33].mxu1  ;;  %v11924_v51 = vmul.f32 %v20442_v61, %v20442_v61  ;;  %v11910_v12 = vmul.f32 %v20442_v61, %v11901_v4 }
 0x670   : > { %v11922_v58 = vmul.f32 %v20444_v11, %v20444_v11  ;;  %v20448_v5 = vpop.f32.mrb[34].mxu1  ;;  %v11908_v18 = vmul.f32 %v20377_v17, %v20444_v11 }
 0x671   : > { %v20450_v37 = vpop.f32.mrb[35].mxu1  ;;  %v11925_v29 = vmul.f32 %v20448_v5, %v20448_v5  ;;  %v11928_v25 = vmul.f32 %v11924_v51, %v11901_v4  ;;  %v11911_v22 = vmul.f32 %v20448_v5, %v11906_v52 }
 0x672   : > { %v11909_v27 = vmul.f32 %v20387_v19, %v20450_v37  ;;  %v11923_v56 = vmul.f32 %v20450_v37, %v20450_v37  ;;  %v11926_v44 = vmul.f32 %v11922_v58, %v20377_v17 }
 0x673   : > { %v11929_v1 = vmul.f32 %v11925_v29, %v11906_v52 }
 0x674   : > { %v11912_v3 = vadd.f32 %v11909_v27, %v11908_v18  ;;  %v11927_v23 = vmul.f32 %v11923_v56, %v20387_v19 }
 0x676   : > { %v11913_v53 = vadd.f32 %v11912_v3, %v11910_v12  ;;  %v11930_v62 = vadd.f32 %v11927_v23, %v11926_v44  ;;  %v11949_v23 = vld [vmem:[%s20655_s6] sm:$0x1] }
 0x678   : > { %v11914_v30 = vadd.f32 %v11913_v53, %v11911_v22  ;;  %v11931_v21 = vadd.f32 %v11930_v62, %v11928_v25  ;;  %v11950_v22 = vld [vmem:[%s20656_s7] sm:$0x1]  ;;  %v20751_v53 = vld [vmem:[#allocation25_spill] sm:$0xff] }
 0x67a   : > { %v11915_v38 = vrot.slane %v11914_v30, 4  ;;  %v11932_v20 = vadd.f32 %v11931_v21, %v11929_v1 }
 0x67c   : > { %v11916_v31 = vadd.f32 %v11915_v38, %v11914_v30  ;;  %v11933_v45 = vrot.slane %v11932_v20, 4 }
 0x67e   : > { %v11917_v17 = vrot.slane %v11916_v31, 2  ;;  %v11934_v36 = vadd.f32 %v11933_v45, %v11932_v20 }
 0x680   : > { %v11918_v49 = vadd.f32 %v11917_v17, %v11916_v31  ;;  %v11935_v39 = vrot.slane %v11934_v36, 2 }
 0x682   : > { %v11919_v7 = vrot.slane %v11918_v49, 1  ;;  %v11936_v41 = vadd.f32 %v11935_v39, %v11934_v36 }
 0x684   : > { %v11920_v19 = vadd.f32 %v11919_v7, %v11918_v49  ;;  %v11937_v58 = vrot.slane %v11936_v41, 1 }
 0x686   : > { %v11921_v4 = vadd.f32 %v11920_v19, %v10714_v43  ;;  %v11938_v51 = vadd.f32 %v11937_v58, %v11936_v41 }
 0x688   : > { %v11939_v18 = vadd.f32 %v11938_v51, %v10768_v57  ;;  %v11944_v27 = vmul.f32 0.00390625, %v11921_v4 }
 0x68a   : > { %v11945_v56 = vmul.f32 0.00390625, %v11939_v18  ;;  %v11946_v12 = vmul.f32 %v11944_v27, %v11944_v27 }
 0x68c   : > { %v11947_v44 = vsub.f32 %v11945_v56, %v11946_v12 }
 0x68e   : > { %v11948_v29 = vmax.f32 %v11947_v44, 0.0 }
 0x690   : > { %v11951_v3 = vadd.f32 1e-05, %v11948_v29 }
 0x692   : > { %16860 = vrsqrt.f32 %v11951_v3 }
 0x69c   : > { %v16861_v52 = vpop.eup %16860 }
 0x69d   : > { %v11953_v25 = vmul.f32 %v16861_v52, %v11949_v23 }
 0x69f   : > { %v11954_v43 = vmul.f32 %v11953_v25, %v11944_v27  ;;  %v20473_v57 = vrot.slane %v11953_v25, %v20751_v53 }
 0x6a1   : > { %v11955_v62 = vsub.f32 %v11950_v22, %v11954_v43  ;;  %v11978_v1 = vmul.f32 %v20473_v57, %v20147_v24  ;;  %v11979_v30 = vmul.f32 %v20473_v57, %v20157_v33  ;;  %v11980_v21 = vmul.f32 %v20145_v6, %v20473_v57 }
 0x6a2   : > { %v11981_v38 = vmul.f32 %v20151_v32, %v20473_v57  ;;  %v11982_v20 = vmul.f32 %v20473_v57, %v20211_v54  ;;  %v11983_v31 = vmul.f32 %v20473_v57, %v20225_v34  ;;  %v11984_v45 = vmul.f32 %v20200_v50, %v20473_v57 }
 0x6a3   : > { %v11985_v24 = vmul.f32 %v20218_v35, %v20473_v57  ;;  %v11986_v33 = vmul.f32 %v20473_v57, %v20269_v15  ;;  %v11987_v6 = vmul.f32 %v20473_v57, %v20285_v59  ;;  %v11988_v32 = vmul.f32 %v20261_v0, %v20473_v57 }
 0x6a4   : > { %v11989_v54 = vmul.f32 %v20276_v8, %v20473_v57  ;;  %v11990_v34 = vmul.f32 %v20473_v57, %v20326_v46  ;;  %v11991_v50 = vmul.f32 %v20473_v57, %v20338_v14  ;;  %v11992_v35 = vmul.f32 %v20322_v47, %v20473_v57 }
 0x6a5   : > { %v11993_v15 = vmul.f32 %v20335_v10, %v20473_v57  ;;  %v20508_v59 = vrot.slane %v11955_v62, %v20751_v53  ;;  %v20512_v0 = vmul.f32 %v20473_v57, %v20181_v26  ;;  %v20516_v8 = vmul.f32 %v20473_v57, %v20198_v2 }
 0x6a6   : > { %v20521_v46 = vmul.f32 %v20174_v13, %v20473_v57  ;;  %v20525_v47 = vmul.f32 %v20187_v28, %v20473_v57  ;;  %v20529_v10 = vmul.f32 %v20473_v57, %v20242_v63  ;;  %v20533_v26 = vmul.f32 %v20473_v57, %v20259_v48 }
 0x6a7   : > { %v12000_v2 = vadd.f32 %v20508_v59, %v11978_v1  ;;  %v12001_v14 = vadd.f32 %v20508_v59, %v11979_v30  ;;  %v12002_v17 = vadd.f32 %v20508_v59, %v11980_v21  ;;  %v12003_v13 = vadd.f32 %v20508_v59, %v11981_v38 }
 0x6a8   : > { %v12004_v36 = vadd.f32 %v20508_v59, %v11982_v20  ;;  %v12005_v28 = vadd.f32 %v20508_v59, %v11983_v31  ;;  %v12006_v49 = vadd.f32 %v20508_v59, %v11984_v45  ;;  %v12007_v63 = vadd.f32 %v20508_v59, %v11985_v24  ;;  %v20752_v20 = vld [vmem:[#allocation14_spill] sm:$0xff]  ;;  %v20753_v45 = vld [vmem:[#allocation12_spill] sm:$0xff] }
 0x6a9   : > { %v12008_v39 = vadd.f32 %v20508_v59, %v11986_v33  ;;  %v12009_v48 = vadd.f32 %v20508_v59, %v11987_v6  ;;  %v12010_v7 = vadd.f32 %v20508_v59, %v11988_v32  ;;  %v12011_v41 = vadd.f32 %v20508_v59, %v11989_v54  ;;  %v20754_v33 = vld [vmem:[#allocation13_spill] sm:$0xff]  ;;  %v20755_v54 = vld [vmem:[#allocation7_spill] sm:$0xff] }
 0x6aa   : > { %v12012_v19 = vadd.f32 %v20508_v59, %v11990_v34  ;;  %v12013_v58 = vadd.f32 %v20508_v59, %v11991_v50  ;;  %v12014_v4 = vadd.f32 %v20508_v59, %v11992_v35  ;;  %v12015_v51 = vadd.f32 %v20508_v59, %v11993_v15 }
 0x6ab   : > { %v12016_v18 = vmax.f32 %v12000_v2, 0.0  ;;  %v12017_v27 = vmax.f32 %v12001_v14, 0.0  ;;  %v12018_v56 = vmax.f32 %v12002_v17, 0.0  ;;  %v12019_v12 = vmax.f32 %v12003_v13, 0.0 }
 0x6ac   : > { %v12020_v44 = vmax.f32 %v12004_v36, 0.0  ;;  %v12021_v29 = vmax.f32 %v12005_v28, 0.0  ;;  %v12022_v3 = vmax.f32 %v12006_v49, 0.0  ;;  %v12023_v23 = vmax.f32 %v12007_v63, 0.0 }
 0x6ad   : > { %v12024_v52 = vmax.f32 %v12008_v39, 0.0  ;;  %v12025_v25 = vmax.f32 %v12009_v48, 0.0  ;;  %v12026_v22 = vmax.f32 %v12010_v7, 0.0  ;;  %v12027_v43 = vmax.f32 %v12011_v41, 0.0  ;;  %12032 = vst [vmem:[%s20550_s30] sm:$0xff] %v12016_v18  ;;  %12033 = vst [vmem:[%s20550_s30 + $0x8] sm:$0xff] %v12017_v27 }
 0x6ae   : > { %12034 = vst [vmem:[%s20550_s30 + $0x10] sm:$0xff] %v12018_v56  ;;  %12035 = vst [vmem:[%s20550_s30 + $0x18] sm:$0xff] %v12019_v12  ;;  %v12028_v53 = vmax.f32 %v12012_v19, 0.0  ;;  %v12029_v62 = vmax.f32 %v12013_v58, 0.0  ;;  %v12030_v1 = vmax.f32 %v12014_v4, 0.0  ;;  %v12031_v30 = vmax.f32 %v12015_v51, 0.0 }
 0x6af   : > { %12036 = vst [vmem:[%s20550_s30 + $0x20] sm:$0xff] %v12020_v44  ;;  %12037 = vst [vmem:[%s20550_s30 + $0x28] sm:$0xff] %v12021_v29  ;;  %v12070_v21 = vmul.f32 %v20237_v60, %v20473_v57  ;;  %v12071_v38 = vmul.f32 %v20251_v40, %v20473_v57  ;;  %v12072_v31 = vmul.f32 %v20473_v57, %v20752_v20 }
 0x6b0   : > { %12038 = vst [vmem:[%s20550_s30 + $0x30] sm:$0xff] %v12022_v3  ;;  %12039 = vst [vmem:[%s20550_s30 + $0x38] sm:$0xff] %v12023_v23  ;;  %v12073_v24 = vmul.f32 %v20473_v57, %v20753_v45  ;;  %v12074_v6 = vmul.f32 %v20754_v33, %v20473_v57  ;;  %v12075_v32 = vmul.f32 %v20311_v16, %v20473_v57 }
 0x6b1   : > { %12040 = vst [vmem:[%s20550_s30 + $0x40] sm:$0xff] %v12024_v52  ;;  %12041 = vst [vmem:[%s20550_s30 + $0x48] sm:$0xff] %v12025_v25  ;;  %v12076_v60 = vmul.f32 %v20473_v57, %v20360_v9  ;;  %v12077_v40 = vmul.f32 %v20473_v57, %v20375_v42  ;;  %v12078_v34 = vmul.f32 %v20755_v54, %v20473_v57 }
 0x6b2   : > { %12042 = vst [vmem:[%s20550_s30 + $0x50] sm:$0xff] %v12026_v22  ;;  %12043 = vst [vmem:[%s20550_s30 + $0x58] sm:$0xff] %v12027_v43  ;;  %v12079_v50 = vmul.f32 %v20369_v55, %v20473_v57  ;;  %v12080_v35 = vadd.f32 %v20512_v0, %v20508_v59  ;;  %v12081_v15 = vadd.f32 %v20516_v8, %v20508_v59 }
 0x6b3   : > { %12044 = vst [vmem:[%s20550_s30 + $0x60] sm:$0xff] %v12028_v53  ;;  %12045 = vst [vmem:[%s20550_s30 + $0x68] sm:$0xff] %v12029_v62  ;;  %v12082_v16 = vadd.f32 %v20521_v46, %v20508_v59  ;;  %v12083_v9 = vadd.f32 %v20525_v47, %v20508_v59  ;;  %v12084_v42 = vadd.f32 %v20529_v10, %v20508_v59 }
 0x6b4   : > { %12046 = vst [vmem:[%s20550_s30 + $0x70] sm:$0xff] %v12030_v1  ;;  %12047 = vst [vmem:[%s20550_s30 + $0x78] sm:$0xff] %v12031_v30  ;;  %v12085_v2 = vadd.f32 %v20533_v26, %v20508_v59  ;;  %v12086_v55 = vadd.f32 %v12070_v21, %v20508_v59  ;;  %v12087_v14 = vadd.f32 %v12071_v38, %v20508_v59  ;;  %v12096_v36 = vmax.f32 %v12080_v35, 0.0 }
 0x6b5   : > { %v12088_v0 = vadd.f32 %v12072_v31, %v20508_v59  ;;  %v12089_v8 = vadd.f32 %v12073_v24, %v20508_v59  ;;  %v12090_v17 = vadd.f32 %v12074_v6, %v20508_v59  ;;  %v12091_v46 = vadd.f32 %v12075_v32, %v20508_v59 }
 0x6b6   : > { %v12092_v47 = vadd.f32 %v12076_v60, %v20508_v59  ;;  %v12093_v10 = vadd.f32 %v12077_v40, %v20508_v59  ;;  %v12094_v26 = vadd.f32 %v12078_v34, %v20508_v59  ;;  %v12095_v13 = vadd.f32 %v12079_v50, %v20508_v59  ;;  %12112 = vst [vmem:[%s20550_s30 + $0x80] sm:$0xff] %v12096_v36 }
 0x6b7   : > { %v12097_v28 = vmax.f32 %v12081_v15, 0.0  ;;  %v12098_v49 = vmax.f32 %v12082_v16, 0.0  ;;  %v12099_v63 = vmax.f32 %v12083_v9, 0.0  ;;  %v12100_v39 = vmax.f32 %v12084_v42, 0.0 }
 0x6b8   : > { %v12101_v48 = vmax.f32 %v12085_v2, 0.0  ;;  %v12102_v7 = vmax.f32 %v12086_v55, 0.0  ;;  %v12103_v41 = vmax.f32 %v12087_v14, 0.0  ;;  %v12104_v19 = vmax.f32 %v12088_v0, 0.0 }
 0x6b9   : > { %v12105_v58 = vmax.f32 %v12089_v8, 0.0  ;;  %12113 = vst [vmem:[%s20550_s30 + $0x88] sm:$0xff] %v12097_v28  ;;  %v12106_v4 = vmax.f32 %v12090_v17, 0.0  ;;  %v12107_v51 = vmax.f32 %v12091_v46, 0.0  ;;  %v12108_v18 = vmax.f32 %v12092_v47, 0.0  ;;  %12114 = vst [vmem:[%s20550_s30 + $0x90] sm:$0xff] %v12098_v49 }
 0x6ba   : > { %v12109_v27 = vmax.f32 %v12093_v10, 0.0  ;;  %12115 = vst [vmem:[%s20550_s30 + $0x98] sm:$0xff] %v12099_v63  ;;  %12116 = vst [vmem:[%s20550_s30 + $0xa0] sm:$0xff] %v12100_v39  ;;  %v12110_v56 = vmax.f32 %v12094_v26, 0.0  ;;  %v12111_v12 = vmax.f32 %v12095_v13, 0.0  ;;  %v12132_v44 = vmul.f32 %v20473_v57, %v20444_v11 }
 0x6bb   : > { %12117 = vst [vmem:[%s20550_s30 + $0xa8] sm:$0xff] %v12101_v48  ;;  %12118 = vst [vmem:[%s20550_s30 + $0xb0] sm:$0xff] %v12102_v7  ;;  %v12133_v29 = vmul.f32 %v20473_v57, %v20450_v37  ;;  %v12134_v3 = vmul.f32 %v20442_v61, %v20473_v57  ;;  %v12135_v23 = vmul.f32 %v20448_v5, %v20473_v57 }
 0x6bc   : > { %12119 = vst [vmem:[%s20550_s30 + $0xb8] sm:$0xff] %v12103_v41  ;;  %12120 = vst [vmem:[%s20550_s30 + $0xc0] sm:$0xff] %v12104_v19  ;;  %v12136_v11 = vadd.f32 %v12132_v44, %v20508_v59 }
 0x6bd   : > { %12121 = vst [vmem:[%s20550_s30 + $0xc8] sm:$0xff] %v12105_v58  ;;  %12122 = vst [vmem:[%s20550_s30 + $0xd0] sm:$0xff] %v12106_v4  ;;  %v12137_v37 = vadd.f32 %v12133_v29, %v20508_v59  ;;  %v12138_v52 = vadd.f32 %v12134_v3, %v20508_v59  ;;  %v12139_v25 = vadd.f32 %v12135_v23, %v20508_v59 }
 0x6be   : > { %12123 = vst [vmem:[%s20550_s30 + $0xd8] sm:$0xff] %v12107_v51  ;;  %12124 = vst [vmem:[%s20550_s30 + $0xe0] sm:$0xff] %v12108_v18  ;;  %v12140_v22 = vmax.f32 %v12136_v11, 0.0 }
 0x6bf   : > { %12125 = vst [vmem:[%s20550_s30 + $0xe8] sm:$0xff] %v12109_v27  ;;  %12126 = vst [vmem:[%s20550_s30 + $0xf0] sm:$0xff] %v12110_v56  ;;  %v12141_v43 = vmax.f32 %v12137_v37, 0.0  ;;  %v12142_v53 = vmax.f32 %v12138_v52, 0.0  ;;  %v12143_v62 = vmax.f32 %v12139_v25, 0.0 }
 0x6c0   : > { %12127 = vst [vmem:[%s20550_s30 + $0xf8] sm:$0xff] %v12111_v12  ;;  %12144 = vst [vmem:[%s20550_s30 + $0x100] sm:$0xff] %v12140_v22 }
 0x6c1   : > { %12145 = vst [vmem:[%s20550_s30 + $0x108] sm:$0xff] %v12141_v43  ;;  %12146 = vst [vmem:[%s20550_s30 + $0x110] sm:$0xff] %v12142_v53 }
 0x6c2   : > { %12147 = vst [vmem:[%s20550_s30 + $0x118] sm:$0xff] %v12143_v62 }
 0x6c3 PF: > { %s18_s27 = sadd.s32 1, %s16874_s27  }
 0x6c4   : > { %p15_p4 = scmp.ge.s32.totalorder %s18_s27, 4  }
 0x6c6   :  { %17 = sbr.rel (!%p15_p4) target bundleno = 1 (0x1), region = 98 }

</bundles_post_ra>
